<compile_context>
chip_gen: v5e
topology: v5e:2x2
jax: 0.10.0
libtpu: 0.0.40
codegen_flags: <defaults>
</compile_context>

<pallas_src>
import functools

import jax
import jax.numpy as jnp
from jax.experimental import pallas as pl
from jax.experimental.pallas import tpu as pltpu


# ----------------------------------------------------------------------------
# Fused Bottleneck kernel (one batch image per grid step)
# ----------------------------------------------------------------------------
def _bottleneck_kernel(x_ref, w1_ref, b1_ref, w2_ref, b2_ref, w3_ref, b3_ref,
                       o_ref, *, H, W):
    HW = H * W
    Cw = w1_ref.shape[1]

    x = x_ref[0]                                     # (HW, Cin) f32; also identity
    x_bf = x.astype(jnp.bfloat16)

    # ---- conv1 (1x1) + folded BN + ReLU -------------------------------------
    h1 = jnp.dot(x_bf, w1_ref[...], preferred_element_type=jnp.float32)
    h1 = jnp.maximum(h1 + b1_ref[...], 0.0).astype(jnp.bfloat16)    # (HW, Cw)

    # ---- conv2 (3x3, stride 1, pad 1) + folded BN + ReLU --------------------
    # Zero-pad h1 along the flattened spatial rows so that every (dy, dx) tap
    # is a contiguous row slice of `g`; taps that cross an image-row boundary
    # in x are zeroed with a precomputed column mask.
    pad = W + 8                                      # > W+1 and a multiple of 8
    zpad = jnp.zeros((pad, Cw), jnp.bfloat16)
    g = jnp.concatenate([zpad, h1, zpad], axis=0)    # (HW + 2*pad, Cw)

    xpos = jax.lax.broadcasted_iota(jnp.int32, (HW, 1), 0) % W
    first_col = xpos == 0
    last_col = xpos == (W - 1)

    slabs = []
    for dy in range(3):
        for dx in range(3):
            start = pad + (dy - 1) * W + (dx - 1)
            slab = g[start:start + HW, :]            # (HW, Cw) bf16
            if dx == 0:                              # needs x-1 -> invalid at x==0
                slab = jnp.where(first_col, jnp.zeros_like(slab), slab)
            elif dx == 2:                            # needs x+1 -> invalid at x==W-1
                slab = jnp.where(last_col, jnp.zeros_like(slab), slab)
            slabs.append(slab)
    # Lane-aligned concat (each piece is a multiple of 128 lanes) -> (HW, 9*Cw).
    patches = jnp.concatenate(slabs, axis=-1)

    h2 = jnp.dot(patches, w2_ref[...], preferred_element_type=jnp.float32)
    h2 = jnp.maximum(h2 + b2_ref[...], 0.0).astype(jnp.bfloat16)    # (HW, Cw)

    # ---- conv3 (1x1) + folded BN + residual + ReLU --------------------------
    out = jnp.dot(h2, w3_ref[...], preferred_element_type=jnp.float32)
    out = jnp.maximum(out + b3_ref[...] + x, 0.0)
    o_ref[0] = out.astype(o_ref.dtype)


def _bottleneck_pallas(x_flat, p, *, H, W):
    """x_flat: (N, H*W, Cin) f32 NHWC-flattened input.  Returns (N, H*W, Cout)."""
    N, HW, Cin = x_flat.shape
    Cw, Cout = p["width"], p["out_ch"]

    # Rough VMEM budget check (double-buffered I/O blocks + resident bf16
    # weights + in-kernel im2col/f32 temporaries).  For large images this would
    # need row-block tiling with a halo instead of whole-image tiles.
    vmem_limit = 32 * 1024 * 1024   # safe on v5e/v6e (128 MiB) and v7x (64 MiB)
    est = (2 * HW * (Cin + Cout) * 4
           + 4 * (Cin * Cw + 9 * Cw * Cw + Cw * Cout)
           + HW * 9 * Cw * 2 + HW * (Cin + Cout) * 4)
    assert est < vmem_limit, "TODO(synk): add row-block tiling for this size"

    kernel = functools.partial(_bottleneck_kernel, H=H, W=W)
    return pl.pallas_call(
        kernel,
        out_shape=jax.ShapeDtypeStruct((N, HW, Cout), x_flat.dtype),
        grid_spec=pltpu.PrefetchScalarGridSpec(
            num_scalar_prefetch=0,
            grid=(N,),
            in_specs=[
                pl.BlockSpec((1, HW, Cin), lambda n: (n, 0, 0)),
                # Grid-invariant weights / biases (constant index_map).
                pl.BlockSpec((Cin, Cw), lambda n: (0, 0)),
                pl.BlockSpec((1, Cw), lambda n: (0, 0)),
                pl.BlockSpec((9 * Cw, Cw), lambda n: (0, 0)),
                pl.BlockSpec((1, Cw), lambda n: (0, 0)),
                pl.BlockSpec((Cw, Cout), lambda n: (0, 0)),
                pl.BlockSpec((1, Cout), lambda n: (0, 0)),
            ],
            out_specs=pl.BlockSpec((1, HW, Cout), lambda n: (n, 0, 0)),
        ),
        compiler_params=pltpu.CompilerParams(
            dimension_semantics=("parallel",),
            vmem_limit_bytes=vmem_limit,
        ),
    )(x_flat, p["w1"], p["b1"], p["w2r"], p["b2"], p["w3"], p["b3"])


# ----------------------------------------------------------------------------
# Parameter construction (deterministic, eval-mode BN folded into the weights)
# ----------------------------------------------------------------------------
def _fold_bn(gamma, beta, mean, var, eps=1e-5):
    scale = gamma / jnp.sqrt(var + eps)
    bias = beta - mean * scale
    return scale, bias


def make_bottleneck_params(key, inplanes, planes, base_width=64, groups=1):
    width = int(planes * (base_width / 64.0)) * groups
    out_ch = planes * 4  # expansion = 4
    ks = jax.random.split(key, 6)

    def w_init(k, shape, fan_in):
        return jax.random.normal(k, shape, jnp.float32) / jnp.sqrt(fan_in)

    w1 = w_init(ks[0], (inplanes, width), inplanes)        # (Cin, Cw)
    w2 = w_init(ks[1], (3, 3, width, width), 9 * width)    # HWIO
    w3 = w_init(ks[2], (width, out_ch), width)             # (Cw, Cout)

    def bn(k, c):
        k1, k2, k3, k4 = jax.random.split(k, 4)
        gamma = 1.0 + 0.1 * jax.random.normal(k1, (c,), jnp.float32)
        beta = 0.05 * jax.random.normal(k2, (c,), jnp.float32)
        mean = 0.02 * jax.random.normal(k3, (c,), jnp.float32)
        var = 1.0 + 0.1 * jnp.abs(jax.random.normal(k4, (c,), jnp.float32))
        return _fold_bn(gamma, beta, mean, var)

    s1, b1 = bn(ks[3], width)
    s2, b2 = bn(ks[4], width)
    s3, b3 = bn(ks[5], out_ch)

    # One-time host-side transform: fold the BN scale into the conv weights,
    # keep only a per-channel bias for the kernel epilogue; store bf16 weights.
    w1f = (w1 * s1[None, :]).astype(jnp.bfloat16)
    w2f = (w2 * s2[None, None, None, :]).astype(jnp.bfloat16)
    w3f = (w3 * s3[None, :]).astype(jnp.bfloat16)

    return dict(
        w1=w1f,
        w2_hwio=w2f,
        w2r=w2f.reshape(9 * width, width),   # rows ordered (dy, dx, cin)
        w3=w3f,
        b1=b1.reshape(1, -1), b2=b2.reshape(1, -1), b3=b3.reshape(1, -1),
        width=width, out_ch=out_ch, stride=1, groups=1, dilation=1)


# ----------------------------------------------------------------------------
# Bottleneck forward (NCHW in / NCHW out, matching the PyTorch module)
# ----------------------------------------------------------------------------
def bottleneck_forward(x_nchw, p):
    N, Cin, H, W = x_nchw.shape
    assert p["stride"] == 1 and p["groups"] == 1 and p["dilation"] == 1, \
        "TODO(synk): stride/groups/dilation != 1 not implemented"
    assert Cin == p["out_ch"], "downsample=None requires inplanes == planes*4"
    assert W % 8 == 0, "W must be a multiple of 8 (sublane-aligned rows)"

    x_flat = jnp.transpose(x_nchw, (0, 2, 3, 1)).reshape(N, H * W, Cin)
    out = _bottleneck_pallas(x_flat, p, H=H, W=W)
    out = out.reshape(N, H, W, p["out_ch"])
    return jnp.transpose(out, (0, 3, 1, 2))


# ----------------------------------------------------------------------------
# Pure-JAX reference (same folded bf16 weights, f32 accumulation/epilogue)
# ----------------------------------------------------------------------------
def bottleneck_reference(x_nchw, p):
    x = jnp.transpose(x_nchw, (0, 2, 3, 1))            # NHWC f32
    dn = ("NHWC", "HWIO", "NHWC")

    def conv(a, w_hwio):
        return jax.lax.conv_general_dilated(
            a.astype(jnp.bfloat16), w_hwio, (1, 1), "SAME",
            dimension_numbers=dn, preferred_element_type=jnp.float32)

    w1 = p["w1"].reshape(1, 1, *p["w1"].shape)
    w3 = p["w3"].reshape(1, 1, *p["w3"].shape)
    h = jnp.maximum(conv(x, w1) + p["b1"], 0.0)
    h = jnp.maximum(conv(h, p["w2_hwio"]) + p["b2"], 0.0)
    h = jnp.maximum(conv(h, w3) + p["b3"] + x, 0.0)
    return jnp.transpose(h, (0, 3, 1, 2))


if __name__ == "__main__":
    # Realistic lane-dense Bottleneck widths (ResNet-50 layer2 body block):
    # inplanes = planes * 4 so downsample=None holds; spatial kept small.
    N, inplanes, planes, H, W = 4, 512, 128, 16, 16

    key = jax.random.PRNGKey(0)
    kx, kp = jax.random.split(key)
    x = jax.random.normal(kx, (N, inplanes, H, W), jnp.float32)
    params = make_bottleneck_params(kp, inplanes, planes)

    out = jax.block_until_ready(bottleneck_forward(x, params))
    ref = jax.block_until_ready(bottleneck_reference(x, params))

    assert out.shape == (N, planes * 4, H, W)
    max_err = float(jnp.max(jnp.abs(out - ref)))
    assert jnp.allclose(out, ref, atol=1e-2, rtol=1e-2), \
        f"mismatch vs JAX reference (max abs err {max_err:.3e})"

    print("KERNEL_OK")
</pallas_src>

<mosaic_0001>
module attributes {stable_mosaic.version = 11 : i64} {
  func.func @_bottleneck_kernel(%arg0: i32, %arg1: memref<1x256x512xf32, #tpu.memory_space<vmem>>, %arg2: memref<512x128xbf16, #tpu.memory_space<vmem>>, %arg3: memref<1x128xf32, #tpu.memory_space<vmem>>, %arg4: memref<1152x128xbf16, #tpu.memory_space<vmem>>, %arg5: memref<1x128xf32, #tpu.memory_space<vmem>>, %arg6: memref<128x512xbf16, #tpu.memory_space<vmem>>, %arg7: memref<1x512xf32, #tpu.memory_space<vmem>>, %arg8: memref<1x256x512xf32, #tpu.memory_space<vmem>>) attributes {dimension_semantics = [#tpu.dimension_semantics<parallel>], iteration_bounds = array<i64: 4>, scalar_prefetch = 0 : i64, scratch_operands = 0 : i64, tpu.core_type = #tpu.core_type<tc>, window_params = [{transform_indices = @transform_0, window_bounds = array<i64: 1, 256, 512>}, {pipeline_mode = #tpu.pipeline_mode<synchronous>, transform_indices = @transform_1, window_bounds = array<i64: 512, 128>}, {pipeline_mode = #tpu.pipeline_mode<synchronous>, transform_indices = @transform_2, window_bounds = array<i64: 1, 128>}, {pipeline_mode = #tpu.pipeline_mode<synchronous>, transform_indices = @transform_3, window_bounds = array<i64: 1152, 128>}, {pipeline_mode = #tpu.pipeline_mode<synchronous>, transform_indices = @transform_4, window_bounds = array<i64: 1, 128>}, {pipeline_mode = #tpu.pipeline_mode<synchronous>, transform_indices = @transform_5, window_bounds = array<i64: 128, 512>}, {pipeline_mode = #tpu.pipeline_mode<synchronous>, transform_indices = @transform_6, window_bounds = array<i64: 1, 512>}, {transform_indices = @transform_7, window_bounds = array<i64: 1, 256, 512>}]} {
    %c0 = arith.constant 0 : index
    %c0_0 = arith.constant 0 : index
    %c0_1 = arith.constant 0 : index
    %0 = vector.load %arg1[%c0, %c0_0, %c0_1] : memref<1x256x512xf32, #tpu.memory_space<vmem>>, vector<1x256x512xf32>
    %1 = vector.shape_cast %0 : vector<1x256x512xf32> to vector<256x512xf32>
    %2 = arith.truncf %1 : vector<256x512xf32> to vector<256x512xbf16>
    %c0_2 = arith.constant 0 : index
    %c0_3 = arith.constant 0 : index
    %3 = vector.load %arg2[%c0_2, %c0_3] : memref<512x128xbf16, #tpu.memory_space<vmem>>, vector<512x128xbf16>
    %cst = arith.constant dense<0.000000e+00> : vector<256x128xf32>
    %4 = tpu.matmul %2, %3, %cst {dimension_numbers = #tpu.dot_dimension_numbers<[1], [0], [0], [1], [0, 0, 1, 1], [], []>} : vector<256x512xbf16>, vector<512x128xbf16>, vector<256x128xf32> -> vector<256x128xf32>
    %c0_4 = arith.constant 0 : index
    %c0_5 = arith.constant 0 : index
    %5 = vector.load %arg3[%c0_4, %c0_5] : memref<1x128xf32, #tpu.memory_space<vmem>>, vector<1x128xf32>
    %6 = vector.broadcast %5 : vector<1x128xf32> to vector<256x128xf32>
    %7 = arith.addf %4, %6 : vector<256x128xf32>
    %cst_6 = arith.constant 0.000000e+00 : f32
    %8 = vector.broadcast %cst_6 : f32 to vector<256x128xf32>
    %9 = arith.maximumf %7, %8 : vector<256x128xf32>
    %10 = arith.truncf %9 : vector<256x128xf32> to vector<256x128xbf16>
    %cst_7 = arith.constant 0.000000e+00 : bf16
    %11 = vector.broadcast %cst_7 : bf16 to vector<24x128xbf16>
    %12 = tpu.concatenate %11, %10, %11 in 0 : vector<24x128xbf16>, vector<256x128xbf16>, vector<24x128xbf16> -> vector<304x128xbf16>
    %13 = tpu.iota {dimensions = array<i32: 0>} : vector<256x1xi32>
    %c16_i32 = arith.constant 16 : i32
    %c0_i32 = arith.constant 0 : i32
    %14 = arith.cmpi eq, %c16_i32, %c0_i32 : i32
    %c1_i32 = arith.constant 1 : i32
    %15 = arith.select %14, %c1_i32, %c16_i32 : i32
    %16 = vector.broadcast %15 : i32 to vector<256x1xi32>
    %17 = arith.remsi %13, %16 : vector<256x1xi32>
    %c0_i32_8 = arith.constant 0 : i32
    %18 = vector.broadcast %c0_i32_8 : i32 to vector<256x1xi32>
    %19 = arith.cmpi ne, %17, %18 : vector<256x1xi32>
    %c0_i32_9 = arith.constant 0 : i32
    %20 = vector.broadcast %c0_i32_9 : i32 to vector<256x1xi32>
    %21 = arith.cmpi slt, %17, %20 : vector<256x1xi32>
    %c0_i32_10 = arith.constant 0 : i32
    %22 = arith.cmpi slt, %15, %c0_i32_10 : i32
    %23 = vector.broadcast %22 : i1 to vector<256x1xi1>
    %24 = vector.broadcast %23 : vector<256x1xi1> to vector<256x1xi1>
    %25 = arith.xori %21, %24 : vector<256x1xi1>
    %26 = arith.andi %25, %19 : vector<256x1xi1>
    %27 = vector.broadcast %15 : i32 to vector<256x1xi32>
    %28 = arith.addi %17, %27 : vector<256x1xi32>
    %29 = arith.select %26, %28, %17 : vector<256x1xi1>, vector<256x1xi32>
    %c0_i32_11 = arith.constant 0 : i32
    %30 = vector.broadcast %c0_i32_11 : i32 to vector<256x1xi32>
    %31 = arith.cmpi eq, %29, %30 : vector<256x1xi32>
    %c15_i32 = arith.constant 15 : i32
    %32 = vector.broadcast %c15_i32 : i32 to vector<256x1xi32>
    %33 = arith.cmpi eq, %29, %32 : vector<256x1xi32>
    %34 = vector.extract_strided_slice %12 {offsets = [7, 0], sizes = [256, 128], strides = [1, 1]} : vector<304x128xbf16> to vector<256x128xbf16>
    %cst_12 = arith.constant 0.000000e+00 : bf16
    %35 = vector.broadcast %cst_12 : bf16 to vector<256x128xbf16>
    %36 = vector.shape_cast %31 : vector<256x1xi1> to vector<256x1xi1>
    %37 = vector.broadcast %36 : vector<256x1xi1> to vector<256x128xi1>
    %38 = arith.select %37, %35, %34 : vector<256x128xi1>, vector<256x128xbf16>
    %39 = vector.extract_strided_slice %12 {offsets = [8, 0], sizes = [256, 128], strides = [1, 1]} : vector<304x128xbf16> to vector<256x128xbf16>
    %40 = vector.extract_strided_slice %12 {offsets = [9, 0], sizes = [256, 128], strides = [1, 1]} : vector<304x128xbf16> to vector<256x128xbf16>
    %cst_13 = arith.constant 0.000000e+00 : bf16
    %41 = vector.broadcast %cst_13 : bf16 to vector<256x128xbf16>
    %42 = vector.shape_cast %33 : vector<256x1xi1> to vector<256x1xi1>
    %43 = vector.broadcast %42 : vector<256x1xi1> to vector<256x128xi1>
    %44 = arith.select %43, %41, %40 : vector<256x128xi1>, vector<256x128xbf16>
    %45 = vector.extract_strided_slice %12 {offsets = [23, 0], sizes = [256, 128], strides = [1, 1]} : vector<304x128xbf16> to vector<256x128xbf16>
    %cst_14 = arith.constant 0.000000e+00 : bf16
    %46 = vector.broadcast %cst_14 : bf16 to vector<256x128xbf16>
    %47 = vector.shape_cast %31 : vector<256x1xi1> to vector<256x1xi1>
    %48 = vector.broadcast %47 : vector<256x1xi1> to vector<256x128xi1>
    %49 = arith.select %48, %46, %45 : vector<256x128xi1>, vector<256x128xbf16>
    %50 = vector.extract_strided_slice %12 {offsets = [24, 0], sizes = [256, 128], strides = [1, 1]} : vector<304x128xbf16> to vector<256x128xbf16>
    %51 = vector.extract_strided_slice %12 {offsets = [25, 0], sizes = [256, 128], strides = [1, 1]} : vector<304x128xbf16> to vector<256x128xbf16>
    %cst_15 = arith.constant 0.000000e+00 : bf16
    %52 = vector.broadcast %cst_15 : bf16 to vector<256x128xbf16>
    %53 = vector.shape_cast %33 : vector<256x1xi1> to vector<256x1xi1>
    %54 = vector.broadcast %53 : vector<256x1xi1> to vector<256x128xi1>
    %55 = arith.select %54, %52, %51 : vector<256x128xi1>, vector<256x128xbf16>
    %56 = vector.extract_strided_slice %12 {offsets = [39, 0], sizes = [256, 128], strides = [1, 1]} : vector<304x128xbf16> to vector<256x128xbf16>
    %cst_16 = arith.constant 0.000000e+00 : bf16
    %57 = vector.broadcast %cst_16 : bf16 to vector<256x128xbf16>
    %58 = vector.shape_cast %31 : vector<256x1xi1> to vector<256x1xi1>
    %59 = vector.broadcast %58 : vector<256x1xi1> to vector<256x128xi1>
    %60 = arith.select %59, %57, %56 : vector<256x128xi1>, vector<256x128xbf16>
    %61 = vector.extract_strided_slice %12 {offsets = [40, 0], sizes = [256, 128], strides = [1, 1]} : vector<304x128xbf16> to vector<256x128xbf16>
    %62 = vector.extract_strided_slice %12 {offsets = [41, 0], sizes = [256, 128], strides = [1, 1]} : vector<304x128xbf16> to vector<256x128xbf16>
    %cst_17 = arith.constant 0.000000e+00 : bf16
    %63 = vector.broadcast %cst_17 : bf16 to vector<256x128xbf16>
    %64 = vector.shape_cast %33 : vector<256x1xi1> to vector<256x1xi1>
    %65 = vector.broadcast %64 : vector<256x1xi1> to vector<256x128xi1>
    %66 = arith.select %65, %63, %62 : vector<256x128xi1>, vector<256x128xbf16>
    %67 = tpu.concatenate %38, %39, %44, %49, %50, %55, %60, %61, %66 in 1 : vector<256x128xbf16>, vector<256x128xbf16>, vector<256x128xbf16>, vector<256x128xbf16>, vector<256x128xbf16>, vector<256x128xbf16>, vector<256x128xbf16>, vector<256x128xbf16>, vector<256x128xbf16> -> vector<256x1152xbf16>
    %c0_18 = arith.constant 0 : index
    %c0_19 = arith.constant 0 : index
    %68 = vector.load %arg4[%c0_18, %c0_19] : memref<1152x128xbf16, #tpu.memory_space<vmem>>, vector<1152x128xbf16>
    %cst_20 = arith.constant dense<0.000000e+00> : vector<256x128xf32>
    %69 = tpu.matmul %67, %68, %cst_20 {dimension_numbers = #tpu.dot_dimension_numbers<[1], [0], [0], [1], [0, 0, 1, 1], [], []>} : vector<256x1152xbf16>, vector<1152x128xbf16>, vector<256x128xf32> -> vector<256x128xf32>
    %c0_21 = arith.constant 0 : index
    %c0_22 = arith.constant 0 : index
    %70 = vector.load %arg5[%c0_21, %c0_22] : memref<1x128xf32, #tpu.memory_space<vmem>>, vector<1x128xf32>
    %71 = vector.broadcast %70 : vector<1x128xf32> to vector<256x128xf32>
    %72 = arith.addf %69, %71 : vector<256x128xf32>
    %cst_23 = arith.constant 0.000000e+00 : f32
    %73 = vector.broadcast %cst_23 : f32 to vector<256x128xf32>
    %74 = arith.maximumf %72, %73 : vector<256x128xf32>
    %75 = arith.truncf %74 : vector<256x128xf32> to vector<256x128xbf16>
    %c0_24 = arith.constant 0 : index
    %c0_25 = arith.constant 0 : index
    %76 = vector.load %arg6[%c0_24, %c0_25] : memref<128x512xbf16, #tpu.memory_space<vmem>>, vector<128x512xbf16>
    %cst_26 = arith.constant dense<0.000000e+00> : vector<256x512xf32>
    %77 = tpu.matmul %75, %76, %cst_26 {dimension_numbers = #tpu.dot_dimension_numbers<[1], [0], [0], [1], [0, 0, 1, 1], [], []>} : vector<256x128xbf16>, vector<128x512xbf16>, vector<256x512xf32> -> vector<256x512xf32>
    %c0_27 = arith.constant 0 : index
    %c0_28 = arith.constant 0 : index
    %78 = vector.load %arg7[%c0_27, %c0_28] : memref<1x512xf32, #tpu.memory_space<vmem>>, vector<1x512xf32>
    %79 = vector.broadcast %78 : vector<1x512xf32> to vector<256x512xf32>
    %80 = arith.addf %77, %79 : vector<256x512xf32>
    %81 = arith.addf %80, %1 : vector<256x512xf32>
    %cst_29 = arith.constant 0.000000e+00 : f32
    %82 = vector.broadcast %cst_29 : f32 to vector<256x512xf32>
    %83 = arith.maximumf %81, %82 : vector<256x512xf32>
    %c0_30 = arith.constant 0 : index
    %c0_31 = arith.constant 0 : index
    %c0_32 = arith.constant 0 : index
    %84 = vector.load %arg8[%c0_30, %c0_31, %c0_32] : memref<1x256x512xf32, #tpu.memory_space<vmem>>, vector<1x256x512xf32>
    %85 = vector.shape_cast %84 : vector<1x256x512xf32> to vector<256x512xf32>
    %86 = vector.shape_cast %83 : vector<256x512xf32> to vector<1x256x512xf32>
    tpu.vector_store %arg8[%c0_30, %c0_31, %c0_32], %86 {strides = array<i32>} : memref<1x256x512xf32, #tpu.memory_space<vmem>>, vector<1x256x512xf32>,
    return
  }
  func.func @transform_0(%arg0: i32) -> (i32, i32, i32) {
    %c0_i32 = arith.constant 0 : i32
    %c0_i32_0 = arith.constant 0 : i32
    %c0_i32_1 = arith.constant 0 : i32
    return %arg0, %c0_i32, %c0_i32_0 : i32, i32, i32
  }
  func.func @transform_1(%arg0: i32) -> (i32, i32) {
    %c0_i32 = arith.constant 0 : i32
    %c0_i32_0 = arith.constant 0 : i32
    %c0_i32_1 = arith.constant 0 : i32
    return %c0_i32, %c0_i32_0 : i32, i32
  }
  func.func @transform_2(%arg0: i32) -> (i32, i32) {
    %c0_i32 = arith.constant 0 : i32
    %c0_i32_0 = arith.constant 0 : i32
    %c0_i32_1 = arith.constant 0 : i32
    return %c0_i32, %c0_i32_0 : i32, i32
  }
  func.func @transform_3(%arg0: i32) -> (i32, i32) {
    %c0_i32 = arith.constant 0 : i32
    %c0_i32_0 = arith.constant 0 : i32
    %c0_i32_1 = arith.constant 0 : i32
    return %c0_i32, %c0_i32_0 : i32, i32
  }
  func.func @transform_4(%arg0: i32) -> (i32, i32) {
    %c0_i32 = arith.constant 0 : i32
    %c0_i32_0 = arith.constant 0 : i32
    %c0_i32_1 = arith.constant 0 : i32
    return %c0_i32, %c0_i32_0 : i32, i32
  }
  func.func @transform_5(%arg0: i32) -> (i32, i32) {
    %c0_i32 = arith.constant 0 : i32
    %c0_i32_0 = arith.constant 0 : i32
    %c0_i32_1 = arith.constant 0 : i32
    return %c0_i32, %c0_i32_0 : i32, i32
  }
  func.func @transform_6(%arg0: i32) -> (i32, i32) {
    %c0_i32 = arith.constant 0 : i32
    %c0_i32_0 = arith.constant 0 : i32
    %c0_i32_1 = arith.constant 0 : i32
    return %c0_i32, %c0_i32_0 : i32, i32
  }
  func.func @transform_7(%arg0: i32) -> (i32, i32, i32) {
    %c0_i32 = arith.constant 0 : i32
    %c0_i32_0 = arith.constant 0 : i32
    %c0_i32_1 = arith.constant 0 : i32
    return %arg0, %c0_i32, %c0_i32_0 : i32, i32, i32
  }
}

</mosaic_0001>

<bundles_post_ra>
// kernel: tpu_custom_call.1
= control target key start
LH: loop header
LB: loop body
LE: loop exit
PB: predicated region body
PF: predicated region fallthrough
CT: control target
= control target key end

     0   :  { %s11892_s0 = inlined_call_operand.hbm [shape: f32[4,256,512], index: 0, kind: input, shape index: {}]   ;;  %s11893_s1 = inlined_call_operand.hbm [shape: bf16[512,128], index: 1, kind: input, shape index: {}]   ;;  %s11894_s2 = inlined_call_operand.hbm [shape: f32[1,128], index: 2, kind: input, shape index: {}]   ;;  %s11895_s3 = inlined_call_operand.hbm [shape: bf16[1152,128], index: 3, kind: input, shape index: {}]   ;;  %s11896_s4 = inlined_call_operand.hbm [shape: f32[1,128], index: 4, kind: input, shape index: {}]   ;;  %s11897_s5 = inlined_call_operand.hbm [shape: bf16[128,512], index: 5, kind: input, shape index: {}]   ;;  %s11898_s6 = inlined_call_operand.hbm [shape: f32[1,512], index: 6, kind: input, shape index: {}]   ;;  %s11899_s7 = inlined_call_operand.hbm [shape: f32[4,256,512], index: 7, kind: output, shape index: {}]  }
   0x1   :  { %12052 = sst [smem:[#allocation83_spill]] %s11893_s1 }
   0x2   :  { %12053 = sst [smem:[#allocation84_spill]] %s11894_s2 }
   0x3   :  { %12 = vsyncpa [#allocation3], 0 }
   0x4   :  { %14 = vsyncpa [#allocation3 + $0x1], 0 }
   0x5   :  { %15 = vsyncpa [#allocation6], 0 }
   0x6   :  { %16 = vsyncpa [#allocation9], 0 }
   0x7   :  { %17 = vsyncpa [#allocation12], 0 }
   0x8   :  { %18 = vsyncpa [#allocation4], 0 }
   0x9   :  { %20 = vsyncpa [#allocation4 + $0x1], 0  ;;  %s8166_s24 = smov 0   ;;  %s8168_s25 = smov 0  }
   0xa   :  { %s8170_s26 = smov 0   ;;  %s8172_s27 = smov 0  }
   0xb LB: > { %s12054_s1 = sld [smem:[#allocation83_spill]]  ;;  %s8190_s8 = sadd.s32 4294967295, %s8108_s27   ;;  %s8108_s27 = sphi %s8172_s27, %s12703_s27   ;;  %s8104_s26 = sphi %s8170_s26, %s12702_s26   ;;  %s8100_s25 = sphi %s8168_s25, %s12701_s25   ;;  %s8096_s24 = sphi %s8166_s24, %s12700_s24  }
   0xc   : > { %p6840_p0 = scmp.ge.s32.totalorder %s8108_s27, 1  ;;  %p47_p1 = scmp.eq.s32.totalorder %s8190_s8, 0 }
   0xd   : > { %p209_p2 = scmp.lt.s32.totalorder %s8108_s27, 5  ;;  %s8110_s10 = smov [#allocation5]  }
   0xe   : > { %s222_s11 = sshll.u32 %s8110_s10, 4  ;;  %s246_s14 = sshll.u32 %s11895_s3, 4  ;;  %s223_s11 = int_to_ptr.vmem [resolvable:$true] %s222_s11  ;;  %s247_s14 = int_to_ptr.hbm [resolvable:$true] %s246_s14 }
   0xf   : > { %p8195_p3 = pnand %p6840_p0, %p209_p2  ;;  %s272_s18 = sshll.u32 %s11897_s5, 4  ;;  %s273_s18 = int_to_ptr.hbm [resolvable:$true] %s272_s18 }
  0x10   : > { %s8111_s19 = smov [#allocation8]   ;;  %s8112_s21 = smov 64  }
  0x11   : > { %s220_s30 = sshll.u32 %s12054_s1, 4  ;;  %p7599_p4 = pneg %p8195_p3  ;;  %s221_s30 = int_to_ptr.hbm [resolvable:$true] %s220_s30 }
  0x12   : > { %s248_s20 = sshll.u32 %s8111_s19, 4  ;;  %s8113_s22 = smov 4   ;;  %s249_s20 = int_to_ptr.vmem [resolvable:$true] %s248_s20 }
  0x13   : > { %p8206_p5 = pnand %p7599_p4, %p47_p1  ;;  %s8114_s23 = smov [#allocation11]  }
  0x14   : > { %s274_s28 = sshll.u32 %s8114_s23, 4  ;;  %s12057_s2 = sld [smem:[#allocation84_spill]]  ;;  %s275_s28 = int_to_ptr.vmem [resolvable:$true] %s274_s28 }
  0x15   : > { %7602 = dma.hbm_to_vmem [thread:$0]  (!%p8206_p5), %s221_s30, 4096, %s223_s11, [#allocation6], %s8112_s21, %s8112_s21, %s8113_s22  }
  0x16   : > { %7608 = dma.hbm_to_vmem [thread:$0]  (!%p8206_p5), %s247_s14, 9216, %s249_s20, [#allocation9], %s8112_s21, %s8112_s21, %s8113_s22  }
  0x17   : > { %s8115_s13 = smov 256   ;;  %s8116_s16 = smov 16  }
  0x18   : > { %7614 = dma.hbm_to_vmem [thread:$0]  (!%p8206_p5), %s273_s18, 4096, %s275_s28, [#allocation12], %s8115_s13, %s8115_s13, %s8116_s16  }
  0x19   : > { %s8117_s30 = smov [#allocation7]   ;;  %s261_s14 = sshll.u32 %s11896_s4, 4  ;;  %s262_s14 = int_to_ptr.hbm [resolvable:$true] %s261_s14 }
  0x1a   : > { %s235_s12 = sshll.u32 %s12057_s2, 4  ;;  %s237_s11 = sshll.u32 %s8117_s30, 4  ;;  %s236_s12 = int_to_ptr.hbm [resolvable:$true] %s235_s12  ;;  %s238_s11 = int_to_ptr.vmem [resolvable:$true] %s237_s11 }
  0x1b   : > { %7605 = dma.hbm_to_vmem [thread:$0]  (!%p8206_p5), %s236_s12, 16, %s238_s11, [#allocation6]  }
  0x1c   : > { %s287_s18 = sshll.u32 %s11898_s6, 4  ;;  %s8118_s22 = smov [#allocation10]   ;;  %s288_s18 = int_to_ptr.hbm [resolvable:$true] %s287_s18 }
  0x1d   : > { %s263_s23 = sshll.u32 %s8118_s22, 4  ;;  %s8119_s28 = smov [#allocation13]   ;;  %s264_s23 = int_to_ptr.vmem [resolvable:$true] %s263_s23 }
  0x1e   : > { %7611 = dma.hbm_to_vmem [thread:$0]  (!%p8206_p5), %s262_s14, 16, %s264_s23, [#allocation9]  }
  0x1f   : > { %s289_s29 = sshll.u32 %s8119_s28, 4  ;;  %s6839_s10 = sadd.s32 4294967294, %s8108_s27   ;;  %s290_s29 = int_to_ptr.vmem [resolvable:$true] %s289_s29 }
  0x20   : > { %7617 = dma.hbm_to_vmem [thread:$0]  (!%p8206_p5), %s288_s18, 64, %s290_s29, [#allocation12]  }
  0x21   : > { %s8236_s12 = sadd.s32 1, %s8108_s27   ;;  %s33_s16 = sadd.s32 1, %s8104_s26 }
  0x22   : > { %s30_s13 = ssub.s32 %s8108_s27, %s8236_s12  ;;  %p40_p7 = scmp.ne.s32.totalorder %s8104_s26, %s8100_s25 }
  0x23   : > { %p31_p6 = scmp.eq.s32.totalorder %s30_s13, 0  ;;  %p41_p8 = scmp.eq.s32.totalorder %s8108_s27, 0 }
  0x24   : > { %p46_p9 = scmp.ne.s32.totalorder %s8100_s25, %s8096_s24  ;;  %p196_p12 = scmp.eq.s32.totalorder %s8190_s8, 3 }
  0x25   : > { %s8247_s30 = scalar_select %p31_p6, %s8104_s26, %s33_s16  }
  0x26   : > { %p8249_p10 = por %p41_p8, %p40_p7  ;;  %p8255_p11 = por %p47_p1, %p46_p9 }
  0x27   : > { %p202_p13 = scmp.eq.s32.totalorder %s6839_s10, 3  ;;  %p7632_p0 = scmp.lt.s32.totalorder %s8108_s27, 4 }
  0x28   : > { %s300_s17 = sand.u32 1, %s8104_s26   ;;  %p8262_p2 = por %p196_p12, %p40_p7 }
  0x29   : > { %p8266_p4 = por %p202_p13, %p46_p9  ;;  %s6848_s20 = sshll.u32 %s300_s17, 10 }
  0x2a   : > { %s7409_s21 = sshll.u32 %s8108_s27, 10  ;;  %s304_s28 = scalar_lea.vmem [#allocation2], %s6848_s20 }
  0x2b   : > { %s309_s23 = scalar_lea.hbm %s11892_s0, %s7409_s21  ;;  %s312_s29 = sshll.u32 %s304_s28, 4  ;;  %s313_s29 = int_to_ptr.vmem [resolvable:$true] %s312_s29 }
  0x2c   : > { %s310_s13 = sshll.u32 %s309_s23, 4  ;;  %p8276_p5 = pnand %p7632_p0, %p8249_p10  ;;  %s311_s13 = int_to_ptr.hbm [resolvable:$true] %s310_s13 }
  0x2d   : > { %s301_s16 = scalar_lea.sflag [#allocation3], %s300_s17  ;;  %s8000_s1 = sshra.s32 %s311_s13, 4  ;;  %s8001_s1 = int_to_ptr.hbm [resolvable:$true] %s8000_s1 }
  0x2e   : > { %s8002_s2 = scalar_lea.hbm %s8001_s1, 1024  ;;  %p8004_p7 = pneg %p8276_p5 }
  0x2f   : > { %p8003_p6 = scmp.ne.s32.totalorder %s8001_s1, %s8002_s2  ;;  %s8007_s18 = scalar_lea.hbm %s11892_s0, 4096 }
  0x30   : > { %p8008_p10 = scmp.lt.s32.totalorder %s8001_s1, %s11892_s0  ;;  %p8009_p12 = scmp.lt.s32.totalorder %s8007_s18, %s8002_s2 }
  0x31   : > { %p8005_p8 = pnand %p8004_p7, %p8003_p6 }
  0x32   : > { %p8010_p13 = por %p8009_p12, %p8008_p10 }
  0x33   : > { %p8006_p9 = pneg %p8005_p8 }
  0x35   : > { %p8011_p0 = pnand %p8010_p13, %p8006_p9 }
  0x37   : > { %8014 = shalt.err (!%p8011_p0)
}
  0x38   : > { %s8120_s17 = smov 512   ;;  %s8121_s23 = smov 32  }
  0x39   : > { %7621 = dma.hbm_to_vmem [thread:$0]  (!%p8276_p5), %s311_s13, 16384, %s313_s29, %s301_s16, %s8120_s17, %s8120_s17, %s8121_s23  }
  0x3a   : > { %324 = sbr.rel (%p8195_p3) target bundleno = 1498 (0x5da), region = 48 }
  0x3f   : > { %s8293_s28 = sand.u32 1, %s8100_s25  }
  0x40   : > { %s6852_s1 = sshll.u32 %s8293_s28, 10  ;;  %s327_s2 = scalar_lea.sflag [#allocation3], %s8293_s28 }
  0x41   : > { %s8299_s20 = scalar_lea.vmem [#allocation2], %s6852_s1 }
  0x42   : > { %8075 = dma.done.wait (%p8255_p11), %s327_s2, 16384  }
  0x43   : > { %8077 = vsyncadd (%p8255_p11), %s327_s2, 4294950912 }
  0x44   : > { %8079 = dma.done.wait (%p47_p1), [#allocation6], 4112  }
  0x45   : > { %8081 = vsyncadd (%p47_p1), [#allocation6], 4294963184 }
  0x46   : > { %8083 = dma.done.wait (%p47_p1), [#allocation9], 9232  }
  0x47   : > { %8085 = vsyncadd (%p47_p1), [#allocation9], 4294958064 }
  0x48   : > { %8087 = dma.done.wait (%p47_p1), [#allocation12], 4160  }
  0x49   : > { %8089 = vsyncadd (%p47_p1), [#allocation12], 4294963136  ;;  %v7417_v0 = vld [vmem:[#allocation5 + $0x38] sm:$0xff]  ;;  %v7416_v1 = vld [vmem:[#allocation5 + $0x30] sm:$0xff]  ;;  %vm8122_vm5 = vmmov 0   ;;  %s11390_s9 = scalar_lea.vmem [#allocation14], %s6852_s1 }
  0x4a   : > { %7547 = vmatpush.bf16.msra.mxu1 %v7417_v0  ;;  %7548 = vmatpush.bf16.msra.mxu2 %v7417_v0  ;;  %v7415_v2 = vld [vmem:[#allocation5 + $0x28] sm:$0xff]  ;;  %v7414_v3 = vld [vmem:[#allocation5 + $0x20] sm:$0xff]  ;;  %v7413_v4 = vld [vmem:[#allocation5 + $0x18] sm:$0xff]  ;;  %s7546_s15 = sshll.u32 %s8190_s8, 10  ;;  %s6706_s16 = sshll.u32 %s11390_s9, 4  ;;  %s6707_s16 = int_to_ptr.vmem [resolvable:$true] %s6706_s16 }
  0x4b   : > { %7549 = vmatpush.bf16.msra.mxu3 %v7417_v0  ;;  %847 = vmatpush.bf16.msra.mxu0 %v7417_v0  ;;  %v7412_v5 = vld [vmem:[#allocation5 + $0x10] sm:$0xff]  ;;  %v7411_v6 = vld [vmem:[#allocation5 + $0x8] sm:$0xff]  ;;  %v7410_v7 = vld [vmem:[#allocation5] sm:$0xff]  ;;  %s6705_s10 = scalar_lea.hbm %s11899_s7, %s7546_s15  ;;  %s6694_s18 = scalar_lea.sflag [#allocation4], %s8293_s28 }
  0x4c   : > { %v427_v8 = vld [vmem:[%s8299_s20 + $0x100] sm:$0xff]  ;;  %v7433_v14 = vld [vmem:[#allocation5 + $0xb8] sm:$0xff]  ;;  %v7432_v20 = vld [vmem:[#allocation5 + $0xb0] sm:$0xff]  ;;  %s6708_s21 = sshll.u32 %s6705_s10, 4  ;;  %s8050_s23 = scalar_lea.hbm %s11899_s7, 4096  ;;  %s6709_s21 = int_to_ptr.hbm [resolvable:$true] %s6708_s21 }
  0x4d   : > { %v431_v9 = vld [vmem:[%s8299_s20 + $0x120] sm:$0xff]  ;;  %v7441_v15 = vld [vmem:[#allocation5 + $0xf8] sm:$0xff]  ;;  %v7440_v21 = vld [vmem:[#allocation5 + $0xf0] sm:$0xff]  ;;  %s8044_s8 = sshra.s32 %s6709_s21, 4  ;;  %s8045_s8 = int_to_ptr.hbm [resolvable:$true] %s8044_s8 }
  0x4e   : > { %7550 = vmatpush.bf16.msra.mxu1 %v7416_v1  ;;  %7551 = vmatpush.bf16.msra.mxu2 %v7416_v1  ;;  %v459_v10 = vld [vmem:[%s8299_s20 + $0x200] sm:$0xff]  ;;  %v7425_v16 = vld [vmem:[#allocation5 + $0x78] sm:$0xff]  ;;  %v539_v17 = vpack.c.bf16 %v431_v9, %v427_v8  ;;  %v7424_v22 = vld [vmem:[#allocation5 + $0x70] sm:$0xff]  ;;  %s8046_s22 = scalar_lea.hbm %s8045_s8, 1024  ;;  %p8051_p5 = scmp.lt.s32.totalorder %s8045_s8, %s11899_s7 }
  0x4f   : > { %7552 = vmatpush.bf16.msra.mxu3 %v7416_v1  ;;  %848 = vmatpush.bf16.msra.mxu0 %v7416_v1  ;;  %v463_v11 = vld [vmem:[%s8299_s20 + $0x220] sm:$0xff]  ;;  %v7431_v23 = vld [vmem:[#allocation5 + $0xa8] sm:$0xff]  ;;  %v7429_v35 = vld [vmem:[#allocation5 + $0x98] sm:$0xff]  ;;  %p8047_p1 = scmp.ne.s32.totalorder %s8045_s8, %s8046_s22  ;;  %p8052_p6 = scmp.lt.s32.totalorder %s8050_s23, %s8046_s22 }
  0x50   : > { %v491_v12 = vld [vmem:[%s8299_s20 + $0x300] sm:$0xff]  ;;  %v555_v18 = vpack.c.bf16 %v463_v11, %v459_v10  ;;  %v7439_v24 = vld [vmem:[#allocation5 + $0xe8] sm:$0xff]  ;;  %v7437_v36 = vld [vmem:[#allocation5 + $0xd8] sm:$0xff] }
  0x51   : > { %v495_v13 = vld [vmem:[%s8299_s20 + $0x320] sm:$0xff]  ;;  %v7423_v25 = vld [vmem:[#allocation5 + $0x68] sm:$0xff]  ;;  %v7421_v37 = vld [vmem:[#allocation5 + $0x58] sm:$0xff]  ;;  %p8048_p3 = pnand %p8047_p1, %p8262_p2  ;;  %p8053_p7 = por %p8052_p6, %p8051_p5 }
  0x52   : > { %7553 = vmatpush.bf16.msra.mxu1 %v7415_v2  ;;  %7554 = vmatpush.bf16.msra.mxu2 %v7415_v2  ;;  %v571_v19 = vpack.c.bf16 %v495_v13, %v491_v12  ;;  %v7430_v26 = vld [vmem:[#allocation5 + $0xa0] sm:$0xff]  ;;  %v7428_v41 = vld [vmem:[#allocation5 + $0x90] sm:$0xff]  ;;  %v7427_v44 = vld [vmem:[#allocation5 + $0x88] sm:$0xff] }
  0x53   : > { %7555 = vmatpush.bf16.msra.mxu3 %v7415_v2  ;;  %849 = vmatpush.bf16.msra.mxu0 %v7415_v2  ;;  %v7438_v27 = vld [vmem:[#allocation5 + $0xe0] sm:$0xff]  ;;  %v7436_v42 = vld [vmem:[#allocation5 + $0xd0] sm:$0xff]  ;;  %v7435_v47 = vld [vmem:[#allocation5 + $0xc8] sm:$0xff]  ;;  %p8049_p11 = pneg %p8048_p3 }
  0x54   : > { %v7422_v28 = vld [vmem:[#allocation5 + $0x60] sm:$0xff]  ;;  %v7420_v43 = vld [vmem:[#allocation5 + $0x50] sm:$0xff]  ;;  %v7419_v48 = vld [vmem:[#allocation5 + $0x48] sm:$0xff] }
  0x55   : > { %v435_v29 = vld [vmem:[%s8299_s20 + $0x140] sm:$0xff]  ;;  %v396_v13 = vld [vmem:[%s8299_s20 + $0x8] sm:$0xff]  ;;  %vm1917_vm6 = vmpackc.low %vm8122_vm5, %vm8122_vm5  ;;  %p8054_p8 = pnand %p8053_p7, %p8049_p11 }
  0x56   : > { %7556 = vmatpush.bf16.msra.mxu1 %v7414_v3  ;;  %7557 = vmatpush.bf16.msra.mxu2 %v7414_v3  ;;  %v439_v30 = vld [vmem:[%s8299_s20 + $0x160] sm:$0xff] }
  0x57   : > { %7558 = vmatpush.bf16.msra.mxu3 %v7414_v3  ;;  %850 = vmatpush.bf16.msra.mxu0 %v7414_v3  ;;  %v467_v31 = vld [vmem:[%s8299_s20 + $0x240] sm:$0xff]  ;;  %v543_v38 = vpack.c.bf16 %v439_v30, %v435_v29  ;;  %v406_v29 = vld [vmem:[%s8299_s20 + $0x58] sm:$0xff] }
  0x58   : > { %v471_v32 = vld [vmem:[%s8299_s20 + $0x260] sm:$0xff]  ;;  %v410_v30 = vld [vmem:[%s8299_s20 + $0x78] sm:$0xff] }
  0x59   : > { %v499_v33 = vld [vmem:[%s8299_s20 + $0x340] sm:$0xff]  ;;  %v559_v39 = vpack.c.bf16 %v471_v32, %v467_v31 }
  0x5a   : > { %7559 = vmatpush.bf16.msra.mxu1 %v7413_v4  ;;  %7560 = vmatpush.bf16.msra.mxu2 %v7413_v4  ;;  %v503_v34 = vld [vmem:[%s8299_s20 + $0x360] sm:$0xff] }
  0x5b   : > { %7561 = vmatpush.bf16.msra.mxu3 %v7413_v4  ;;  %851 = vmatpush.bf16.msra.mxu0 %v7413_v4  ;;  %v575_v40 = vpack.c.bf16 %v503_v34, %v499_v33  ;;  %v395_v45 = vld [vmem:[%s8299_s20] sm:$0xff]  ;;  %v530_v33 = vpack.c.bf16 %v410_v30, %v406_v29  ;;  %v412_v34 = vld [vmem:[%s8299_s20 + $0x88] sm:$0xff] }
  0x5c   : > { %v399_v46 = vld [vmem:[%s8299_s20 + $0x20] sm:$0xff] }
  0x5d   : > { %v523_v49 = vpack.c.bf16 %v399_v46, %v395_v45  ;;  %v7426_v50 = vld [vmem:[#allocation5 + $0x80] sm:$0xff]  ;;  %v421_v45 = vld [vmem:[%s8299_s20 + $0xd0] sm:$0xff] }
  0x5e   : > { %7562 = vmatpush.bf16.msra.mxu1 %v7412_v5  ;;  %7563 = vmatpush.bf16.msra.mxu2 %v7412_v5  ;;  %v7434_v51 = vld [vmem:[#allocation5 + $0xc0] sm:$0xff]  ;;  %v425_v46 = vld [vmem:[%s8299_s20 + $0xf0] sm:$0xff] }
  0x5f   : > { %7564 = vmatpush.bf16.msra.mxu3 %v7412_v5  ;;  %852 = vmatpush.bf16.msra.mxu0 %v7412_v5  ;;  %v7418_v52 = vld [vmem:[#allocation5 + $0x40] sm:$0xff] }
  0x60   : > { %v443_v53 = vld [vmem:[%s8299_s20 + $0x180] sm:$0xff] }
  0x61   : > { %v447_v54 = vld [vmem:[%s8299_s20 + $0x1a0] sm:$0xff] }
  0x62   : > { %7565 = vmatpush.bf16.msra.mxu1 %v7411_v6  ;;  %7566 = vmatpush.bf16.msra.mxu2 %v7411_v6  ;;  %v475_v55 = vld [vmem:[%s8299_s20 + $0x280] sm:$0xff]  ;;  %v547_v59 = vpack.c.bf16 %v447_v54, %v443_v53  ;;  %v428_v53 = vld [vmem:[%s8299_s20 + $0x108] sm:$0xff] }
  0x63   : > { %7567 = vmatpush.bf16.msra.mxu3 %v7411_v6  ;;  %853 = vmatpush.bf16.msra.mxu0 %v7411_v6  ;;  %v479_v56 = vld [vmem:[%s8299_s20 + $0x2a0] sm:$0xff]  ;;  %v432_v54 = vld [vmem:[%s8299_s20 + $0x128] sm:$0xff] }
  0x64   : > { %v507_v57 = vld [vmem:[%s8299_s20 + $0x380] sm:$0xff]  ;;  %v563_v60 = vpack.c.bf16 %v479_v56, %v475_v55  ;;  %v429_v55 = vld [vmem:[%s8299_s20 + $0x110] sm:$0xff] }
  0x65   : > { %v511_v58 = vld [vmem:[%s8299_s20 + $0x3a0] sm:$0xff]  ;;  %v433_v56 = vld [vmem:[%s8299_s20 + $0x130] sm:$0xff] }
  0x66   : > { %7568 = vmatpush.bf16.msra.mxu1 %v7410_v7  ;;  %7569 = vmatpush.bf16.msra.mxu2 %v7410_v7  ;;  %v579_v61 = vpack.c.bf16 %v511_v58, %v507_v57  ;;  %v403_v62 = vld [vmem:[%s8299_s20 + $0x40] sm:$0xff]  ;;  %v430_v57 = vld [vmem:[%s8299_s20 + $0x118] sm:$0xff] }
  0x67   : > { %7570 = vmatpush.bf16.msra.mxu3 %v7410_v7  ;;  %854 = vmatpush.bf16.msra.mxu0 %v7410_v7  ;;  %v407_v63 = vld [vmem:[%s8299_s20 + $0x60] sm:$0xff]  ;;  %v434_v58 = vld [vmem:[%s8299_s20 + $0x138] sm:$0xff] }
  0x68   : > { %v527_v0 = vpack.c.bf16 %v407_v63, %v403_v62  ;;  %v451_v1 = vld [vmem:[%s8299_s20 + $0x1c0] sm:$0xff]  ;;  %v542_v62 = vpack.c.bf16 %v434_v58, %v430_v57  ;;  %v7448_v63 = vld [vmem:[#allocation8 + $0x30] sm:$0xff] }
  0x69   : > { %875 = vmatmul.bf16.vlgmr.msra.gmra.mxu1 %v539_v17  ;;  %895 = vmatmul.bf16.vlgmr.msra.gmra.mxu2 %v555_v18  ;;  %v455_v2 = vld [vmem:[%s8299_s20 + $0x1e0] sm:$0xff]  ;;  %v398_v17 = vld [vmem:[%s8299_s20 + $0x18] sm:$0xff] }
  0x6a   : > { %1025 = vmatpush.bf16.msrb.mxu2 %v7433_v14  ;;  %936 = vmatpush.bf16.msrb.mxu1 %v7425_v16  ;;  %v483_v3 = vld [vmem:[%s8299_s20 + $0x2c0] sm:$0xff]  ;;  %v551_v7 = vpack.c.bf16 %v455_v2, %v451_v1  ;;  %v400_v14 = vld [vmem:[%s8299_s20 + $0x28] sm:$0xff]  ;;  %v401_v16 = vld [vmem:[%s8299_s20 + $0x30] sm:$0xff] }
  0x6b   : > { %1114 = vmatpush.bf16.msrb.mxu3 %v7441_v15  ;;  %855 = vmatmul.bf16.vlgmr.msra.gmra.mxu0 %v523_v49  ;;  %v487_v4 = vld [vmem:[%s8299_s20 + $0x2e0] sm:$0xff]  ;;  %v397_v15 = vld [vmem:[%s8299_s20 + $0x10] sm:$0xff]  ;;  %v402_v18 = vld [vmem:[%s8299_s20 + $0x38] sm:$0xff] }
  0x6c   : > { %915 = vmatmul.bf16.vlgmr.msra.gmra.mxu3 %v571_v19  ;;  %v515_v5 = vld [vmem:[%s8299_s20 + $0x3c0] sm:$0xff]  ;;  %v567_v8 = vpack.c.bf16 %v487_v4, %v483_v3  ;;  %v524_v19 = vpack.c.bf16 %v400_v14, %v396_v13  ;;  %v7447_v3 = vld [vmem:[#allocation8 + $0x28] sm:$0xff] }
  0x6d   : > { %v519_v6 = vld [vmem:[%s8299_s20 + $0x3e0] sm:$0xff]  ;;  %v436_v4 = vld [vmem:[%s8299_s20 + $0x148] sm:$0xff] }
  0x6e   : > { %1026 = vmatpush.bf16.msrb.mxu2 %v7432_v20  ;;  %937 = vmatpush.bf16.msrb.mxu1 %v7424_v22  ;;  %v583_v9 = vpack.c.bf16 %v519_v6, %v515_v5  ;;  %v411_v10 = vld [vmem:[%s8299_s20 + $0x80] sm:$0xff]  ;;  %v525_v20 = vpack.c.bf16 %v401_v16, %v397_v15  ;;  %v440_v5 = vld [vmem:[%s8299_s20 + $0x168] sm:$0xff]  ;;  %v437_v6 = vld [vmem:[%s8299_s20 + $0x150] sm:$0xff] }
  0x6f   : > { %1115 = vmatpush.bf16.msrb.mxu3 %v7440_v21  ;;  %v415_v11 = vld [vmem:[%s8299_s20 + $0xa0] sm:$0xff]  ;;  %v526_v21 = vpack.c.bf16 %v402_v18, %v398_v17 }
  0x70   : > { %v531_v12 = vpack.c.bf16 %v415_v11, %v411_v10  ;;  %v419_v22 = vld [vmem:[%s8299_s20 + $0xc0] sm:$0xff] }
  0x71   : > { %v7446_v16 = vld [vmem:[#allocation8 + $0x20] sm:$0xff] }
  0x72   : > { %1027 = vmatpush.bf16.msrb.mxu2 %v7431_v23  ;;  %938 = vmatpush.bf16.msrb.mxu1 %v7423_v25  ;;  %v423_v23 = vld [vmem:[%s8299_s20 + $0xe0] sm:$0xff]  ;;  %v404_v25 = vld [vmem:[%s8299_s20 + $0x48] sm:$0xff] }
  0x73   : > { %1116 = vmatpush.bf16.msrb.mxu3 %v7439_v24  ;;  %v535_v24 = vpack.c.bf16 %v423_v23, %v419_v22  ;;  %v448_v22 = vld [vmem:[%s8299_s20 + $0x1a8] sm:$0xff]  ;;  %v445_v23 = vld [vmem:[%s8299_s20 + $0x190] sm:$0xff] }
  0x76   : > { %1028 = vmatpush.bf16.msrb.mxu2 %v7430_v26  ;;  %939 = vmatpush.bf16.msrb.mxu1 %v7422_v28  ;;  %v408_v26 = vld [vmem:[%s8299_s20 + $0x68] sm:$0xff]  ;;  %v409_v28 = vld [vmem:[%s8299_s20 + $0x70] sm:$0xff] }
  0x77   : > { %1117 = vmatpush.bf16.msrb.mxu3 %v7438_v27  ;;  %v405_v27 = vld [vmem:[%s8299_s20 + $0x50] sm:$0xff]  ;;  %v528_v31 = vpack.c.bf16 %v408_v26, %v404_v25  ;;  %v1371_v25 = vlaneseq  ;;  %v446_v26 = vld [vmem:[%s8299_s20 + $0x198] sm:$0xff] }
  0x78   : > { %v529_v32 = vpack.c.bf16 %v409_v28, %v405_v27  ;;  %v450_v27 = vld [vmem:[%s8299_s20 + $0x1b8] sm:$0xff] }
  0x79   : > { %880 = vmatmul.bf16.gmra.mxu1 %v543_v38  ;;  %900 = vmatmul.bf16.gmra.mxu2 %v559_v39  ;;  %v414_v38 = vld [vmem:[%s8299_s20 + $0x98] sm:$0xff] }
  0x7a   : > { %1029 = vmatpush.bf16.msrb.mxu2 %v7429_v35  ;;  %940 = vmatpush.bf16.msrb.mxu1 %v7421_v37  ;;  %v416_v35 = vld [vmem:[%s8299_s20 + $0xa8] sm:$0xff]  ;;  %v417_v37 = vld [vmem:[%s8299_s20 + $0xb0] sm:$0xff]  ;;  %v418_v39 = vld [vmem:[%s8299_s20 + $0xb8] sm:$0xff] }
  0x7b   : > { %1118 = vmatpush.bf16.msrb.mxu3 %v7437_v36  ;;  %860 = vmatmul.bf16.gmra.mxu0 %v527_v0  ;;  %v413_v36 = vld [vmem:[%s8299_s20 + $0x90] sm:$0xff] }
  0x7c   : > { %920 = vmatmul.bf16.gmra.mxu3 %v575_v40  ;;  %v532_v40 = vpack.c.bf16 %v416_v35, %v412_v34  ;;  %v550_v34 = vpack.c.bf16 %v450_v27, %v446_v26  ;;  %v8419_v35 = vshrl.u32 %v1371_v25, 7 }
  0x7e   : > { %1030 = vmatpush.bf16.msrb.mxu2 %v7428_v41  ;;  %941 = vmatpush.bf16.msrb.mxu1 %v7420_v43  ;;  %v533_v41 = vpack.c.bf16 %v417_v37, %v413_v36  ;;  %v420_v43 = vld [vmem:[%s8299_s20 + $0xc8] sm:$0xff]  ;;  %v7444_v36 = vld [vmem:[#allocation8 + $0x10] sm:$0xff]  ;;  %v1374_v37 = vadd.s32 16, %v8419_v35 }
  0x7f   : > { %1119 = vmatpush.bf16.msrb.mxu3 %v7436_v42  ;;  %v534_v42 = vpack.c.bf16 %v418_v39, %v414_v38  ;;  %v1373_v38 = vadd.s32 8, %v8419_v35 }
  0x82   : > { %1031 = vmatpush.bf16.msrb.mxu2 %v7427_v44  ;;  %942 = vmatpush.bf16.msrb.mxu1 %v7419_v48  ;;  %v424_v44 = vld [vmem:[%s8299_s20 + $0xe8] sm:$0xff]  ;;  %v426_v48 = vld [vmem:[%s8299_s20 + $0xf8] sm:$0xff] }
  0x83   : > { %1120 = vmatpush.bf16.msrb.mxu3 %v7435_v47  ;;  %v422_v47 = vld [vmem:[%s8299_s20 + $0xd8] sm:$0xff]  ;;  %v536_v49 = vpack.c.bf16 %v424_v44, %v420_v43 }
  0x86   : > { %1032 = vmatpush.bf16.msrb.mxu2 %v7426_v50  ;;  %943 = vmatpush.bf16.msrb.mxu1 %v7418_v52  ;;  %v537_v50 = vpack.c.bf16 %v425_v46, %v421_v45  ;;  %v7449_v52 = vld [vmem:[#allocation8 + $0x38] sm:$0xff]  ;;  %v1422_v45 = vand.u32 15, %v1374_v37  ;;  %v1415_v46 = vand.u32 15, %v1373_v38  ;;  %v1377_v38 = vadd.s32 40, %v8419_v35 }
  0x87   : > { %1121 = vmatpush.bf16.msrb.mxu3 %v7434_v51  ;;  %v538_v51 = vpack.c.bf16 %v426_v48, %v422_v47  ;;  %4902 = vmatpush.bf16.msrb.mxu0 %v7449_v52  ;;  %v457_v52 = vld [vmem:[%s8299_s20 + $0x1f0] sm:$0xff] }
  0x88   : > { %vm8441_vm1 = vcmp.eq.s32.totalorder %v1422_v45, 0  ;;  %vm8447_vm2 = vcmp.eq.s32.totalorder %v1415_v46, 15  ;;  %v460_v46 = vld [vmem:[%s8299_s20 + $0x208] sm:$0xff] }
  0x89   : > { %885 = vmatmul.bf16.gmra.mxu1 %v547_v59  ;;  %905 = vmatmul.bf16.gmra.mxu2 %v563_v60  ;;  %v540_v59 = vpack.c.bf16 %v432_v54, %v428_v53  ;;  %v541_v60 = vpack.c.bf16 %v433_v56, %v429_v55  ;;  %v454_v54 = vld [vmem:[%s8299_s20 + $0x1d8] sm:$0xff]  ;;  %vm1918_vm7 = vmpackc.low %vm8441_vm1, %vm8441_vm1  ;;  %vm11916_vm1 = vcmask 1043456  }
  0x8a   : > { %v458_v55 = vld [vmem:[%s8299_s20 + $0x1f8] sm:$0xff]  ;;  %vm2365_vm8 = vmpackc.low %vm8447_vm2, %vm8447_vm2  ;;  %vm11922_vm2 = vsmask.f32 4352 }
  0x8b   : > { %865 = vmatmul.bf16.gmra.mxu0 %v531_v12  ;;  %v544_v12 = vpack.c.bf16 %v440_v5, %v436_v4  ;;  %v11900_v4 = vmov 0   ;;  %v466_v56 = vld [vmem:[%s8299_s20 + $0x238] sm:$0xff] }
  0x8c   : > { %925 = vmatmul.bf16.gmra.mxu3 %v579_v61  ;;  %4903 = vmatpush.bf16.msrb.mxu0 %v7448_v63 }
  0x90   : > { %4904 = vmatpush.bf16.msrb.mxu0 %v7447_v3  ;;  %v554_v3 = vpack.c.bf16 %v458_v55, %v454_v54  ;;  %v462_v55 = vld [vmem:[%s8299_s20 + $0x218] sm:$0xff] }
  0x94   : > { %4905 = vmatpush.bf16.msrb.mxu0 %v7446_v16 }
  0x99   : > { %890 = vmatmul.bf16.gmra.mxu1 %v551_v7  ;;  %910 = vmatmul.bf16.gmra.mxu2 %v567_v8  ;;  %v441_v7 = vld [vmem:[%s8299_s20 + $0x170] sm:$0xff]  ;;  %v438_v8 = vld [vmem:[%s8299_s20 + $0x158] sm:$0xff] }
  0x9a   : > { %v545_v13 = vpack.c.bf16 %v441_v7, %v437_v6  ;;  %v1949_v6 = vsel %vm1917_vm6, 65537, %v11900_v4 }
  0x9b   : > { %870 = vmatmul.bf16.gmra.mxu0 %v535_v24  ;;  %v449_v24 = vld [vmem:[%s8299_s20 + $0x1b0] sm:$0xff] }
  0x9c   : > { %930 = vmatmul.bf16.gmra.mxu3 %v583_v9  ;;  %v442_v9 = vld [vmem:[%s8299_s20 + $0x178] sm:$0xff] }
  0x9d   : > { %v546_v15 = vpack.c.bf16 %v442_v9, %v438_v8  ;;  %v1950_v8 = vsel %vm1918_vm7, 65537, %v11900_v4  ;;  %v8478_v9 = vld [vmem:[#allocation7] ss:$0 sm:$0xff] }
  0xa9   : > { %944 = vmatmul.bf16.vlgmr.msrb.gmra.mxu1 %v524_v19  ;;  %1033 = vmatmul.bf16.vlgmr.msrb.gmra.mxu2 %v525_v20  ;;  %v7445_v20 = vld [vmem:[#allocation8 + $0x18] sm:$0xff] }
  0xaa   : > { %4906 = vmatpush.bf16.msrb.mxu0 %v7445_v20  ;;  %v7443_v20 = vld [vmem:[#allocation8 + $0x8] sm:$0xff] }
  0xac   : > { %1122 = vmatmul.bf16.vlgmr.msrb.gmra.mxu3 %v526_v21  ;;  %v444_v21 = vld [vmem:[%s8299_s20 + $0x188] sm:$0xff] }
  0xae   : > { %4907 = vmatpush.bf16.msrb.mxu0 %v7444_v36  ;;  %v7442_v36 = vld [vmem:[#allocation8] sm:$0xff] }
  0xb2   : > { %4908 = vmatpush.bf16.msrb.mxu0 %v7443_v20 }
  0xb6   : > { %4909 = vmatpush.bf16.msrb.mxu0 %v7442_v36 }
  0xb9   : > { %949 = vmatmul.bf16.gmra.mxu1 %v528_v31  ;;  %1038 = vmatmul.bf16.gmra.mxu2 %v529_v32  ;;  %v548_v31 = vpack.c.bf16 %v448_v22, %v444_v21  ;;  %v549_v32 = vpack.c.bf16 %v449_v24, %v445_v23  ;;  %v1982_v21 = vunpack.c.l.b16 %v1950_v8  ;;  %v1376_v24 = vadd.s32 32, %v8419_v35 }
  0xbb   : > { %v1436_v37 = vand.u32 15, %v1376_v24 }
  0xbc   : > { %1127 = vmatmul.bf16.gmra.mxu3 %v530_v33 }
  0xbd   : > { %vm1792_vm10 = vcmp.eq.s32.totalorder %v1436_v37, 0 }
  0xbe   : > { %vm1920_vm11 = vmpackc.low %vm1792_vm10, %vm1792_vm10  ;;  %vm11918_vm10 = vsmask.f32 7424 }
  0xbf   : > { %v1952_v54 = vsel %vm1920_vm11, 65537, %v11900_v4 }
  0xc0   : > { %v1984_v8 = vunpack.c.l.b16 %v1952_v54 }
  0xc9   : > { %954 = vmatmul.bf16.gmra.mxu1 %v532_v40  ;;  %1043 = vmatmul.bf16.gmra.mxu2 %v533_v41  ;;  %v1375_v40 = vadd.s32 24, %v8419_v35  ;;  %v1408_v41 = vand.u32 15, %v8419_v35 }
  0xcb   : > { %v1429_v47 = vand.u32 15, %v1375_v40  ;;  %vm8433_vm0 = vcmp.eq.s32.totalorder %v1408_v41, 0 }
  0xcc   : > { %1132 = vmatmul.bf16.gmra.mxu3 %v534_v42  ;;  %vm1916_vm3 = vmpackc.low %vm8433_vm0, %vm8433_vm0  ;;  %vm11921_vm0 = vsmask.f32 3328 }
  0xcd   : > { %vm8456_vm4 = vcmp.eq.s32.totalorder %v1429_v47, 15  ;;  %v1948_v5 = vsel %vm1916_vm3, 65537, %v11900_v4  ;;  %v464_v47 = vld [vmem:[%s8299_s20 + $0x228] sm:$0xff] }
  0xce   : > { %vm2367_vm9 = vmpackc.low %vm8456_vm4, %vm8456_vm4 }
  0xcf   : > { %v2399_v16 = vsel %vm2367_vm9, 65537, %v11900_v4 }
  0xd0   : > { %v2431_v27 = vunpack.c.l.b16 %v2399_v16 }
  0xd9   : > { %959 = vmatmul.bf16.gmra.mxu1 %v536_v49  ;;  %1048 = vmatmul.bf16.gmra.mxu2 %v537_v50  ;;  %v452_v49 = vld [vmem:[%s8299_s20 + $0x1c8] sm:$0xff] }
  0xda   : > { %v456_v50 = vld [vmem:[%s8299_s20 + $0x1e8] sm:$0xff] }
  0xdc   : > { %1137 = vmatmul.bf16.gmra.mxu3 %v538_v51  ;;  %v453_v51 = vld [vmem:[%s8299_s20 + $0x1d0] sm:$0xff] }
  0xe6   : > { %v8379_v61 = vpop.f32.mrf.mxu1 }
  0xe7   : > { %v8489_v25 = vadd.f32 %v8478_v9, %v8379_v61 }
  0xe8   : > { %v8413_v29 = vpop.f32.mrf.mxu0 }
  0xe9   : > { %964 = vmatmul.bf16.gmra.mxu1 %v540_v59  ;;  %1053 = vmatmul.bf16.gmra.mxu2 %v541_v60  ;;  %v552_v60 = vpack.c.bf16 %v456_v50, %v452_v49  ;;  %v461_v49 = vld [vmem:[%s8299_s20 + $0x210] sm:$0xff] }
  0xea   : > { %v465_v50 = vld [vmem:[%s8299_s20 + $0x230] sm:$0xff] }
  0xec   : > { %1142 = vmatmul.bf16.gmra.mxu3 %v542_v62  ;;  %v8381_v0 = vpop.f32.mrf.mxu2  ;;  %v553_v62 = vpack.c.bf16 %v457_v52, %v453_v51 }
  0xee   : > { %v8385_v2 = vpop.f32.mrf.mxu1 }
  0xef   : > { %v8383_v1 = vpop.f32.mrf.mxu3  ;;  %v8507_v40 = vadd.f32 %v8478_v9, %v8385_v2 }
  0xf0   : > { %v8431_v44 = vpop.f32.mrf.mxu0  ;;  %v8503_v61 = vadd.f32 %v8478_v9, %v8383_v1  ;;  %v1443_v1 = vand.u32 15, %v1377_v38  ;;  %v7465_v38 = vld [vmem:[#allocation8 + $0xb8] sm:$0xff] }
  0xf1   : > { %5080 = vmatpush.bf16.msra.mxu2 %v7465_v38  ;;  %v472_v38 = vld [vmem:[%s8299_s20 + $0x268] sm:$0xff] }
  0xf2   : > { %12072 = vst [vmem:[#allocation21_spill] sm:$0xff] %v8503_v61  ;;  %vm8543_vm12 = vcmp.eq.s32.totalorder %v1443_v1, 15 }
  0xf3   : > { %vm2369_vm13 = vmpackc.low %vm8543_vm12, %vm8543_vm12  ;;  %vm11919_vm12 = vcmask 1046528  }
  0xf4   : > { %v8393_v10 = vpop.f32.mrf.mxu2 }
  0xf6   : > { %v8397_v14 = vpop.f32.mrf.mxu1 }
  0xf7   : > { %v8395_v11 = vpop.f32.mrf.mxu3  ;;  %v8523_v2 = vadd.f32 %v8478_v9, %v8397_v14 }
  0xf8   : > { %v8475_v7 = vpop.f32.mrf.mxu0  ;;  %v8516_v45 = vadd.f32 %v8478_v9, %v8395_v11 }
  0xf9   : > { %969 = vmatmul.bf16.gmra.mxu1 %v544_v12  ;;  %1058 = vmatmul.bf16.gmra.mxu2 %v545_v13  ;;  %v2397_v12 = vsel %vm2365_vm8, 65537, %v11900_v4  ;;  %v1980_v13 = vunpack.c.l.b16 %v1948_v5  ;;  %v557_v5 = vpack.c.bf16 %v465_v50, %v461_v49 }
  0xfa   : > { %v2429_v23 = vunpack.c.l.b16 %v2397_v12  ;;  %12074 = vst [vmem:[#allocation23_spill] sm:$0xff] %v8516_v45 }
  0xfc   : > { %1147 = vmatmul.bf16.gmra.mxu3 %v546_v15  ;;  %v8399_v17 = vpop.f32.mrf.mxu2  ;;  %v8481_v15 = vunpack.c.l.b16 %v1949_v6 }
  0xfe   : > { %v8403_v19 = vpop.f32.mrf.mxu1  ;;  %v2013_v41 = vpack.c.b16 %v8481_v15, %v1982_v21  ;;  %v2460_v48 = vpack.c.b16 %v2429_v23, %v8481_v15  ;;  %v2461_v51 = vpack.c.b16 %v2431_v27, %v8481_v15  ;;  %v1378_v21 = vadd.s32 48, %v8419_v35 }
  0xff   : > { %v8401_v18 = vpop.f32.mrf.mxu3  ;;  %v8538_v52 = vadd.f32 %v8478_v9, %v8403_v19  ;;  %v556_v19 = vpack.c.bf16 %v464_v47, %v460_v46  ;;  %v558_v27 = vpack.c.bf16 %v466_v56, %v462_v55  ;;  %v2014_v49 = vpack.c.b16 %v8481_v15, %v1984_v8 }
 0x100   : > { %v8531_v11 = vadd.f32 %v8478_v9, %v8401_v18  ;;  %v8540_v14 = vpop.f32.mrf.mxu0  ;;  %v857_v18 = vadd.f32 %v8478_v9, %v8413_v29  ;;  %v2478_v6 = vshrl.u32 %v2460_v48, 16  ;;  %v2486_v16 = vshrl.u32 %v2461_v51, 16 }
 0x101   : > { %v2489_v20 = vshll.u32 %v2461_v51, 16  ;;  %v1450_v50 = vand.u32 15, %v1378_v21 }
 0x102   : > { %12076 = vst [vmem:[#allocation25_spill] sm:$0xff] %v8531_v11  ;;  %v2480_v1 = vrot.slane %v2478_v6, 3 }
 0x103   : > { %v2491_v54 = vrot.slane %v2489_v20, 4  ;;  %vm8588_vm14 = vcmp.eq.s32.totalorder %v1450_v50, 0 }
 0x104   : > { %v8411_v28 = vpop.f32.mrf.mxu2  ;;  %vm1922_vm15 = vmpackc.low %vm8588_vm14, %vm8588_vm14 }
 0x105   : > { %v8561_v29 = vadd.f32 %v8478_v9, %v8411_v28  ;;  %v7481_v28 = vld [vmem:[#allocation8 + $0x138] sm:$0xff] }
 0x106   : > { %v8417_v33 = vpop.f32.mrf.mxu1  ;;  %5258 = vmatpush.bf16.msra.mxu0 %v7481_v28 }
 0x107   : > { %v8415_v30 = vpop.f32.mrf.mxu3  ;;  %12080 = vst [vmem:[#allocation27_spill] sm:$0xff] %v8561_v29  ;;  %v8569_v36 = vadd.f32 %v8478_v9, %v8417_v33 }
 0x108   : > { %v8565_v23 = vadd.f32 %v8478_v9, %v8415_v30  ;;  %v2401_v30 = vsel %vm2369_vm13, 65537, %v11900_v4 }
 0x109   : > { %974 = vmatmul.bf16.gmra.mxu1 %v548_v31  ;;  %1063 = vmatmul.bf16.gmra.mxu2 %v549_v32  ;;  %v8495_v31 = vadd.f32 %v8478_v9, %v8381_v0  ;;  %v8511_v0 = vadd.f32 %v8478_v9, %v8393_v10  ;;  %v8527_v10 = vadd.f32 %v8478_v9, %v8399_v17 }
 0x10a   : > { %12081 = vst [vmem:[#allocation28_spill] sm:$0xff] %v8565_v23 }
 0x10b   : > { %12071 = vst [vmem:[#allocation20_spill] sm:$0xff] %v8495_v31  ;;  %v7471_v31 = vld [vmem:[#allocation8 + $0xe8] sm:$0xff] }
 0x10c   : > { %1152 = vmatmul.bf16.gmra.mxu3 %v550_v34  ;;  %v8423_v39 = vpop.f32.mrf.mxu2  ;;  %v2012_v34 = vpack.c.b16 %v8481_v15, %v1980_v13  ;;  %12073 = vst [vmem:[#allocation22_spill] sm:$0xff] %v8511_v0  ;;  %v2481_v13 = vshll.u32 %v2460_v48, 16  ;;  %v7457_v48 = vld [vmem:[#allocation8 + $0x78] sm:$0xff] }
 0x10d   : > { %12075 = vst [vmem:[#allocation24_spill] sm:$0xff] %v8527_v10  ;;  %v8580_v55 = vadd.f32 %v8478_v9, %v8423_v39  ;;  %4991 = vmatpush.bf16.msra.mxu1 %v7457_v48 }
 0x10e   : > { %v8429_v43 = vpop.f32.mrf.mxu1  ;;  %v2030_v53 = vshrl.u32 %v2012_v34, 16  ;;  %v2033_v58 = vshll.u32 %v2012_v34, 16  ;;  %12082 = vst [vmem:[#allocation29_spill] sm:$0xff] %v8569_v36  ;;  %v2483_v51 = vrot.slane %v2481_v13, 4 }
 0x10f   : > { %v8427_v42 = vpop.f32.mrf.mxu3  ;;  %12083 = vst [vmem:[#allocation30_spill] sm:$0xff] %v8580_v55  ;;  %v9023_v55 = vld [vmem:[%s8299_s20 + $0x368] sm:$0xff] }
 0x110   : > { %v2032_v34 = vrot.slane %v2030_v53, 4  ;;  %v2035_v37 = vrot.slane %v2033_v58, 5  ;;  %v2488_v53 = vrot.slane %v2486_v16, 3  ;;  %v8584_v56 = vadd.f32 %v8478_v9, %v8427_v42 }
 0x111   : > { %v859_v58 = vadd.f32 %v8478_v9, %v8431_v44  ;;  %v2433_v42 = vunpack.c.l.b16 %v2401_v30  ;;  %v8609_v13 = vor.u32 %v2483_v51, %v2480_v1  ;;  %v470_v51 = vld [vmem:[%s8299_s20 + $0x258] sm:$0xff] }
 0x112   : > { %12084 = vst [vmem:[#allocation31_spill] sm:$0xff] %v8584_v56  ;;  %v8611_v16 = vor.u32 %v2491_v54, %v2488_v53  ;;  %v474_v53 = vld [vmem:[%s8299_s20 + $0x278] sm:$0xff] }
 0x113   : > { %12089 = vst [vmem:[#allocation34_spill] sm:$0xff] %v8609_v13 }
 0x114   : > { %v8454_v57 = vpop.f32.mrf.mxu2  ;;  %v2493_v50 = vsel %vm11922_vm2, %v8609_v13, %v8611_v16 }
 0x115   : > { %v8605_v44 = vadd.f32 %v8478_v9, %v8454_v57  ;;  %v1954_v57 = vsel %vm1922_vm15, 65537, %v11900_v4  ;;  %v2621_v56 = vunpack.c.h.b16 %v2493_v50 }
 0x116   : > { %v8465_v63 = vpop.f32.mrf.mxu1  ;;  %v1986_v28 = vunpack.c.l.b16 %v1954_v57  ;;  %v2620_v57 = vunpack.c.l.b16 %v2493_v50 }
 0x117   : > { %v8460_v59 = vpop.f32.mrf.mxu3  ;;  %12088 = vst [vmem:[#allocation33_spill] sm:$0xff] %v8605_v44  ;;  %v8620_v21 = vadd.f32 %v8478_v9, %v8465_v63  ;;  %v2462_v63 = vpack.c.b16 %v2433_v42, %v8481_v15 }
 0x118   : > { %v8616_v20 = vadd.f32 %v8478_v9, %v8460_v59  ;;  %v2015_v13 = vpack.c.b16 %v8481_v15, %v1986_v28 }
 0x119   : > { %979 = vmatmul.bf16.gmra.mxu1 %v552_v60  ;;  %1068 = vmatmul.bf16.gmra.mxu2 %v553_v62  ;;  %v2038_v60 = vshrl.u32 %v2013_v41, 16  ;;  %v2041_v62 = vshll.u32 %v2013_v41, 16  ;;  %v7473_v41 = vld [vmem:[#allocation8 + $0xf8] sm:$0xff]  ;;  %12091 = vst [vmem:[#allocation36_spill] sm:$0xff] %v8620_v21 }
 0x11a   : > { %5169 = vmatpush.bf16.msra.mxu3 %v7473_v41  ;;  %12090 = vst [vmem:[#allocation35_spill] sm:$0xff] %v8616_v20  ;;  %v469_v41 = vld [vmem:[%s8299_s20 + $0x250] sm:$0xff]  ;;  %v2056_v50 = vshrl.u32 %v2015_v13, 16 }
 0x11b   : > { %v2040_v46 = vrot.slane %v2038_v60, 4  ;;  %v2043_v47 = vrot.slane %v2041_v62, 5  ;;  %v8596_v60 = vor.u32 %v2035_v37, %v2032_v34  ;;  %v8624_v37 = vunpack.c.l.b16 %v11900_v4 }
 0x11c   : > { %1157 = vmatmul.bf16.gmra.mxu3 %v554_v3  ;;  %v8484_v22 = vpop.f32.mrf.mxu2 }
 0x11d   : > { %v8598_v39 = vor.u32 %v2043_v47, %v2040_v46  ;;  %v473_v46 = vld [vmem:[%s8299_s20 + $0x270] sm:$0xff]  ;;  %v8634_v47 = vunpack.c.h.b16 %v11900_v4  ;;  %v2748_v30 = vunpack.c.l.b16 %v8596_v60  ;;  %v562_v4 = vpack.c.bf16 %v474_v53, %v470_v51 }
 0x11e   : > { %v8497_v32 = vpop.f32.mrf.mxu1  ;;  %v561_v17 = vpack.c.bf16 %v473_v46, %v469_v41  ;;  %v2059_v51 = vshll.u32 %v2015_v13, 16  ;;  %v1380_v53 = vadd.s32 64, %v8419_v35  ;;  %vm8690_vm6 = vcmp.ne.s32.totalorder %v2620_v57, %v8624_v37  ;;  %v7472_v13 = vld [vmem:[#allocation8 + $0xf0] sm:$0xff] }
 0x11f   : > { %v8491_v26 = vpop.f32.mrf.mxu3  ;;  %v2045_v59 = vsel %vm11921_vm0, %v8596_v60, %v8598_v39  ;;  %vm8695_vm7 = vcmp.ne.s32.totalorder %v2621_v56, %v8634_v47  ;;  %vm8700_vm8 = vcmp.ne.s32.totalorder %v2748_v30, %v8624_v37  ;;  %v8714_v56 = vadd.f32 %v8478_v9, %v8497_v32  ;;  %v8719_v30 = vld [vmem:[%s8299_s20 + $0x288] sm:$0xff]  ;;  %5170 = vmatpush.bf16.msra.mxu3 %v7472_v13 }
 0x120   : > { %v2172_v42 = vunpack.c.l.b16 %v2045_v59  ;;  %v2058_v32 = vrot.slane %v2056_v50, 4  ;;  %vm8766_vm13 = vmpackc.low %vm8695_vm7, %vm8690_vm6 }
 0x121   : > { %12114 = vst [vmem:[#allocation44_spill] sm:$0xff] %v8714_v56  ;;  %v7455_v56 = vld [vmem:[#allocation8 + $0x68] sm:$0xff] }
 0x122   : > { %vm8653_vm3 = vcmp.ne.s32.totalorder %v2172_v42, %v8624_v37  ;;  %v8672_v42 = vadd.f32 %v8478_v9, %v8484_v22  ;;  %v8687_v22 = vadd.f32 %v8478_v9, %v8491_v26 }
 0x123   : > { %5171 = vmatpush.bf16.msra.mxu3 %v7471_v31 }
 0x124   : > { %v8551_v3 = vpop.f32.mrf.mxu2  ;;  %12097 = vst [vmem:[#allocation37_spill] sm:$0xff] %v8672_v42 }
 0x125   : > { %12102 = vst [vmem:[#allocation40_spill] sm:$0xff] %v8687_v22  ;;  %v8736_v22 = vld [vmem:[%s8299_s20 + $0x298] sm:$0xff] }
 0x126   : > { %v945_v24 = vpop.f32.mrf.mxu1 }
 0x127   : > { %v8553_v12 = vpop.f32.mrf.mxu3  ;;  %v946_v33 = vadd.f32 %v945_v24, %v857_v18  ;;  %v8594_v18 = vadd.f32 %v8478_v9, %v8429_v43  ;;  %v2047_v43 = vshrl.u32 %v2014_v49, 16 }
 0x128   : > { %12079 = vst [vmem:[#allocation26_spill] sm:$0xff] %v8553_v12 }
 0x129   : > { %984 = vmatmul.bf16.gmra.mxu1 %v556_v19  ;;  %1073 = vmatmul.bf16.gmra.mxu2 %v557_v5  ;;  %12087 = vst [vmem:[#allocation32_spill] sm:$0xff] %v8594_v18  ;;  %v8607_v19 = vpop.f32.mrf.mxu0  ;;  %v2050_v5 = vshll.u32 %v2014_v49, 16  ;;  %v2049_v48 = vrot.slane %v2047_v43, 4  ;;  %v2495_v43 = vshrl.u32 %v2462_v63, 16 }
 0x12a   : > { %v867_v50 = vadd.f32 %v8478_v9, %v8607_v19 }
 0x12b   : > { %v2052_v1 = vrot.slane %v2050_v5, 5  ;;  %v2498_v5 = vshll.u32 %v2462_v63, 16  ;;  %v2497_v28 = vrot.slane %v2495_v43, 3 }
 0x12c   : > { %1162 = vmatmul.bf16.gmra.mxu3 %v558_v27  ;;  %v1034_v62 = vpop.f32.mrf.mxu2  ;;  %v468_v27 = vld [vmem:[%s8299_s20 + $0x248] sm:$0xff] }
 0x12d   : > { %v1035_v6 = vadd.f32 %v1034_v62, %v946_v33  ;;  %v2749_v33 = vunpack.c.h.b16 %v8596_v60  ;;  %v560_v54 = vpack.c.bf16 %v472_v38, %v468_v27  ;;  %v2173_v62 = vunpack.c.h.b16 %v2045_v59 }
 0x12e   : > { %v947_v24 = vpop.f32.mrf.mxu1  ;;  %v8643_v12 = vor.u32 %v2052_v1, %v2049_v48  ;;  %v862_v60 = vadd.f32 %v8478_v9, %v8475_v7  ;;  %v12096_v59 = vmov 0  }
 0x12f   : > { %v1123_v8 = vpop.f32.mrf.mxu3  ;;  %vm8658_vm4 = vcmp.ne.s32.totalorder %v2173_v62, %v8634_v47  ;;  %v3267_v63 = vrot.slane %v12096_v59, 3  ;;  %v3268_v1 = vrot.slane %v12096_v59, 4  ;;  %vm8705_vm9 = vcmp.ne.s32.totalorder %v2749_v33, %v8634_v47 }
 0x130   : > { %v1124_v34 = vadd.f32 %v1123_v8, %v1035_v6  ;;  %v948_v8 = vadd.f32 %v947_v24, %v859_v58  ;;  %v8650_v58 = vadd.f32 %v8478_v9, %v8540_v14  ;;  %v2500_v14 = vrot.slane %v2498_v5, 4  ;;  %vm8681_vm5 = vmpackc.low %vm8658_vm4, %vm8653_vm3  ;;  %v8722_v5 = vld [vmem:[%s8299_s20 + $0x2a8] sm:$0xff] }
 0x131   : > { %v8663_v7 = vpop.f32.mrf.mxu0  ;;  %v8710_v26 = vrot.slane %v12096_v59, 1  ;;  %v8716_v43 = vor.u32 %v3268_v1, %v3267_v63  ;;  %v8733_v1 = vld [vmem:[%s8299_s20 + $0x2b0] sm:$0xff]  ;;  %vm11915_vm4 = vmpackc.low %vm8705_vm9, %vm8700_vm8 }
 0x132   : > { %v1203_v49 = vmax.f32 %v1124_v34, 0.0  ;;  %v8724_v57 = vor.u32 %v2500_v14, %v2497_v28  ;;  %v8739_v28 = vld [vmem:[%s8299_s20 + $0x2b8] sm:$0xff]  ;;  %v8743_v14 = vadd.f32 %v8478_v9, %v8551_v3 }
 0x133   : > { %12113 = vst [vmem:[#allocation43_spill] sm:$0xff] %v8710_v26  ;;  %v566_v11 = vpack.c.bf16 %v8739_v28, %v8736_v22  ;;  %v7464_v22 = vld [vmem:[#allocation8 + $0xb0] sm:$0xff] }
 0x134   : > { %v1235_v6 = vpack.c.bf16 %v1203_v49, %v1203_v49  ;;  %v1036_v34 = vpop.f32.mrf.mxu2  ;;  %v2054_v49 = vsel %vm11921_vm0, %v8598_v39, %v8643_v12  ;;  %v12099_v39 = vmov 0  ;;  %12115 = vst [vmem:[#allocation45_spill] sm:$0xff] %v8716_v43  ;;  %5081 = vmatpush.bf16.msra.mxu2 %v7464_v22 }
 0x135   : > { %v1037_v27 = vadd.f32 %v1036_v34, %v948_v8  ;;  %v12100_v39 = vsel %vm8681_vm5, 4294967295, %v12099_v39  ;;  %v12110_v8 = vmov 0  ;;  %v2179_v33 = vunpack.c.l.b16 %v2054_v49  ;;  %12116 = vst [vmem:[#allocation46_spill] sm:$0xff] %v8743_v14 }
 0x136   : > { %v1299_v20 = vunpack.c.l.b16 %v1235_v6  ;;  %v950_v41 = vpop.f32.mrf.mxu1  ;;  %12101 = vst [vmem:[#allocation39_spill] sm:$0xff] %v12100_v39  ;;  %v12111_v8 = vsel %vm8705_vm9, 4294967295, %v12110_v8 }
 0x137   : > { %v1125_v38 = vpop.f32.mrf.mxu3  ;;  %v951_v6 = vadd.f32 %v950_v41, %v862_v60  ;;  %12112 = vst [vmem:[#allocation42_spill] sm:$0xff] %v12111_v8  ;;  %v8730_v60 = vld [vmem:[%s8299_s20 + $0x290] sm:$0xff]  ;;  %vm8773_vm14 = vcmp.ne.s32.totalorder %v2179_v33, %v8624_v37 }
 0x138   : > { %v1331_v48 = vpack.c.b16 %v1299_v20, %v1299_v20  ;;  %v1126_v20 = vadd.f32 %v1125_v38, %v1037_v27  ;;  %v2061_v27 = vrot.slane %v2059_v51, 5  ;;  %v1464_v38 = vand.u32 15, %v1380_v53 }
 0x139   : > { %989 = vmatmul.bf16.gmra.mxu1 %v560_v54  ;;  %1078 = vmatmul.bf16.gmra.mxu2 %v561_v17  ;;  %v12107_v17 = vmov 0  ;;  %v564_v51 = vpack.c.bf16 %v8722_v5, %v8719_v30  ;;  %v2180_v53 = vunpack.c.h.b16 %v2054_v49  ;;  %v565_v3 = vpack.c.bf16 %v8733_v1, %v8730_v60  ;;  %v871_v45 = vpop.f32.mrf.mxu0 }
 0x13a   : > { %v8675_v62 = vsel %vm11916_vm1, 0, %v1331_v48  ;;  %v12108_v17 = vsel %vm8700_vm8, 4294967295, %v12107_v17  ;;  %v1204_v41 = vmax.f32 %v1126_v20, 0.0  ;;  %v8756_v19 = vor.u32 %v2061_v27, %v2058_v32 }
 0x13b   : > { %12098 = vst [vmem:[#allocation38_spill] sm:$0xff] %v8675_v62  ;;  %v2284_v34 = vsel %vm8681_vm5, 0, %v8675_v62  ;;  %vm8758_vm11 = vcmp.eq.s32.totalorder %v1464_v38, 0  ;;  %v2835_v32 = vshll.u32 %v8675_v62, 16  ;;  %vm8779_vm15 = vcmp.ne.s32.totalorder %v2180_v53, %v8634_v47 }
 0x13c   : > { %12109 = vst [vmem:[#allocation41_spill] sm:$0xff] %v12108_v17  ;;  %1167 = vmatmul.bf16.gmra.mxu3 %v562_v4  ;;  %v1039_v4 = vpop.f32.mrf.mxu2  ;;  %v3271_v63 = vshrl.u32 %v2284_v34, 16  ;;  %v3274_v48 = vshll.u32 %v2284_v34, 16  ;;  %v2502_v34 = vsel %vm11922_vm2, %v8611_v16, %v8724_v57  ;;  %v12119_v16 = vmov 0  ;;  %vm1924_vm3 = vmpackc.low %vm8758_vm11, %vm8758_vm11 }
 0x13d   : > { %v1040_v24 = vadd.f32 %v1039_v4, %v951_v6  ;;  %v12120_v16 = vsel %vm8766_vm13, 4294967295, %v12119_v16  ;;  %v1236_v49 = vpack.c.bf16 %v1204_v41, %v1204_v41  ;;  %v2627_v54 = vunpack.c.l.b16 %v2502_v34  ;;  %vm8823_vm6 = vmpackc.low %vm8779_vm15, %vm8773_vm14 }
 0x13e   : > { %v952_v23 = vpop.f32.mrf.mxu1  ;;  %v3273_v6 = vrot.slane %v3271_v63, 3  ;;  %v3276_v4 = vrot.slane %v3274_v48, 4  ;;  %12121 = vst [vmem:[#allocation47_spill] sm:$0xff] %v12120_v16  ;;  %v2628_v27 = vunpack.c.h.b16 %v2502_v34  ;;  %v8796_v48 = vadd.f32 %v8478_v9, %v8663_v7 }
 0x13f   : > { %v1128_v46 = vpop.f32.mrf.mxu3  ;;  %v953_v33 = vadd.f32 %v952_v23, %v8650_v58  ;;  %v8801_v23 = vsel %vm11921_vm0, %v8643_v12, %v8756_v19  ;;  %v1300_v1 = vunpack.c.l.b16 %v1236_v49  ;;  %v1382_v7 = vadd.s32 80, %v8419_v35 }
 0x140   : > { %v1129_v20 = vadd.f32 %v1128_v46, %v1040_v24  ;;  %v8770_v60 = vor.u32 %v3276_v4, %v3273_v6  ;;  %v1956_v24 = vsel %vm1924_vm3, 65537, %v12096_v59  ;;  %v2732_v46 = vsel %vm8766_vm13, 0, %v8675_v62  ;;  %v8808_v6 = vld [vmem:[%s8299_s20 + $0x2c8] sm:$0xff] }
 0x141   : > { %v1988_v58 = vunpack.c.l.b16 %v1956_v24  ;;  %v8811_v4 = vld [vmem:[%s8299_s20 + $0x2e8] sm:$0xff]  ;;  %v8814_v34 = vrot.slane %v2835_v32, 1  ;;  %v8817_v30 = vadd.f32 %v8478_v9, %v871_v45  ;;  %v12126_v49 = vmov 0 }
 0x142   : > { %v1205_v5 = vmax.f32 %v1129_v20, 0.0  ;;  %v3278_v41 = vsel %vm11922_vm2, %v8716_v43, %v8770_v60  ;;  %v12127_v49 = vsel %vm8823_vm6, 4294967295, %v12126_v49  ;;  %vm8828_vm7 = vcmp.ne.s32.totalorder %v2627_v54, %v8624_v37 }
 0x143   : > { %4910 = vmatmul.bf16.vlgmr.msrb.gmra.mxu0 %v3278_v41  ;;  %12128 = vst [vmem:[#allocation48_spill] sm:$0xff] %v12127_v49  ;;  %vm8833_vm11 = vcmp.ne.s32.totalorder %v2628_v27, %v8634_v47  ;;  %v8837_v45 = vrot.slane %v2732_v46, 1  ;;  %v2016_v41 = vpack.c.b16 %v8481_v15, %v1988_v58  ;;  %v1478_v24 = vand.u32 15, %v1382_v7  ;;  %v7480_v27 = vld [vmem:[#allocation8 + $0x130] sm:$0xff]  ;;  %v873_v7 = vpop.f32.mrf.mxu0 }
 0x144   : > { %v1237_v38 = vpack.c.bf16 %v1205_v5, %v1205_v5  ;;  %v1041_v63 = vpop.f32.mrf.mxu2  ;;  %v2186_v43 = vunpack.c.l.b16 %v8801_v23  ;;  %v8846_v16 = vadd.s32 56, %v8419_v35  ;;  %v2755_v46 = vsel %vm11915_vm4, 0, %v8675_v62  ;;  %5259 = vmatpush.bf16.msra.mxu0 %v7480_v27 }
 0x145   : > { %v1042_v53 = vadd.f32 %v1041_v63, %v953_v33  ;;  %v7456_v33 = vld [vmem:[#allocation8 + $0x70] sm:$0xff]  ;;  %vm1798_vm14 = vcmp.eq.s32.totalorder %v1478_v24, 0  ;;  %v2838_v54 = vsel %vm11918_vm10, %v8710_v26, %v8814_v34  ;;  %v8867_v13 = vadd.f32 %v8478_v9, %v873_v7 }
 0x146   : > { %v1301_v28 = vunpack.c.l.b16 %v1237_v38  ;;  %v955_v12 = vpop.f32.mrf.mxu1  ;;  %vm1926_vm15 = vmpackc.low %vm1798_vm14, %vm1798_vm14  ;;  %4992 = vmatpush.bf16.msra.mxu1 %v7456_v33  ;;  %v3283_v33 = vshll.u32 %v2838_v54, 16  ;;  %vm8872_vm3 = vcmp.ne.s32.totalorder %v2186_v43, %v8624_v37  ;;  %v489_v43 = vld [vmem:[%s8299_s20 + $0x2f0] sm:$0xff]  ;;  %v12147_v27 = vpack.c.bf16 %v8811_v4, %v8808_v6 }
 0x147   : > { %v1130_v20 = vpop.f32.mrf.mxu3 }
 0x148   : > { %v8839_v38 = vpack.c.b16 %v1301_v28, %v1300_v1  ;;  %v1131_v63 = vadd.f32 %v1130_v20, %v1042_v53  ;;  %v956_v1 = vadd.f32 %v955_v12, %v867_v50  ;;  %v2187_v50 = vunpack.c.h.b16 %v8801_v23 }
 0x149   : > { %994 = vmatmul.bf16.gmra.mxu1 %v564_v51  ;;  %1083 = vmatmul.bf16.gmra.mxu2 %v565_v3  ;;  %v2065_v51 = vshrl.u32 %v2016_v41, 16  ;;  %v1958_v3 = vsel %vm1926_vm15, 65537, %v12096_v59  ;;  %v2068_v28 = vshll.u32 %v2016_v41, 16  ;;  %v3280_v23 = vshrl.u32 %v2838_v54, 16  ;;  %vm8893_vm15 = vmpackc.low %vm8833_vm11, %vm8828_vm7  ;;  %v8942_v54 = vld [vmem:[%s8299_s20 + $0x328] sm:$0xff] }
 0x14a   : > { %12133 = vst [vmem:[#allocation49_spill] sm:$0xff] %v8839_v38  ;;  %v2285_v58 = vsel %vm8823_vm6, 0, %v8839_v38  ;;  %v1206_v12 = vmax.f32 %v1131_v63, 0.0  ;;  %v1990_v42 = vunpack.c.l.b16 %v1958_v3  ;;  %v3314_v41 = vshrl.u32 %v2755_v46, 16  ;;  %4993 = vmatpush.bf16.msra.mxu1 %v7455_v56 }
 0x14b   : > { %v3400_v53 = vshrl.u32 %v2285_v58, 16  ;;  %v3403_v20 = vshll.u32 %v2285_v58, 16  ;;  %vm8877_vm14 = vcmp.ne.s32.totalorder %v2187_v50, %v8634_v47  ;;  %v2843_v3 = vshll.u32 %v8839_v38, 16 }
 0x14c   : > { %1172 = vmatmul.bf16.gmra.mxu3 %v566_v11  ;;  %v2982_v11 = vsel %vm11919_vm12, %v8710_v26, %v8837_v45  ;;  %v1044_v24 = vpop.f32.mrf.mxu2  ;;  %v1238_v9 = vpack.c.bf16 %v1206_v12, %v1206_v12  ;;  %v12138_v50 = vmov 0  ;;  %v8907_v5 = vrot.slane %v3314_v41, 3  ;;  %vm8926_vm7 = vmpackc.low %vm8877_vm14, %vm8872_vm3 }
 0x14d   : > { %v3402_v58 = vrot.slane %v3400_v53, 3  ;;  %v3405_v22 = vrot.slane %v3403_v20, 4  ;;  %v1045_v17 = vadd.f32 %v1044_v24, %v956_v1  ;;  %v3297_v26 = vshrl.u32 %v2982_v11, 16  ;;  %v486_v24 = vld [vmem:[%s8299_s20 + $0x2d8] sm:$0xff] }
 0x14e   : > { %v957_v61 = vpop.f32.mrf.mxu1  ;;  %v3300_v63 = vshll.u32 %v2982_v11, 16  ;;  %v3317_v1 = vshll.u32 %v2755_v46, 16  ;;  %v2067_v53 = vrot.slane %v2065_v51, 4  ;;  %v2070_v20 = vrot.slane %v2068_v28, 5 }
 0x14f   : > { %v1133_v8 = vpop.f32.mrf.mxu3  ;;  %v8869_v14 = vor.u32 %v3405_v22, %v3402_v58  ;;  %v8887_v46 = vrot.slane %v3280_v23, 3  ;;  %v12139_v50 = vsel %vm8893_vm15, 4294967295, %v12138_v50  ;;  %v8898_v28 = vrot.slane %v3283_v33, 4  ;;  %v490_v58 = vld [vmem:[%s8299_s20 + $0x2f8] sm:$0xff] }
 0x150   : > { %v1134_v44 = vadd.f32 %v1133_v8, %v1045_v17  ;;  %v485_v8 = vld [vmem:[%s8299_s20 + $0x2d0] sm:$0xff]  ;;  %12140 = vst [vmem:[#allocation50_spill] sm:$0xff] %v12139_v50  ;;  %v8900_v51 = vrot.slane %v3297_v26, 3  ;;  %v958_v12 = vadd.f32 %v957_v61, %v8796_v48  ;;  %v8909_v32 = vrot.slane %v3317_v1, 4 }
 0x151   : > { %v3407_v17 = vsel %vm11922_vm2, %v8770_v60, %v8869_v14  ;;  %v8902_v60 = vrot.slane %v3300_v63, 4  ;;  %v1302_v22 = vunpack.c.l.b16 %v1238_v9  ;;  %v8911_v33 = vor.u32 %v2070_v20, %v2067_v53 }
 0x152   : > { %v1207_v7 = vmax.f32 %v1134_v44, 0.0  ;;  %v2017_v44 = vpack.c.b16 %v8481_v15, %v1990_v42  ;;  %v569_v42 = vpack.c.bf16 %v489_v43, %v485_v8  ;;  %v2733_v26 = vsel %vm8893_vm15, 0, %v8839_v38 }
 0x153   : > { %4915 = vmatmul.bf16.gmra.mxu0 %v3407_v17  ;;  %v1384_v41 = vadd.s32 96, %v8419_v35  ;;  %v8917_v1 = vrot.slane %v2843_v3, 1  ;;  %v12141_v9 = vshrl.u32 %v8675_v62, 16  ;;  %v570_v20 = vpack.c.bf16 %v490_v58, %v486_v24  ;;  %v8933_v3 = vld [vmem:[%s8299_s20 + $0x308] sm:$0xff]  ;;  %v8945_v24 = vld [vmem:[%s8299_s20 + $0x310] sm:$0xff] }
 0x154   : > { %v1239_v11 = vpack.c.bf16 %v1207_v7, %v1207_v7  ;;  %v1046_v23 = vpop.f32.mrf.mxu2  ;;  %v12142_v17 = vmov 0  ;;  %v2074_v8 = vshrl.u32 %v2017_v44, 16  ;;  %v2077_v43 = vshll.u32 %v2017_v44, 16  ;;  %v8948_v58 = vld [vmem:[%s8299_s20 + $0x330] sm:$0xff] }
 0x155   : > { %v1047_v61 = vadd.f32 %v1046_v23, %v958_v12  ;;  %v2841_v7 = vor.u32 %v12141_v9, %v8814_v34  ;;  %v12143_v17 = vsel %vm8926_vm7, 4294967295, %v12142_v17  ;;  %v2072_v44 = vsel %vm11921_vm0, %v8756_v19, %v8911_v33 }
 0x156   : > { %v1303_v63 = vunpack.c.l.b16 %v1239_v11  ;;  %v960_v53 = vpop.f32.mrf.mxu1  ;;  %12144 = vst [vmem:[#allocation51_spill] sm:$0xff] %v12143_v17  ;;  %v8953_v23 = vrot.slane %v2733_v26, 1  ;;  %v2193_v4 = vunpack.c.l.b16 %v2072_v44  ;;  %v2847_v21 = vshrl.u32 %v8839_v38, 16 }
 0x157   : > { %v1135_v48 = vpop.f32.mrf.mxu3  ;;  %v961_v34 = vadd.f32 %v960_v53, %v8817_v30  ;;  %v2846_v19 = vsel %vm11918_vm10, %v2841_v7, %v8917_v1  ;;  %v8974_v7 = vld [vmem:[%s8299_s20 + $0x318] sm:$0xff] }
 0x158   : > { %v8930_v11 = vpack.c.b16 %v1303_v63, %v1302_v22  ;;  %v1492_v22 = vand.u32 15, %v1384_v41  ;;  %12146 = vst [vmem:[#allocation53_spill] sm:$0xff] %v8953_v23  ;;  %v1457_v63 = vand.u32 15, %v8846_v16  ;;  %v1136_v9 = vadd.f32 %v1135_v48, %v1047_v61 }
 0x159   : > { %999 = vmatmul.bf16.gmra.mxu1 %v12147_v27  ;;  %1088 = vmatmul.bf16.gmra.mxu2 %v569_v42  ;;  %v2076_v61 = vrot.slane %v2074_v8, 4  ;;  %v2079_v48 = vrot.slane %v2077_v43, 5  ;;  %v2194_v8 = vunpack.c.h.b16 %v2072_v44  ;;  %v8982_v43 = vsel %vm8681_vm5, 0, %v8839_v38 }
 0x15a   : > { %12145 = vst [vmem:[#allocation52_spill] sm:$0xff] %v8930_v11  ;;  %v2286_v12 = vsel %vm8926_vm7, 0, %v8930_v11  ;;  %vm8969_vm11 = vcmp.eq.s32.totalorder %v1492_v22, 0  ;;  %v3288_v22 = vshrl.u32 %v2846_v19, 16  ;;  %v3291_v39 = vshll.u32 %v2846_v19, 16 }
 0x15b   : > { %v3463_v26 = vshrl.u32 %v2286_v12, 16  ;;  %v3466_v16 = vshll.u32 %v2286_v12, 16  ;;  %v1208_v12 = vmax.f32 %v1136_v9, 0.0  ;;  %vm1928_vm3 = vmpackc.low %vm8969_vm11, %vm8969_vm11  ;;  %v8992_v44 = vor.u32 %v2079_v48, %v2076_v61 }
 0x15c   : > { %1177 = vmatmul.bf16.gmra.mxu3 %v570_v20  ;;  %v1049_v41 = vpop.f32.mrf.mxu2  ;;  %v8977_v20 = vld [vmem:[%s8299_s20 + $0x338] sm:$0xff]  ;;  %vm1827_vm14 = vcmp.eq.s32.totalorder %v1457_v63, 15  ;;  %vm8997_vm4 = vcmp.ne.s32.totalorder %v2193_v4, %v8624_v37  ;;  %v1960_v42 = vsel %vm1928_vm3, 65537, %v12096_v59  ;;  %vm9008_vm1 = vcmp.ne.s32.totalorder %v2194_v8, %v8634_v47 }
 0x15d   : > { %v3465_v53 = vrot.slane %v3463_v26, 3  ;;  %v3468_v27 = vrot.slane %v3466_v16, 4  ;;  %v1050_v6 = vadd.f32 %v1049_v41, %v961_v34  ;;  %v2984_v26 = vsel %vm11919_vm12, %v8837_v45, %v8953_v23  ;;  %vm2371_vm11 = vmpackc.low %vm1827_vm14, %vm1827_vm14 }
 0x15e   : > { %v962_v16 = vpop.f32.mrf.mxu1  ;;  %v574_v34 = vpack.c.bf16 %v8977_v20, %v8974_v7  ;;  %v3305_v45 = vshrl.u32 %v2984_v26, 16  ;;  %v3308_v41 = vshll.u32 %v2984_v26, 16  ;;  %v2403_v19 = vsel %vm2371_vm11, 65537, %v12096_v59  ;;  %v9020_v26 = vld [vmem:[%s8299_s20 + $0x348] sm:$0xff]  ;;  %vm9039_vm3 = vmpackc.low %vm9008_vm1, %vm8997_vm4 }
 0x15f   : > { %v1138_v30 = vpop.f32.mrf.mxu3  ;;  %v8990_v62 = vor.u32 %v3468_v27, %v3465_v53  ;;  %v3322_v53 = vshrl.u32 %v8982_v43, 16  ;;  %v1240_v63 = vpack.c.bf16 %v1208_v12, %v1208_v12  ;;  %v1992_v4 = vunpack.c.l.b16 %v1960_v42 }
 0x160   : > { %v1139_v50 = vadd.f32 %v1138_v30, %v1050_v6  ;;  %v9015_v6 = vsel %vm11921_vm0, %v8911_v33, %v8992_v44  ;;  %v3290_v27 = vrot.slane %v3288_v22, 3  ;;  %v3293_v7 = vrot.slane %v3291_v39, 4  ;;  %v7463_v30 = vld [vmem:[#allocation8 + $0xa8] sm:$0xff] }
 0x161   : > { %v3470_v48 = vsel %vm11922_vm2, %v8869_v14, %v8990_v62  ;;  %v3325_v14 = vshll.u32 %v8982_v43, 16  ;;  %v2435_v12 = vunpack.c.l.b16 %v2403_v19  ;;  %v3307_v33 = vrot.slane %v3305_v45, 3  ;;  %v9029_v43 = vld [vmem:[%s8299_s20 + $0x350] sm:$0xff]  ;;  %5082 = vmatpush.bf16.msra.mxu2 %v7463_v30 }
 0x162   : > { %v1209_v61 = vmax.f32 %v1139_v50, 0.0  ;;  %v963_v50 = vadd.f32 %v962_v16, %v8867_v13  ;;  %v3310_v42 = vrot.slane %v3308_v41, 4  ;;  %v9025_v22 = vrot.slane %v3322_v53, 3  ;;  %v9032_v19 = vld [vmem:[%s8299_s20 + $0x370] sm:$0xff]  ;;  %v9044_v41 = vld [vmem:[%s8299_s20 + $0x358] sm:$0xff] }
 0x163   : > { %4920 = vmatmul.bf16.gmra.mxu0 %v3470_v48  ;;  %v2851_v39 = vshll.u32 %v8930_v11, 16  ;;  %v2200_v48 = vunpack.c.l.b16 %v9015_v6  ;;  %v12154_v45 = vmov 0  ;;  %v9047_v53 = vld [vmem:[%s8299_s20 + $0x378] sm:$0xff]  ;;  %v576_v9 = vpack.c.bf16 %v9023_v55, %v9020_v26 }
 0x164   : > { %v1241_v20 = vpack.c.bf16 %v1209_v61, %v1209_v61  ;;  %v1051_v8 = vpop.f32.mrf.mxu2  ;;  %v1304_v61 = vunpack.c.l.b16 %v1240_v63  ;;  %v12155_v45 = vsel %vm9039_vm3, 4294967295, %v12154_v45  ;;  %v2201_v63 = vunpack.c.h.b16 %v9015_v6 }
 0x165   : > { %v1052_v16 = vadd.f32 %v1051_v8, %v963_v50  ;;  %12156 = vst [vmem:[#allocation54_spill] sm:$0xff] %v12155_v45  ;;  %v1386_v50 = vadd.s32 112, %v8419_v35  ;;  %v9052_v8 = vor.u32 %v3293_v7, %v3290_v27  ;;  %v2463_v18 = vpack.c.b16 %v2435_v12, %v8481_v15 }
 0x166   : > { %v1305_v13 = vunpack.c.l.b16 %v1241_v20  ;;  %v965_v10 = vpop.f32.mrf.mxu1  ;;  %v2018_v20 = vpack.c.b16 %v8481_v15, %v1992_v4  ;;  %v577_v6 = vpack.c.bf16 %v9032_v19, %v9029_v43  ;;  %v7479_v4 = vld [vmem:[#allocation8 + $0x128] sm:$0xff]  ;;  %v9062_v36 = vor.u32 %v3310_v42, %v3307_v33 }
 0x167   : > { %v1140_v29 = vpop.f32.mrf.mxu3  ;;  %v1506_v23 = vand.u32 15, %v1386_v50  ;;  %v9064_v27 = vrot.slane %v2851_v39, 1  ;;  %v2849_v33 = vor.u32 %v2847_v21, %v8917_v1  ;;  %5260 = vmatpush.bf16.msra.mxu0 %v7479_v4  ;;  %v3327_v50 = vrot.slane %v3325_v14, 4 }
 0x168   : > { %v9054_v0 = vpack.c.b16 %v1305_v13, %v1304_v61  ;;  %v1141_v7 = vadd.f32 %v1140_v29, %v1052_v16  ;;  %v12158_v61 = vpack.c.bf16 %v8942_v54, %v8933_v3  ;;  %v12159_v13 = vpack.c.bf16 %v8948_v58, %v8945_v24 }
 0x169   : > { %v2083_v39 = vshrl.u32 %v2018_v20, 16  ;;  %v2086_v3 = vshll.u32 %v2018_v20, 16  ;;  %v966_v54 = vadd.f32 %v965_v10, %v8489_v25  ;;  %vm1802_vm1 = vcmp.eq.s32.totalorder %v1506_v23, 0 }
 0x16a   : > { %12157 = vst [vmem:[#allocation55_spill] sm:$0xff] %v9054_v0  ;;  %1004 = vmatmul.bf16.gmra.mxu1 %v12158_v61  ;;  %1093 = vmatmul.bf16.gmra.mxu2 %v12159_v13  ;;  %v2287_v12 = vsel %vm9039_vm3, 0, %v9054_v0  ;;  %v2504_v24 = vshrl.u32 %v2463_v18, 16  ;;  %v2507_v58 = vshll.u32 %v2463_v18, 16  ;;  %vm1930_vm4 = vmpackc.low %vm1802_vm1, %vm1802_vm1  ;;  %v2854_v21 = vsel %vm11918_vm10, %v2849_v33, %v9064_v27 }
 0x16b   : > { %v3526_v42 = vshrl.u32 %v2287_v12, 16  ;;  %v3529_v29 = vshll.u32 %v2287_v12, 16  ;;  %v1210_v1 = vmax.f32 %v1141_v7, 0.0  ;;  %v1962_v20 = vsel %vm1930_vm4, 65537, %v12096_v59 }
 0x16c   : > { %1182 = vmatmul.bf16.gmra.mxu3 %v574_v34  ;;  %v1054_v16 = vpop.f32.mrf.mxu2  ;;  %v1381_v25 = vadd.s32 72, %v8419_v35  ;;  %vm9086_vm14 = vcmp.ne.s32.totalorder %v2200_v48, %v8624_v37  ;;  %v2085_v56 = vrot.slane %v2083_v39, 4  ;;  %v2088_v23 = vrot.slane %v2086_v3, 5 }
 0x16d   : > { %v3528_v61 = vrot.slane %v3526_v42, 3  ;;  %v3531_v13 = vrot.slane %v3529_v29, 4  ;;  %v1055_v34 = vadd.f32 %v1054_v16, %v966_v54  ;;  %v1994_v4 = vunpack.c.l.b16 %v1962_v20 }
 0x16e   : > { %v967_v31 = vpop.f32.mrf.mxu1  ;;  %v2506_v12 = vrot.slane %v2504_v24, 3  ;;  %v2509_v7 = vrot.slane %v2507_v58, 4  ;;  %vm9091_vm11 = vcmp.ne.s32.totalorder %v2201_v63, %v8634_v47  ;;  %v9096_v42 = vor.u32 %v3327_v50, %v9025_v22 }
 0x16f   : > { %v1143_v30 = vpop.f32.mrf.mxu3  ;;  %v9083_v10 = vor.u32 %v3531_v13, %v3528_v61  ;;  %v3331_v29 = vshrl.u32 %v2854_v21, 16  ;;  %v3334_v54 = vshll.u32 %v2854_v21, 16  ;;  %v1242_v48 = vpack.c.bf16 %v1210_v1, %v1210_v1  ;;  %vm9130_vm1 = vmpackc.low %vm9091_vm11, %vm9086_vm14 }
 0x170   : > { %v1144_v14 = vadd.f32 %v1143_v30, %v1055_v34  ;;  %v1471_v3 = vand.u32 15, %v1381_v25  ;;  %v9101_v61 = vor.u32 %v2088_v23, %v2085_v56  ;;  %v12164_v63 = vor.u32 %v8898_v28, %v8887_v46  ;;  %v9146_v56 = vld [vmem:[%s8299_s20 + $0x388] sm:$0xff] }
 0x171   : > { %v3533_v39 = vsel %vm11922_vm2, %v8990_v62, %v9083_v10  ;;  %v12165_v22 = vor.u32 %v8902_v60, %v8900_v51  ;;  %v9120_v62 = vsel %vm8823_vm6, 0, %v8930_v11  ;;  %v968_v13 = vadd.f32 %v967_v31, %v8507_v40 }
 0x172   : > { %v1211_v16 = vmax.f32 %v1144_v14, 0.0  ;;  %v9108_v24 = vsel %vm11922_vm2, %v12164_v63, %v9052_v8  ;;  %v2019_v46 = vpack.c.b16 %v8481_v15, %v1994_v4  ;;  %v9124_v28 = vor.u32 %v2509_v7, %v2506_v12  ;;  %v7454_v4 = vld [vmem:[#allocation8 + $0x60] sm:$0xff] }
 0x173   : > { %v9115_v50 = vsel %vm11922_vm2, %v12165_v22, %v9062_v36  ;;  %4925 = vmatmul.bf16.gmra.mxu0 %v3533_v39  ;;  %v12166_v51 = vmov 0  ;;  %v12169_v60 = vor.u32 %v8909_v32, %v8907_v5  ;;  %v3333_v1 = vrot.slane %v3331_v29, 3  ;;  %v9153_v32 = vld [vmem:[%s8299_s20 + $0x3a8] sm:$0xff]  ;;  %4994 = vmatpush.bf16.msra.mxu1 %v7454_v4 }
 0x174   : > { %v1243_v58 = vpack.c.bf16 %v1211_v16, %v1211_v16  ;;  %v1056_v21 = vpop.f32.mrf.mxu2  ;;  %v12167_v51 = vsel %vm9130_vm1, 4294967295, %v12166_v51  ;;  %v3336_v34 = vrot.slane %v3334_v54, 4  ;;  %vm9141_vm4 = vcmp.eq.s32.totalorder %v1471_v3, 15  ;;  %v7462_v12 = vld [vmem:[#allocation8 + $0xa0] sm:$0xff] }
 0x175   : > { %12168 = vst [vmem:[#allocation56_spill] sm:$0xff] %v12167_v51  ;;  %v9139_v40 = vsel %vm11922_vm2, %v12169_v60, %v9096_v42  ;;  %v1306_v20 = vunpack.c.l.b16 %v1242_v48  ;;  %v1057_v31 = vadd.f32 %v1056_v21, %v968_v13  ;;  %v2855_v23 = vshrl.u32 %v8930_v11, 16  ;;  %vm2373_vm14 = vmpackc.low %vm9141_vm4, %vm9141_vm4  ;;  %v7470_v48 = vld [vmem:[#allocation8 + $0xe0] sm:$0xff]  ;;  %5083 = vmatpush.bf16.msra.mxu2 %v7462_v12  ;;  %v9186_v21 = vld [vmem:[%s8299_s20 + $0x3b0] sm:$0xff] }
 0x176   : > { %v1307_v25 = vunpack.c.l.b16 %v1243_v58  ;;  %v970_v5 = vpop.f32.mrf.mxu1  ;;  %v9158_v14 = vsel %vm11921_vm0, %v8992_v44, %v9101_v61  ;;  %v3418_v7 = vshrl.u32 %v9120_v62, 16  ;;  %v2859_v33 = vshll.u32 %v9054_v0, 16  ;;  %v9189_v60 = vld [vmem:[%s8299_s20 + $0x398] sm:$0xff]  ;;  %5172 = vmatpush.bf16.msra.mxu3 %v7470_v48 }
 0x177   : > { %v1145_v18 = vpop.f32.mrf.mxu3  ;;  %v2405_v29 = vsel %vm2373_vm14, 65537, %v12096_v59  ;;  %v2092_v16 = vshrl.u32 %v2019_v46, 16  ;;  %v2095_v39 = vshll.u32 %v2019_v46, 16  ;;  %v2511_v44 = vsel %vm11922_vm2, %v8724_v57, %v9124_v28  ;;  %v9183_v46 = vld [vmem:[%s8299_s20 + $0x390] sm:$0xff] }
 0x178   : > { %v9163_v54 = vpack.c.b16 %v1307_v25, %v1306_v20  ;;  %v1146_v3 = vadd.f32 %v1145_v18, %v1057_v31  ;;  %v9168_v63 = vor.u32 %v3336_v34, %v3333_v1  ;;  %v3421_v22 = vshll.u32 %v9120_v62, 16  ;;  %v7453_v1 = vld [vmem:[#allocation8 + $0x58] sm:$0xff] }
 0x179   : > { %v2437_v58 = vunpack.c.l.b16 %v2405_v29  ;;  %v2207_v55 = vunpack.c.l.b16 %v9158_v14  ;;  %v2857_v26 = vor.u32 %v2855_v23, %v9064_v27  ;;  %v12173_v43 = vpack.c.bf16 %v9047_v53, %v9044_v41  ;;  %v7461_v34 = vld [vmem:[#allocation8 + $0x98] sm:$0xff]  ;;  %4995 = vmatpush.bf16.msra.mxu1 %v7453_v1 }
 0x17a   : > { %12172 = vst [vmem:[#allocation57_spill] sm:$0xff] %v9163_v54  ;;  %1009 = vmatmul.bf16.gmra.mxu1 %v576_v9  ;;  %1098 = vmatmul.bf16.gmra.mxu2 %v577_v6  ;;  %v2288_v57 = vsel %vm9130_vm1, 0, %v9163_v54  ;;  %v9197_v6 = vld [vmem:[%s8299_s20 + $0x3b8] sm:$0xff]  ;;  %v2634_v30 = vunpack.c.l.b16 %v2511_v44  ;;  %v9199_v20 = vrot.slane %v2859_v33, 1  ;;  %v971_v25 = vadd.f32 %v970_v5, %v8523_v2 }
 0x17b   : > { %v3589_v19 = vshrl.u32 %v2288_v57, 16  ;;  %v3592_v9 = vshll.u32 %v2288_v57, 16  ;;  %v7469_v31 = vld [vmem:[#allocation8 + $0xd8] sm:$0xff]  ;;  %v2094_v18 = vrot.slane %v2092_v16, 4  ;;  %v2097_v4 = vrot.slane %v2095_v39, 5  ;;  %5084 = vmatpush.bf16.msra.mxu2 %v7461_v34  ;;  %v9288_v39 = vld [vmem:[%s8299_s20 + $0x3f0] sm:$0xff] }
 0x17c   : > { %1187 = vmatmul.bf16.gmra.mxu3 %v12173_v43  ;;  %v2635_v27 = vunpack.c.h.b16 %v2511_v44  ;;  %v1212_v23 = vmax.f32 %v1146_v3, 0.0  ;;  %v1059_v12 = vpop.f32.mrf.mxu2  ;;  %v2464_v29 = vpack.c.b16 %v2437_v58, %v8481_v15  ;;  %v2208_v5 = vunpack.c.h.b16 %v9158_v14  ;;  %v7452_v44 = vld [vmem:[#allocation8 + $0x50] sm:$0xff] }
 0x17d   : > { %v3591_v41 = vrot.slane %v3589_v19, 3  ;;  %v3594_v53 = vrot.slane %v3592_v9, 4  ;;  %v1060_v57 = vadd.f32 %v1059_v12, %v971_v25  ;;  %vm9211_vm11 = vcmp.ne.s32.totalorder %v2207_v55, %v8624_v37  ;;  %v7460_v3 = vld [vmem:[#allocation8 + $0x90] sm:$0xff]  ;;  %5173 = vmatpush.bf16.msra.mxu3 %v7469_v31  ;;  %4996 = vmatpush.bf16.msra.mxu1 %v7452_v44 }
 0x17e   : > { %v972_v48 = vpop.f32.mrf.mxu1  ;;  %v9218_v58 = vsel %vm11922_vm2, %v9052_v8, %v9168_v63  ;;  %v2862_v19 = vsel %vm11918_vm10, %v2857_v26, %v9199_v20  ;;  %v7468_v14 = vld [vmem:[#allocation8 + $0xd0] sm:$0xff]  ;;  %vm9223_vm4 = vcmp.ne.s32.totalorder %v2634_v30, %v8624_v37  ;;  %v2513_v55 = vshrl.u32 %v2464_v29, 16 }
 0x17f   : > { %v1148_v43 = vpop.f32.mrf.mxu3  ;;  %v9208_v16 = vor.u32 %v3594_v53, %v3591_v41  ;;  %v2516_v34 = vshll.u32 %v2464_v29, 16  ;;  %v1244_v25 = vpack.c.bf16 %v1212_v23, %v1212_v23  ;;  %5085 = vmatpush.bf16.msra.mxu2 %v7460_v3  ;;  %v9227_v12 = vor.u32 %v2097_v4, %v2094_v18  ;;  %v7451_v23 = vld [vmem:[#allocation8 + $0x48] sm:$0xff] }
 0x180   : > { %v1149_v9 = vadd.f32 %v1148_v43, %v1060_v57  ;;  %vm9230_vm14 = vcmp.ne.s32.totalorder %v2635_v27, %v8634_v47  ;;  %v2515_v31 = vrot.slane %v2513_v55, 3  ;;  %vm9238_vm10 = vcmp.ne.s32.totalorder %v2208_v5, %v8634_v47  ;;  %v7459_v18 = vld [vmem:[#allocation8 + $0x88] sm:$0xff] }
 0x181   : > { %v3596_v30 = vsel %vm11922_vm2, %v9083_v10, %v9208_v16  ;;  %v2518_v41 = vrot.slane %v2516_v34, 4  ;;  %v3420_v4 = vrot.slane %v3418_v7, 3  ;;  %v3423_v27 = vrot.slane %v3421_v22, 4  ;;  %5174 = vmatpush.bf16.msra.mxu3 %v7468_v14  ;;  %v7467_v10 = vld [vmem:[#allocation8 + $0xc8] sm:$0xff]  ;;  %vm9249_vm12 = vmpackc.low %vm9230_vm14, %vm9223_vm4  ;;  %4997 = vmatpush.bf16.msra.mxu1 %v7451_v23 }
 0x182   : > { %v1213_v26 = vmax.f32 %v1149_v9, 0.0  ;;  %v3374_v29 = vshrl.u32 %v2862_v19, 16  ;;  %v973_v43 = vadd.f32 %v972_v48, %v8538_v52  ;;  %v12182_v5 = vmov 0  ;;  %vm9270_vm4 = vmpackc.low %vm9238_vm10, %vm9211_vm11  ;;  %v9278_v55 = vld [vmem:[%s8299_s20 + $0x3e8] sm:$0xff] }
 0x183   : > { %v12183_v5 = vsel %vm9249_vm12, 4294967295, %v12182_v5  ;;  %v3377_v44 = vshll.u32 %v2862_v19, 16  ;;  %v9253_v62 = vor.u32 %v2518_v41, %v2515_v31  ;;  %v1308_v7 = vunpack.c.l.b16 %v1244_v25  ;;  %4930 = vmatmul.bf16.gmra.mxu0 %v3596_v30  ;;  %5086 = vmatpush.bf16.msra.mxu2 %v7459_v18  ;;  %v7450_v30 = vld [vmem:[#allocation8 + $0x40] sm:$0xff] }
 0x184   : > { %v1245_v57 = vpack.c.bf16 %v1213_v26, %v1213_v26  ;;  %12184 = vst [vmem:[#allocation58_spill] sm:$0xff] %v12183_v5  ;;  %v1061_v22 = vpop.f32.mrf.mxu2  ;;  %v9258_v52 = vsel %vm11921_vm0, %v9101_v61, %v9227_v12  ;;  %v1388_v48 = vadd.s32 128, %v8419_v35  ;;  %v9264_v3 = vsel %vm8926_vm7, 0, %v9054_v0  ;;  %v9275_v61 = vld [vmem:[%s8299_s20 + $0x3c8] sm:$0xff]  ;;  %v9285_v26 = vld [vmem:[%s8299_s20 + $0x3d0] sm:$0xff] }
 0x185   : > { %v1062_v9 = vadd.f32 %v1061_v22, %v973_v43  ;;  %v12185_v1 = vmov 0  ;;  %v2520_v34 = vsel %vm11922_vm2, %v9124_v28, %v9253_v62  ;;  %v1383_v25 = vadd.s32 88, %v8419_v35  ;;  %5175 = vmatpush.bf16.msra.mxu3 %v7467_v10  ;;  %v7478_v28 = vld [vmem:[#allocation8 + $0x120] sm:$0xff]  ;;  %4998 = vmatpush.bf16.msra.mxu1 %v7450_v30 }
 0x186   : > { %v1309_v19 = vunpack.c.l.b16 %v1245_v57  ;;  %v12186_v1 = vsel %vm9270_vm4, 4294967295, %v12185_v1  ;;  %v975_v8 = vpop.f32.mrf.mxu1  ;;  %v1520_v31 = vand.u32 15, %v1388_v48  ;;  %v2734_v41 = vsel %vm9249_vm12, 0, %v8930_v11  ;;  %v7458_v57 = vld [vmem:[#allocation8 + $0x80] sm:$0xff]  ;;  %5261 = vmatpush.bf16.msra.mxu0 %v7478_v28 }
 0x187   : > { %v1150_v14 = vpop.f32.mrf.mxu3  ;;  %12187 = vst [vmem:[#allocation59_spill] sm:$0xff] %v12186_v1  ;;  %v9293_v53 = vor.u32 %v3423_v27, %v3420_v4  ;;  %v9295_v23 = vrot.slane %v3374_v29, 3  ;;  %v7466_v43 = vld [vmem:[#allocation8 + $0xc0] sm:$0xff]  ;;  %v3379_v22 = vrot.slane %v3377_v44, 4  ;;  %v2641_v2 = vunpack.c.l.b16 %v2520_v34  ;;  %5087 = vmatpush.bf16.msra.mxu2 %v7458_v57  ;;  %v12195_v57 = vld [vmem:[#allocation53_spill] sm:$0xff] }
 0x188   : > { %v9297_v18 = vpack.c.b16 %v1309_v19, %v1308_v7  ;;  %v2642_v33 = vunpack.c.h.b16 %v2520_v34  ;;  %v1151_v13 = vadd.f32 %v1150_v14, %v1062_v9  ;;  %v2214_v17 = vunpack.c.l.b16 %v9258_v52  ;;  %v12192_v9 = vld [vmem:[#allocation29_spill] sm:$0xff] }
 0x189   : > { %vm1804_vm10 = vcmp.eq.s32.totalorder %v1520_v31, 0  ;;  %v12189_v4 = vpack.c.bf16 %v9153_v32, %v9146_v56  ;;  %v12190_v27 = vpack.c.bf16 %v9186_v21, %v9183_v46  ;;  %v9313_v44 = vrot.slane %v2734_v41, 1  ;;  %5176 = vmatpush.bf16.msra.mxu3 %v7466_v43  ;;  %v7476_v1 = vld [vmem:[#allocation8 + $0x110] sm:$0xff] }
 0x18a   : > { %12188 = vst [vmem:[#allocation60_spill] sm:$0xff] %v9297_v18  ;;  %v2289_v29 = vsel %vm9270_vm4, 0, %v9297_v18  ;;  %vm1932_vm11 = vmpackc.low %vm1804_vm10, %vm1804_vm10  ;;  %v1485_v7 = vand.u32 15, %v1383_v25  ;;  %v12191_v19 = vpack.c.bf16 %v9197_v6, %v9189_v60  ;;  %v2867_v21 = vshll.u32 %v9163_v54, 16 }
 0x18b   : > { %1014 = vmatmul.bf16.gmra.mxu1 %v12189_v4  ;;  %1103 = vmatmul.bf16.gmra.mxu2 %v12190_v27  ;;  %v3652_v56 = vshrl.u32 %v2289_v29, 16  ;;  %v3655_v32 = vshll.u32 %v2289_v29, 16  ;;  %v1964_v46 = vsel %vm1932_vm11, 65537, %v12096_v59  ;;  %v976_v14 = vadd.f32 %v975_v8, %v12192_v9 }
 0x18c   : > { %1192 = vmatmul.bf16.gmra.mxu3 %v12191_v19  ;;  %v1996_v34 = vunpack.c.l.b16 %v1964_v46  ;;  %vm9322_vm14 = vcmp.ne.s32.totalorder %v2641_v2, %v8624_v37  ;;  %vm2646_vm10 = vcmp.ne.s32.totalorder %v2642_v33, %v8634_v47  ;;  %v1214_v60 = vmax.f32 %v1151_v13, 0.0  ;;  %v1064_v6 = vpop.f32.mrf.mxu2 }
 0x18d   : > { %v3654_v25 = vrot.slane %v3652_v56, 3  ;;  %v3657_v31 = vrot.slane %v3655_v32, 4  ;;  %vm1831_vm0 = vcmp.eq.s32.totalorder %v1485_v7, 15  ;;  %v1065_v41 = vadd.f32 %v1064_v6, %v976_v14  ;;  %vm9336_vm7 = vmpackc.low %vm2646_vm10, %vm9322_vm14 }
 0x18e   : > { %v2215_v4 = vunpack.c.h.b16 %v9258_v52  ;;  %v2020_v8 = vpack.c.b16 %v8481_v15, %v1996_v34  ;;  %vm12196_vm11 = vcmask 1046528   ;;  %vm2375_vm2 = vmpackc.low %vm1831_vm0, %vm1831_vm0  ;;  %v977_v43 = vpop.f32.mrf.mxu1  ;;  %v12197_v13 = vmov 0 }
 0x18f   : > { %v1153_v28 = vpop.f32.mrf.mxu3  ;;  %v2986_v2 = vsel %vm12196_vm11, %v12195_v57, %v9313_v44  ;;  %v9332_v27 = vor.u32 %v3657_v31, %v3654_v25  ;;  %v12198_v13 = vsel %vm9336_vm7, 4294967295, %v12197_v13  ;;  %v2863_v33 = vshrl.u32 %v9054_v0, 16  ;;  %v12203_v25 = vld [vmem:[#allocation32_spill] sm:$0xff] }
 0x190   : > { %12199 = vst [vmem:[#allocation29_spill] sm:$0xff] %v12198_v13  ;;  %v9341_v29 = vrot.slane %v2867_v21, 1  ;;  %v2407_v52 = vsel %vm2375_vm2, 65537, %v12096_v59  ;;  %v1154_v7 = vadd.f32 %v1153_v28, %v1065_v41  ;;  %vm9345_vm6 = vcmp.ne.s32.totalorder %v2214_v17, %v8624_v37 }
 0x191   : > { %v2101_v56 = vshrl.u32 %v2020_v8, 16  ;;  %v2104_v32 = vshll.u32 %v2020_v8, 16  ;;  %v1246_v46 = vpack.c.bf16 %v1214_v60, %v1214_v60  ;;  %v3409_v9 = vshrl.u32 %v2986_v2, 16  ;;  %v522_v8 = vld [vmem:[%s8299_s20 + $0x3f8] sm:$0xff] }
 0x192   : > { %v3412_v14 = vshll.u32 %v2986_v2, 16  ;;  %v2865_v34 = vor.u32 %v2863_v33, %v9199_v20  ;;  %v1215_v30 = vmax.f32 %v1154_v7, 0.0  ;;  %vm12202_vm0 = vsmask.f32 4352 }
 0x193   : > { %v3659_v21 = vsel %vm12202_vm0, %v9208_v16, %v9332_v27  ;;  %v2735_v17 = vsel %vm9336_vm7, 0, %v9054_v0  ;;  %v2439_v6 = vunpack.c.l.b16 %v2407_v52  ;;  %v978_v31 = vadd.f32 %v977_v43, %v12203_v25  ;;  %v518_v16 = vld [vmem:[%s8299_s20 + $0x3d8] sm:$0xff]  ;;  %vm12211_vm11 = vmmov %vm12202_vm0 }
 0x194   : > { %vm9358_vm2 = vcmp.ne.s32.totalorder %v2215_v4, %v8634_v47  ;;  %v9363_v60 = vor.u32 %v3379_v22, %v9295_v23  ;;  %vm12206_vm14 = vsmask.f32 7424  ;;  %v1247_v28 = vpack.c.bf16 %v1215_v30, %v1215_v30  ;;  %4935 = vmatmul.bf16.gmra.mxu0 %v3659_v21  ;;  %v1066_v43 = vpop.f32.mrf.mxu2 }
 0x195   : > { %v2870_v20 = vsel %vm12206_vm14, %v2865_v34, %v9341_v29  ;;  %v2103_v57 = vrot.slane %v2101_v56, 4  ;;  %v2106_v2 = vrot.slane %v2104_v32, 5  ;;  %v2465_v33 = vpack.c.b16 %v2439_v6, %v8481_v15  ;;  %vm9377_vm10 = vmpackc.low %vm9358_vm2, %vm9345_vm6 }
 0x196   : > { %v3411_v52 = vrot.slane %v3409_v9, 3  ;;  %v3414_v4 = vrot.slane %v3412_v14, 4  ;;  %v9370_v7 = vrot.slane %v2735_v17, 1  ;;  %v3481_v25 = vshrl.u32 %v9264_v3, 16  ;;  %v980_v30 = vpop.f32.mrf.mxu1  ;;  %vm12212_vm6 = vmmov %vm12202_vm0 }
 0x197   : > { %v1310_v23 = vunpack.c.l.b16 %v1246_v46  ;;  %v1311_v22 = vunpack.c.l.b16 %v1247_v28  ;;  %v1067_v10 = vadd.f32 %v1066_v43, %v978_v31  ;;  %v1155_v48 = vpop.f32.mrf.mxu3  ;;  %v2522_v34 = vshrl.u32 %v2465_v33, 16  ;;  %vm12218_vm14 = vmmov %vm12212_vm6 }
 0x198   : > { %v586_v13 = vpack.c.bf16 %v522_v8, %v518_v16  ;;  %v12207_v56 = vmov 0  ;;  %v3484_v32 = vshll.u32 %v9264_v3, 16  ;;  %v3445_v9 = vshrl.u32 %v2870_v20, 16 }
 0x199   : > { %v12208_v56 = vsel %vm9377_vm10, 4294967295, %v12207_v56  ;;  %v2525_v14 = vshll.u32 %v2465_v33, 16  ;;  %v9382_v21 = vpack.c.b16 %v1311_v22, %v1310_v23  ;;  %v9384_v46 = vor.u32 %v2106_v2, %v2103_v57 }
 0x19a   : > { %12209 = vst [vmem:[#allocation53_spill] sm:$0xff] %v12208_v56  ;;  %v9389_v17 = vsel %vm12211_vm11, %v9096_v42, %v9293_v53  ;;  %v3448_v19 = vshll.u32 %v2870_v20, 16  ;;  %v9391_v6 = vor.u32 %v3414_v4, %v3411_v52  ;;  %v9396_v31 = vsel %vm12212_vm6, %v9168_v63, %v9363_v60 }
 0x19b   : > { %12210 = vst [vmem:[#allocation32_spill] sm:$0xff] %v9382_v21  ;;  %vm12213_vm0 = vcmask 1046528   ;;  %v3483_v41 = vrot.slane %v3481_v25, 3  ;;  %v1156_v28 = vadd.f32 %v1155_v48, %v1067_v10  ;;  %v12214_v16 = vpack.c.bf16 %v9278_v55, %v9275_v61  ;;  %v12216_v48 = vld [vmem:[#allocation36_spill] sm:$0xff] }
 0x19c   : > { %v2988_v3 = vsel %vm12213_vm0, %v9313_v44, %v9370_v7  ;;  %v12215_v42 = vpack.c.bf16 %v9288_v39, %v9285_v26  ;;  %v2290_v20 = vsel %vm9377_vm10, 0, %v9382_v21  ;;  %v2524_v63 = vrot.slane %v2522_v34, 3  ;;  %1197 = vmatmul.bf16.gmra.mxu3 %v586_v13  ;;  %v1069_v39 = vpop.f32.mrf.mxu2  ;;  %vm12219_vm0 = vmmov %vm12212_vm6 }
 0x19d   : > { %1019 = vmatmul.bf16.gmra.mxu1 %v12214_v16  ;;  %v2527_v8 = vrot.slane %v2525_v14, 4  ;;  %v3715_v57 = vshrl.u32 %v2290_v20, 16  ;;  %v3718_v2 = vshll.u32 %v2290_v20, 16  ;;  %v3486_v44 = vrot.slane %v3484_v32, 4 }
 0x19e   : > { %1108 = vmatmul.bf16.gmra.mxu2 %v12215_v42  ;;  %v3447_v33 = vrot.slane %v3445_v9, 3  ;;  %v981_v10 = vadd.f32 %v980_v30, %v12216_v48  ;;  %vm12217_vm2 = vsmask.f32 3328  ;;  %v3450_v55 = vrot.slane %v3448_v19, 4  ;;  %v982_v32 = vpop.f32.mrf.mxu1 }
 0x19f   : > { %v2108_v61 = vsel %vm12217_vm2, %v9227_v12, %v9384_v46  ;;  %v1385_v26 = vadd.s32 104, %v8419_v35  ;;  %v3717_v43 = vrot.slane %v3715_v57, 3  ;;  %v3720_v52 = vrot.slane %v3718_v2, 4  ;;  %v1158_v22 = vpop.f32.mrf.mxu3 }
 0x1a0   : > { %v3472_v4 = vshrl.u32 %v2988_v3, 16  ;;  %v3475_v25 = vshll.u32 %v2988_v3, 16  ;;  %v1216_v23 = vmax.f32 %v1156_v28, 0.0  ;;  %v1070_v13 = vadd.f32 %v1069_v39, %v981_v10 }
 0x1a1   : > { %v9418_v34 = vsel %vm12218_vm14, %v9062_v36, %v9391_v6  ;;  %v9420_v30 = vor.u32 %v2527_v8, %v2524_v63  ;;  %v9422_v12 = vor.u32 %v3720_v52, %v3717_v43  ;;  %v2221_v9 = vunpack.c.l.b16 %v2108_v61 }
 0x1a2   : > { %v9424_v14 = vor.u32 %v3486_v44, %v3483_v41  ;;  %v1499_v19 = vand.u32 15, %v1385_v26  ;;  %v1159_v16 = vadd.f32 %v1158_v22, %v1070_v13  ;;  %v2222_v42 = vunpack.c.h.b16 %v2108_v61 }
 0x1a3   : > { %v9426_v3 = vor.u32 %v3450_v55, %v3447_v33  ;;  %v2759_v28 = vsel %vm9039_vm3, 0, %v9163_v54  ;;  %v3474_v20 = vrot.slane %v3472_v4, 3  ;;  %v3477_v36 = vrot.slane %v3475_v25, 4  ;;  %v12222_v55 = vld [vmem:[#allocation44_spill] sm:$0xff] }
 0x1a4   : > { %v2875_v63 = vshll.u32 %v9297_v18, 16  ;;  %vm1833_vm11 = vcmp.eq.s32.totalorder %v1499_v19, 15  ;;  %v1248_v8 = vpack.c.bf16 %v1216_v23, %v1216_v23  ;;  %v1217_v57 = vmax.f32 %v1159_v16, 0.0  ;;  %v1071_v39 = vpop.f32.mrf.mxu2 }
 0x1a5   : > { %v3722_v41 = vsel %vm12212_vm6, %v9332_v27, %v9422_v12  ;;  %v2529_v2 = vsel %vm12219_vm0, %v9253_v62, %v9420_v30  ;;  %vm2377_vm2 = vmpackc.low %vm1833_vm11, %vm1833_vm11  ;;  %vm9439_vm14 = vcmp.ne.s32.totalorder %v2221_v9, %v8624_v37  ;;  %v3544_v33 = vshrl.u32 %v2759_v28, 16 }
 0x1a6   : > { %v3547_v48 = vshll.u32 %v2759_v28, 16  ;;  %v2409_v10 = vsel %vm2377_vm2, 65537, %v12096_v59  ;;  %v1249_v61 = vpack.c.bf16 %v1217_v57, %v1217_v57  ;;  %v983_v26 = vadd.f32 %v982_v32, %v12222_v55  ;;  %4940 = vmatmul.bf16.gmra.mxu0 %v3722_v41  ;;  %v985_v19 = vpop.f32.mrf.mxu1  ;;  %vm12226_vm6 = vmmov %vm12219_vm0 }
 0x1a7   : > { %vm2226_vm3 = vcmp.ne.s32.totalorder %v2222_v42, %v8634_v47  ;;  %v2441_v27 = vunpack.c.l.b16 %v2409_v10  ;;  %v1390_v62 = vadd.s32 144, %v8419_v35  ;;  %v2648_v43 = vunpack.c.l.b16 %v2529_v2  ;;  %v1160_v22 = vpop.f32.mrf.mxu3 }
 0x1a8   : > { %v2649_v52 = vunpack.c.h.b16 %v2529_v2  ;;  %v2871_v4 = vshrl.u32 %v9163_v54, 16  ;;  %v1312_v25 = vunpack.c.l.b16 %v1248_v8  ;;  %v1313_v23 = vunpack.c.l.b16 %v1249_v61  ;;  %vm9452_vm11 = vmpackc.low %vm2226_vm3, %vm9439_vm14 }
 0x1a9   : > { %v1072_v13 = vadd.f32 %v1071_v39, %v983_v26  ;;  %v9448_v9 = vrot.slane %v2875_v63, 1  ;;  %v12223_v32 = vmov 0  ;;  %v1534_v16 = vand.u32 15, %v1390_v62  ;;  %v7477_v63 = vld [vmem:[#allocation8 + $0x118] sm:$0xff]  ;;  %v12234_v26 = vld [vmem:[#allocation20_spill] sm:$0xff] }
 0x1aa   : > { %v12224_v32 = vsel %vm9452_vm11, 4294967295, %v12223_v32  ;;  %v9456_v42 = vor.u32 %v3477_v36, %v3474_v20  ;;  %v9461_v28 = vsel %vm12226_vm6, %v9293_v53, %v9424_v14  ;;  %v2466_v8 = vpack.c.b16 %v2441_v27, %v8481_v15  ;;  %5262 = vmatpush.bf16.msra.mxu0 %v7477_v63 }
 0x1ab   : > { %12225 = vst [vmem:[#allocation36_spill] sm:$0xff] %v12224_v32  ;;  %v9464_v57 = vpack.c.b16 %v1313_v23, %v1312_v25  ;;  %v3546_v41 = vrot.slane %v3544_v33, 3  ;;  %v3549_v2 = vrot.slane %v3547_v48, 4  ;;  %v2873_v44 = vor.u32 %v2871_v4, %v9341_v29 }
 0x1ac   : > { %v1161_v10 = vadd.f32 %v1160_v22, %v1072_v13  ;;  %vm1806_vm3 = vcmp.eq.s32.totalorder %v1534_v16, 0  ;;  %vm9468_vm0 = vcmp.ne.s32.totalorder %v2648_v43, %v8624_v37  ;;  %vm9473_vm2 = vcmp.ne.s32.totalorder %v2649_v52, %v8634_v47  ;;  %5177 = vmatmul.bf16.vlgmr.msra.gmra.mxu3 %v9139_v40  ;;  %v1074_v52 = vpop.f32.mrf.mxu2 }
 0x1ad   : > { %12227 = vst [vmem:[#allocation44_spill] sm:$0xff] %v9464_v57  ;;  %4999 = vmatmul.bf16.vlgmr.msra.gmra.mxu1 %v9108_v24  ;;  %v2291_v29 = vsel %vm9452_vm11, 0, %v9464_v57  ;;  %vm1934_vm14 = vmpackc.low %vm1806_vm3, %vm1806_vm3  ;;  %v9485_v36 = vsel %vm12226_vm6, %v9363_v60, %v9426_v3  ;;  %vm12233_vm7 = vsmask.f32 7424  ;;  %v1387_v48 = vadd.s32 120, %v8419_v35 }
 0x1ae   : > { %5088 = vmatmul.bf16.vlgmr.msra.gmra.mxu2 %v9115_v50  ;;  %12232 = vst [vmem:[#allocation61_spill] sm:$0xff] %v9485_v36  ;;  %v2878_v33 = vsel %vm12233_vm7, %v2873_v44, %v9448_v9  ;;  %v3778_v24 = vshrl.u32 %v2291_v29, 16  ;;  %v3781_v61 = vshll.u32 %v2291_v29, 16  ;;  %v1966_v50 = vsel %vm1934_vm14, 65537, %v12096_v59  ;;  %vm12235_vm3 = vmmov %vm12226_vm6  ;;  %v987_v63 = vpop.f32.mrf.mxu1  ;;  %5263 = vmatpush.bf16.msra.mxu0 %v7476_v1 }
 0x1af   : > { %v2531_v55 = vshrl.u32 %v2466_v8, 16  ;;  %v986_v27 = vadd.f32 %v985_v19, %v12234_v26  ;;  %v1998_v39 = vunpack.c.l.b16 %v1966_v50  ;;  %v9496_v60 = vsel %vm12235_vm3, %v9391_v6, %v9456_v42  ;;  %vm9502_vm7 = vmpackc.low %vm9473_vm2, %vm9468_vm0  ;;  %v1163_v22 = vpop.f32.mrf.mxu3 }
 0x1b0   : > { %v12236_v40 = vmov 0  ;;  %v2534_v62 = vshll.u32 %v2466_v8, 16  ;;  %v1218_v43 = vmax.f32 %v1161_v10, 0.0  ;;  %v3780_v4 = vrot.slane %v3778_v24, 3  ;;  %vm12239_vm0 = vmmov %vm12235_vm3 }
 0x1b1   : > { %v12237_v40 = vsel %vm9502_vm7, 4294967295, %v12236_v40  ;;  %v3783_v25 = vrot.slane %v3781_v61, 4  ;;  %v9506_v23 = vor.u32 %v3549_v2, %v3546_v41  ;;  %v1075_v13 = vadd.f32 %v1074_v52, %v986_v27  ;;  %vm12240_vm2 = vmmov %vm12239_vm0  ;;  %v12241_v52 = vld [vmem:[#allocation22_spill] sm:$0xff] }
 0x1b2   : > { %12238 = vst [vmem:[#allocation20_spill] sm:$0xff] %v12237_v40  ;;  %v2021_v6 = vpack.c.b16 %v8481_v15, %v1998_v39  ;;  %v3508_v19 = vshrl.u32 %v2878_v33, 16  ;;  %v3511_v16 = vshll.u32 %v2878_v33, 16  ;;  %v2736_v20 = vsel %vm9502_vm7, 0, %v9163_v54 }
 0x1b3   : > { %v9509_v44 = vor.u32 %v3783_v25, %v3780_v4  ;;  %v2533_v8 = vrot.slane %v2531_v55, 3  ;;  %v1513_v10 = vand.u32 15, %v1387_v48  ;;  %v1164_v53 = vadd.f32 %v1163_v22, %v1075_v13 }
 0x1b4   : > { %v2110_v29 = vshrl.u32 %v2021_v6, 16  ;;  %v2113_v24 = vshll.u32 %v2021_v6, 16  ;;  %v2536_v41 = vrot.slane %v2534_v62, 4  ;;  %v1250_v2 = vpack.c.bf16 %v1218_v43, %v1218_v43 }
 0x1b5   : > { %v9517_v61 = vsel %vm12239_vm0, %v9424_v14, %v9506_v23  ;;  %v9522_v33 = vsel %vm9130_vm1, 0, %v9297_v18  ;;  %v2883_v50 = vshll.u32 %v9382_v21, 16  ;;  %v1219_v26 = vmax.f32 %v1164_v53, 0.0 }
 0x1b6   : > { %v3785_v48 = vsel %vm12240_vm2, %v9422_v12, %v9509_v44  ;;  %v2112_v55 = vrot.slane %v2110_v29, 4  ;;  %v2115_v27 = vrot.slane %v2113_v24, 5  ;;  %v9528_v39 = vrot.slane %v2736_v20, 1  ;;  %v1076_v12 = vpop.f32.mrf.mxu2 }
 0x1b7   : > { %v9530_v62 = vrot.slane %v3508_v19, 3  ;;  %v9532_v14 = vrot.slane %v3511_v16, 4  ;;  %vm1835_vm14 = vcmp.eq.s32.totalorder %v1513_v10, 15  ;;  %v1251_v43 = vpack.c.bf16 %v1219_v26, %v1219_v26  ;;  %4945 = vmatmul.bf16.gmra.mxu0 %v3785_v48  ;;  %v1165_v10 = vpop.f32.mrf.mxu3 }
 0x1b8   : > { %v988_v4 = vadd.f32 %v987_v63, %v12241_v52  ;;  %v9535_v25 = vor.u32 %v2115_v27, %v2112_v55  ;;  %v9537_v13 = vor.u32 %v2536_v41, %v2533_v8  ;;  %vm2379_vm6 = vmpackc.low %vm1835_vm14, %vm1835_vm14  ;;  %v1314_v22 = vunpack.c.l.b16 %v1250_v2  ;;  %v990_v8 = vpop.f32.mrf.mxu1 }
 0x1b9   : > { %v2879_v6 = vshrl.u32 %v9297_v18, 16  ;;  %v9540_v20 = vrot.slane %v2883_v50, 1  ;;  %v2411_v19 = vsel %vm2379_vm6, 65537, %v12096_v59  ;;  %v1315_v16 = vunpack.c.l.b16 %v1251_v43 }
 0x1ba   : > { %v1077_v53 = vadd.f32 %v1076_v12, %v988_v4  ;;  %vm12242_vm3 = vsmask.f32 3328  ;;  %v2443_v29 = vunpack.c.l.b16 %v2411_v19  ;;  %v1392_v2 = vadd.s32 160, %v8419_v35 }
 0x1bb   : > { %v2117_v63 = vsel %vm12242_vm3, %v9384_v46, %v9535_v25  ;;  %vm12243_vm0 = vcmask 1046528   ;;  %v9550_v26 = vpack.c.b16 %v1315_v16, %v1314_v22  ;;  %v2538_v55 = vsel %vm12240_vm2, %v9420_v30, %v9537_v13 }
 0x1bc   : > { %v2228_v24 = vunpack.c.l.b16 %v2117_v63  ;;  %v2229_v41 = vunpack.c.h.b16 %v2117_v63  ;;  %v2990_v50 = vsel %vm12243_vm0, %v9370_v7, %v9528_v39  ;;  %v1166_v48 = vadd.f32 %v1165_v10, %v1077_v53  ;;  %5182 = vmatmul.bf16.gmra.mxu3 %v9389_v17 }
 0x1bd   : > { %12244 = vst [vmem:[#allocation22_spill] sm:$0xff] %v9550_v26  ;;  %v2881_v27 = vor.u32 %v2879_v6, %v9448_v9  ;;  %v1548_v46 = vand.u32 15, %v1392_v2  ;;  %v2467_v43 = vpack.c.b16 %v2443_v29, %v8481_v15  ;;  %5004 = vmatmul.bf16.gmra.mxu1 %v9218_v58  ;;  %v12245_v7 = vmov 0  ;;  %v12249_v6 = vld [vmem:[#allocation24_spill] sm:$0xff] }
 0x1be   : > { %vm2232_vm14 = vcmp.ne.s32.totalorder %v2228_v24, %v8624_v37  ;;  %vm2233_vm6 = vcmp.ne.s32.totalorder %v2229_v41, %v8634_v47  ;;  %5093 = vmatmul.bf16.gmra.mxu2 %v9418_v34  ;;  %v3535_v52 = vshrl.u32 %v2990_v50, 16  ;;  %v3607_v30 = vshrl.u32 %v9522_v33, 16 }
 0x1bf   : > { %vm9561_vm3 = vmpackc.low %vm2233_vm6, %vm2232_vm14  ;;  %v3610_v9 = vshll.u32 %v9522_v33, 16  ;;  %vm12248_vm0 = vsmask.f32 7424  ;;  %vm1808_vm2 = vcmp.eq.s32.totalorder %v1548_v46, 0  ;;  %v2655_v34 = vunpack.c.l.b16 %v2538_v55  ;;  %v1079_v33 = vpop.f32.mrf.mxu2  ;;  %v1168_v2 = vpop.f32.mrf.mxu3 }
 0x1c0   : > { %v12246_v7 = vsel %vm9561_vm3, 4294967295, %v12245_v7  ;;  %v2886_v4 = vsel %vm12248_vm0, %v2881_v27, %v9540_v20  ;;  %v2292_v22 = vsel %vm9561_vm3, 0, %v9550_v26  ;;  %v2656_v12 = vunpack.c.h.b16 %v2538_v55  ;;  %vm1936_vm14 = vmpackc.low %vm1808_vm2, %vm1808_vm2  ;;  %v992_v46 = vpop.f32.mrf.mxu1 }
 0x1c1   : > { %12247 = vst [vmem:[#allocation62_spill] sm:$0xff] %v12246_v7  ;;  %v991_v19 = vadd.f32 %v990_v8, %v12249_v6  ;;  %v3841_v16 = vshrl.u32 %v2292_v22, 16  ;;  %v3844_v53 = vshll.u32 %v2292_v22, 16  ;;  %v3538_v10 = vshll.u32 %v2990_v50, 16 }
 0x1c2   : > { %v1220_v63 = vmax.f32 %v1166_v48, 0.0  ;;  %v1968_v29 = vsel %vm1936_vm14, 65537, %v12096_v59  ;;  %v3571_v24 = vshrl.u32 %v2886_v4, 16  ;;  %v2540_v41 = vshrl.u32 %v2467_v43, 16 }
 0x1c3   : > { %v1080_v17 = vadd.f32 %v1079_v33, %v991_v19  ;;  %v3843_v27 = vrot.slane %v3841_v16, 3  ;;  %v3846_v51 = vrot.slane %v3844_v53, 4  ;;  %v2543_v45 = vshll.u32 %v2467_v43, 16  ;;  %v9580_v53 = vpop.f32.mrf.mxu0 }
 0x1c4   : > { %v2000_v40 = vunpack.c.l.b16 %v1968_v29  ;;  %vm2659_vm6 = vcmp.ne.s32.totalorder %v2655_v34, %v8624_v37  ;;  %vm2660_vm0 = vcmp.ne.s32.totalorder %v2656_v12, %v8634_v47  ;;  %v3574_v8 = vshll.u32 %v2886_v4, 16 }
 0x1c5   : > { %v1169_v55 = vadd.f32 %v1168_v2, %v1080_v17  ;;  %v9577_v50 = vor.u32 %v3846_v51, %v3843_v27  ;;  %v3609_v48 = vrot.slane %v3607_v30, 3  ;;  %v3612_v22 = vrot.slane %v3610_v9, 4  ;;  %vm9585_vm14 = vmpackc.low %vm2660_vm0, %vm2659_vm6 }
 0x1c6   : > { %v1252_v6 = vpack.c.bf16 %v1220_v63, %v1220_v63  ;;  %v2022_v54 = vpack.c.b16 %v8481_v15, %v2000_v40  ;;  %v3537_v19 = vrot.slane %v3535_v52, 3  ;;  %v3540_v33 = vrot.slane %v3538_v10, 4  ;;  %v12254_v52 = vld [vmem:[#allocation27_spill] sm:$0xff] }
 0x1c7   : > { %v1221_v16 = vmax.f32 %v1169_v55, 0.0  ;;  %vm12250_vm2 = vsmask.f32 4352  ;;  %v12251_v34 = vmov 0  ;;  %v2542_v51 = vrot.slane %v2540_v41, 3  ;;  %v1081_v17 = vpop.f32.mrf.mxu2 }
 0x1c8   : > { %v3848_v43 = vsel %vm12250_vm2, %v9509_v44, %v9577_v50  ;;  %v12252_v34 = vsel %vm9585_vm14, 4294967295, %v12251_v34  ;;  %v2545_v4 = vrot.slane %v2543_v45, 4  ;;  %v2119_v30 = vshrl.u32 %v2022_v54, 16  ;;  %vm12256_vm6 = vmmov %vm12250_vm2 }
 0x1c9   : > { %12253 = vst [vmem:[#allocation24_spill] sm:$0xff] %v12252_v34  ;;  %v2122_v9 = vshll.u32 %v2022_v54, 16  ;;  %v3573_v12 = vrot.slane %v3571_v24, 3  ;;  %v3576_v63 = vrot.slane %v3574_v8, 4  ;;  %v1253_v40 = vpack.c.bf16 %v1221_v16, %v1221_v16  ;;  %4950 = vmatmul.bf16.gmra.mxu0 %v3848_v43  ;;  %v1170_v8 = vpop.f32.mrf.mxu3 }
 0x1ca   : > { %v993_v10 = vadd.f32 %v992_v46, %v12254_v52  ;;  %v3514_v29 = vor.u32 %v9532_v14, %v9530_v62  ;;  %v9595_v44 = vsel %vm9270_vm4, 0, %v9382_v21  ;;  %v2121_v2 = vrot.slane %v2119_v30, 4  ;;  %v995_v14 = vpop.f32.mrf.mxu1 }
 0x1cb   : > { %v2124_v41 = vrot.slane %v2122_v9, 5  ;;  %v2737_v45 = vsel %vm9585_vm14, 0, %v9297_v18  ;;  %v1389_v54 = vadd.s32 136, %v8419_v35  ;;  %v1316_v24 = vunpack.c.l.b16 %v1252_v6 }
 0x1cc   : > { %v1317_v27 = vunpack.c.l.b16 %v1253_v40  ;;  %v1082_v46 = vadd.f32 %v1081_v17, %v993_v10  ;;  %v9601_v62 = vor.u32 %v2545_v4, %v2542_v51  ;;  %v9605_v16 = vor.u32 %v3540_v33, %v3537_v19  ;;  %v9624_v33 = vpop.f32.mrf.mxu0  ;;  %5187 = vmatmul.bf16.gmra.mxu3 %v9461_v28 }
 0x1cd   : > { %v9603_v55 = vor.u32 %v2124_v41, %v2121_v2  ;;  %v9607_v43 = vor.u32 %v3612_v22, %v3609_v48  ;;  %v9609_v30 = vor.u32 %v3576_v63, %v3573_v12  ;;  %v1394_v52 = vadd.s32 176, %v8419_v35  ;;  %5009 = vmatmul.bf16.gmra.mxu1 %v9396_v31 }
 0x1ce   : > { %v9611_v9 = vpack.c.b16 %v1317_v27, %v1316_v24  ;;  %v9616_v6 = vsel %vm12256_vm6, %v9426_v3, %v3514_v29  ;;  %v3670_v51 = vshrl.u32 %v9595_v44, 16  ;;  %v1171_v4 = vadd.f32 %v1170_v8, %v1082_v46  ;;  %5098 = vmatmul.bf16.gmra.mxu2 %v9496_v60  ;;  %vm12259_vm6 = vmmov %vm12250_vm2 }
 0x1cf   : > { %12257 = vst [vmem:[#allocation63_spill] sm:$0xff] %v9616_v6  ;;  %vm12258_vm0 = vsmask.f32 3328  ;;  %v9622_v48 = vrot.slane %v2737_v45, 1  ;;  %v1527_v22 = vand.u32 15, %v1389_v54  ;;  %v1562_v3 = vand.u32 15, %v1394_v52  ;;  %v1084_v28 = vpop.f32.mrf.mxu2 }
 0x1d0   : > { %12255 = vst [vmem:[#allocation27_spill] sm:$0xff] %v9611_v9  ;;  %v2126_v19 = vsel %vm12258_vm0, %v9535_v25, %v9603_v55  ;;  %v2547_v40 = vsel %vm12250_vm2, %v9537_v13, %v9601_v62  ;;  %v9635_v25 = vsel %vm12259_vm6, %v9456_v42, %v9605_v16  ;;  %vm12260_vm0 = vmmov %vm12250_vm2  ;;  %v12263_v13 = vld [vmem:[#allocation30_spill] sm:$0xff]  ;;  %v1222_v1 = vmax.f32 %v1171_v4, 0.0 }
 0x1d1   : > { %v2235_v12 = vunpack.c.l.b16 %v2126_v19  ;;  %v2236_v63 = vunpack.c.h.b16 %v2126_v19  ;;  %v9640_v10 = vsel %vm12260_vm0, %v9506_v23, %v9607_v43  ;;  %vm12261_vm4 = vmmov %vm12260_vm0  ;;  %v996_v2 = vadd.f32 %v995_v14, %v12263_v13  ;;  %v1173_v24 = vpop.f32.mrf.mxu3 }
 0x1d2   : > { %v9644_v60 = vsel %vm12261_vm4, %v3514_v29, %v9609_v30  ;;  %vm9650_vm6 = vcmp.eq.s32.totalorder %v1562_v3, 0  ;;  %v12266_v23 = vmov 0  ;;  %vm12269_vm4 = vcmask 1046528   ;;  %v997_v14 = vpop.f32.mrf.mxu1 }
 0x1d3   : > { %12262 = vst [vmem:[#allocation64_spill] sm:$0xff] %v9644_v60  ;;  %vm2239_vm2 = vcmp.ne.s32.totalorder %v2235_v12, %v8624_v37  ;;  %vm2240_vm1 = vcmp.ne.s32.totalorder %v2236_v63, %v8634_v47  ;;  %v2992_v29 = vsel %vm12269_vm4, %v9528_v39, %v9622_v48  ;;  %v2662_v41 = vunpack.c.l.b16 %v2547_v40 }
 0x1d4   : > { %vm9654_vm0 = vmpackc.low %vm2240_vm1, %vm2239_vm2  ;;  %vm9661_vm14 = vcmp.eq.s32.totalorder %v1527_v22, 15  ;;  %v1085_v54 = vadd.f32 %v1084_v28, %v996_v2  ;;  %v2663_v46 = vunpack.c.h.b16 %v2547_v40  ;;  %v9671_v8 = vrot.slane %v3670_v51, 3  ;;  %v9683_v28 = vpop.f32.mrf.mxu0 }
 0x1d5   : > { %v12267_v23 = vsel %vm9654_vm0, 4294967295, %v12266_v23  ;;  %v2293_v27 = vsel %vm9654_vm0, 0, %v9611_v9  ;;  %vm1938_vm1 = vmpackc.low %vm9650_vm6, %vm9650_vm6  ;;  %v2891_v19 = vshll.u32 %v9464_v57, 16  ;;  %v3598_v63 = vshrl.u32 %v2992_v29, 16 }
 0x1d6   : > { %12268 = vst [vmem:[#allocation30_spill] sm:$0xff] %v12267_v23  ;;  %v3904_v39 = vshrl.u32 %v2293_v27, 16  ;;  %v3907_v52 = vshll.u32 %v2293_v27, 16  ;;  %v1970_v4 = vsel %vm1938_vm1, 65537, %v12096_v59  ;;  %vm2381_vm2 = vmpackc.low %vm9661_vm14, %vm9661_vm14  ;;  %v1174_v22 = vadd.f32 %v1173_v24, %v1085_v54 }
 0x1d7   : > { %v2002_v12 = vunpack.c.l.b16 %v1970_v4  ;;  %v3601_v3 = vshll.u32 %v2992_v29, 16  ;;  %v1254_v13 = vpack.c.bf16 %v1222_v1, %v1222_v1  ;;  %vm9679_vm6 = vcmp.ne.s32.totalorder %v2662_v41, %v8624_v37 }
 0x1d8   : > { %v3906_v2 = vrot.slane %v3904_v39, 3  ;;  %v3909_v40 = vrot.slane %v3907_v52, 4  ;;  %v1223_v42 = vmax.f32 %v1174_v22, 0.0  ;;  %vm2667_vm4 = vcmp.ne.s32.totalorder %v2663_v46, %v8634_v47  ;;  %v12274_v39 = vld [vmem:[#allocation33_spill] sm:$0xff]  ;;  %v1086_v46 = vpop.f32.mrf.mxu2 }
 0x1d9   : > { %v2023_v27 = vpack.c.b16 %v8481_v15, %v2002_v12  ;;  %v2413_v45 = vsel %vm2381_vm2, 65537, %v12096_v59  ;;  %v2887_v1 = vshrl.u32 %v9382_v21, 16  ;;  %v9691_v29 = vrot.slane %v2891_v19, 1  ;;  %vm9699_vm1 = vmpackc.low %vm2667_vm4, %vm9679_vm6 }
 0x1da   : > { %v9688_v54 = vor.u32 %v3909_v40, %v3906_v2  ;;  %v2445_v24 = vunpack.c.l.b16 %v2413_v45  ;;  %v1255_v41 = vpack.c.bf16 %v1223_v42, %v1223_v42  ;;  %v998_v52 = vadd.f32 %v997_v14, %v12274_v39  ;;  %v1000_v39 = vpop.f32.mrf.mxu1 }
 0x1db   : > { %v2128_v4 = vshrl.u32 %v2023_v27, 16  ;;  %v2131_v22 = vshll.u32 %v2023_v27, 16  ;;  %v1318_v17 = vunpack.c.l.b16 %v1254_v13  ;;  %vm12275_vm14 = vsmask.f32 4352  ;;  %v1175_v27 = vpop.f32.mrf.mxu3 }
 0x1dc   : > { %v3911_v12 = vsel %vm12275_vm14, %v9577_v50, %v9688_v54  ;;  %v12276_v2 = vmov 0  ;;  %v2889_v19 = vor.u32 %v2887_v1, %v9540_v20  ;;  %v2468_v40 = vpack.c.b16 %v2445_v24, %v8481_v15  ;;  %5192 = vmatmul.bf16.gmra.mxu3 %v9517_v61 }
 0x1dd   : > { %v12277_v2 = vsel %vm9699_vm1, 4294967295, %v12276_v2  ;;  %v1319_v42 = vunpack.c.l.b16 %v1255_v41  ;;  %4955 = vmatmul.bf16.gmra.mxu0 %v3911_v12  ;;  %v1087_v14 = vadd.f32 %v1086_v46, %v998_v52  ;;  %v2130_v13 = vrot.slane %v2128_v4, 4  ;;  %5014 = vmatmul.bf16.gmra.mxu1 %v9485_v36 }
 0x1de   : > { %12278 = vst [vmem:[#allocation33_spill] sm:$0xff] %v12277_v2  ;;  %v2133_v45 = vrot.slane %v2131_v22, 5  ;;  %v3600_v34 = vrot.slane %v3598_v63, 3  ;;  %vm12279_vm2 = vsmask.f32 7424  ;;  %v2549_v51 = vshrl.u32 %v2468_v40, 16  ;;  %v9715_v63 = vpop.f32.mrf.mxu0  ;;  %5103 = vmatmul.bf16.gmra.mxu2 %v9635_v25 }
 0x1df   : > { %v2894_v50 = vsel %vm12279_vm2, %v2889_v19, %v9691_v29  ;;  %v2552_v18 = vshll.u32 %v2468_v40, 16  ;;  %v9707_v49 = vpack.c.b16 %v1319_v42, %v1318_v17  ;;  %v3603_v20 = vrot.slane %v3601_v3, 4 }
 0x1e0   : > { %v9709_v5 = vor.u32 %v2133_v45, %v2130_v13  ;;  %v2738_v1 = vsel %vm9699_vm1, 0, %v9382_v21  ;;  %v1176_v24 = vadd.f32 %v1175_v27, %v1087_v14  ;;  %v1396_v41 = vadd.s32 192, %v8419_v35  ;;  %v12283_v14 = vld [vmem:[#allocation37_spill] sm:$0xff] }
 0x1e1   : > { %12280 = vst [vmem:[#allocation65_spill] sm:$0xff] %v9707_v49  ;;  %v2551_v52 = vrot.slane %v2549_v51, 3  ;;  %v2554_v4 = vrot.slane %v2552_v18, 4  ;;  %vm12281_vm6 = vsmask.f32 3328  ;;  %v12282_v3 = vshll.u32 %v9595_v44, 16  ;;  %v1089_v44 = vpop.f32.mrf.mxu2 }
 0x1e2   : > { %v2135_v17 = vsel %vm12281_vm6, %v9603_v55, %v9709_v5  ;;  %v3634_v12 = vshrl.u32 %v2894_v50, 16  ;;  %v3637_v46 = vshll.u32 %v2894_v50, 16  ;;  %v1576_v18 = vand.u32 15, %v1396_v41 }
 0x1e3   : > { %v3675_v22 = vrot.slane %v12282_v3, 4  ;;  %v2242_v19 = vunpack.c.l.b16 %v2135_v17  ;;  %v2243_v40 = vunpack.c.h.b16 %v2135_v17  ;;  %v1391_v42 = vadd.s32 152, %v8419_v35  ;;  %v1178_v51 = vpop.f32.mrf.mxu3 }
 0x1e4   : > { %v1001_v27 = vadd.f32 %v1000_v39, %v12283_v14  ;;  %v9727_v13 = vor.u32 %v3603_v20, %v3600_v34  ;;  %v9729_v25 = vrot.slane %v2738_v1, 1  ;;  %v9731_v45 = vor.u32 %v2554_v4, %v2551_v52 }
 0x1e5   : > { %v1224_v55 = vmax.f32 %v1176_v24, 0.0  ;;  %vm2246_vm4 = vcmp.ne.s32.totalorder %v2242_v19, %v8624_v37  ;;  %vm2247_vm14 = vcmp.ne.s32.totalorder %v2243_v40, %v8634_v47  ;;  %vm9735_vm2 = vcmp.eq.s32.totalorder %v1576_v18, 0  ;;  %v1002_v24 = vpop.f32.mrf.mxu1 }
 0x1e6   : > { %v1090_v50 = vadd.f32 %v1089_v44, %v1001_v27  ;;  %vm9739_vm6 = vmpackc.low %vm2247_vm14, %vm2246_vm4  ;;  %v12286_v39 = vmov 0  ;;  %v9744_v34 = vor.u32 %v3675_v22, %v9671_v8  ;;  %vm12289_vm1 = vsmask.f32 4352  ;;  %v9764_v44 = vpop.f32.mrf.mxu0 }
 0x1e7   : > { %v12287_v39 = vsel %vm9739_vm6, 4294967295, %v12286_v39  ;;  %v2556_v20 = vsel %vm12289_vm1, %v9601_v62, %v9731_v45  ;;  %v9752_v1 = vsel %vm9377_vm10, 0, %v9464_v57  ;;  %v2294_v41 = vsel %vm9739_vm6, 0, %v9707_v49  ;;  %vm1940_vm4 = vmpackc.low %vm9735_vm2, %vm9735_vm2 }
 0x1e8   : > { %12288 = vst [vmem:[#allocation37_spill] sm:$0xff] %v12287_v39  ;;  %v3636_v8 = vrot.slane %v3634_v12, 3  ;;  %v3639_v52 = vrot.slane %v3637_v46, 4  ;;  %v1541_v4 = vand.u32 15, %v1391_v42  ;;  %v1179_v17 = vadd.f32 %v1178_v51, %v1090_v50 }
 0x1e9   : > { %v3967_v3 = vshrl.u32 %v2294_v41, 16  ;;  %v3970_v62 = vshll.u32 %v2294_v41, 16  ;;  %vm12290_vm1 = vcmask 1046528   ;;  %v1256_v19 = vpack.c.bf16 %v1224_v55, %v1224_v55  ;;  %v12291_v41 = vld [vmem:[#allocation46_spill] sm:$0xff] }
 0x1ea   : > { %v2994_v22 = vsel %vm12290_vm1, %v9622_v48, %v9729_v25  ;;  %v1972_v40 = vsel %vm1940_vm4, 65537, %v12096_v59  ;;  %v2669_v18 = vunpack.c.l.b16 %v2556_v20  ;;  %v2670_v14 = vunpack.c.h.b16 %v2556_v20 }
 0x1eb   : > { %v1225_v27 = vmax.f32 %v1179_v17, 0.0  ;;  %v3969_v61 = vrot.slane %v3967_v3, 3  ;;  %v3972_v56 = vrot.slane %v3970_v62, 4  ;;  %v2004_v12 = vunpack.c.l.b16 %v1972_v40  ;;  %v1091_v17 = vpop.f32.mrf.mxu2 }
 0x1ec   : > { %v3661_v46 = vshrl.u32 %v2994_v22, 16  ;;  %v3664_v42 = vshll.u32 %v2994_v22, 16  ;;  %v3733_v50 = vshrl.u32 %v9752_v1, 16  ;;  %vm1839_vm14 = vcmp.eq.s32.totalorder %v1541_v4, 15  ;;  %5197 = vmatmul.bf16.gmra.mxu3 %v9640_v10 }
 0x1ed   : > { %v1257_v51 = vpack.c.bf16 %v1225_v27, %v1225_v27  ;;  %v1003_v2 = vadd.f32 %v1002_v24, %v12291_v41  ;;  %v9768_v48 = vor.u32 %v3972_v56, %v3969_v61  ;;  %v2024_v55 = vpack.c.b16 %v8481_v15, %v2004_v12  ;;  %vm2383_vm2 = vmpackc.low %vm1839_vm14, %vm1839_vm14  ;;  %5019 = vmatmul.bf16.gmra.mxu1 %v9616_v6 }
 0x1ee   : > { %v1320_v20 = vunpack.c.l.b16 %v1256_v19  ;;  %vm9772_vm4 = vcmp.ne.s32.totalorder %v2669_v18, %v8624_v37  ;;  %vm9777_vm1 = vcmp.ne.s32.totalorder %v2670_v14, %v8634_v47  ;;  %v2415_v4 = vsel %vm2383_vm2, 65537, %v12096_v59  ;;  %v1180_v19 = vpop.f32.mrf.mxu3  ;;  %v1005_v18 = vpop.f32.mrf.mxu1 }
 0x1ef   : > { %v1321_v24 = vunpack.c.l.b16 %v1257_v51  ;;  %vm12296_vm10 = vsmask.f32 4352  ;;  %v1092_v22 = vadd.f32 %v1091_v17, %v1003_v2  ;;  %v2137_v40 = vshrl.u32 %v2024_v55, 16 }
 0x1f0   : > { %v3974_v56 = vsel %vm12296_vm10, %v9688_v54, %v9768_v48  ;;  %vm12297_vm14 = vmmov %vm12296_vm10  ;;  %v2140_v14 = vshll.u32 %v2024_v55, 16  ;;  %v2447_v12 = vunpack.c.l.b16 %v2415_v4  ;;  %v9795_v2 = vor.u32 %v3639_v52, %v3636_v8  ;;  %v7475_v52 = vld [vmem:[#allocation8 + $0x108] sm:$0xff] }
 0x1f1   : > { %4960 = vmatmul.bf16.gmra.mxu0 %v3974_v56  ;;  %v3605_v27 = vsel %vm12297_vm14, %v9605_v16, %v9727_v13  ;;  %vm12298_vm7 = vmmov %vm12296_vm10  ;;  %v9793_v51 = vpack.c.b16 %v1321_v24, %v1320_v20  ;;  %v1181_v41 = vadd.f32 %v1180_v19, %v1092_v22  ;;  %v2139_v54 = vrot.slane %v2137_v40, 4  ;;  %v9807_v20 = vpop.f32.mrf.mxu0  ;;  %v12303_v40 = vld [vmem:[#allocation21_spill] sm:$0xff] }
 0x1f2   : > { %v9791_v61 = vsel %vm12298_vm7, %v9607_v43, %v9744_v34  ;;  %vm9801_vm10 = vmpackc.low %vm9777_vm1, %vm9772_vm4  ;;  %v12300_v17 = vmov 0  ;;  %v2142_v16 = vrot.slane %v2140_v14, 5  ;;  %v3663_v55 = vrot.slane %v3661_v46, 3  ;;  %5108 = vmatmul.bf16.gmra.mxu2 %v3605_v27  ;;  %5264 = vmatpush.bf16.msra.mxu0 %v7475_v52 }
 0x1f3   : > { %12299 = vst [vmem:[#allocation46_spill] sm:$0xff] %v9793_v51  ;;  %v12301_v17 = vsel %vm9801_vm10, 4294967295, %v12300_v17  ;;  %v1398_v43 = vadd.s32 208, %v8419_v35  ;;  %v3736_v4 = vshll.u32 %v9752_v1, 16  ;;  %v3666_v8 = vrot.slane %v3664_v42, 4  ;;  %v1094_v14 = vpop.f32.mrf.mxu2 }
 0x1f4   : > { %12302 = vst [vmem:[#allocation66_spill] sm:$0xff] %v12301_v17  ;;  %v3735_v3 = vrot.slane %v3733_v50, 3  ;;  %v2899_v62 = vshll.u32 %v9550_v26, 16  ;;  %v2469_v24 = vpack.c.b16 %v2447_v12, %v8481_v15  ;;  %v9813_v56 = vor.u32 %v2142_v16, %v2139_v54 }
 0x1f5   : > { %v1590_v46 = vand.u32 15, %v1398_v43  ;;  %v2739_v1 = vsel %vm9801_vm10, 0, %v9464_v57  ;;  %v2895_v22 = vshrl.u32 %v9464_v57, 16  ;;  %v1226_v19 = vmax.f32 %v1181_v41, 0.0 }
 0x1f6   : > { %v1006_v42 = vadd.f32 %v1005_v18, %v12303_v40  ;;  %v2558_v50 = vshrl.u32 %v2469_v24, 16  ;;  %v2561_v27 = vshll.u32 %v2469_v24, 16  ;;  %vm12304_vm7 = vsmask.f32 3328  ;;  %v1183_v43 = vpop.f32.mrf.mxu3  ;;  %v1007_v18 = vpop.f32.mrf.mxu1 }
 0x1f7   : > { %v2144_v10 = vsel %vm12304_vm7, %v9709_v5, %v9813_v56  ;;  %vm1814_vm2 = vcmp.eq.s32.totalorder %v1590_v46, 0  ;;  %v3738_v12 = vrot.slane %v3736_v4, 4  ;;  %v2897_v54 = vor.u32 %v2895_v22, %v9691_v29 }
 0x1f8   : > { %v1095_v16 = vadd.f32 %v1094_v14, %v1006_v42  ;;  %v2249_v17 = vunpack.c.l.b16 %v2144_v10  ;;  %v2250_v21 = vunpack.c.h.b16 %v2144_v10  ;;  %vm1942_vm4 = vmpackc.low %vm1814_vm2, %vm1814_vm2  ;;  %v9824_v41 = vrot.slane %v2899_v62, 1  ;;  %v12312_v14 = vld [vmem:[#allocation23_spill] sm:$0xff] }
 0x1f9   : > { %v1974_v52 = vsel %vm1942_vm4, 65537, %v12096_v59  ;;  %v9827_v24 = vrot.slane %v2739_v1, 1  ;;  %v2560_v40 = vrot.slane %v2558_v50, 3  ;;  %v2563_v57 = vrot.slane %v2561_v27, 4 }
 0x1fa   : > { %v1258_v0 = vpack.c.bf16 %v1226_v19, %v1226_v19  ;;  %v1184_v5 = vadd.f32 %v1183_v43, %v1095_v16  ;;  %vm2253_vm1 = vcmp.ne.s32.totalorder %v2249_v17, %v8624_v37  ;;  %vm2254_vm14 = vcmp.ne.s32.totalorder %v2250_v21, %v8634_v47  ;;  %v9844_v19 = vpop.f32.mrf.mxu0 }
 0x1fb   : > { %vm9831_vm7 = vmpackc.low %vm2254_vm14, %vm2253_vm1  ;;  %v12305_v29 = vmov 0  ;;  %v9835_v4 = vor.u32 %v3666_v8, %v3663_v55  ;;  %v2006_v62 = vunpack.c.l.b16 %v1974_v52  ;;  %vm12308_vm2 = vsmask.f32 4352 }
 0x1fc   : > { %v12306_v29 = vsel %vm9831_vm7, 4294967295, %v12305_v29  ;;  %v9840_v46 = vsel %vm12308_vm2, %v9609_v30, %v9795_v2  ;;  %v9842_v1 = vor.u32 %v2563_v57, %v2560_v40  ;;  %v1227_v22 = vmax.f32 %v1184_v5, 0.0  ;;  %vm12313_vm14 = vmmov %vm12308_vm2  ;;  %5202 = vmatmul.bf16.gmra.mxu3 %v9791_v61 }
 0x1fd   : > { %12307 = vst [vmem:[#allocation21_spill] sm:$0xff] %v12306_v29  ;;  %v2295_v21 = vsel %vm9831_vm7, 0, %v9793_v51  ;;  %v9849_v17 = vor.u32 %v3738_v12, %v3735_v3  ;;  %vm12310_vm4 = vsmask.f32 7424  ;;  %v2025_v30 = vpack.c.b16 %v8481_v15, %v2006_v62  ;;  %5024 = vmatmul.bf16.gmra.mxu1 %v9644_v60  ;;  %v7690_v29 = vld [vmem:[#allocation7] ss:$0 sm:$0xff] }
 0x1fe   : > { %12309 = vst [vmem:[#allocation67_spill] sm:$0xff] %v9840_v46  ;;  %v9853_v55 = vsel %vm12310_vm4, %v2897_v54, %v9824_v41  ;;  %v4030_v8 = vshrl.u32 %v2295_v21, 16  ;;  %v4033_v42 = vshll.u32 %v2295_v21, 16  ;;  %vm12311_vm1 = vcmask 1046528   ;;  %v1096_v54 = vpop.f32.mrf.mxu2  ;;  %v1185_v62 = vpop.f32.mrf.mxu3 }
 0x1ff   : > { %v2996_v57 = vsel %vm12311_vm1, %v9729_v25, %v9827_v24  ;;  %v1322_v50 = vunpack.c.l.b16 %v1258_v0  ;;  %v1259_v27 = vpack.c.bf16 %v1227_v22, %v1227_v22  ;;  %v1008_v10 = vadd.f32 %v1007_v18, %v12312_v14  ;;  %v1010_v0 = vpop.f32.mrf.mxu1 }
 0x200   : > { %v2565_v3 = vsel %vm12313_vm14, %v9731_v45, %v9842_v1  ;;  %v4032_v12 = vrot.slane %v4030_v8, 3  ;;  %v4035_v16 = vrot.slane %v4033_v42, 4  ;;  %v2146_v43 = vshrl.u32 %v2025_v30, 16  ;;  %vm12320_vm14 = vmmov %vm12308_vm2 }
 0x201   : > { %v2149_v52 = vshll.u32 %v2025_v30, 16  ;;  %v1323_v40 = vunpack.c.l.b16 %v1259_v27  ;;  %v1097_v5 = vadd.f32 %v1096_v54, %v1008_v10  ;;  %v2676_v21 = vunpack.c.l.b16 %v2565_v3  ;;  %vm12322_vm10 = vmmov %vm12320_vm14 }
 0x202   : > { %v2677_v38 = vunpack.c.h.b16 %v2565_v3  ;;  %v9863_v11 = vor.u32 %v4035_v16, %v4032_v12  ;;  %v2148_v25 = vrot.slane %v2146_v43, 4  ;;  %v3697_v18 = vshrl.u32 %v9853_v55, 16 }
 0x203   : > { %v2151_v22 = vrot.slane %v2149_v52, 5  ;;  %v9866_v14 = vpack.c.b16 %v1323_v40, %v1322_v50  ;;  %v1186_v45 = vadd.f32 %v1185_v62, %v1097_v5  ;;  %v3724_v8 = vshrl.u32 %v2996_v57, 16  ;;  %v9884_v50 = vpop.f32.mrf.mxu0 }
 0x204   : > { %v1400_v42 = vadd.s32 224, %v8419_v35  ;;  %v4037_v30 = vsel %vm12308_vm2, %v9768_v48, %v9863_v11  ;;  %vm9875_vm4 = vcmp.ne.s32.totalorder %v2676_v21, %v8624_v37  ;;  %vm9880_vm1 = vcmp.ne.s32.totalorder %v2677_v38, %v8634_v47  ;;  %12319 = vst [vmem:[#allocation68_spill] sm:$0xff] %v9884_v50 }
 0x205   : > { %12314 = vst [vmem:[#allocation23_spill] sm:$0xff] %v9866_v14  ;;  %v9872_v27 = vor.u32 %v2151_v22, %v2148_v25  ;;  %4965 = vmatmul.bf16.gmra.mxu0 %v4037_v30  ;;  %v3668_v48 = vsel %vm12320_vm14, %v9727_v13, %v9835_v4  ;;  %v3727_v12 = vshll.u32 %v2996_v57, 16  ;;  %v1393_v54 = vadd.s32 168, %v8419_v35  ;;  %v12323_v57 = vld [vmem:[#allocation25_spill] sm:$0xff] }
 0x206   : > { %v1604_v16 = vand.u32 15, %v1400_v42  ;;  %5113 = vmatmul.bf16.gmra.mxu2 %v3668_v48  ;;  %vm12321_vm2 = vsmask.f32 3328  ;;  %v9898_v43 = vsel %vm12322_vm10, %v9744_v34, %v9849_v17  ;;  %v9900_v52 = vrot.slane %v3697_v18, 3  ;;  %v1188_v18 = vpop.f32.mrf.mxu3 }
 0x207   : > { %v2153_v38 = vsel %vm12321_vm2, %v9813_v56, %v9872_v27  ;;  %v3700_v13 = vshll.u32 %v9853_v55, 16  ;;  %v1011_v40 = vadd.f32 %v1010_v0, %v12323_v57  ;;  %vm9912_vm2 = vmpackc.low %vm9880_vm1, %vm9875_vm4  ;;  %v12326_v61 = vmov 0  ;;  %v1099_v56 = vpop.f32.mrf.mxu2 }
 0x208   : > { %v2256_v5 = vunpack.c.l.b16 %v2153_v38  ;;  %v2257_v62 = vunpack.c.h.b16 %v2153_v38  ;;  %vm9904_vm14 = vcmp.eq.s32.totalorder %v1604_v16, 0  ;;  %v12327_v61 = vsel %vm9912_vm2, 4294967295, %v12326_v61 }
 0x209   : > { %12328 = vst [vmem:[#allocation25_spill] sm:$0xff] %v12327_v61  ;;  %v1228_v34 = vmax.f32 %v1186_v45, 0.0  ;;  %v3726_v25 = vrot.slane %v3724_v8, 3  ;;  %vm1944_vm10 = vmpackc.low %vm9904_vm14, %vm9904_vm14  ;;  %v9922_v55 = vsel %vm9452_vm11, 0, %v9550_v26  ;;  %v1555_v0 = vand.u32 15, %v1393_v54  ;;  %v1012_v45 = vpop.f32.mrf.mxu1  ;;  %v12333_v61 = vld [vmem:[#allocation28_spill] sm:$0xff] }
 0x20a   : > { %v1100_v22 = vadd.f32 %v1099_v56, %v1011_v40  ;;  %vm2260_vm4 = vcmp.ne.s32.totalorder %v2256_v5, %v8624_v37  ;;  %vm2261_vm1 = vcmp.ne.s32.totalorder %v2257_v62, %v8634_v47  ;;  %v3729_v42 = vrot.slane %v3727_v12, 4 }
 0x20b   : > { %vm9926_vm12 = vmpackc.low %vm2261_vm1, %vm2260_vm4  ;;  %v12329_v8 = vmov 0  ;;  %v1976_v30 = vsel %vm1944_vm10, 65537, %v12096_v59  ;;  %v9931_v10 = vrot.slane %v3700_v13, 4  ;;  %v2903_v3 = vshrl.u32 %v9550_v26, 16  ;;  %v9941_v62 = vpop.f32.mrf.mxu0 }
 0x20c   : > { %v12330_v8 = vsel %vm9926_vm12, 4294967295, %v12329_v8  ;;  %vm1841_vm14 = vcmp.eq.s32.totalorder %v1555_v0, 15  ;;  %v1189_v48 = vadd.f32 %v1188_v18, %v1100_v22  ;;  %v2296_v16 = vsel %vm9926_vm12, 0, %v9866_v14  ;;  %12332 = vst [vmem:[#allocation70_spill] sm:$0xff] %v9941_v62  ;;  %5207 = vmatmul.bf16.gmra.mxu3 %v9898_v43 }
 0x20d   : > { %12331 = vst [vmem:[#allocation69_spill] sm:$0xff] %v12330_v8  ;;  %v2008_v54 = vunpack.c.l.b16 %v1976_v30  ;;  %v2740_v12 = vsel %vm9912_vm2, 0, %v9550_v26  ;;  %vm2385_vm4 = vmpackc.low %vm1841_vm14, %vm1841_vm14  ;;  %v1260_v38 = vpack.c.bf16 %v1228_v34, %v1228_v34  ;;  %v4093_v57 = vshrl.u32 %v2296_v16, 16  ;;  %5029 = vmatmul.bf16.gmra.mxu1 %v9840_v46 }
 0x20e   : > { %v4096_v40 = vshll.u32 %v2296_v16, 16  ;;  %v3796_v13 = vshrl.u32 %v9922_v55, 16  ;;  %v1229_v5 = vmax.f32 %v1189_v48, 0.0  ;;  %v9943_v21 = vor.u32 %v3729_v42, %v3726_v25 }
 0x20f   : > { %v2026_v56 = vpack.c.b16 %v8481_v15, %v2008_v54  ;;  %v2417_v0 = vsel %vm2385_vm4, 65537, %v12096_v59  ;;  %v4095_v22 = vrot.slane %v4093_v57, 3  ;;  %v9947_v30 = vrot.slane %v2740_v12, 1  ;;  %v1101_v25 = vpop.f32.mrf.mxu2  ;;  %v1190_v57 = vpop.f32.mrf.mxu3 }
 0x210   : > { %v4098_v18 = vrot.slane %v4096_v40, 4  ;;  %v2907_v32 = vshll.u32 %v9611_v9, 16  ;;  %v1261_v34 = vpack.c.bf16 %v1229_v5, %v1229_v5  ;;  %v1013_v16 = vadd.f32 %v1012_v45, %v12333_v61 }
 0x211   : > { %v2155_v26 = vshrl.u32 %v2026_v56, 16  ;;  %v2158_v60 = vshll.u32 %v2026_v56, 16  ;;  %v1324_v48 = vunpack.c.l.b16 %v1260_v38  ;;  %v3799_v42 = vshll.u32 %v9922_v55, 16  ;;  %v1015_v50 = vpop.f32.mrf.mxu1 }
 0x212   : > { %v9951_v6 = vor.u32 %v4098_v18, %v4095_v22  ;;  %v2449_v54 = vunpack.c.l.b16 %v2417_v0  ;;  %v1325_v36 = vunpack.c.l.b16 %v1261_v34  ;;  %v1102_v62 = vadd.f32 %v1101_v25, %v1013_v16  ;;  %v7474_v34 = vld [vmem:[#allocation8 + $0x100] sm:$0xff] }
 0x213   : > { %v2157_v40 = vrot.slane %v2155_v26, 4  ;;  %v2160_v12 = vrot.slane %v2158_v60, 5  ;;  %vm12334_vm10 = vsmask.f32 4352  ;;  %vm12335_vm1 = vcmask 1046528   ;;  %5265 = vmatpush.bf16.msra.mxu0 %v7474_v34 }
 0x214   : > { %v4100_v5 = vsel %vm12334_vm10, %v9863_v11, %v9951_v6  ;;  %v2998_v61 = vsel %vm12335_vm1, %v9827_v24, %v9947_v30  ;;  %v3798_v45 = vrot.slane %v3796_v13, 3  ;;  %v2470_v38 = vpack.c.b16 %v2449_v54, %v8481_v15  ;;  %vm12337_vm14 = vmmov %vm12334_vm10  ;;  %v9971_v24 = vpop.f32.mrf.mxu0  ;;  %v12339_v54 = vld [vmem:[#allocation31_spill] sm:$0xff] }
 0x215   : > { %v9961_v56 = vpack.c.b16 %v1325_v36, %v1324_v48  ;;  %v3731_v55 = vsel %vm12337_vm14, %v9835_v4, %v9943_v21  ;;  %v9966_v26 = vor.u32 %v2160_v12, %v2157_v40  ;;  %v9968_v60 = vrot.slane %v2907_v32, 1  ;;  %4970 = vmatmul.bf16.gmra.mxu0 %v4100_v5 }
 0x216   : > { %v1191_v0 = vadd.f32 %v1190_v57, %v1102_v62  ;;  %v1402_v11 = vadd.s32 240, %v8419_v35  ;;  %v2567_v22 = vshrl.u32 %v2470_v38, 16  ;;  %v2570_v18 = vshll.u32 %v2470_v38, 16  ;;  %5118 = vmatmul.bf16.gmra.mxu2 %v3731_v55 }
 0x217   : > { %12336 = vst [vmem:[#allocation28_spill] sm:$0xff] %v9961_v56  ;;  %vm12338_vm4 = vsmask.f32 3328  ;;  %v3787_v13 = vshrl.u32 %v2998_v61, 16  ;;  %v3801_v4 = vrot.slane %v3799_v42, 4  ;;  %v2905_v32 = vor.u32 %v2903_v3, %v9824_v41  ;;  %v1104_v5 = vpop.f32.mrf.mxu2  ;;  %v1193_v3 = vpop.f32.mrf.mxu3 }
 0x218   : > { %v2162_v36 = vsel %vm12338_vm4, %v9872_v27, %v9966_v26  ;;  %v3790_v48 = vshll.u32 %v2998_v61, 16  ;;  %v1618_v25 = vand.u32 15, %v1402_v11  ;;  %v1016_v57 = vadd.f32 %v1015_v50, %v12339_v54 }
 0x219   : > { %v2263_v62 = vunpack.c.l.b16 %v2162_v36  ;;  %v2264_v16 = vunpack.c.h.b16 %v2162_v36  ;;  %vm12340_vm10 = vsmask.f32 7424  ;;  %v2569_v27 = vrot.slane %v2567_v22, 3 }
 0x21a   : > { %v9982_v40 = vsel %vm12340_vm10, %v2905_v32, %v9968_v60  ;;  %v2572_v12 = vrot.slane %v2570_v18, 4  ;;  %v1230_v42 = vmax.f32 %v1191_v0, 0.0  ;;  %vm9986_vm4 = vcmp.eq.s32.totalorder %v1618_v25, 0  ;;  %v1017_v0 = vpop.f32.mrf.mxu1 }
 0x21b   : > { %vm2267_vm1 = vcmp.ne.s32.totalorder %v2263_v62, %v8624_v37  ;;  %vm2268_vm14 = vcmp.ne.s32.totalorder %v2264_v16, %v8634_v47  ;;  %v1105_v43 = vadd.f32 %v1104_v5, %v1016_v57  ;;  %v12343_v50 = vmov 0  ;;  %vm1946_vm10 = vmpackc.low %vm9986_vm4, %vm9986_vm4 }
 0x21c   : > { %vm9990_vm11 = vmpackc.low %vm2268_vm14, %vm2267_vm1  ;;  %v9996_v61 = vor.u32 %v9931_v10, %v9900_v52  ;;  %v9998_v38 = vor.u32 %v3801_v4, %v3798_v45  ;;  %v10000_v55 = vor.u32 %v2572_v12, %v2569_v27  ;;  %v3789_v22 = vrot.slane %v3787_v13, 3 }
 0x21d   : > { %v12344_v50 = vsel %vm9990_vm11, 4294967295, %v12343_v50  ;;  %v2297_v11 = vsel %vm9990_vm11, 0, %v9961_v56  ;;  %v3792_v18 = vrot.slane %v3790_v48, 4  ;;  %v3760_v36 = vshrl.u32 %v9982_v40, 16  ;;  %v10017_v48 = vpop.f32.mrf.mxu0 }
 0x21e   : > { %12345 = vst [vmem:[#allocation31_spill] sm:$0xff] %v12344_v50  ;;  %v1194_v34 = vadd.f32 %v1193_v3, %v1105_v43  ;;  %v4156_v52 = vshrl.u32 %v2297_v11, 16  ;;  %v4159_v10 = vshll.u32 %v2297_v11, 16  ;;  %v2764_v45 = vsel %vm9561_vm3, 0, %v9611_v9  ;;  %v12347_v43 = vld [vmem:[#allocation35_spill] sm:$0xff] }
 0x21f   : > { %v1262_v4 = vpack.c.bf16 %v1230_v42, %v1230_v42  ;;  %v1978_v32 = vsel %vm1946_vm10, 65537, %v12096_v59  ;;  %vm12346_vm1 = vsmask.f32 4352  ;;  %v1395_v62 = vadd.s32 184, %v8419_v35  ;;  %v1106_v7 = vpop.f32.mrf.mxu2 }
 0x220   : > { %v2574_v13 = vsel %vm12346_vm1, %v9842_v1, %v10000_v55  ;;  %v1231_v16 = vmax.f32 %v1194_v34, 0.0  ;;  %v4158_v25 = vrot.slane %v4156_v52, 3  ;;  %v4161_v54 = vrot.slane %v4159_v10, 4 }
 0x221   : > { %v2010_v57 = vunpack.c.l.b16 %v1978_v32  ;;  %v10019_v27 = vor.u32 %v3792_v18, %v3789_v22  ;;  %v3763_v12 = vshll.u32 %v9982_v40, 16  ;;  %v2683_v5 = vunpack.c.l.b16 %v2574_v13  ;;  %v1195_v40 = vpop.f32.mrf.mxu3 }
 0x222   : > { %v2684_v42 = vunpack.c.h.b16 %v2574_v13  ;;  %v1263_v41 = vpack.c.bf16 %v1231_v16, %v1231_v16  ;;  %v1018_v3 = vadd.f32 %v1017_v0, %v12347_v43  ;;  %v10023_v11 = vor.u32 %v4161_v54, %v4158_v25  ;;  %v1020_v16 = vpop.f32.mrf.mxu1 }
 0x223   : > { %v2027_v1 = vpack.c.b16 %v8481_v15, %v2010_v57  ;;  %vm2687_vm14 = vcmp.ne.s32.totalorder %v2683_v5, %v8624_v37  ;;  %v3859_v34 = vshrl.u32 %v2764_v45, 16  ;;  %v1569_v52 = vand.u32 15, %v1395_v62 }
 0x224   : > { %vm2688_vm4 = vcmp.ne.s32.totalorder %v2684_v42, %v8634_v47  ;;  %v1326_v22 = vunpack.c.l.b16 %v1262_v4  ;;  %v1327_v18 = vunpack.c.l.b16 %v1263_v41  ;;  %v1107_v10 = vadd.f32 %v1106_v7, %v1018_v3  ;;  %v10038_v4 = vld [vmem:[#allocation10] ss:$0 sm:$0xff] }
 0x225   : > { %v2164_v32 = vshrl.u32 %v2027_v1, 16  ;;  %vm10028_vm10 = vmpackc.low %vm2688_vm4, %vm2687_vm14  ;;  %v12348_v13 = vmov 0  ;;  %v4163_v0 = vsel %vm12346_vm1, %v9951_v6, %v10023_v11  ;;  %v2167_v25 = vshll.u32 %v2027_v1, 16 }
 0x226   : > { %v12349_v13 = vsel %vm10028_vm10, 4294967295, %v12348_v13  ;;  %v2741_v54 = vsel %vm10028_vm10, 0, %v9611_v9  ;;  %v3862_v62 = vshll.u32 %v2764_v45, 16  ;;  %v10040_v7 = vpack.c.b16 %v1327_v18, %v1326_v22  ;;  %vm12352_vm14 = vmmov %vm12346_vm1  ;;  %4975 = vmatmul.bf16.gmra.mxu0 %v4163_v0  ;;  %v10052_v45 = vpop.f32.mrf.mxu0 }
 0x227   : > { %12350 = vst [vmem:[#allocation35_spill] sm:$0xff] %v12349_v13  ;;  %v10045_v57 = vsel %vm12352_vm14, %v9795_v2, %v9996_v61  ;;  %vm12354_vm4 = vmmov %vm12346_vm1  ;;  %v2166_v5 = vrot.slane %v2164_v32, 4  ;;  %v1196_v42 = vadd.f32 %v1195_v40, %v1107_v10  ;;  %v2169_v41 = vrot.slane %v2167_v25, 5  ;;  %v12357_v32 = vld [vmem:[#allocation40_spill] sm:$0xff] }
 0x228   : > { %12351 = vst [vmem:[#allocation71_spill] sm:$0xff] %v10040_v7  ;;  %v3803_v6 = vsel %vm12354_vm4, %v9849_v17, %v9998_v38  ;;  %v10050_v43 = vrot.slane %v2741_v54, 1  ;;  %vm1843_vm1 = vcmp.eq.s32.totalorder %v1569_v52, 15  ;;  %5034 = vmatmul.bf16.gmra.mxu1 %v10045_v57  ;;  %vm12355_vm3 = vmmov %vm12354_vm4  ;;  %v3762_v3 = vrot.slane %v3760_v36, 3 }
 0x229   : > { %12353 = vst [vmem:[#allocation72_spill] sm:$0xff] %v10045_v57  ;;  %v3794_v2 = vsel %vm12355_vm3, %v9943_v21, %v10019_v27  ;;  %v3765_v1 = vrot.slane %v3763_v12, 4  ;;  %v3861_v22 = vrot.slane %v3859_v34, 3  ;;  %vm2387_vm14 = vmpackc.low %vm1843_vm1, %vm1843_vm1  ;;  %5212 = vmatmul.bf16.gmra.mxu3 %v3803_v6  ;;  %v2170_v17 = vor.u32 %v2169_v41, %v2166_v5  ;;  %v1109_v12 = vpop.f32.mrf.mxu2  ;;  %v1198_v5 = vpop.f32.mrf.mxu3 }
 0x22a   : > { %5123 = vmatmul.bf16.gmra.mxu2 %v3794_v2  ;;  %vm12356_vm4 = vcmask 1046528   ;;  %v3864_v18 = vrot.slane %v3862_v62, 4  ;;  %v2419_v10 = vsel %vm2387_vm14, 65537, %v12096_v59  ;;  %v4912_v40 = vadd.f32 %v10038_v4, %v9580_v53  ;;  %v10068_v2 = vpop.f32.mrf.mxu1 }
 0x22b   : > { %v3000_v52 = vsel %vm12356_vm4, %v9947_v30, %v10050_v43  ;;  %v1021_v0 = vadd.f32 %v1020_v16, %v12357_v32  ;;  %v2915_v21 = vshll.u32 %v9707_v49, 16  ;;  %v1232_v36 = vmax.f32 %v1196_v42, 0.0 }
 0x22c   : > { %vm12358_vm3 = vsmask.f32 3328  ;;  %v3850_v25 = vshrl.u32 %v3000_v52, 16  ;;  %v2451_v54 = vunpack.c.l.b16 %v2419_v10  ;;  %v3853_v41 = vshll.u32 %v3000_v52, 16  ;;  %v7497_v10 = vld [vmem:[#allocation8 + $0x1b8] sm:$0xff] }
 0x22d   : > { %v2171_v34 = vsel %vm12358_vm3, %v9966_v26, %v2170_v17  ;;  %v1110_v6 = vadd.f32 %v1109_v12, %v1021_v0  ;;  %v10070_v13 = vor.u32 %v3765_v1, %v3762_v3  ;;  %v10072_v53 = vor.u32 %v3864_v18, %v3861_v22  ;;  %v7505_v0 = vld [vmem:[#allocation8 + $0x1f8] sm:$0xff]  ;;  %5436 = vmatpush.bf16.msrb.mxu2 %v7497_v10 }
 0x22e   : > { %v2270_v30 = vunpack.c.l.b16 %v2171_v34  ;;  %v2271_v62 = vunpack.c.h.b16 %v2171_v34  ;;  %v2277_v16 = vunpack.c.l.b16 %v2170_v17  ;;  %v2911_v42 = vshrl.u32 %v9611_v9, 16  ;;  %v10085_v34 = vpop.f32.mrf.mxu0  ;;  %5525 = vmatpush.bf16.msrb.mxu3 %v7505_v0 }
 0x22f   : > { %v1199_v32 = vadd.f32 %v1198_v5, %v1110_v6  ;;  %v2278_v26 = vunpack.c.h.b16 %v2170_v17  ;;  %v1264_v12 = vpack.c.bf16 %v1232_v36, %v1232_v36  ;;  %v12359_v52 = vmov 0  ;;  %12362 = vst [vmem:[#allocation73_spill] sm:$0xff] %v10085_v34 }
 0x230   : > { %vm2274_vm1 = vcmp.ne.s32.totalorder %v2270_v30, %v8624_v37  ;;  %vm2275_vm14 = vcmp.ne.s32.totalorder %v2271_v62, %v8634_v47  ;;  %v2913_v3 = vor.u32 %v2911_v42, %v9968_v60  ;;  %v10082_v1 = vrot.slane %v2915_v21, 1 }
 0x231   : > { %vm10077_vm4 = vmpackc.low %vm2275_vm14, %vm2274_vm1  ;;  %v2471_v22 = vpack.c.b16 %v2451_v54, %v8481_v15  ;;  %v1233_v18 = vmax.f32 %v1199_v32, 0.0  ;;  %v3852_v6 = vrot.slane %v3850_v25, 3  ;;  %v3855_v5 = vrot.slane %v3853_v41, 4  ;;  %v10101_v0 = vpop.f32.mrf.mxu2  ;;  %v10105_v9 = vpop.f32.mrf.mxu3 }
 0x232   : > { %v12360_v52 = vsel %vm10077_vm4, 4294967295, %v12359_v52  ;;  %v2298_v17 = vsel %vm10077_vm4, 0, %v10040_v7  ;;  %vm10091_vm3 = vcmp.ne.s32.totalorder %v2277_v16, %v8624_v37  ;;  %v1397_v21 = vadd.s32 200, %v8419_v35  ;;  %v5000_v34 = vpop.f32.mrf.mxu1 }
 0x233   : > { %12361 = vst [vmem:[#allocation40_spill] sm:$0xff] %v12360_v52  ;;  %v4219_v36 = vshrl.u32 %v2298_v17, 16  ;;  %v4222_v30 = vshll.u32 %v2298_v17, 16  ;;  %v1265_v54 = vpack.c.bf16 %v1233_v18, %v1233_v18  ;;  %vm10097_vm1 = vcmp.ne.s32.totalorder %v2278_v26, %v8634_v47 }
 0x234   : > { %v2576_v42 = vshrl.u32 %v2471_v22, 16  ;;  %v2579_v25 = vshll.u32 %v2471_v22, 16  ;;  %v1328_v41 = vunpack.c.l.b16 %v1264_v12  ;;  %vm12367_vm14 = vsmask.f32 7424  ;;  %vm11999_vm10 = vmpackc.low %vm10097_vm1, %vm10091_vm3 }
 0x235   : > { %v4221_v32 = vrot.slane %v4219_v36, 3  ;;  %v4224_v10 = vrot.slane %v4222_v30, 4  ;;  %v2918_v16 = vsel %vm12367_vm14, %v2913_v3, %v10082_v1  ;;  %v1329_v17 = vunpack.c.l.b16 %v1265_v54 }
 0x236   : > { %v10107_v57 = vor.u32 %v3855_v5, %v3852_v6  ;;  %v2578_v18 = vrot.slane %v2576_v42, 3  ;;  %v2581_v26 = vrot.slane %v2579_v25, 4  ;;  %v1583_v12 = vand.u32 15, %v1397_v21  ;;  %v7489_v21 = vld [vmem:[#allocation8 + $0x178] sm:$0xff] }
 0x237   : > { %v10109_v46 = vor.u32 %v4224_v10, %v4221_v32  ;;  %v10115_v22 = vpack.c.b16 %v1329_v17, %v1328_v41  ;;  %v5001_v36 = vadd.f32 %v5000_v34, %v4912_v40  ;;  %vm12369_vm14 = vsmask.f32 4352  ;;  %v10133_v34 = vpop.f32.mrf.mxu0  ;;  %v7513_v42 = vld [vmem:[#allocation8 + $0x238] sm:$0xff]  ;;  %5347 = vmatpush.bf16.msrb.mxu1 %v7489_v21 }
 0x238   : > { %v10120_v3 = vsel %vm12369_vm14, %v9996_v61, %v10070_v13  ;;  %v10122_v6 = vor.u32 %v2581_v26, %v2578_v18  ;;  %vm12371_vm2 = vmmov %vm12369_vm14  ;;  %v3823_v54 = vshrl.u32 %v2918_v16, 16  ;;  %v2765_v40 = vsel %vm9654_vm0, 0, %v9707_v49  ;;  %5614 = vmatpush.bf16.msrb.mxu0 %v7513_v42 }
 0x239   : > { %12368 = vst [vmem:[#allocation74_spill] sm:$0xff] %v10115_v22  ;;  %v4226_v5 = vsel %vm12371_vm2, %v10023_v11, %v10109_v46  ;;  %vm12372_vm8 = vmmov %vm12371_vm2  ;;  %5039 = vmatmul.bf16.gmra.mxu1 %v10120_v3  ;;  %v3826_v10 = vshll.u32 %v2918_v16, 16  ;;  %v3922_v18 = vshrl.u32 %v2765_v40, 16  ;;  %v3925_v26 = vshll.u32 %v2765_v40, 16 }
 0x23a   : > { %12370 = vst [vmem:[#allocation75_spill] sm:$0xff] %v10120_v3  ;;  %v3866_v30 = vsel %vm12372_vm8, %v9998_v38, %v10072_v53  ;;  %4980 = vmatmul.bf16.gmra.mxu0 %v4226_v5  ;;  %vm12373_vm14 = vmmov %vm12371_vm2  ;;  %v2299_v38 = vsel %vm11999_vm10, 0, %v10115_v22  ;;  %v4914_v5 = vadd.f32 %v10038_v4, %v9624_v33  ;;  %v5002_v25 = vpop.f32.mrf.mxu1  ;;  %v12377_v21 = vmov 0 }
 0x23b   : > { %v3857_v61 = vsel %vm12373_vm14, %v10019_v27, %v10107_v57  ;;  %vm12374_vm8 = vmmov %vm12371_vm2  ;;  %vm10148_vm2 = vcmp.eq.s32.totalorder %v1583_v12, 15  ;;  %5217 = vmatmul.bf16.gmra.mxu3 %v3866_v30  ;;  %v4282_v27 = vshrl.u32 %v2299_v38, 16  ;;  %v4285_v41 = vshll.u32 %v2299_v38, 16 }
 0x23c   : > { %v2583_v11 = vsel %vm12374_vm8, %v10000_v55, %v10122_v6  ;;  %5128 = vmatmul.bf16.gmra.mxu2 %v3857_v61  ;;  %vm2389_vm14 = vmpackc.low %vm10148_vm2, %vm10148_vm2  ;;  %v5089_v55 = vpop.f32.mrf.mxu2  ;;  %v5178_v61 = vpop.f32.mrf.mxu3  ;;  %v3825_v38 = vrot.slane %v3823_v54, 3  ;;  %v2923_v42 = vshll.u32 %v9793_v51, 16  ;;  %v5003_v23 = vadd.f32 %v5002_v25, %v4914_v5 }
 0x23d   : > { %v2690_v32 = vunpack.c.l.b16 %v2583_v11  ;;  %v2691_v17 = vunpack.c.h.b16 %v2583_v11  ;;  %v2421_v12 = vsel %vm2389_vm14, 65537, %v12096_v59  ;;  %v5090_v30 = vadd.f32 %v5089_v55, %v5001_v36 }
 0x23e   : > { %v4284_v16 = vrot.slane %v4282_v27, 3  ;;  %v4287_v11 = vrot.slane %v4285_v41, 4  ;;  %v2453_v40 = vunpack.c.l.b16 %v2421_v12  ;;  %v3828_v3 = vrot.slane %v3826_v10, 4 }
 0x23f   : > { %vm2694_vm8 = vcmp.ne.s32.totalorder %v2690_v32, %v8624_v37  ;;  %vm2695_vm10 = vcmp.ne.s32.totalorder %v2691_v17, %v8634_v47  ;;  %v10165_v32 = vadd.f32 %v5178_v61, %v5090_v30  ;;  %v3924_v54 = vrot.slane %v3922_v18, 3  ;;  %v10175_v55 = vpop.f32.mrf.mxu0 }
 0x240   : > { %vm10160_vm2 = vmpackc.low %vm2695_vm10, %vm2694_vm8  ;;  %v3927_v27 = vrot.slane %v3925_v26, 4  ;;  %v2472_v41 = vpack.c.b16 %v2453_v40, %v8481_v15  ;;  %v4917_v17 = vadd.f32 %v10038_v4, %v9683_v28  ;;  %12381 = vst [vmem:[#allocation78_spill] sm:$0xff] %v10175_v55  ;;  %v2919_v12 = vshrl.u32 %v9707_v49, 16 }
 0x241   : > { %v12378_v21 = vsel %vm10160_vm2, 4294967295, %v12377_v21  ;;  %12380 = vst [vmem:[#allocation77_spill] sm:$0xff] %v10165_v32  ;;  %v2742_v33 = vsel %vm10160_vm2, 0, %v9707_v49  ;;  %v4288_v30 = vor.u32 %v4287_v11, %v4284_v16  ;;  %vm12382_vm10 = vcmask 1046528  }
 0x242   : > { %12379 = vst [vmem:[#allocation76_spill] sm:$0xff] %v12378_v21  ;;  %v10170_v36 = vrot.slane %v2742_v33, 1  ;;  %v10181_v5 = vrot.slane %v2923_v42, 1  ;;  %v2585_v61 = vshrl.u32 %v2472_v41, 16  ;;  %v10183_v25 = vor.u32 %v3828_v3, %v3825_v38  ;;  %v5005_v38 = vpop.f32.mrf.mxu1 }
 0x243   : > { %v2588_v40 = vshll.u32 %v2472_v41, 16  ;;  %v10185_v21 = vor.u32 %v3927_v27, %v3924_v54  ;;  %v2921_v28 = vor.u32 %v2919_v12, %v10082_v1  ;;  %v1399_v16 = vadd.s32 216, %v8419_v35 }
 0x244   : > { %v3002_v10 = vsel %vm12382_vm10, %v10050_v43, %v10170_v36  ;;  %v5091_v33 = vpop.f32.mrf.mxu2  ;;  %v2587_v32 = vrot.slane %v2585_v61, 3  ;;  %v5180_v49 = vpop.f32.mrf.mxu3  ;;  %vm12383_vm14 = vsmask.f32 4352  ;;  %vm12384_vm8 = vsmask.f32 7424 }
 0x245   : > { %v3913_v18 = vshrl.u32 %v3002_v10, 16  ;;  %v3916_v26 = vshll.u32 %v3002_v10, 16  ;;  %v5092_v11 = vadd.f32 %v5091_v33, %v5003_v23  ;;  %v2590_v42 = vrot.slane %v2588_v40, 4  ;;  %vm12385_vm10 = vmmov %vm12383_vm14 }
 0x246   : > { %v4289_v3 = vsel %vm12383_vm14, %v10109_v46, %v4288_v30  ;;  %v2926_v41 = vsel %vm12384_vm8, %v2921_v28, %v10181_v5  ;;  %v1597_v10 = vand.u32 15, %v1399_v16  ;;  %v5006_v27 = vadd.f32 %v5005_v38, %v4917_v17  ;;  %vm12386_vm14 = vmmov %vm12385_vm10 }
 0x247   : > { %v3915_v55 = vrot.slane %v3913_v18, 3  ;;  %v3918_v43 = vrot.slane %v3916_v26, 4  ;;  %v10193_v54 = vadd.f32 %v5180_v49, %v5092_v11  ;;  %v10197_v12 = vor.u32 %v2590_v42, %v2587_v32  ;;  %v10204_v46 = vpop.f32.mrf.mxu0  ;;  %vm12387_vm8 = vmmov %vm12385_vm10 }
 0x248   : > { %v10202_v23 = vsel %vm12385_vm10, %v10070_v13, %v10183_v25  ;;  %vm1847_vm0 = vcmp.eq.s32.totalorder %v1597_v10, 15  ;;  %v3929_v32 = vsel %vm12387_vm8, %v10072_v53, %v10185_v21  ;;  %vm12388_vm2 = vmmov %vm12387_vm8  ;;  %v2766_v13 = vsel %vm9739_vm6, 0, %v9793_v51 }
 0x249   : > { %v10195_v1 = vor.u32 %v3918_v43, %v3915_v55  ;;  %5044 = vmatmul.bf16.gmra.mxu1 %v10202_v23  ;;  %v2592_v17 = vsel %vm12388_vm2, %v10122_v6, %v10197_v12  ;;  %vm2391_vm10 = vmpackc.low %vm1847_vm0, %vm1847_vm0  ;;  %v3886_v55 = vshrl.u32 %v2926_v41, 16  ;;  %v4919_v18 = vadd.f32 %v10038_v4, %v9715_v63 }
 0x24a   : > { %4985 = vmatmul.bf16.gmra.mxu0 %v4289_v3  ;;  %v2697_v30 = vunpack.c.l.b16 %v2592_v17  ;;  %v2698_v61 = vunpack.c.h.b16 %v2592_v17  ;;  %v3889_v53 = vshll.u32 %v2926_v41, 16  ;;  %v3985_v6 = vshrl.u32 %v2766_v13, 16  ;;  %v5007_v3 = vpop.f32.mrf.mxu1  ;;  %v7496_v17 = vld [vmem:[#allocation8 + $0x1b0] sm:$0xff] }
 0x24b   : > { %v3920_v49 = vsel %vm12386_vm14, %v10107_v57, %v10195_v1  ;;  %5222 = vmatmul.bf16.gmra.mxu3 %v3929_v32  ;;  %v2423_v57 = vsel %vm2391_vm10, 65537, %v12096_v59  ;;  %v3988_v33 = vshll.u32 %v2766_v13, 16  ;;  %v12389_v11 = vmov 0  ;;  %v7504_v13 = vld [vmem:[#allocation8 + $0x1f0] sm:$0xff]  ;;  %5437 = vmatpush.bf16.msrb.mxu2 %v7496_v17 }
 0x24c   : > { %5133 = vmatmul.bf16.gmra.mxu2 %v3920_v49  ;;  %v2455_v26 = vunpack.c.l.b16 %v2423_v57  ;;  %v5094_v40 = vpop.f32.mrf.mxu2  ;;  %vm2701_vm2 = vcmp.ne.s32.totalorder %v2697_v30, %v8624_v37  ;;  %vm2702_vm14 = vcmp.ne.s32.totalorder %v2698_v61, %v8634_v47  ;;  %v5183_v16 = vpop.f32.mrf.mxu3  ;;  %v2931_v43 = vshll.u32 %v9866_v14, 16  ;;  %5526 = vmatpush.bf16.msrb.mxu3 %v7504_v13 }
 0x24d   : > { %v5095_v28 = vadd.f32 %v5094_v40, %v5006_v27  ;;  %vm10224_vm0 = vmpackc.low %vm2702_vm14, %vm2701_vm2  ;;  %v1401_v63 = vadd.s32 232, %v8419_v35  ;;  %v3888_v38 = vrot.slane %v3886_v55, 3  ;;  %v5008_v27 = vadd.f32 %v5007_v3, %v4919_v18 }
 0x24e   : > { %v12390_v11 = vsel %vm10224_vm0, 4294967295, %v12389_v11  ;;  %v2473_v42 = vpack.c.b16 %v2455_v26, %v8481_v15  ;;  %v2743_v41 = vsel %vm10224_vm0, 0, %v9793_v51  ;;  %v3891_v49 = vrot.slane %v3889_v53, 4 }
 0x24f   : > { %12391 = vst [vmem:[#allocation79_spill] sm:$0xff] %v12390_v11  ;;  %v10234_v10 = vadd.f32 %v5183_v16, %v5095_v28  ;;  %v10236_v32 = vrot.slane %v2743_v41, 1  ;;  %v3987_v30 = vrot.slane %v3985_v6, 3  ;;  %v3990_v61 = vrot.slane %v3988_v33, 4  ;;  %v10238_v40 = vpop.f32.mrf.mxu0 }
 0x250   : > { %v2594_v57 = vshrl.u32 %v2473_v42, 16  ;;  %v2597_v26 = vshll.u32 %v2473_v42, 16  ;;  %vm12392_vm8 = vcmask 1046528   ;;  %v2927_v39 = vshrl.u32 %v9793_v51, 16 }
 0x251   : > { %v3004_v55 = vsel %vm12392_vm8, %v10170_v36, %v10236_v32  ;;  %v10244_v28 = vrot.slane %v2931_v43, 1  ;;  %v1611_v18 = vand.u32 15, %v1401_v63  ;;  %v10246_v6 = vor.u32 %v3891_v49, %v3888_v38 }
 0x252   : > { %v3976_v53 = vshrl.u32 %v3004_v55, 16  ;;  %v3979_v16 = vshll.u32 %v3004_v55, 16  ;;  %v2596_v3 = vrot.slane %v2594_v57, 3  ;;  %v2929_v33 = vor.u32 %v2927_v39, %v10181_v5  ;;  %v5010_v5 = vpop.f32.mrf.mxu1 }
 0x253   : > { %v2599_v42 = vrot.slane %v2597_v26, 4  ;;  %vm1849_vm10 = vcmp.eq.s32.totalorder %v1611_v18, 15  ;;  %v4922_v41 = vadd.f32 %v10038_v4, %v9764_v44  ;;  %v10251_v43 = vor.u32 %v3990_v61, %v3987_v30 }
 0x254   : > { %v5096_v36 = vpop.f32.mrf.mxu2  ;;  %v3978_v11 = vrot.slane %v3976_v53, 3  ;;  %v3981_v51 = vrot.slane %v3979_v16, 4  ;;  %vm2393_vm2 = vmpackc.low %vm1849_vm10, %vm1849_vm10  ;;  %v5185_v63 = vpop.f32.mrf.mxu3  ;;  %vm12393_vm14 = vsmask.f32 7424  ;;  %v2767_v44 = vsel %vm9831_vm7, 0, %v9866_v14 }
 0x255   : > { %v5097_v17 = vadd.f32 %v5096_v36, %v5008_v27  ;;  %v2934_v13 = vsel %vm12393_vm14, %v2929_v33, %v10244_v28  ;;  %v10255_v38 = vor.u32 %v2599_v42, %v2596_v3  ;;  %v2425_v39 = vsel %vm2393_vm2, 65537, %v12096_v59  ;;  %v7512_v33 = vld [vmem:[#allocation8 + $0x230] sm:$0xff] }
 0x256   : > { %v10258_v49 = vor.u32 %v3981_v51, %v3978_v11  ;;  %v2457_v57 = vunpack.c.l.b16 %v2425_v39  ;;  %v1403_v30 = vadd.s32 248, %v8419_v35  ;;  %v5011_v27 = vadd.f32 %v5010_v5, %v4922_v41  ;;  %5615 = vmatpush.bf16.msrb.mxu0 %v7512_v33 }
 0x257   : > { %v10264_v61 = vadd.f32 %v5185_v63, %v5097_v17  ;;  %vm12394_vm8 = vsmask.f32 4352  ;;  %v3949_v55 = vshrl.u32 %v2934_v13, 16  ;;  %v10278_v35 = vpop.f32.mrf.mxu0  ;;  %v3952_v16 = vshll.u32 %v2934_v13, 16 }
 0x258   : > { %v10269_v26 = vsel %vm12394_vm8, %v10183_v25, %v10246_v6  ;;  %vm12395_vm10 = vmmov %vm12394_vm8  ;;  %v4048_v3 = vshrl.u32 %v2767_v44, 16  ;;  %v2474_v42 = vpack.c.b16 %v2457_v57, %v8481_v15  ;;  %v12398_v41 = vmov 0 }
 0x259   : > { %v2601_v51 = vsel %vm12395_vm10, %v10197_v12, %v10255_v38  ;;  %vm12396_vm2 = vmmov %vm12394_vm8  ;;  %5049 = vmatmul.bf16.gmra.mxu1 %v10269_v26  ;;  %v7488_v12 = vld [vmem:[#allocation8 + $0x170] sm:$0xff]  ;;  %v4924_v17 = vadd.f32 %v10038_v4, %v9807_v20  ;;  %v3951_v13 = vrot.slane %v3949_v55, 3  ;;  %v3954_v57 = vrot.slane %v3952_v16, 4 }
 0x25a   : > { %v3992_v11 = vsel %vm12396_vm2, %v10185_v21, %v10251_v43  ;;  %v2704_v18 = vunpack.c.l.b16 %v2601_v51  ;;  %v2705_v53 = vunpack.c.h.b16 %v2601_v51  ;;  %5266 = vmatmul.bf16.vlgmr.msra.gmra.mxu0 %v9218_v58  ;;  %vm12397_vm14 = vmmov %vm12396_vm2  ;;  %v4051_v58 = vshll.u32 %v2767_v44, 16  ;;  %5348 = vmatpush.bf16.msrb.mxu1 %v7488_v12 }
 0x25b   : > { %v3983_v25 = vsel %vm12397_vm14, %v10195_v1, %v10258_v49  ;;  %5227 = vmatmul.bf16.gmra.mxu3 %v3992_v11  ;;  %v1625_v21 = vand.u32 15, %v1403_v30  ;;  %v2603_v1 = vshrl.u32 %v2474_v42, 16  ;;  %v2606_v36 = vshll.u32 %v2474_v42, 16  ;;  %v5012_v11 = vpop.f32.mrf.mxu1 }
 0x25c   : > { %5138 = vmatmul.bf16.gmra.mxu2 %v3983_v25  ;;  %vm2708_vm8 = vcmp.ne.s32.totalorder %v2704_v18, %v8624_v37  ;;  %vm2709_vm10 = vcmp.ne.s32.totalorder %v2705_v53, %v8634_v47  ;;  %v5099_v63 = vpop.f32.mrf.mxu2  ;;  %v5188_v44 = vpop.f32.mrf.mxu3  ;;  %v4050_v18 = vrot.slane %v4048_v3, 3  ;;  %v4053_v53 = vrot.slane %v4051_v58, 4 }
 0x25d   : > { %vm10287_vm2 = vmpackc.low %vm2709_vm10, %vm2708_vm8  ;;  %vm1851_vm14 = vcmp.eq.s32.totalorder %v1625_v21, 15  ;;  %v5100_v5 = vadd.f32 %v5099_v63, %v5011_v27  ;;  %v2605_v51 = vrot.slane %v2603_v1, 3  ;;  %v2608_v25 = vrot.slane %v2606_v36, 4 }
 0x25e   : > { %v12399_v41 = vsel %vm10287_vm2, 4294967295, %v12398_v41  ;;  %v2744_v39 = vsel %vm10287_vm2, 0, %v9866_v14  ;;  %vm2395_vm8 = vmpackc.low %vm1851_vm14, %vm1851_vm14  ;;  %v5013_v55 = vadd.f32 %v5012_v11, %v4924_v17  ;;  %vm12401_vm10 = vcmask 1046528  }
 0x25f   : > { %12400 = vst [vmem:[#allocation80_spill] sm:$0xff] %v12399_v41  ;;  %v3005_v30 = vrot.slane %v2744_v39, 1  ;;  %v2427_v12 = vsel %vm2395_vm8, 65537, %v12096_v59  ;;  %v10297_v20 = vadd.f32 %v5188_v44, %v5100_v5  ;;  %v2939_v42 = vshll.u32 %v9961_v56, 16  ;;  %v10304_v3 = vpop.f32.mrf.mxu0 }
 0x260   : > { %v2609_v16 = vor.u32 %v2608_v25, %v2605_v51  ;;  %v2459_v63 = vunpack.c.l.b16 %v2427_v12  ;;  %v4927_v1 = vadd.f32 %v10038_v4, %v9844_v19  ;;  %vm12402_vm14 = vsmask.f32 4352 }
 0x261   : > { %v3006_v33 = vsel %vm12401_vm10, %v10236_v32, %v3005_v30  ;;  %v10309_v39 = vor.u32 %v3954_v57, %v3951_v13  ;;  %v2935_v32 = vshrl.u32 %v9866_v14, 16  ;;  %v10314_v25 = vor.u32 %v4053_v53, %v4050_v18 }
 0x262   : > { %v4039_v27 = vshrl.u32 %v3006_v33, 16  ;;  %v4042_v21 = vshll.u32 %v3006_v33, 16  ;;  %v2610_v59 = vsel %vm12402_vm14, %v10255_v38, %v2609_v16  ;;  %v2475_v17 = vpack.c.b16 %v2459_v63, %v8481_v15 }
 0x263   : > { %v2711_v5 = vunpack.c.l.b16 %v2610_v59  ;;  %v2712_v44 = vunpack.c.h.b16 %v2610_v59  ;;  %v10316_v19 = vrot.slane %v2939_v42, 1  ;;  %v5015_v38 = vpop.f32.mrf.mxu1  ;;  %v2937_v13 = vor.u32 %v2935_v32, %v10244_v28  ;;  %v12411_v32 = vld [vmem:[#allocation68_spill] sm:$0xff] }
 0x264   : > { %v4041_v58 = vrot.slane %v4039_v27, 3  ;;  %v4044_v36 = vrot.slane %v4042_v21, 4  ;;  %v5101_v51 = vpop.f32.mrf.mxu2  ;;  %v2612_v12 = vshrl.u32 %v2475_v17, 16  ;;  %v5190_v27 = vpop.f32.mrf.mxu3  ;;  %v2615_v15 = vshll.u32 %v2475_v17, 16 }
 0x265   : > { %v5102_v33 = vadd.f32 %v5101_v51, %v5013_v55  ;;  %vm2715_vm8 = vcmp.ne.s32.totalorder %v2711_v5, %v8624_v37  ;;  %vm2716_vm10 = vcmp.ne.s32.totalorder %v2712_v44, %v8634_v47  ;;  %v12403_v57 = vmov 0 }
 0x266   : > { %v10312_v11 = vor.u32 %v4044_v36, %v4041_v58  ;;  %vm10321_vm14 = vmpackc.low %vm2716_vm10, %vm2715_vm8  ;;  %v2614_v21 = vrot.slane %v2612_v12, 3  ;;  %v5016_v53 = vadd.f32 %v5015_v38, %v4927_v1  ;;  %v2617_v42 = vrot.slane %v2615_v15, 4 }
 0x267   : > { %v12404_v57 = vsel %vm10321_vm14, 4294967295, %v12403_v57  ;;  %v10325_v18 = vadd.f32 %v5190_v27, %v5102_v33  ;;  %v2745_v55 = vsel %vm10321_vm14, 0, %v9961_v56  ;;  %vm12406_vm7 = vsmask.f32 4352 }
 0x268   : > { %12405 = vst [vmem:[#allocation81_spill] sm:$0xff] %v12404_v57  ;;  %v10333_v63 = vsel %vm12406_vm7, %v10246_v6, %v10309_v39  ;;  %vm12407_vm8 = vmmov %vm12406_vm7  ;;  %v10338_v58 = vrot.slane %v2745_v55, 1  ;;  %v2768_v1 = vsel %vm9926_vm12, 0, %v9961_v56  ;;  %v10350_v59 = vor.u32 %v2617_v42, %v2614_v21 }
 0x269   : > { %v4055_v28 = vsel %vm12407_vm8, %v10251_v43, %v10314_v25  ;;  %5054 = vmatmul.bf16.gmra.mxu1 %v10333_v63  ;;  %vm12408_vm10 = vmmov %vm12406_vm7  ;;  %vm12409_vm7 = vsmask.f32 7424  ;;  %v10352_v43 = vpop.f32.mrf.mxu0  ;;  %vm12410_vm8 = vcmask 1046528   ;;  %v4929_v5 = vadd.f32 %v10038_v4, %v12411_v32 }
 0x26a   : > { %5271 = vmatmul.bf16.gmra.mxu0 %v9396_v31  ;;  %v4046_v36 = vsel %vm12408_vm10, %v10258_v49, %v10312_v11  ;;  %v2942_v6 = vsel %vm12409_vm7, %v2937_v13, %v10316_v19  ;;  %v3008_v17 = vsel %vm12410_vm8, %v3005_v30, %v10338_v58  ;;  %v4111_v44 = vshrl.u32 %v2768_v1, 16  ;;  %vm12412_vm12 = vmmov %vm12408_vm10 }
 0x26b   : > { %5232 = vmatmul.bf16.gmra.mxu3 %v4055_v28  ;;  %v2619_v51 = vsel %vm12412_vm12, %v2609_v16, %v10350_v59  ;;  %v4012_v12 = vshrl.u32 %v2942_v6, 16  ;;  %v4015_v33 = vshll.u32 %v2942_v6, 16  ;;  %v4102_v21 = vshrl.u32 %v3008_v17, 16  ;;  %v5017_v28 = vpop.f32.mrf.mxu1 }
 0x26c   : > { %5143 = vmatmul.bf16.gmra.mxu2 %v4046_v36  ;;  %v5104_v49 = vpop.f32.mrf.mxu2  ;;  %v2718_v27 = vunpack.c.l.b16 %v2619_v51  ;;  %v2719_v15 = vunpack.c.h.b16 %v2619_v51  ;;  %v5193_v13 = vpop.f32.mrf.mxu3  ;;  %v4105_v55 = vshll.u32 %v3008_v17, 16  ;;  %v4114_v42 = vshll.u32 %v2768_v1, 16  ;;  %v7503_v51 = vld [vmem:[#allocation8 + $0x1e8] sm:$0xff] }
 0x26d   : > { %v5105_v38 = vadd.f32 %v5104_v49, %v5016_v53  ;;  %v5018_v36 = vadd.f32 %v5017_v28, %v4929_v5  ;;  %v4014_v32 = vrot.slane %v4012_v12, 3  ;;  %v4017_v16 = vrot.slane %v4015_v33, 4  ;;  %v7495_v53 = vld [vmem:[#allocation8 + $0x1a8] sm:$0xff]  ;;  %5527 = vmatpush.bf16.msrb.mxu3 %v7503_v51 }
 0x26e   : > { %vm2722_vm10 = vcmp.ne.s32.totalorder %v2718_v27, %v8624_v37  ;;  %vm2723_vm7 = vcmp.ne.s32.totalorder %v2719_v15, %v8634_v47  ;;  %v2947_v8 = vshll.u32 %v10040_v7, 16  ;;  %v12413_v6 = vmov 0  ;;  %5438 = vmatpush.bf16.msrb.mxu2 %v7495_v53 }
 0x26f   : > { %v10362_v30 = vadd.f32 %v5193_v13, %v5105_v38  ;;  %vm10365_vm12 = vmpackc.low %vm2723_vm7, %vm2722_vm10  ;;  %v4104_v17 = vrot.slane %v4102_v21, 3  ;;  %v4107_v1 = vrot.slane %v4105_v55, 4  ;;  %v4113_v49 = vrot.slane %v4111_v44, 3  ;;  %v12416_v13 = vld [vmem:[#allocation70_spill] sm:$0xff] }
 0x270   : > { %v12414_v6 = vsel %vm10365_vm12, 4294967295, %v12413_v6  ;;  %v4116_v57 = vrot.slane %v4114_v42, 4  ;;  %v2746_v5 = vsel %vm10365_vm12, 0, %v10040_v7  ;;  %v10374_v33 = vor.u32 %v4017_v16, %v4014_v32 }
 0x271   : > { %12415 = vst [vmem:[#allocation68_spill] sm:$0xff] %v12414_v6  ;;  %v10369_v27 = vpop.f32.mrf.mxu0  ;;  %v2943_v15 = vshrl.u32 %v9961_v56, 16  ;;  %v10377_v38 = vrot.slane %v2947_v8, 1  ;;  %v4932_v21 = vadd.f32 %v10038_v4, %v12416_v13  ;;  %v10381_v42 = vor.u32 %v4107_v1, %v4104_v17  ;;  %v12417_v8 = vld [vmem:[#allocation26_spill] sm:$0xff]  ;;  %v12420_v1 = vld [vmem:[#allocation61_spill] sm:$0xff] }
 0x272   : > { %v10383_v28 = vor.u32 %v4116_v57, %v4113_v49  ;;  %v10386_v6 = vrot.slane %v2746_v5, 1  ;;  %v934_v41 = vadd.f32 %v7690_v29, %v12417_v8  ;;  %vm12418_vm8 = vsmask.f32 4352  ;;  %v7487_v49 = vld [vmem:[#allocation8 + $0x168] sm:$0xff] }
 0x273   : > { %v5020_v53 = vpop.f32.mrf.mxu1  ;;  %v2945_v51 = vor.u32 %v2943_v15, %v10316_v19  ;;  %vm12419_vm10 = vsmask.f32 7424  ;;  %v2725_v17 = vunpack.c.l.b16 %v10350_v59  ;;  %vm12421_vm7 = vmmov %vm12418_vm8  ;;  %v7511_v5 = vld [vmem:[#allocation8 + $0x228] sm:$0xff]  ;;  %5349 = vmatpush.bf16.msrb.mxu1 %v7487_v49 }
 0x274   : > { %v5106_v12 = vpop.f32.mrf.mxu2  ;;  %v5195_v55 = vpop.f32.mrf.mxu3  ;;  %v5021_v16 = vadd.f32 %v5020_v53, %v4932_v21  ;;  %v4109_v19 = vsel %vm12421_vm7, %v10312_v11, %v10381_v42  ;;  %vm12422_vm12 = vmmov %vm12421_vm7  ;;  %v4934_v11 = vadd.f32 %v10038_v4, %v9971_v24  ;;  %v1023_v13 = vadd.f32 %v10068_v2, %v934_v41  ;;  %5616 = vmatpush.bf16.msrb.mxu0 %v7511_v5 }
 0x275   : > { %v5107_v44 = vadd.f32 %v5106_v12, %v5018_v36  ;;  %v10394_v36 = vsel %vm12418_vm8, %v10309_v39, %v10374_v33  ;;  %v2950_v57 = vsel %vm12419_vm10, %v2945_v51, %v10377_v38  ;;  %v4118_v29 = vsel %vm12422_vm12, %v10314_v25, %v10383_v28 }
 0x276   : > { %v2769_v39 = vsel %vm9990_vm11, 0, %v10040_v7  ;;  %v2726_v12 = vunpack.c.h.b16 %v10350_v59  ;;  %vm12423_vm8 = vcmask 1046528   ;;  %v4075_v25 = vshrl.u32 %v2950_v57, 16 }
 0x277   : > { %v10388_v32 = vadd.f32 %v5195_v55, %v5107_v44  ;;  %v3010_v15 = vsel %vm12423_vm8, %v10338_v58, %v10386_v6  ;;  %v4078_v55 = vshll.u32 %v2950_v57, 16  ;;  %v4174_v53 = vshrl.u32 %v2769_v39, 16 }
 0x278   : > { %v4177_v59 = vshll.u32 %v2769_v39, 16  ;;  %vm10420_vm12 = vcmp.ne.s32.totalorder %v2725_v17, %v8624_v37  ;;  %v12424_v51 = vmov 0  ;;  %v4168_v24 = vshll.u32 %v3010_v15, 16 }
 0x279   : > { %5059 = vmatmul.bf16.gmra.mxu1 %v10394_v36  ;;  %v10417_v21 = vpop.f32.mrf.mxu0  ;;  %v12425_v51 = vsel %vm10420_vm12, 4294967295, %v12424_v51  ;;  %vm10425_vm10 = vcmp.ne.s32.totalorder %v2726_v12, %v8634_v47  ;;  %v12427_v2 = vmov 0  ;;  %v4077_v49 = vrot.slane %v4075_v25, 3 }
 0x27a   : > { %5276 = vmatmul.bf16.gmra.mxu0 %v12420_v1  ;;  %12426 = vst [vmem:[#allocation70_spill] sm:$0xff] %v12425_v51  ;;  %v12428_v2 = vsel %vm10425_vm10, 4294967295, %v12427_v2  ;;  %v4080_v17 = vrot.slane %v4078_v55, 4  ;;  %v4176_v5 = vrot.slane %v4174_v53, 3  ;;  %vm12028_vm7 = vmpackc.low %vm10425_vm10, %vm10420_vm12  ;;  %v4179_v12 = vrot.slane %v4177_v59, 4 }
 0x27b   : > { %5237 = vmatmul.bf16.gmra.mxu3 %v4118_v29  ;;  %12429 = vst [vmem:[#allocation26_spill] sm:$0xff] %v12428_v2  ;;  %v5022_v41 = vpop.f32.mrf.mxu1  ;;  %v1112_v29 = vadd.f32 %v10101_v0, %v1023_v13  ;;  %v2747_v0 = vsel %vm12028_vm7, 0, %v10115_v22  ;;  %v2951_v55 = vshrl.u32 %v10040_v7, 16  ;;  %vm12431_vm8 = vsmask.f32 4352  ;;  %v7501_v2 = vld [vmem:[#allocation8 + $0x1d8] sm:$0xff] }
 0x27c   : > { %5148 = vmatmul.bf16.gmra.mxu2 %v4109_v19  ;;  %v5109_v44 = vpop.f32.mrf.mxu2  ;;  %v5198_v8 = vpop.f32.mrf.mxu3  ;;  %v4165_v19 = vshrl.u32 %v3010_v15, 16  ;;  %v5023_v39 = vadd.f32 %v5022_v41, %v4934_v11  ;;  %v4170_v15 = vrot.slane %v4168_v24, 4  ;;  %v4937_v11 = vadd.f32 %v10038_v4, %v10017_v48  ;;  %vm12433_vm7 = vmmov %vm12431_vm8 }
 0x27d   : > { %v5110_v58 = vadd.f32 %v5109_v44, %v5021_v16  ;;  %v2955_v44 = vshll.u32 %v10115_v22, 16  ;;  %v1201_v50 = vadd.f32 %v10105_v9, %v1112_v29  ;;  %v10446_v25 = vor.u32 %v4080_v17, %v4077_v49  ;;  %vm12434_vm12 = vmmov %vm12433_vm7 }
 0x27e   : > { %v4167_v16 = vrot.slane %v4165_v19, 3  ;;  %v10451_v9 = vor.u32 %v4179_v12, %v4176_v5  ;;  %v10457_v41 = vrot.slane %v2747_v0, 1  ;;  %v2953_v17 = vor.u32 %v2951_v55, %v10377_v38  ;;  %v12432_v5 = vld [vmem:[#allocation63_spill] sm:$0xff] }
 0x27f   : > { %v10430_v57 = vadd.f32 %v5198_v8, %v5110_v58  ;;  %v10453_v8 = vrot.slane %v2955_v44, 1  ;;  %v1234_v29 = vmax.f32 %v1201_v50, 0.0  ;;  %vm12435_vm10 = vsmask.f32 7424  ;;  %v7494_v12 = vld [vmem:[#allocation8 + $0x1a0] sm:$0xff] }
 0x280   : > { %v10449_v58 = vor.u32 %v4170_v15, %v4167_v16  ;;  %v4181_v50 = vsel %vm12434_vm12, %v10383_v28, %v10451_v9  ;;  %v7486_v15 = vld [vmem:[#allocation8 + $0x160] sm:$0xff]  ;;  %5439 = vmatpush.bf16.msrb.mxu2 %v7494_v12  ;;  %v4939_v28 = vadd.f32 %v10038_v4, %v10052_v45  ;;  %v7493_v12 = vld [vmem:[#allocation8 + $0x198] sm:$0xff]  ;;  %vm12439_vm12 = vcmask 1043456  }
 0x281   : > { %v2958_v38 = vsel %vm12435_vm10, %v2953_v17, %v10453_v8  ;;  %v7502_v44 = vld [vmem:[#allocation8 + $0x1e0] sm:$0xff]  ;;  %v1266_v0 = vpack.c.bf16 %v1234_v29, %v1234_v29  ;;  %5350 = vmatpush.bf16.msrb.mxu1 %v7486_v15  ;;  %v7485_v15 = vld [vmem:[#allocation8 + $0x158] sm:$0xff]  ;;  %vm12441_vm10 = vmmov %vm12433_vm7 }
 0x282   : > { %v10455_v19 = vpop.f32.mrf.mxu0  ;;  %v4172_v16 = vsel %vm12433_vm7, %v10381_v42, %v10449_v58  ;;  %v2770_v42 = vsel %vm10077_vm4, 0, %v10115_v22  ;;  %5528 = vmatpush.bf16.msrb.mxu3 %v7502_v44 }
 0x283   : > { %v5025_v24 = vpop.f32.mrf.mxu1  ;;  %v4237_v17 = vshrl.u32 %v2770_v42, 16  ;;  %v1330_v51 = vunpack.c.l.b16 %v1266_v0 }
 0x284   : > { %v5111_v13 = vpop.f32.mrf.mxu2  ;;  %v5200_v59 = vpop.f32.mrf.mxu3  ;;  %v5026_v49 = vadd.f32 %v5025_v24, %v4937_v11  ;;  %v4138_v11 = vshrl.u32 %v2958_v38, 16  ;;  %5440 = vmatpush.bf16.msrb.mxu2 %v7493_v12  ;;  %v7483_v12 = vld [vmem:[#allocation8 + $0x148] sm:$0xff] }
 0x285   : > { %v5112_v53 = vadd.f32 %v5111_v13, %v5023_v39  ;;  %v10465_v39 = vsel %vm12431_vm8, %v10374_v33, %v10446_v25  ;;  %vm12436_vm8 = vcmask 1046528   ;;  %v4141_v13 = vshll.u32 %v2958_v38, 16  ;;  %5351 = vmatpush.bf16.msrb.mxu1 %v7485_v15 }
 0x286   : > { %v3012_v33 = vsel %vm12436_vm8, %v10386_v6, %v10457_v41  ;;  %v4140_v45 = vrot.slane %v4138_v11, 3  ;;  %v4239_v14 = vrot.slane %v4237_v17, 3  ;;  %5529 = vmatpush.bf16.msrb.mxu3 %v7501_v2  ;;  %v2959_v2 = vshrl.u32 %v10115_v22, 16  ;;  %vm12443_vm8 = vmmov %vm12433_vm7 }
 0x287   : > { %v10459_v48 = vadd.f32 %v5200_v59, %v5112_v53  ;;  %v4228_v59 = vshrl.u32 %v3012_v33, 16  ;;  %v4231_v24 = vshll.u32 %v3012_v33, 16  ;;  %v4143_v38 = vrot.slane %v4141_v13, 4  ;;  %v7484_v33 = vld [vmem:[#allocation8 + $0x150] sm:$0xff] }
 0x289   : > { %12430 = vst [vmem:[#allocation61_spill] sm:$0xff] %v10459_v48  ;;  %5064 = vmatmul.bf16.gmra.mxu1 %v10465_v39  ;;  %v4230_v44 = vrot.slane %v4228_v59, 3  ;;  %v4233_v56 = vrot.slane %v4231_v24, 4  ;;  %v10489_v0 = vor.u32 %v4143_v38, %v4140_v45  ;;  %v7491_v45 = vld [vmem:[#allocation8 + $0x188] sm:$0xff] }
 0x28a   : > { %5281 = vmatmul.bf16.gmra.mxu0 %v12432_v5  ;;  %v10485_v6 = vpop.f32.mrf.mxu0  ;;  %5352 = vmatpush.bf16.msrb.mxu1 %v7484_v33  ;;  %v7499_v38 = vld [vmem:[#allocation8 + $0x1c8] sm:$0xff] }
 0x28b   : > { %5242 = vmatmul.bf16.gmra.mxu3 %v4181_v50  ;;  %v5027_v52 = vpop.f32.mrf.mxu1  ;;  %12437 = vst [vmem:[#allocation63_spill] sm:$0xff] %v10489_v0  ;;  %v10493_v11 = vor.u32 %v4233_v56, %v4230_v44  ;;  %v10511_v56 = vor.u32 %v2959_v2, %v10453_v8  ;;  %v7510_v8 = vld [vmem:[#allocation8 + $0x220] sm:$0xff]  ;;  %v12445_v44 = vld [vmem:[#allocation34_spill] sm:$0xff] }
 0x28c   : > { %5153 = vmatmul.bf16.gmra.mxu2 %v4172_v16  ;;  %v5114_v55 = vpop.f32.mrf.mxu2  ;;  %v5203_v53 = vpop.f32.mrf.mxu3  ;;  %v4240_v16 = vshll.u32 %v2770_v42, 16  ;;  %v5028_v29 = vadd.f32 %v5027_v52, %v4939_v28  ;;  %v7492_v42 = vld [vmem:[#allocation8 + $0x190] sm:$0xff]  ;;  %v2772_v33 = vunpack.c.l.b16 %v12445_v44  ;;  %5617 = vmatpush.bf16.msrb.mxu0 %v7510_v8 }
 0x28d   : > { %v5115_v50 = vadd.f32 %v5114_v55, %v5026_v49  ;;  %v7500_v49 = vld [vmem:[#allocation8 + $0x1d0] sm:$0xff]  ;;  %v1347_v55 = vpack.c.b16 %v1330_v51, %v1330_v51  ;;  %5441 = vmatpush.bf16.msrb.mxu2 %v7492_v42  ;;  %v7490_v42 = vld [vmem:[#allocation8 + $0x180] sm:$0xff]  ;;  %v4291_v62 = vshrl.u32 %v10511_v56, 16  ;;  %v4294_v60 = vshll.u32 %v10511_v56, 16 }
 0x28e   : > { %v4242_v48 = vrot.slane %v4240_v16, 4  ;;  %v12438_v52 = vld [vmem:[#allocation73_spill] sm:$0xff]  ;;  %5530 = vmatpush.bf16.msrb.mxu3 %v7500_v49  ;;  %5353 = vmatpush.bf16.msrb.mxu1 %v7483_v12  ;;  %v10529_v49 = vld [vmem:[#allocation10] ss:$0 sm:$0xff] }
 0x28f   : > { %v10487_v7 = vadd.f32 %v5203_v53, %v5115_v50  ;;  %v4942_v28 = vadd.f32 %v10038_v4, %v12438_v52  ;;  %v10501_v51 = vsel %vm12439_vm12, %v1347_v55, 0  ;;  %vm12444_vm12 = vmpackc.low %vm10097_vm1, %vm10091_vm3  ;;  %v4944_v55 = vadd.f32 %v10529_v49, %v10133_v34  ;;  %v7498_v52 = vld [vmem:[#allocation8 + $0x1c0] sm:$0xff] }
 0x290   : > { %v10495_v13 = vor.u32 %v4242_v48, %v4239_v14  ;;  %v10508_v14 = vsel %vm12441_vm10, %v10446_v25, %v10489_v0  ;;  %v12442_v48 = vld [vmem:[#allocation64_spill] sm:$0xff]  ;;  %v2771_v25 = vsel %vm12444_vm12, 0, %v10501_v51  ;;  %vm10540_vm3 = vcmp.ne.s32.totalorder %v2772_v33, %v8624_v37  ;;  %vm12462_vm12 = vmmov %vm12433_vm7 }
 0x291   : > { %5442 = vmatpush.bf16.msrb.mxu2 %v7491_v45  ;;  %v4312_v2 = vshll.u32 %v2771_v25, 16  ;;  %v12446_v34 = vmov 0  ;;  %v4296_v8 = vrot.slane %v4294_v60, 4  ;;  %v12453_v33 = vld [vmem:[#allocation52_spill] sm:$0xff] }
 0x292   : > { %v10497_v59 = vpop.f32.mrf.mxu0  ;;  %v4244_v15 = vsel %vm12443_vm8, %v10451_v9, %v10495_v13  ;;  %v2773_v9 = vunpack.c.h.b16 %v12445_v44  ;;  %5531 = vmatpush.bf16.msrb.mxu3 %v7499_v38  ;;  %v12447_v34 = vsel %vm10540_vm3, 4294967295, %v12446_v34  ;;  %v12449_v38 = vmov 0  ;;  %vm12461_vm8 = vmmov %vm12433_vm7 }
 0x293   : > { %v5030_v17 = vpop.f32.mrf.mxu1  ;;  %12448 = vst [vmem:[#allocation64_spill] sm:$0xff] %v12447_v34  ;;  %v4314_v37 = vrot.slane %v4312_v2, 4  ;;  %v12458_v2 = vld [vmem:[#allocation38_spill] sm:$0xff] }
 0x294   : > { %v5116_v53 = vpop.f32.mrf.mxu2  ;;  %v5205_v50 = vpop.f32.mrf.mxu3  ;;  %v5031_v16 = vadd.f32 %v5030_v17, %v4942_v28  ;;  %v4309_v17 = vshrl.u32 %v2771_v25, 16  ;;  %vm10545_vm1 = vcmp.ne.s32.totalorder %v2773_v9, %v8634_v47  ;;  %v4293_v25 = vrot.slane %v4291_v62, 3  ;;  %v12457_v62 = vld [vmem:[#allocation78_spill] sm:$0xff] }
 0x295   : > { %v5117_v24 = vadd.f32 %v5116_v53, %v5028_v29  ;;  %v4235_v29 = vsel %vm12433_vm7, %v10449_v58, %v10493_v11  ;;  %v7482_v58 = vld [vmem:[#allocation8 + $0x140] sm:$0xff]  ;;  %5443 = vmatpush.bf16.msrb.mxu2 %v7490_v42  ;;  %v12450_v38 = vsel %vm10545_vm1, 4294967295, %v12449_v38  ;;  %vm12042_vm10 = vmpackc.low %vm10545_vm1, %vm10540_vm3  ;;  %v4947_v60 = vadd.f32 %v10529_v49, %v12457_v62 }
 0x296   : > { %5354 = vmatpush.bf16.msrb.mxu1 %v7482_v58  ;;  %12451 = vst [vmem:[#allocation34_spill] sm:$0xff] %v12450_v38  ;;  %5532 = vmatpush.bf16.msrb.mxu3 %v7498_v52  ;;  %v4297_v47 = vor.u32 %v4296_v8, %v4293_v25  ;;  %v12455_v58 = vld [vmem:[#allocation49_spill] sm:$0xff] }
 0x297   : > { %v10503_v4 = vadd.f32 %v5205_v50, %v5117_v24  ;;  %v4300_v50 = vshrl.u32 %v10457_v41, 16  ;;  %v4303_v24 = vshll.u32 %v10457_v41, 16  ;;  %v2780_v9 = vsel %vm8766_vm13, 0, %v12455_v58 }
 0x298   : > { %v3038_v22 = vrot.slane %v2780_v9, 1 }
 0x299   : > { %12440 = vst [vmem:[#allocation73_spill] sm:$0xff] %v10503_v4  ;;  %5069 = vmatmul.bf16.gmra.mxu1 %v10508_v14  ;;  %v4305_v44 = vrot.slane %v4303_v24, 4 }
 0x29a   : > { %5286 = vmatmul.bf16.gmra.mxu0 %v12442_v48 }
 0x29b   : > { %5247 = vmatmul.bf16.gmra.mxu3 %v4244_v15  ;;  %v5032_v12 = vpop.f32.mrf.mxu1 }
 0x29c   : > { %5158 = vmatmul.bf16.gmra.mxu2 %v4235_v29  ;;  %v5119_v28 = vpop.f32.mrf.mxu2  ;;  %v5208_v53 = vpop.f32.mrf.mxu3  ;;  %v5033_v45 = vadd.f32 %v5032_v12, %v4944_v55  ;;  %v2781_v55 = vsel %vm8893_vm15, 0, %v12453_v33 }
 0x29d   : > { %v10537_v29 = vpop.f32.mrf.mxu0  ;;  %v5120_v15 = vadd.f32 %v5119_v28, %v5031_v16  ;;  %v4302_v16 = vrot.slane %v4300_v50, 3  ;;  %v4311_v28 = vrot.slane %v4309_v17, 3  ;;  %v10563_v17 = vrot.slane %v2781_v55, 1 }
 0x29f   : > { %v10549_v41 = vadd.f32 %v5208_v53, %v5120_v15  ;;  %v4306_v50 = vor.u32 %v4305_v44, %v4302_v16  ;;  %v4315_v24 = vor.u32 %v4314_v37, %v4311_v28  ;;  %v2779_v15 = vsel %vm12042_vm10, 0, %v12458_v2  ;;  %v12460_v28 = vld [vmem:[#allocation67_spill] sm:$0xff] }
 0x2a0   : > { %v4298_v16 = vsel %vm12433_vm7, %v10489_v0, %v4297_v47  ;;  %v3037_v44 = vrot.slane %v2779_v15, 1  ;;  %vm12463_vm10 = vcmask 1046528   ;;  %v12470_v0 = vld [vmem:[#allocation55_spill] sm:$0xff] }
 0x2a1   : > { %12452 = vst [vmem:[#allocation82_spill] sm:$0xff] %v10549_v41  ;;  %v4307_v37 = vsel %vm12461_vm8, %v10493_v11, %v4306_v50  ;;  %v4316_v55 = vsel %vm12462_vm12, %v10495_v13, %v4315_v24  ;;  %vm12465_vm7 = vmmov %vm12463_vm10  ;;  %v12467_v11 = vld [vmem:[#allocation41_spill] sm:$0xff]  ;;  %v4949_v50 = vadd.f32 %v10529_v49, %v10204_v46  ;;  %v12471_v41 = vld [vmem:[#allocation58_spill] sm:$0xff] }
 0x2a2   : > { %v3039_v47 = vsel %vm12465_vm7, %v3037_v44, %v3038_v22  ;;  %vm12468_vm8 = vnez %v12467_v11 }
 0x2a3   : > { %vm12469_vm4 = vmpackc.low %vm8705_vm9, %vm12468_vm8  ;;  %v3340_v44 = vshrl.u32 %v3039_v47, 16 }
 0x2a4   : > { %v5121_v52 = vpop.f32.mrf.mxu2  ;;  %v5210_v53 = vpop.f32.mrf.mxu3  ;;  %v2796_v13 = vsel %vm12469_vm4, 0, %v12455_v58  ;;  %vm12474_vm9 = vmmov %vm12462_vm12 }
 0x2a5   : > { %v10571_v12 = vpop.f32.mrf.mxu0  ;;  %v5122_v25 = vadd.f32 %v5121_v52, %v5033_v45  ;;  %v5035_v8 = vpop.f32.mrf.mxu1  ;;  %v3041_v45 = vsel %vm12463_vm10, %v3038_v22, %v10563_v17  ;;  %v3357_v9 = vshrl.u32 %v2796_v13, 16  ;;  %v3360_v2 = vshll.u32 %v2796_v13, 16  ;;  %vm12476_vm4 = vmmov %vm12474_vm9 }
 0x2a6   : > { %v5036_v42 = vadd.f32 %v5035_v8, %v4947_v60  ;;  %v2797_v60 = vsel %vm8681_vm5, 0, %v12453_v33  ;;  %v3348_v52 = vshrl.u32 %v3041_v45, 16  ;;  %v3342_v46 = vrot.slane %v3340_v44, 3  ;;  %vm12477_vm10 = vmmov %vm12465_vm7 }
 0x2a7   : > { %v10573_v62 = vadd.f32 %v5210_v53, %v5122_v25  ;;  %v3351_v53 = vshll.u32 %v3041_v45, 16  ;;  %v3365_v25 = vshrl.u32 %v2797_v60, 16  ;;  %v3368_v8 = vshll.u32 %v2797_v60, 16  ;;  %vm12485_vm8 = vmmov %vm12476_vm4 }
 0x2a8   : > { %v3350_v11 = vrot.slane %v3348_v52, 3  ;;  %vm12472_vm5 = vnez %v12471_v41  ;;  %v3359_v4 = vrot.slane %v3357_v9, 3 }
 0x2a9   : > { %12459 = vst [vmem:[#allocation78_spill] sm:$0xff] %v10573_v62  ;;  %5074 = vmatmul.bf16.gmra.mxu1 %v4298_v16  ;;  %v3353_v38 = vrot.slane %v3351_v53, 4  ;;  %v3367_v58 = vrot.slane %v3365_v25, 3  ;;  %v3370_v33 = vrot.slane %v3368_v8, 4  ;;  %v2782_v60 = vsel %vm12472_vm5, 0, %v12470_v0 }
 0x2aa   : > { %5291 = vmatmul.bf16.gmra.mxu0 %v12460_v28 }
 0x2ab   : > { %5252 = vmatmul.bf16.gmra.mxu3 %v4316_v55  ;;  %v3343_v55 = vshll.u32 %v3039_v47, 16  ;;  %v4952_v47 = vadd.f32 %v10529_v49, %v10238_v40 }
 0x2ac   : > { %5163 = vmatmul.bf16.gmra.mxu2 %v4307_v37  ;;  %v5213_v15 = vpop.f32.mrf.mxu3 }
 0x2ad   : > { %v5124_v24 = vpop.f32.mrf.mxu2  ;;  %v10596_v16 = vpop.f32.mrf.mxu0  ;;  %v3345_v62 = vrot.slane %v3343_v55, 4 }
 0x2ae   : > { %v5125_v37 = vadd.f32 %v5124_v24, %v5036_v42  ;;  %v5037_v22 = vpop.f32.mrf.mxu1  ;;  %v3362_v42 = vrot.slane %v3360_v2, 4  ;;  %v3354_v24 = vor.u32 %v3353_v38, %v3350_v11  ;;  %v12475_v2 = vld [vmem:[#allocation72_spill] sm:$0xff]  ;;  %v4954_v11 = vadd.f32 %v10529_v49, %v10278_v35 }
 0x2af   : > { %v5038_v45 = vadd.f32 %v5037_v22, %v4949_v50  ;;  %v3346_v8 = vor.u32 %v3345_v62, %v3342_v46 }
 0x2b0   : > { %v10598_v34 = vadd.f32 %v5213_v15, %v5125_v37  ;;  %v3371_v15 = vor.u32 %v3370_v33, %v3367_v58  ;;  %v3042_v37 = vrot.slane %v2782_v60, 1  ;;  %v3363_v44 = vor.u32 %v3362_v42, %v3359_v4  ;;  %v7509_v33 = vld [vmem:[#allocation8 + $0x218] sm:$0xff]  ;;  %v12478_v58 = vld [vmem:[#allocation48_spill] sm:$0xff] }
 0x2b1   : > { %v3355_v9 = vsel %vm12474_vm9, %v3346_v8, %v3354_v24  ;;  %vm12479_vm12 = vnez %v12478_v58  ;;  %5618 = vmatpush.bf16.msrb.mxu0 %v7509_v33  ;;  %v4957_v58 = vadd.f32 %v10529_v49, %v10304_v3  ;;  %vm12487_vm9 = vmmov %vm12476_vm4 }
 0x2b2   : > { %v3372_v40 = vsel %vm12476_vm4, %v3363_v44, %v3371_v15  ;;  %v3043_v38 = vsel %vm12477_vm10, %v10563_v17, %v3042_v37  ;;  %v2798_v4 = vsel %vm12479_vm12, 0, %v12470_v0  ;;  %vm12488_vm4 = vmmov %vm12477_vm10 }
 0x2b3   : > { %v3427_v62 = vshrl.u32 %v3043_v38, 16  ;;  %v3436_v42 = vshrl.u32 %v2798_v4, 16 }
 0x2b4   : > { %v5215_v13 = vpop.f32.mrf.mxu3 }
 0x2b5   : > { %v5126_v50 = vpop.f32.mrf.mxu2  ;;  %v3438_v44 = vrot.slane %v3436_v42, 3 }
 0x2b6   : > { %v5127_v53 = vadd.f32 %v5126_v50, %v5038_v45  ;;  %v5040_v25 = vpop.f32.mrf.mxu1  ;;  %v3430_v45 = vshll.u32 %v3043_v38, 16  ;;  %v12482_v38 = vld [vmem:[#allocation29_spill] sm:$0xff] }
 0x2b7   : > { %v10605_v52 = vpop.f32.mrf.mxu0  ;;  %v5041_v22 = vadd.f32 %v5040_v25, %v4952_v47  ;;  %v3439_v47 = vshll.u32 %v2798_v4, 16  ;;  %v3429_v25 = vrot.slane %v3427_v62, 3  ;;  %vm12483_vm7 = vnez %v12482_v38 }
 0x2b8   : > { %v10607_v55 = vadd.f32 %v5215_v13, %v5127_v53  ;;  %v3432_v8 = vrot.slane %v3430_v45, 4 }
 0x2b9   : > { %5355 = vmatmul.bf16.vlgmr.msrb.gmra.mxu1 %v3355_v9  ;;  %v3441_v9 = vrot.slane %v3439_v47, 4  ;;  %v12486_v47 = vld [vmem:[#allocation75_spill] sm:$0xff] }
 0x2ba   : > { %12473 = vst [vmem:[#allocation38_spill] sm:$0xff] %v10607_v55  ;;  %5296 = vmatmul.bf16.gmra.mxu0 %v12475_v2  ;;  %v3433_v35 = vor.u32 %v3432_v8, %v3429_v25 }
 0x2bb   : > { %5533 = vmatmul.bf16.vlgmr.msrb.gmra.mxu3 %v9396_v31  ;;  %v3442_v41 = vor.u32 %v3441_v9, %v3438_v44 }
 0x2bc   : > { %5444 = vmatmul.bf16.vlgmr.msrb.gmra.mxu2 %v3372_v40  ;;  %v12481_v40 = vld [vmem:[#allocation57_spill] sm:$0xff]  ;;  %v3434_v42 = vsel %vm12485_vm8, %v3354_v24, %v3433_v35 }
 0x2bd   : > { %v2783_v33 = vsel %vm12483_vm7, 0, %v12481_v40 }
 0x2be   : > { %v5218_v60 = vpop.f32.mrf.mxu3  ;;  %v5042_v13 = vpop.f32.mrf.mxu1 }
 0x2bf   : > { %v5129_v46 = vpop.f32.mrf.mxu2  ;;  %v10620_v50 = vpop.f32.mrf.mxu0  ;;  %v5043_v53 = vadd.f32 %v5042_v13, %v4954_v11  ;;  %v12489_v13 = vld [vmem:[#allocation51_spill] sm:$0xff] }
 0x2c0   : > { %v5130_v17 = vadd.f32 %v5129_v46, %v5041_v22  ;;  %v3044_v22 = vrot.slane %v2783_v33, 1  ;;  %vm12490_vm10 = vnez %v12489_v13  ;;  %v12491_v13 = vld [vmem:[#allocation60_spill] sm:$0xff] }
 0x2c2   : > { %v10622_v31 = vadd.f32 %v5218_v60, %v5130_v17  ;;  %v3443_v17 = vsel %vm12487_vm9, %v3371_v15, %v3442_v41  ;;  %v3045_v3 = vsel %vm12488_vm4, %v3042_v37, %v3044_v22  ;;  %vm12496_vm9 = vmmov %vm12485_vm8 }
 0x2c3   : > { %v3490_v25 = vshrl.u32 %v3045_v3, 16  ;;  %v3493_v8 = vshll.u32 %v3045_v3, 16  ;;  %v12492_v3 = vld [vmem:[#allocation20_spill] sm:$0xff] }
 0x2c4   : > { %12480 = vst [vmem:[#allocation67_spill] sm:$0xff] %v10622_v31  ;;  %vm12493_vm12 = vnez %v12492_v3 }
 0x2c5   : > { %v2784_v38 = vsel %vm12493_vm12, 0, %v12491_v13 }
 0x2c6   : > { %v5220_v55 = vpop.f32.mrf.mxu3  ;;  %v5045_v60 = vpop.f32.mrf.mxu1 }
 0x2c7   : > { %v5131_v4 = vpop.f32.mrf.mxu2  ;;  %v10629_v46 = vpop.f32.mrf.mxu0  ;;  %v5046_v62 = vadd.f32 %v5045_v60, %v4957_v58  ;;  %v3495_v60 = vrot.slane %v3493_v8, 4 }
 0x2c8   : > { %v5132_v11 = vadd.f32 %v5131_v4, %v5043_v53  ;;  %v2799_v53 = vsel %vm12490_vm10, 0, %v12481_v40 }
 0x2c9   : > { %5360 = vmatmul.bf16.gmra.mxu1 %v3434_v42  ;;  %v3499_v9 = vshrl.u32 %v2799_v53, 16  ;;  %v3502_v33 = vshll.u32 %v2799_v53, 16 }
 0x2ca   : > { %v10631_v45 = vadd.f32 %v5220_v55, %v5132_v11  ;;  %5301 = vmatmul.bf16.gmra.mxu0 %v12486_v47  ;;  %v4959_v55 = vadd.f32 %v10529_v49, %v10352_v43 }
 0x2cb   : > { %5538 = vmatmul.bf16.gmra.mxu3 %v12420_v1  ;;  %v3492_v1 = vrot.slane %v3490_v25, 3  ;;  %v3501_v42 = vrot.slane %v3499_v9, 3 }
 0x2cc   : > { %12484 = vst [vmem:[#allocation39_spill] sm:$0xff] %v10631_v45  ;;  %5449 = vmatmul.bf16.gmra.mxu2 %v3443_v17  ;;  %v3504_v17 = vrot.slane %v3502_v33, 4  ;;  %v4962_v45 = vadd.f32 %v10529_v49, %v10369_v27 }
 0x2cd   : > { %v3496_v43 = vor.u32 %v3495_v60, %v3492_v1  ;;  %v7508_v1 = vld [vmem:[#allocation8 + $0x210] sm:$0xff] }
 0x2ce   : > { %v5223_v44 = vpop.f32.mrf.mxu3  ;;  %v5047_v37 = vpop.f32.mrf.mxu1  ;;  %v3505_v40 = vor.u32 %v3504_v17, %v3501_v42  ;;  %5619 = vmatpush.bf16.msrb.mxu0 %v7508_v1  ;;  %v12499_v1 = vld [vmem:[#allocation32_spill] sm:$0xff] }
 0x2cf   : > { %v5134_v24 = vpop.f32.mrf.mxu2  ;;  %v10643_v58 = vpop.f32.mrf.mxu0  ;;  %v5048_v4 = vadd.f32 %v5047_v37, %v4959_v55  ;;  %v3497_v33 = vsel %vm12485_vm8, %v3433_v35, %v3496_v43  ;;  %v4964_v35 = vadd.f32 %v10529_v49, %v10417_v21 }
 0x2d0   : > { %v5135_v15 = vadd.f32 %v5134_v24, %v5046_v62  ;;  %v3046_v62 = vrot.slane %v2784_v38, 1  ;;  %v3506_v27 = vsel %vm12496_vm9, %v3442_v41, %v3505_v40  ;;  %v12497_v38 = vld [vmem:[#allocation54_spill] sm:$0xff] }
 0x2d1   : > { %vm12498_vm10 = vnez %v12497_v38  ;;  %v12500_v38 = vld [vmem:[#allocation24_spill] sm:$0xff] }
 0x2d2   : > { %v10645_v11 = vadd.f32 %v5223_v44, %v5135_v15  ;;  %v12494_v15 = vld [vmem:[#allocation77_spill] sm:$0xff]  ;;  %v3047_v37 = vsel %vm12488_vm4, %v3044_v22, %v3046_v62  ;;  %vm12501_vm8 = vnez %v12500_v38  ;;  %vm12502_vm4 = vmmov %vm12496_vm9 }
 0x2d3   : > { %v2785_v21 = vsel %vm12501_vm8, 0, %v12499_v1 }
 0x2d6   : > { %v5225_v31 = vpop.f32.mrf.mxu3  ;;  %v5050_v44 = vpop.f32.mrf.mxu1 }
 0x2d7   : > { %v5136_v53 = vpop.f32.mrf.mxu2  ;;  %v5267_v24 = vpop.f32.mrf.mxu0  ;;  %v5051_v8 = vadd.f32 %v5050_v44, %v4962_v45  ;;  %v3556_v45 = vshll.u32 %v3047_v37, 16 }
 0x2d8   : > { %v5137_v55 = vadd.f32 %v5136_v53, %v5048_v4  ;;  %v10653_v25 = vadd.f32 %v5267_v24, %v12494_v15  ;;  %v2800_v4 = vsel %vm12498_vm10, 0, %v12491_v13  ;;  %vm12503_vm10 = vcmask 1046528  }
 0x2d9   : > { %5365 = vmatmul.bf16.gmra.mxu1 %v3497_v33  ;;  %v3562_v17 = vshrl.u32 %v2800_v4, 16  ;;  %v3565_v41 = vshll.u32 %v2800_v4, 16  ;;  %v3558_v33 = vrot.slane %v3556_v45, 4  ;;  %v4967_v4 = vadd.f32 %v10529_v49, %v10455_v19 }
 0x2da   : > { %v10655_v9 = vadd.f32 %v5225_v31, %v5137_v55  ;;  %5306 = vmatmul.bf16.gmra.mxu0 %v10202_v23  ;;  %v3553_v31 = vshrl.u32 %v3047_v37, 16 }
 0x2db   : > { %5543 = vmatmul.bf16.gmra.mxu3 %v12432_v5  ;;  %v3567_v37 = vrot.slane %v3565_v41, 4 }
 0x2dc   : > { %12495 = vst [vmem:[#allocation42_spill] sm:$0xff] %v10655_v9  ;;  %5454 = vmatmul.bf16.gmra.mxu2 %v3506_v27  ;;  %v3555_v15 = vrot.slane %v3553_v31, 3  ;;  %v3564_v27 = vrot.slane %v3562_v17, 3 }
 0x2de   : > { %v5228_v42 = vpop.f32.mrf.mxu3  ;;  %v5052_v24 = vpop.f32.mrf.mxu1  ;;  %v3559_v3 = vor.u32 %v3558_v33, %v3555_v15  ;;  %v3568_v9 = vor.u32 %v3567_v37, %v3564_v27  ;;  %v4969_v33 = vadd.f32 %v10529_v49, %v10485_v6 }
 0x2df   : > { %v5139_v60 = vpop.f32.mrf.mxu2  ;;  %v5269_v53 = vpop.f32.mrf.mxu0  ;;  %v5053_v5 = vadd.f32 %v5052_v24, %v4964_v35  ;;  %v12504_v24 = vld [vmem:[#allocation56_spill] sm:$0xff] }
 0x2e0   : > { %v5140_v22 = vadd.f32 %v5139_v60, %v5051_v8  ;;  %v10668_v55 = vadd.f32 %v5269_v53, %v10193_v54  ;;  %v3048_v54 = vrot.slane %v2785_v21, 1  ;;  %v3560_v41 = vsel %vm12496_vm9, %v3496_v43, %v3559_v3  ;;  %vm12509_vm9 = vmmov %vm12502_vm4 }
 0x2e1   : > { %v3569_v19 = vsel %vm12502_vm4, %v3505_v40, %v3568_v9  ;;  %vm12505_vm8 = vnez %v12504_v24 }
 0x2e2   : > { %v10670_v44 = vadd.f32 %v5228_v42, %v5140_v22  ;;  %v3049_v22 = vsel %vm12503_vm10, %v3046_v62, %v3048_v54 }
 0x2e3   : > { %v3619_v15 = vshll.u32 %v3049_v22, 16 }
 0x2e6   : > { %v5230_v60 = vpop.f32.mrf.mxu3  ;;  %v5055_v42 = vpop.f32.mrf.mxu1 }
 0x2e7   : > { %v5141_v8 = vpop.f32.mrf.mxu2  ;;  %v5272_v53 = vpop.f32.mrf.mxu0  ;;  %v5056_v45 = vadd.f32 %v5055_v42, %v4967_v4 }
 0x2e8   : > { %v5142_v35 = vadd.f32 %v5141_v8, %v5053_v5  ;;  %v10678_v31 = vadd.f32 %v5272_v53, %v10234_v10  ;;  %v2801_v10 = vsel %vm12505_vm8, 0, %v12499_v1  ;;  %v3616_v5 = vshrl.u32 %v3049_v22, 16  ;;  %v12507_v22 = vld [vmem:[#allocation33_spill] sm:$0xff] }
 0x2e9   : > { %5370 = vmatmul.bf16.gmra.mxu1 %v3560_v41  ;;  %v3625_v37 = vshrl.u32 %v2801_v10, 16  ;;  %v3628_v21 = vshll.u32 %v2801_v10, 16  ;;  %vm12508_vm8 = vnez %v12507_v22  ;;  %v4972_v10 = vadd.f32 %v10529_v49, %v10497_v59 }
 0x2ea   : > { %v10680_v17 = vadd.f32 %v5230_v60, %v5142_v35  ;;  %5311 = vmatmul.bf16.gmra.mxu0 %v10269_v26  ;;  %v3618_v53 = vrot.slane %v3616_v5, 3  ;;  %v3621_v35 = vrot.slane %v3619_v15, 4 }
 0x2eb   : > { %5548 = vmatmul.bf16.gmra.mxu3 %v12442_v48  ;;  %v3627_v42 = vrot.slane %v3625_v37, 3  ;;  %v3630_v41 = vrot.slane %v3628_v21, 4 }
 0x2ec   : > { %5459 = vmatmul.bf16.gmra.mxu2 %v3569_v19  ;;  %v12506_v19 = vld [vmem:[#allocation44_spill] sm:$0xff]  ;;  %v3622_v24 = vor.u32 %v3621_v35, %v3618_v53 }
 0x2ed   : > { %v2786_v6 = vsel %vm12508_vm8, 0, %v12506_v19  ;;  %v3631_v38 = vor.u32 %v3630_v41, %v3627_v42 }
 0x2ee   : > { %v5233_v27 = vpop.f32.mrf.mxu3  ;;  %v5057_v8 = vpop.f32.mrf.mxu1  ;;  %v3623_v21 = vsel %vm12509_vm9, %v3559_v3, %v3622_v24  ;;  %v4974_v3 = vadd.f32 %v10529_v49, %v10537_v29  ;;  %vm12515_vm9 = vmmov %vm12502_vm4 }
 0x2ef   : > { %v5144_v43 = vpop.f32.mrf.mxu2  ;;  %v5274_v4 = vpop.f32.mrf.mxu0  ;;  %v5058_v48 = vadd.f32 %v5057_v8, %v4969_v33  ;;  %v3632_v59 = vsel %vm12502_vm4, %v3568_v9, %v3631_v38  ;;  %v7507_v8 = vld [vmem:[#allocation8 + $0x208] sm:$0xff] }
 0x2f0   : > { %v5145_v40 = vadd.f32 %v5144_v43, %v5056_v45  ;;  %v10693_v62 = vadd.f32 %v5274_v4, %v10264_v61  ;;  %v3050_v61 = vrot.slane %v2786_v6, 1  ;;  %5620 = vmatpush.bf16.msrb.mxu0 %v7507_v8  ;;  %v12513_v8 = vld [vmem:[#allocation66_spill] sm:$0xff] }
 0x2f2   : > { %v10695_v60 = vadd.f32 %v5233_v27, %v5145_v40  ;;  %v3051_v40 = vsel %vm12503_vm10, %v3048_v54, %v3050_v61 }
 0x2f3   : > { %v3679_v53 = vshrl.u32 %v3051_v40, 16  ;;  %v3682_v35 = vshll.u32 %v3051_v40, 16  ;;  %v12512_v40 = vld [vmem:[#allocation22_spill] sm:$0xff] }
 0x2f6   : > { %v5235_v43 = vpop.f32.mrf.mxu3  ;;  %v5060_v27 = vpop.f32.mrf.mxu1 }
 0x2f7   : > { %v5146_v45 = vpop.f32.mrf.mxu2  ;;  %v5277_v4 = vpop.f32.mrf.mxu0  ;;  %v5061_v15 = vadd.f32 %v5060_v27, %v4972_v10  ;;  %v3684_v27 = vrot.slane %v3682_v35, 4 }
 0x2f8   : > { %v5147_v33 = vadd.f32 %v5146_v45, %v5058_v48  ;;  %v10703_v5 = vadd.f32 %v5277_v4, %v10297_v20  ;;  %v12510_v48 = vld [vmem:[#allocation59_spill] sm:$0xff] }
 0x2f9   : > { %5375 = vmatmul.bf16.gmra.mxu1 %v3623_v21  ;;  %vm12511_vm8 = vnez %v12510_v48 }
 0x2fa   : > { %v10705_v37 = vadd.f32 %v5235_v43, %v5147_v33  ;;  %5316 = vmatmul.bf16.gmra.mxu0 %v10333_v63  ;;  %v2802_v20 = vsel %vm12511_vm8, 0, %v12506_v19  ;;  %v3681_v33 = vrot.slane %v3679_v53, 3  ;;  %vm12514_vm8 = vnez %v12513_v8 }
 0x2fb   : > { %5553 = vmatmul.bf16.gmra.mxu3 %v12460_v28  ;;  %v3688_v6 = vshrl.u32 %v2802_v20, 16  ;;  %v3691_v9 = vshll.u32 %v2802_v20, 16  ;;  %v2787_v29 = vsel %vm12514_vm8, 0, %v12512_v40  ;;  %v4977_v20 = vadd.f32 %v10529_v49, %v10571_v12 }
 0x2fc   : > { %5464 = vmatmul.bf16.gmra.mxu2 %v3632_v59  ;;  %v3685_v48 = vor.u32 %v3684_v27, %v3681_v33  ;;  %v4979_v27 = vadd.f32 %v10529_v49, %v10596_v16 }
 0x2fd   : > { %v3690_v21 = vrot.slane %v3688_v6, 3  ;;  %v3693_v59 = vrot.slane %v3691_v9, 4 }
 0x2fe   : > { %v5238_v41 = vpop.f32.mrf.mxu3  ;;  %v5062_v45 = vpop.f32.mrf.mxu1  ;;  %v3686_v9 = vsel %vm12515_vm9, %v3622_v24, %v3685_v48  ;;  %vm12522_vm9 = vmmov %vm12502_vm4 }
 0x2ff   : > { %v5149_v42 = vpop.f32.mrf.mxu2  ;;  %v5279_v10 = vpop.f32.mrf.mxu0  ;;  %v5063_v28 = vadd.f32 %v5062_v45, %v4974_v3  ;;  %v3694_v22 = vor.u32 %v3693_v59, %v3690_v21  ;;  %v12516_v45 = vld [vmem:[#allocation53_spill] sm:$0xff] }
 0x300   : > { %v5150_v54 = vadd.f32 %v5149_v42, %v5061_v15  ;;  %v10718_v43 = vadd.f32 %v5279_v10, %v10325_v18  ;;  %v3052_v18 = vrot.slane %v2787_v29, 1  ;;  %vm12517_vm8 = vnez %v12516_v45 }
 0x301   : > { %v3695_v12 = vsel %vm12502_vm4, %v3631_v38, %v3694_v22  ;;  %vm12523_vm4 = vmmov %vm12503_vm10 }
 0x302   : > { %v10720_v4 = vadd.f32 %v5238_v41, %v5150_v54  ;;  %v3053_v54 = vsel %vm12503_vm10, %v3050_v61, %v3052_v18  ;;  %vm12524_vm10 = vmmov %vm12522_vm9 }
 0x303   : > { %v3745_v33 = vshll.u32 %v3053_v54, 16 }
 0x306   : > { %v5240_v42 = vpop.f32.mrf.mxu3  ;;  %v5065_v41 = vpop.f32.mrf.mxu1 }
 0x307   : > { %v5151_v15 = vpop.f32.mrf.mxu2  ;;  %v5282_v10 = vpop.f32.mrf.mxu0  ;;  %v5066_v35 = vadd.f32 %v5065_v41, %v4977_v20 }
 0x308   : > { %v5152_v3 = vadd.f32 %v5151_v15, %v5063_v28  ;;  %v10728_v53 = vadd.f32 %v5282_v10, %v10362_v30  ;;  %v2803_v30 = vsel %vm12517_vm8, 0, %v12512_v40  ;;  %v3742_v28 = vshrl.u32 %v3053_v54, 16  ;;  %v12519_v54 = vld [vmem:[#allocation25_spill] sm:$0xff] }
 0x309   : > { %5380 = vmatmul.bf16.gmra.mxu1 %v3686_v9  ;;  %v3751_v59 = vshrl.u32 %v2803_v30, 16  ;;  %v3754_v29 = vshll.u32 %v2803_v30, 16  ;;  %vm12520_vm8 = vnez %v12519_v54 }
 0x30a   : > { %v10730_v6 = vadd.f32 %v5240_v42, %v5152_v3  ;;  %5321 = vmatmul.bf16.gmra.mxu0 %v10394_v36  ;;  %v3744_v10 = vrot.slane %v3742_v28, 3  ;;  %v3747_v3 = vrot.slane %v3745_v33, 4 }
 0x30b   : > { %5558 = vmatmul.bf16.gmra.mxu3 %v12475_v2  ;;  %v3753_v41 = vrot.slane %v3751_v59, 3  ;;  %v3756_v9 = vrot.slane %v3754_v29, 4 }
 0x30c   : > { %5469 = vmatmul.bf16.gmra.mxu2 %v3695_v12  ;;  %v12518_v12 = vld [vmem:[#allocation27_spill] sm:$0xff]  ;;  %v3748_v45 = vor.u32 %v3747_v3, %v3744_v10 }
 0x30d   : > { %v2788_v16 = vsel %vm12520_vm8, 0, %v12518_v12 }
 0x30e   : > { %v5243_v21 = vpop.f32.mrf.mxu3  ;;  %v5067_v15 = vpop.f32.mrf.mxu1  ;;  %v3054_v8 = vrot.slane %v2788_v16, 1  ;;  %v3749_v29 = vsel %vm12522_vm9, %v3685_v48, %v3748_v45  ;;  %v4984_v48 = vadd.f32 %v10529_v49, %v10620_v50  ;;  %vm12533_vm9 = vmmov %vm12523_vm4 }
 0x30f   : > { %v5154_v24 = vpop.f32.mrf.mxu2  ;;  %v5284_v20 = vpop.f32.mrf.mxu0  ;;  %v5068_v2 = vadd.f32 %v5067_v15, %v4979_v27  ;;  %v7506_v15 = vld [vmem:[#allocation8 + $0x200] sm:$0xff] }
 0x310   : > { %v5155_v38 = vadd.f32 %v5154_v24, %v5066_v35  ;;  %v10743_v61 = vadd.f32 %v5284_v20, %v10388_v32  ;;  %v4982_v35 = vadd.f32 %v10529_v49, %v10605_v52  ;;  %v3757_v32 = vor.u32 %v3756_v9, %v3753_v41  ;;  %5621 = vmatpush.bf16.msrb.mxu0 %v7506_v15  ;;  %v12531_v15 = vld [vmem:[#allocation35_spill] sm:$0xff] }
 0x312   : > { %v10745_v42 = vadd.f32 %v5243_v21, %v5155_v38  ;;  %v3055_v38 = vsel %vm12523_vm4, %v3052_v18, %v3054_v8  ;;  %v3758_v52 = vsel %vm12524_vm10, %v3694_v22, %v3757_v32  ;;  %vm12535_vm4 = vmmov %vm12524_vm10  ;;  %vm12536_vm10 = vsmask.f32 7424 }
 0x313   : > { %v3805_v10 = vshrl.u32 %v3055_v38, 16  ;;  %v3808_v3 = vshll.u32 %v3055_v38, 16  ;;  %v3013_v38 = vshll.u32 %v10501_v51, 16 }
 0x316   : > { %v5245_v24 = vpop.f32.mrf.mxu3  ;;  %v5070_v21 = vpop.f32.mrf.mxu1 }
 0x317   : > { %v5156_v30 = vpop.f32.mrf.mxu2  ;;  %v5287_v20 = vpop.f32.mrf.mxu0  ;;  %v5071_v33 = vadd.f32 %v5070_v21, %v4982_v35 }
 0x318   : > { %v5157_v27 = vadd.f32 %v5156_v30, %v5068_v2  ;;  %v10753_v28 = vadd.f32 %v5287_v20, %v10430_v57  ;;  %v12525_v2 = vld [vmem:[#allocation36_spill] sm:$0xff] }
 0x319   : > { %5385 = vmatmul.bf16.gmra.mxu1 %v3749_v29  ;;  %vm12526_vm8 = vnez %v12525_v2  ;;  %v3810_v29 = vrot.slane %v3808_v3, 4 }
 0x31a   : > { %v10755_v59 = vadd.f32 %v5245_v24, %v5157_v27  ;;  %5326 = vmatmul.bf16.gmra.mxu0 %v10465_v39  ;;  %v2804_v57 = vsel %vm12526_vm8, 0, %v12518_v12  ;;  %v12527_v24 = vld [vmem:[#allocation61_spill] sm:$0xff]  ;;  %v3807_v27 = vrot.slane %v3805_v10, 3  ;;  %vm12532_vm8 = vnez %v12531_v15 }
 0x31b   : > { %5563 = vmatmul.bf16.gmra.mxu3 %v12486_v47  ;;  %v3814_v9 = vshrl.u32 %v2804_v57, 16  ;;  %v3817_v16 = vshll.u32 %v2804_v57, 16  ;;  %v4987_v10 = vadd.f32 %v10529_v49, %v10629_v46 }
 0x31c   : > { %12521 = vst [vmem:[#allocation41_spill] sm:$0xff] %v10755_v59  ;;  %5474 = vmatmul.bf16.gmra.mxu2 %v3758_v52  ;;  %v12530_v52 = vld [vmem:[#allocation65_spill] sm:$0xff] }
 0x31d   : > { %v2789_v50 = vsel %vm12532_vm8, 0, %v12530_v52  ;;  %v3816_v2 = vrot.slane %v3814_v9, 3  ;;  %v3819_v54 = vrot.slane %v3817_v16, 4  ;;  %vm12537_vm8 = vmmov %vm12535_vm4 }
 0x31e   : > { %v5248_v41 = vpop.f32.mrf.mxu3  ;;  %v5072_v30 = vpop.f32.mrf.mxu1  ;;  %v10776_v57 = vrot.slane %v2789_v50, 1 }
 0x31f   : > { %v5159_v18 = vpop.f32.mrf.mxu2  ;;  %v5289_v35 = vpop.f32.mrf.mxu0  ;;  %v5073_v47 = vadd.f32 %v5072_v30, %v4984_v48  ;;  %v10784_v3 = vor.u32 %v3819_v54, %v3816_v2 }
 0x320   : > { %v5160_v22 = vadd.f32 %v5159_v18, %v5071_v33  ;;  %v10768_v20 = vadd.f32 %v5289_v35, %v12527_v24  ;;  %v10778_v33 = vor.u32 %v3810_v29, %v3807_v27  ;;  %v10780_v18 = vrot.slane %v3013_v38, 1 }
 0x321   : > { %v3057_v16 = vsel %vm12533_vm9, %v3054_v8, %v10776_v57 }
 0x322   : > { %12528 = vst [vmem:[#allocation55_spill] sm:$0xff] %v10768_v20  ;;  %v10770_v21 = vadd.f32 %v5248_v41, %v5160_v22  ;;  %v3812_v29 = vsel %vm12535_vm4, %v3748_v45, %v10778_v33  ;;  %v3016_v46 = vsel %vm12536_vm10, %v10511_v56, %v10780_v18  ;;  %v3868_v54 = vshrl.u32 %v3057_v16, 16  ;;  %vm12548_vm10 = vmmov %vm12535_vm4 }
 0x323   : > { %v3871_v8 = vshll.u32 %v3057_v16, 16  ;;  %v4201_v45 = vshrl.u32 %v3016_v46, 16  ;;  %v4204_v50 = vshll.u32 %v3016_v46, 16  ;;  %v4989_v56 = vadd.f32 %v10529_v49, %v10643_v58  ;;  %v7542_v46 = vld [vmem:[#allocation11 + $0xe4] sm:$0xf] }
 0x324   : > { %12529 = vst [vmem:[#allocation72_spill] sm:$0xff] %v10770_v21  ;;  %v7398_v49 = vld [vmem:[#allocation11 + $0xe8] sm:$0xf] }
 0x325   : > { %v4206_v20 = vrot.slane %v4204_v50, 4 }
 0x326   : > { %v5250_v41 = vpop.f32.mrf.mxu3  ;;  %v5075_v30 = vpop.f32.mrf.mxu1 }
 0x327   : > { %v5161_v48 = vpop.f32.mrf.mxu2  ;;  %v5292_v35 = vpop.f32.mrf.mxu0  ;;  %v5076_v9 = vadd.f32 %v5075_v30, %v4987_v10  ;;  %v3870_v30 = vrot.slane %v3868_v54, 3  ;;  %v7545_v54 = vld [vmem:[#allocation11 + $0xf4] sm:$0xf0] }
 0x328   : > { %v5162_v22 = vadd.f32 %v5161_v48, %v5073_v47  ;;  %v10787_v24 = vadd.f32 %v5292_v35, %v10487_v7  ;;  %v3821_v7 = vsel %vm12537_vm8, %v3757_v32, %v10784_v3  ;;  %v12538_v47 = vld [vmem:[#allocation62_spill] sm:$0xff] }
 0x329   : > { %5390 = vmatmul.bf16.gmra.mxu1 %v3812_v29  ;;  %vm12539_vm9 = vnez %v12538_v47  ;;  %v12540_v29 = vld [vmem:[#allocation73_spill] sm:$0xff]  ;;  %v4203_v47 = vrot.slane %v4201_v45, 3 }
 0x32a   : > { %v10791_v27 = vadd.f32 %v5250_v41, %v5162_v22  ;;  %5331 = vmatmul.bf16.gmra.mxu0 %v10508_v14  ;;  %v2805_v38 = vsel %vm12539_vm9, 0, %v12530_v52  ;;  %v12543_v52 = vld [vmem:[#allocation46_spill] sm:$0xff]  ;;  %vm12550_vm9 = vcmask 1046528  }
 0x32b   : > { %5568 = vmatmul.bf16.gmra.mxu3 %v10202_v23  ;;  %v3877_v48 = vshrl.u32 %v2805_v38, 16  ;;  %v3880_v41 = vshll.u32 %v2805_v38, 16  ;;  %v3873_v23 = vrot.slane %v3871_v8, 4  ;;  %v12544_v38 = vld [vmem:[#allocation76_spill] sm:$0xff]  ;;  %v7399_v8 = vor.u32 %v7545_v54, %v7398_v49  ;;  %v7544_v49 = vld [vmem:[#allocation11 + $0xec] sm:$0xf0] }
 0x32c   : > { %12534 = vst [vmem:[#allocation48_spill] sm:$0xff] %v10791_v27  ;;  %5479 = vmatmul.bf16.gmra.mxu2 %v3821_v7  ;;  %v7392_v27 = vld [vmem:[#allocation11 + $0xf0] sm:$0xf0]  ;;  %vm12545_vm8 = vnez %v12544_v38  ;;  %v7400_v54 = vld [vmem:[#allocation11 + $0xf8] sm:$0xf0] }
 0x32d   : > { %v3879_v58 = vrot.slane %v3877_v48, 3  ;;  %v3882_v21 = vrot.slane %v3880_v41, 4  ;;  %v10815_v59 = vor.u32 %v3873_v23, %v3870_v30  ;;  %6131 = vmatpush.bf16.msra.mxu3 %v7399_v8  ;;  %v3017_v48 = vshrl.u32 %v10501_v51, 16  ;;  %v12547_v23 = vld [vmem:[#allocation63_spill] sm:$0xff] }
 0x32e   : > { %v5253_v10 = vpop.f32.mrf.mxu3  ;;  %v5077_v22 = vpop.f32.mrf.mxu1  ;;  %v12557_v38 = vld [vmem:[#allocation23_spill] sm:$0xff] }
 0x32f   : > { %v5164_v2 = vpop.f32.mrf.mxu2  ;;  %v5294_v35 = vpop.f32.mrf.mxu0  ;;  %v5078_v7 = vadd.f32 %v5077_v22, %v4989_v56  ;;  %v10817_v56 = vor.u32 %v4206_v20, %v4203_v47  ;;  %v3875_v20 = vsel %vm12535_vm4, %v10778_v33, %v10815_v59  ;;  %v7390_v33 = vld [vmem:[#allocation11 + $0xe0] sm:$0xf] }
 0x330   : > { %v5165_v32 = vadd.f32 %v5164_v2, %v5076_v9  ;;  %v10808_v16 = vadd.f32 %v5294_v35, %v12540_v29  ;;  %v2790_v9 = vsel %vm12545_vm8, 0, %v12543_v52  ;;  %v7395_v2 = vor.u32 %v7542_v46, %v7392_v27  ;;  %v12546_v27 = vld [vmem:[#allocation82_spill] sm:$0xff] }
 0x331   : > { %v10819_v45 = vrot.slane %v2790_v9, 1  ;;  %v10821_v35 = vor.u32 %v3882_v21, %v3879_v58  ;;  %v10834_v47 = vsel %vm12548_vm10, %v12547_v23, %v10817_v56  ;;  %v10839_v46 = vor.u32 %v3017_v48, %v10780_v18  ;;  %v7543_v58 = vld [vmem:[#allocation11 + $0xec] sm:$0xf]  ;;  %v12551_v18 = vld [vmem:[#allocation30_spill] sm:$0xff] }
 0x332   : > { %12541 = vst [vmem:[#allocation75_spill] sm:$0xff] %v10808_v16  ;;  %v10810_v15 = vadd.f32 %v5253_v10, %v5165_v32  ;;  %6042 = vmatpush.bf16.msra.mxu2 %v7395_v2  ;;  %vm12552_vm10 = vnez %v12551_v18  ;;  %v7391_v2 = vor.u32 %v7544_v49, %v7390_v33  ;;  %v7403_v8 = vor.u32 %v7543_v58, %v7400_v54  ;;  %v12553_v23 = vld [vmem:[#allocation78_spill] sm:$0xff] }
 0x333   : > { %v2806_v9 = vsel %vm12552_vm10, 0, %v12543_v52  ;;  %v2814_v18 = vsel %vm8893_vm15, 0, %v12470_v0  ;;  %v12561_v0 = vld [vmem:[#allocation49_spill] sm:$0xff]  ;;  %vm12564_vm15 = vmpackc.low %vm10545_vm1, %vm10540_vm3 }
 0x334   : > { %12542 = vst [vmem:[#allocation51_spill] sm:$0xff] %v10810_v15  ;;  %5953 = vmatpush.bf16.msra.mxu1 %v7391_v2  ;;  %6220 = vmatpush.bf16.msra.mxu0 %v7403_v8  ;;  %vm12566_vm3 = vmmov %vm12535_vm4 }
 0x335   : > { %vm12568_vm1 = vmmov %vm12566_vm3 }
 0x336   : > { %v5255_v10 = vpop.f32.mrf.mxu3  ;;  %v5356_v22 = vpop.f32.mrf.mxu1  ;;  %vm12570_vm10 = vmmov %vm12550_vm9 }
 0x337   : > { %v5166_v50 = vpop.f32.mrf.mxu2  ;;  %v5297_v41 = vpop.f32.mrf.mxu0  ;;  %v5357_v30 = vadd.f32 %v5356_v22, %v10653_v25  ;;  %v3884_v25 = vsel %vm12535_vm4, %v10784_v3, %v10821_v35  ;;  %v3943_v22 = vshll.u32 %v2806_v9, 16  ;;  %vm12569_vm4 = vmmov %vm12568_vm1 }
 0x338   : > { %v5167_v32 = vadd.f32 %v5166_v50, %v5078_v7  ;;  %v10825_v29 = vadd.f32 %v5297_v41, %v12546_v27  ;;  %v3059_v7 = vsel %vm12550_vm9, %v10776_v57, %v10819_v45  ;;  %v4318_v50 = vshrl.u32 %v10839_v46, 16 }
 0x339   : > { %5395 = vmatmul.bf16.gmra.mxu1 %v3875_v20  ;;  %v3931_v57 = vshrl.u32 %v3059_v7, 16  ;;  %v3934_v48 = vshll.u32 %v3059_v7, 16  ;;  %v3945_v8 = vrot.slane %v3943_v22, 4 }
 0x33a   : > { %v10836_v21 = vadd.f32 %v5255_v10, %v5167_v32  ;;  %5336 = vmatmul.bf16.gmra.mxu0 %v10834_v47  ;;  %v4321_v10 = vshll.u32 %v10839_v46, 16  ;;  %v3940_v32 = vshrl.u32 %v2806_v9, 16  ;;  %v4320_v2 = vrot.slane %v4318_v50, 3 }
 0x33b   : > { %5573 = vmatmul.bf16.gmra.mxu3 %v10269_v26  ;;  %v3933_v49 = vrot.slane %v3931_v57, 3  ;;  %v3936_v16 = vrot.slane %v3934_v48, 4  ;;  %v10869_v57 = vrot.slane %v2814_v18, 1 }
 0x33c   : > { %12549 = vst [vmem:[#allocation60_spill] sm:$0xff] %v10836_v21  ;;  %5484 = vmatmul.bf16.gmra.mxu2 %v3884_v25  ;;  %v4323_v54 = vrot.slane %v4321_v10, 4  ;;  %v3942_v9 = vrot.slane %v3940_v32, 3  ;;  %v2812_v10 = vsel %vm12564_vm15, 0, %v12561_v0  ;;  %vm12581_vm15 = vmmov %vm12568_vm1 }
 0x33d   : > { %v10871_v58 = vor.u32 %v3936_v16, %v3933_v49 }
 0x33e   : > { %v5534_v41 = vpop.f32.mrf.mxu3  ;;  %v5358_v20 = vpop.f32.mrf.mxu1 }
 0x33f   : > { %v5445_v3 = vpop.f32.mrf.mxu2  ;;  %v5299_v26 = vpop.f32.mrf.mxu0  ;;  %v5359_v33 = vadd.f32 %v5358_v20, %v10668_v55  ;;  %v4324_v20 = vor.u32 %v4323_v54, %v4320_v2  ;;  %v3087_v2 = vrot.slane %v2812_v10, 1 }
 0x340   : > { %v5446_v27 = vadd.f32 %v5445_v3, %v5357_v30  ;;  %v10855_v25 = vadd.f32 %v5299_v26, %v12553_v23  ;;  %v2791_v3 = vsel %vm10224_vm0, 0, %v12557_v38  ;;  %v12559_v26 = vld [vmem:[#allocation52_spill] sm:$0xff] }
 0x341   : > { %v2813_v55 = vsel %vm8766_vm13, 0, %v12559_v26  ;;  %v10879_v48 = vrot.slane %v2791_v3, 1  ;;  %vm12565_vm13 = vmmov %vm12550_vm9  ;;  %v4325_v3 = vsel %vm12566_vm3, %v10817_v56, %v4324_v20 }
 0x342   : > { %12554 = vst [vmem:[#allocation77_spill] sm:$0xff] %v10855_v25  ;;  %v10861_v7 = vadd.f32 %v5534_v41, %v5446_v27  ;;  %v10881_v27 = vor.u32 %v3945_v8, %v3942_v9  ;;  %v3088_v23 = vrot.slane %v2813_v55, 1  ;;  %v3938_v9 = vsel %vm12568_vm1, %v10815_v59, %v10871_v58 }
 0x343   : > { %v2807_v59 = vsel %vm9739_vm6, 0, %v12557_v38  ;;  %v7382_v38 = vld [vmem:[#allocation11 + $0xc8] sm:$0xf]  ;;  %vm12579_vm6 = vmmov %vm12550_vm9 }
 0x344   : > { %12556 = vst [vmem:[#allocation54_spill] sm:$0xff] %v10861_v7  ;;  %v3091_v54 = vsel %vm12565_vm13, %v3088_v23, %v10869_v57  ;;  %vm12582_vm13 = vmmov %vm12568_vm1 }
 0x345   : > { %v3394_v8 = vshll.u32 %v3091_v54, 16  ;;  %vm12583_vm3 = vmmov %vm12579_vm6 }
 0x346   : > { %v5536_v22 = vpop.f32.mrf.mxu3  ;;  %v5361_v25 = vpop.f32.mrf.mxu1 }
 0x347   : > { %v5447_v32 = vpop.f32.mrf.mxu2  ;;  %v5302_v26 = vpop.f32.mrf.mxu0  ;;  %v5362_v49 = vadd.f32 %v5361_v25, %v10678_v31  ;;  %v3947_v31 = vsel %vm12569_vm4, %v10821_v35, %v10881_v27  ;;  %v3089_v25 = vsel %vm12570_vm10, %v3087_v2, %v3088_v23  ;;  %v12572_v23 = vld [vmem:[#allocation57_spill] sm:$0xff]  ;;  %v12576_v2 = vld [vmem:[#allocation28_spill] sm:$0xff]  ;;  %vm12594_vm10 = vmmov %vm12569_vm4 }
 0x348   : > { %v5448_v18 = vadd.f32 %v5447_v32, %v5359_v33  ;;  %v10884_v16 = vadd.f32 %v5302_v26, %v10598_v34  ;;  %v3061_v34 = vsel %vm12550_vm9, %v10819_v45, %v10879_v48  ;;  %v3391_v33 = vshrl.u32 %v3091_v54, 16 }
 0x349   : > { %5400 = vmatmul.bf16.gmra.mxu1 %v3938_v9  ;;  %v3994_v20 = vshrl.u32 %v3061_v34, 16  ;;  %v3997_v41 = vshll.u32 %v3061_v34, 16  ;;  %v3383_v10 = vshrl.u32 %v3089_v25, 16  ;;  %v3386_v32 = vshll.u32 %v3089_v25, 16  ;;  %v7538_v25 = vld [vmem:[#allocation11 + $0xc4] sm:$0xf] }
 0x34a   : > { %v10891_v0 = vadd.f32 %v5536_v22, %v5448_v18  ;;  %5341 = vmatmul.bf16.gmra.mxu0 %v4325_v3  ;;  %v4003_v22 = vshrl.u32 %v2807_v59, 16  ;;  %v4006_v26 = vshll.u32 %v2807_v59, 16  ;;  %v3396_v9 = vrot.slane %v3394_v8, 4  ;;  %v7376_v59 = vld [vmem:[#allocation11 + $0xd0] sm:$0xf0] }
 0x34b   : > { %5578 = vmatmul.bf16.gmra.mxu3 %v10333_v63  ;;  %v3393_v63 = vrot.slane %v3391_v33, 3  ;;  %v2815_v54 = vsel %vm12472_vm5, 0, %v12572_v23  ;;  %v3996_v30 = vrot.slane %v3994_v20, 3  ;;  %v7379_v33 = vor.u32 %v7538_v25, %v7376_v59  ;;  %v7541_v8 = vld [vmem:[#allocation11 + $0xd4] sm:$0xf0]  ;;  %v12578_v25 = vld [vmem:[#allocation67_spill] sm:$0xff]  ;;  %vm12580_vm5 = vmmov %vm12568_vm1 }
 0x34c   : > { %12567 = vst [vmem:[#allocation32_spill] sm:$0xff] %v10891_v0  ;;  %5489 = vmatmul.bf16.gmra.mxu2 %v3947_v31  ;;  %v12574_v31 = vld [vmem:[#allocation38_spill] sm:$0xff]  ;;  %v3999_v0 = vrot.slane %v3997_v41, 4  ;;  %v3385_v21 = vrot.slane %v3383_v10, 3  ;;  %v3388_v15 = vrot.slane %v3386_v32, 4  ;;  %v12584_v59 = vld [vmem:[#allocation43_spill] sm:$0xff] }
 0x34d   : > { %6043 = vmatpush.bf16.msra.mxu2 %v7379_v33  ;;  %vm12585_vm1 = vsmask.f32 7424 }
 0x34e   : > { %v5539_v50 = vpop.f32.mrf.mxu3  ;;  %v5363_v3 = vpop.f32.mrf.mxu1  ;;  %v10923_v20 = vor.u32 %v3999_v0, %v3996_v30  ;;  %v3389_v32 = vor.u32 %v3388_v15, %v3385_v21 }
 0x34f   : > { %v5450_v45 = vpop.f32.mrf.mxu2  ;;  %v5304_v35 = vpop.f32.mrf.mxu0  ;;  %v5364_v34 = vadd.f32 %v5363_v3, %v10693_v62  ;;  %v10921_v62 = vor.u32 %v3396_v9, %v3393_v63  ;;  %v7540_v9 = vld [vmem:[#allocation11 + $0xcc] sm:$0xf0] }
 0x350   : > { %v5451_v18 = vadd.f32 %v5450_v45, %v5362_v49  ;;  %v10911_v55 = vadd.f32 %v5304_v35, %v12574_v31  ;;  %v4005_v49 = vrot.slane %v4003_v22, 3  ;;  %v4008_v45 = vrot.slane %v4006_v26, 4 }
 0x351   : > { %v2792_v35 = vsel %vm10287_vm2, 0, %v12576_v2  ;;  %v7383_v31 = vor.u32 %v7541_v8, %v7382_v38  ;;  %v3398_v0 = vsel %vm12580_vm5, %v3389_v32, %v10921_v62  ;;  %v4001_v15 = vsel %vm12581_vm15, %v10871_v58, %v10923_v20  ;;  %v7384_v8 = vld [vmem:[#allocation11 + $0xd8] sm:$0xf0]  ;;  %vm12596_vm5 = vmmov %vm12583_vm3 }
 0x352   : > { %12575 = vst [vmem:[#allocation56_spill] sm:$0xff] %v10911_v55  ;;  %v10914_v7 = vadd.f32 %v5539_v50, %v5451_v18  ;;  %v10919_v55 = vrot.slane %v2815_v54, 1  ;;  %v10925_v22 = vor.u32 %v4008_v45, %v4005_v49  ;;  %v10927_v26 = vrot.slane %v2792_v35, 1  ;;  %v12586_v45 = vld [vmem:[#allocation21_spill] sm:$0xff]  ;;  %vm12597_vm15 = vmmov %vm12569_vm4 }
 0x353   : > { %6132 = vmatpush.bf16.msra.mxu3 %v7383_v31  ;;  %v3070_v49 = vsel %vm12585_vm1, %v10839_v46, %v12584_v59  ;;  %vm12587_vm9 = vnez %v12586_v45  ;;  %vm12607_vm1 = vmmov %vm12569_vm4 }
 0x354   : > { %v3093_v30 = vsel %vm12579_vm6, %v10869_v57, %v10919_v55  ;;  %v4010_v21 = vsel %vm12582_vm13, %v10881_v27, %v10925_v22  ;;  %v7374_v57 = vld [vmem:[#allocation11 + $0xc0] sm:$0xf]  ;;  %v2808_v33 = vsel %vm12587_vm9, 0, %v12576_v2  ;;  %vm12595_vm6 = vmmov %vm12569_vm4 }
 0x355   : > { %v3454_v58 = vshrl.u32 %v3093_v30, 16  ;;  %v7375_v27 = vor.u32 %v7540_v9, %v7374_v57  ;;  %v3457_v35 = vshll.u32 %v3093_v30, 16  ;;  %v4066_v46 = vshrl.u32 %v2808_v33, 16  ;;  %v12588_v57 = vld [vmem:[#allocation39_spill] sm:$0xff]  ;;  %vm12608_vm9 = vmmov %vm12596_vm5 }
 0x356   : > { %v5541_v50 = vpop.f32.mrf.mxu3  ;;  %v5366_v3 = vpop.f32.mrf.mxu1 }
 0x357   : > { %v5452_v41 = vpop.f32.mrf.mxu2  ;;  %v5307_v10 = vpop.f32.mrf.mxu0  ;;  %v5367_v54 = vadd.f32 %v5366_v3, %v10703_v5  ;;  %v3063_v5 = vsel %vm12583_vm3, %v10879_v48, %v10927_v26  ;;  %v4264_v48 = vshrl.u32 %v3070_v49, 16  ;;  %5954 = vmatpush.bf16.msra.mxu1 %v7375_v27  ;;  %v4069_v3 = vshll.u32 %v2808_v33, 16 }
 0x358   : > { %v5453_v18 = vadd.f32 %v5452_v41, %v5364_v34  ;;  %v10930_v38 = vadd.f32 %v5307_v10, %v12578_v25  ;;  %v7539_v34 = vld [vmem:[#allocation11 + $0xcc] sm:$0xf]  ;;  %v4267_v41 = vshll.u32 %v3070_v49, 16  ;;  %v4060_v10 = vshll.u32 %v3063_v5, 16 }
 0x359   : > { %5405 = vmatmul.bf16.gmra.mxu1 %v4001_v15  ;;  %v7387_v31 = vor.u32 %v7539_v34, %v7384_v8  ;;  %v3456_v45 = vrot.slane %v3454_v58, 3  ;;  %v3459_v34 = vrot.slane %v3457_v35, 4 }
 0x35a   : > { %v10938_v63 = vadd.f32 %v5541_v50, %v5453_v18  ;;  %5622 = vmatmul.bf16.vlgmr.msrb.gmra.mxu0 %v3398_v0  ;;  %v4057_v50 = vshrl.u32 %v3063_v5, 16  ;;  %v4269_v25 = vrot.slane %v4267_v41, 4  ;;  %v4062_v8 = vrot.slane %v4060_v10, 4  ;;  %v12591_v41 = vld [vmem:[#allocation71_spill] sm:$0xff] }
 0x35b   : > { %5583 = vmatmul.bf16.gmra.mxu3 %v10394_v36  ;;  %6221 = vmatpush.bf16.msra.mxu0 %v7387_v31  ;;  %v4266_v36 = vrot.slane %v4264_v48, 3  ;;  %v2816_v31 = vsel %vm12483_vm7, 0, %v12491_v13  ;;  %v4068_v48 = vrot.slane %v4066_v46, 3  ;;  %vm12593_vm7 = vmmov %vm12583_vm3 }
 0x35c   : > { %5494 = vmatmul.bf16.gmra.mxu2 %v4010_v21  ;;  %v4059_v27 = vrot.slane %v4057_v50, 3  ;;  %v10975_v35 = vrot.slane %v2816_v31, 1 }
 0x35d   : > { %v10960_v49 = vor.u32 %v4269_v25, %v4266_v36 }
 0x35e   : > { %v5544_v18 = vpop.f32.mrf.mxu3  ;;  %v5368_v21 = vpop.f32.mrf.mxu1  ;;  %v10979_v50 = vor.u32 %v4062_v8, %v4059_v27 }
 0x35f   : > { %v5455_v32 = vpop.f32.mrf.mxu2  ;;  %v5309_v0 = vpop.f32.mrf.mxu0  ;;  %v5369_v30 = vadd.f32 %v5368_v21, %v10718_v43  ;;  %v10973_v43 = vsel %vm12569_vm4, %v10817_v56, %v10960_v49  ;;  %v3095_v21 = vsel %vm12593_vm7, %v10919_v55, %v10975_v35  ;;  %vm12610_vm7 = vmmov %vm12596_vm5 }
 0x360   : > { %v5456_v15 = vadd.f32 %v5455_v32, %v5367_v54  ;;  %v10957_v9 = vadd.f32 %v5309_v0, %v12588_v57  ;;  %v4071_v54 = vrot.slane %v4069_v3, 4  ;;  %v2793_v32 = vsel %vm10321_vm14, 0, %v12591_v41 }
 0x361   : > { %v10981_v10 = vrot.slane %v2793_v32, 1  ;;  %v3517_v55 = vshrl.u32 %v3095_v21, 16 }
 0x362   : > { %12589 = vst [vmem:[#allocation44_spill] sm:$0xff] %v10957_v9  ;;  %v10962_v5 = vadd.f32 %v5544_v18, %v5456_v15  ;;  %v10977_v18 = vor.u32 %v3459_v34, %v3456_v45  ;;  %v10983_v3 = vor.u32 %v4071_v54, %v4068_v48  ;;  %v12598_v34 = vld [vmem:[#allocation69_spill] sm:$0xff] }
 0x363   : > { %vm12599_vm13 = vnez %v12598_v34 }
 0x364   : > { %v3461_v45 = vsel %vm12594_vm10, %v10921_v62, %v10977_v18  ;;  %v3520_v62 = vshll.u32 %v3095_v21, 16  ;;  %v2809_v27 = vsel %vm12599_vm13, 0, %v12591_v41  ;;  %vm12621_vm13 = vmmov %vm12607_vm1 }
 0x365   : > { %v4132_v48 = vshll.u32 %v2809_v27, 16 }
 0x366   : > { %v5546_v46 = vpop.f32.mrf.mxu3  ;;  %v5371_v0 = vpop.f32.mrf.mxu1 }
 0x367   : > { %v5457_v13 = vpop.f32.mrf.mxu2  ;;  %v5312_v36 = vpop.f32.mrf.mxu0  ;;  %v5372_v56 = vadd.f32 %v5371_v0, %v10728_v53  ;;  %v4073_v53 = vsel %vm12597_vm15, %v10925_v22, %v10983_v3  ;;  %v3522_v22 = vrot.slane %v3520_v62, 4  ;;  %v4134_v9 = vrot.slane %v4132_v48, 4  ;;  %v7537_v62 = vld [vmem:[#allocation11 + $0xb4] sm:$0xf0]  ;;  %vm12620_vm15 = vmmov %vm12610_vm7 }
 0x368   : > { %v5458_v25 = vadd.f32 %v5457_v13, %v5369_v30  ;;  %v10986_v15 = vadd.f32 %v5312_v36, %v10645_v11  ;;  %v4064_v30 = vsel %vm12595_vm6, %v10923_v20, %v10979_v50  ;;  %v3065_v11 = vsel %vm12596_vm5, %v10927_v26, %v10981_v10  ;;  %v12600_v36 = vld [vmem:[#allocation42_spill] sm:$0xff] }
 0x369   : > { %5410 = vmatmul.bf16.gmra.mxu1 %v4064_v30  ;;  %v4120_v20 = vshrl.u32 %v3065_v11, 16  ;;  %v4123_v8 = vshll.u32 %v3065_v11, 16  ;;  %v4129_v26 = vshrl.u32 %v2809_v27, 16  ;;  %v7534_v30 = vld [vmem:[#allocation11 + $0xa4] sm:$0xf] }
 0x36a   : > { %v10995_v57 = vadd.f32 %v5546_v46, %v5458_v25  ;;  %5627 = vmatmul.bf16.gmra.mxu0 %v3461_v45  ;;  %v3519_v46 = vrot.slane %v3517_v55, 3  ;;  %v7360_v11 = vld [vmem:[#allocation11 + $0xb0] sm:$0xf0] }
 0x36b   : > { %5588 = vmatmul.bf16.gmra.mxu3 %v10465_v39  ;;  %v4122_v0 = vrot.slane %v4120_v20, 3  ;;  %v4125_v21 = vrot.slane %v4123_v8, 4  ;;  %v4131_v34 = vrot.slane %v4129_v26, 3  ;;  %v7363_v55 = vor.u32 %v7534_v30, %v7360_v11 }
 0x36c   : > { %5499 = vmatmul.bf16.gmra.mxu2 %v4073_v53  ;;  %v7366_v53 = vld [vmem:[#allocation11 + $0xa8] sm:$0xf]  ;;  %v11022_v20 = vor.u32 %v3522_v22, %v3519_v46 }
 0x36d   : > { %6044 = vmatpush.bf16.msra.mxu2 %v7363_v55  ;;  %v11024_v8 = vor.u32 %v4125_v21, %v4122_v0  ;;  %v7536_v0 = vld [vmem:[#allocation11 + $0xac] sm:$0xf0]  ;;  %v7535_v21 = vld [vmem:[#allocation11 + $0xac] sm:$0xf] }
 0x36e   : > { %v5549_v31 = vpop.f32.mrf.mxu3  ;;  %v5373_v13 = vpop.f32.mrf.mxu1 }
 0x36f   : > { %v5460_v33 = vpop.f32.mrf.mxu2  ;;  %v5314_v54 = vpop.f32.mrf.mxu0  ;;  %v5374_v39 = vadd.f32 %v5373_v13, %v10743_v61  ;;  %v7367_v61 = vor.u32 %v7537_v62, %v7366_v53 }
 0x370   : > { %v5461_v32 = vadd.f32 %v5460_v33, %v5372_v56  ;;  %v11011_v25 = vadd.f32 %v5314_v54, %v12600_v36  ;;  %v2817_v56 = vsel %vm12493_vm12, 0, %v12499_v1  ;;  %v12603_v33 = vld [vmem:[#allocation74_spill] sm:$0xff]  ;;  %v12604_v54 = vld [vmem:[#allocation68_spill] sm:$0xff]  ;;  %vm12606_vm12 = vmmov %vm12569_vm4 }
 0x371   : > { %vm12605_vm3 = vnez %v12604_v54  ;;  %6133 = vmatpush.bf16.msra.mxu3 %v7367_v61  ;;  %v3524_v46 = vsel %vm12606_vm12, %v10977_v18, %v11022_v20  ;;  %vm12609_vm4 = vmmov %vm12607_vm1  ;;  %v7358_v18 = vld [vmem:[#allocation11 + $0xa0] sm:$0xf] }
 0x372   : > { %12601 = vst [vmem:[#allocation59_spill] sm:$0xff] %v11011_v25  ;;  %v11014_v45 = vadd.f32 %v5549_v31, %v5461_v32  ;;  %v2794_v36 = vsel %vm12605_vm3, 0, %v12603_v33  ;;  %v11026_v31 = vrot.slane %v2817_v56, 1  ;;  %v11028_v32 = vor.u32 %v4134_v9, %v4131_v34  ;;  %v7368_v56 = vld [vmem:[#allocation11 + $0xb8] sm:$0xf0]  ;;  %vm12622_vm12 = vmmov %vm12607_vm1 }
 0x373   : > { %v3066_v1 = vrot.slane %v2794_v36, 1  ;;  %v4127_v9 = vsel %vm12607_vm1, %v10979_v50, %v11024_v8  ;;  %v2810_v34 = vsel %vm9990_vm11, 0, %v12603_v33  ;;  %v7371_v36 = vor.u32 %v7535_v21, %v7368_v56  ;;  %vm12623_vm1 = vmmov %vm12610_vm7  ;;  %v7286_v25 = vld [vmem:[#allocation11 + $0x8] sm:$0xf] }
 0x375   : > { %6222 = vmatpush.bf16.msra.mxu0 %v7371_v36 }
 0x376   : > { %v5551_v48 = vpop.f32.mrf.mxu3  ;;  %v5376_v11 = vpop.f32.mrf.mxu1 }
 0x377   : > { %v5462_v26 = vpop.f32.mrf.mxu2  ;;  %v5317_v13 = vpop.f32.mrf.mxu0  ;;  %v5377_v53 = vadd.f32 %v5376_v11, %v10753_v28  ;;  %v3067_v28 = vsel %vm12610_vm7, %v10981_v10, %v3066_v1 }
 0x378   : > { %v5463_v30 = vadd.f32 %v5462_v26, %v5374_v39  ;;  %v11031_v27 = vadd.f32 %v5317_v13, %v10670_v44  ;;  %v3097_v39 = vsel %vm12608_vm9, %v10975_v35, %v11026_v31  ;;  %v4136_v44 = vsel %vm12609_vm4, %v10983_v3, %v11028_v32  ;;  %vm12624_vm9 = vmmov %vm12609_vm4 }
 0x379   : > { %5415 = vmatmul.bf16.gmra.mxu1 %v4127_v9  ;;  %v7359_v35 = vor.u32 %v7536_v0, %v7358_v18  ;;  %v3580_v55 = vshrl.u32 %v3097_v39, 16  ;;  %v3583_v62 = vshll.u32 %v3097_v39, 16  ;;  %v4183_v61 = vshrl.u32 %v3067_v28, 16 }
 0x37a   : > { %v11037_v22 = vadd.f32 %v5551_v48, %v5463_v30  ;;  %5632 = vmatmul.bf16.gmra.mxu0 %v3524_v46  ;;  %v4186_v3 = vshll.u32 %v3067_v28, 16  ;;  %v4192_v48 = vshrl.u32 %v2810_v34, 16  ;;  %v4195_v13 = vshll.u32 %v2810_v34, 16  ;;  %v12613_v28 = vld [vmem:[#allocation24_spill] sm:$0xff] }
 0x37b   : > { %5593 = vmatmul.bf16.gmra.mxu3 %v10508_v14  ;;  %5955 = vmatpush.bf16.msra.mxu1 %v7359_v35  ;;  %v3582_v9 = vrot.slane %v3580_v55, 3  ;;  %v4185_v39 = vrot.slane %v4183_v61, 3  ;;  %vm12614_vm11 = vnez %v12613_v28  ;;  %v12615_v35 = vld [vmem:[#allocation26_spill] sm:$0xff] }
 0x37c   : > { %5504 = vmatmul.bf16.gmra.mxu2 %v4136_v44  ;;  %v3585_v44 = vrot.slane %v3583_v62, 4  ;;  %v4188_v0 = vrot.slane %v4186_v3, 4  ;;  %v2818_v21 = vsel %vm12614_vm11, 0, %v12506_v19  ;;  %v4194_v50 = vrot.slane %v4192_v48, 3  ;;  %vm12630_vm11 = vmmov %vm12624_vm9 }
 0x37d   : > { %v4197_v34 = vrot.slane %v4195_v13, 4  ;;  %vm12616_vm10 = vnez %v12615_v35  ;;  %v3098_v56 = vrot.slane %v2818_v21, 1 }
 0x37e   : > { %v5554_v10 = vpop.f32.mrf.mxu3  ;;  %v11054_v14 = vpop.f32.mrf.mxu1  ;;  %v3586_v55 = vor.u32 %v3585_v44, %v3582_v9  ;;  %v4189_v62 = vor.u32 %v4188_v0, %v4185_v39 }
 0x37f   : > { %v5465_v26 = vpop.f32.mrf.mxu2  ;;  %v5319_v30 = vpop.f32.mrf.mxu0 }
 0x380   : > { %v5466_v11 = vadd.f32 %v5465_v26, %v5377_v53  ;;  %v11057_v46 = vadd.f32 %v5319_v30, %v10680_v17  ;;  %v12617_v53 = vld [vmem:[#allocation70_spill] sm:$0xff]  ;;  %v4198_v26 = vor.u32 %v4197_v34, %v4194_v50  ;;  %v3099_v30 = vsel %vm12620_vm15, %v11026_v31, %v3098_v56  ;;  %v12625_v31 = vld [vmem:[#allocation40_spill] sm:$0xff] }
 0x381   : > { %vm12618_vm6 = vnez %v12617_v53  ;;  %v4190_v9 = vsel %vm12622_vm12, %v11024_v8, %v4189_v62  ;;  %vm12626_vm4 = vnez %v12625_v31 }
 0x382   : > { %12612 = vst [vmem:[#allocation22_spill] sm:$0xff] %v11057_v46  ;;  %v11059_v18 = vadd.f32 %v5554_v10, %v5466_v11  ;;  %vm12619_vm5 = vmpackc.low %vm12616_vm10, %vm12618_vm6  ;;  %v3587_v11 = vsel %vm12621_vm13, %v11022_v20, %v3586_v55  ;;  %v2811_v39 = vsel %vm12626_vm4, 0, %v10501_v51  ;;  %v3646_v20 = vshll.u32 %v3099_v30, 16  ;;  %v7533_v46 = vld [vmem:[#allocation11 + $0x94] sm:$0xf0] }
 0x383   : > { %v2795_v17 = vsel %vm12619_vm5, 0, %v10501_v51  ;;  %v4255_v50 = vshrl.u32 %v2811_v39, 16  ;;  %vm12631_vm10 = vmmov %vm12624_vm9 }
 0x384   : > { %v11070_v36 = vrot.slane %v2795_v17, 1  ;;  %vm12632_vm6 = vmmov %vm12623_vm1 }
 0x385   : > { %vm12633_vm5 = vmmov %vm12624_vm9 }
 0x386   : > { %v11074_v3 = vpop.f32.mrf.mxu3  ;;  %v5381_v10 = vpop.f32.mrf.mxu1  ;;  %v3069_v44 = vsel %vm12623_vm1, %v3066_v1, %v11070_v36  ;;  %v4258_v1 = vshll.u32 %v2811_v39, 16  ;;  %v12628_v39 = vld [vmem:[#allocation33_spill] sm:$0xff]  ;;  %vm12637_vm13 = vmmov %vm12633_vm5 }
 0x387   : > { %v11072_v61 = vpop.f32.mrf.mxu2  ;;  %v5322_v19 = vpop.f32.mrf.mxu0  ;;  %v5382_v13 = vadd.f32 %v5381_v10, %v10787_v24  ;;  %v3643_v24 = vshrl.u32 %v3099_v30, 16  ;;  %v4246_v0 = vshrl.u32 %v3069_v44, 16  ;;  %v4249_v28 = vshll.u32 %v3069_v44, 16  ;;  %v7530_v30 = vld [vmem:[#allocation11 + $0x84] sm:$0xf]  ;;  %vm12638_vm12 = vmmov %vm12633_vm5 }
 0x388   : > { %v11077_v48 = vadd.f32 %v5322_v19, %v10695_v60  ;;  %v4199_v60 = vsel %vm12624_vm9, %v11028_v32, %v4198_v26  ;;  %v7350_v44 = vld [vmem:[#allocation11 + $0x88] sm:$0xf]  ;;  %v4260_v31 = vrot.slane %v4258_v1, 4  ;;  %vm12629_vm7 = vnez %v12628_v39  ;;  %vm12640_vm9 = vmmov %vm12633_vm5 }
 0x389   : > { %5420 = vmatmul.bf16.gmra.mxu1 %v4190_v9  ;;  %v3645_v32 = vrot.slane %v3643_v24, 3  ;;  %v4248_v19 = vrot.slane %v4246_v0, 3  ;;  %v4251_v10 = vrot.slane %v4249_v28, 4  ;;  %v7344_v9 = vld [vmem:[#allocation11 + $0x90] sm:$0xf0]  ;;  %v7351_v24 = vor.u32 %v7533_v46, %v7350_v44  ;;  %vm12641_vm4 = vmmov %vm12633_vm5 }
 0x38a   : > { %5637 = vmatmul.bf16.gmra.mxu0 %v3587_v11  ;;  %v7352_v44 = vld [vmem:[#allocation11 + $0x98] sm:$0xf0] }
 0x38b   : > { %5598 = vmatmul.bf16.gmra.mxu3 %v10834_v47  ;;  %v3648_v47 = vrot.slane %v3646_v20, 4 }
 0x38c   : > { %5509 = vmatmul.bf16.gmra.mxu2 %v4199_v60  ;;  %v4257_v60 = vrot.slane %v4255_v50, 3  ;;  %6134 = vmatpush.bf16.msra.mxu3 %v7351_v24 }
 0x38e   : > { %v5559_v21 = vpop.f32.mrf.mxu3  ;;  %v11094_v53 = vpop.f32.mrf.mxu1 }
 0x38f   : > { %v5470_v8 = vpop.f32.mrf.mxu2  ;;  %v5324_v34 = vpop.f32.mrf.mxu0 }
 0x390   : > { %v5471_v35 = vadd.f32 %v5470_v8, %v5382_v13  ;;  %v11097_v17 = vadd.f32 %v5324_v34, %v10705_v37  ;;  %v2819_v13 = vsel %vm12629_vm7, 0, %v12512_v40  ;;  %v7347_v8 = vor.u32 %v7530_v30, %v7344_v9  ;;  %v7531_v9 = vld [vmem:[#allocation11 + $0x8c] sm:$0xf] }
 0x391   : > { %v3649_v37 = vor.u32 %v3648_v47, %v3645_v32  ;;  %v4252_v34 = vor.u32 %v4251_v10, %v4248_v19  ;;  %v3100_v20 = vrot.slane %v2819_v13, 1  ;;  %v7342_v19 = vld [vmem:[#allocation11 + $0x80] sm:$0xf]  ;;  %v7532_v10 = vld [vmem:[#allocation11 + $0x8c] sm:$0xf0] }
 0x392   : > { %12627 = vst [vmem:[#allocation53_spill] sm:$0xff] %v11097_v17  ;;  %v11099_v11 = vadd.f32 %v5559_v21, %v5471_v35  ;;  %6045 = vmatpush.bf16.msra.mxu2 %v7347_v8  ;;  %v4261_v21 = vor.u32 %v4260_v31, %v4257_v60 }
 0x393   : > { %v3650_v30 = vsel %vm12630_vm11, %v3586_v55, %v3649_v37  ;;  %v4253_v46 = vsel %vm12631_vm10, %v4189_v62, %v4252_v34  ;;  %v3101_v32 = vsel %vm12632_vm6, %v3098_v56, %v3100_v20  ;;  %v4327_v55 = vshrl.u32 %v11070_v36, 16  ;;  %vm12648_vm11 = vmmov %vm12641_vm4 }
 0x394   : > { %v4262_v47 = vsel %vm12633_vm5, %v4198_v26, %v4261_v21  ;;  %v3706_v60 = vshrl.u32 %v3101_v32, 16  ;;  %v3709_v31 = vshll.u32 %v3101_v32, 16  ;;  %v4330_v62 = vshll.u32 %v11070_v36, 16  ;;  %vm12649_vm10 = vmmov %vm12623_vm1 }
 0x395   : > { %v4329_v36 = vrot.slane %v4327_v55, 3  ;;  %vm12656_vm5 = vmmov %vm12641_vm4 }
 0x396   : > { %v11106_v28 = vpop.f32.mrf.mxu3  ;;  %v5386_v50 = vpop.f32.mrf.mxu1  ;;  %v4332_v32 = vrot.slane %v4330_v62, 4 }
 0x397   : > { %v11104_v0 = vpop.f32.mrf.mxu2  ;;  %v5327_v35 = vpop.f32.mrf.mxu0  ;;  %v5387_v40 = vadd.f32 %v5386_v50, %v10825_v29  ;;  %v7355_v29 = vor.u32 %v7531_v9, %v7352_v44  ;;  %v4340_v50 = vshll.u32 %v12584_v59, 16 }
 0x398   : > { %v11109_v1 = vadd.f32 %v5327_v35, %v10720_v4  ;;  %v7343_v4 = vor.u32 %v7532_v10, %v7342_v19  ;;  %v4337_v35 = vshrl.u32 %v12584_v59, 16 }
 0x399   : > { %5425 = vmatmul.bf16.gmra.mxu1 %v4253_v46  ;;  %6223 = vmatpush.bf16.msra.mxu0 %v7355_v29  ;;  %v3711_v46 = vrot.slane %v3709_v31, 4  ;;  %v4342_v10 = vrot.slane %v4340_v50, 4 }
 0x39a   : > { %5642 = vmatmul.bf16.gmra.mxu0 %v3650_v30  ;;  %5956 = vmatpush.bf16.msra.mxu1 %v7343_v4  ;;  %v4333_v4 = vor.u32 %v4332_v32, %v4329_v36 }
 0x39b   : > { %5603 = vmatmul.bf16.gmra.mxu3 %v10973_v43  ;;  %v3708_v43 = vrot.slane %v3706_v60, 3 }
 0x39c   : > { %5514 = vmatmul.bf16.gmra.mxu2 %v4262_v47  ;;  %v12635_v47 = vld [vmem:[#allocation66_spill] sm:$0xff]  ;;  %v4334_v62 = vsel %vm12638_vm12, %v4252_v34, %v4333_v4  ;;  %vm12666_vm12 = vmmov %vm12623_vm1 }
 0x39d   : > { %vm12636_vm15 = vnez %v12635_v47  ;;  %v3712_v9 = vor.u32 %v3711_v46, %v3708_v43 }
 0x39e   : > { %v5564_v39 = vpop.f32.mrf.mxu3  ;;  %v11119_v8 = vpop.f32.mrf.mxu1  ;;  %v2820_v19 = vsel %vm12636_vm15, 0, %v12518_v12  ;;  %vm12657_vm15 = vmmov %vm12623_vm1 }
 0x39f   : > { %v5475_v56 = vpop.f32.mrf.mxu2  ;;  %v5329_v26 = vpop.f32.mrf.mxu0  ;;  %v3713_v12 = vsel %vm12637_vm13, %v3649_v37, %v3712_v9  ;;  %vm12665_vm13 = vmmov %vm12641_vm4 }
 0x3a0   : > { %v5476_v13 = vadd.f32 %v5475_v56, %v5387_v40  ;;  %v11122_v24 = vadd.f32 %v5329_v26, %v10730_v6  ;;  %v4339_v40 = vrot.slane %v4337_v35, 3  ;;  %v3102_v6 = vrot.slane %v2820_v19, 1 }
 0x3a2   : > { %12634 = vst [vmem:[#allocation27_spill] sm:$0xff] %v11122_v24  ;;  %v11126_v30 = vadd.f32 %v5564_v39, %v5476_v13  ;;  %v11139_v55 = vor.u32 %v4342_v10, %v4339_v40  ;;  %v3103_v26 = vsel %vm12623_vm1, %v3100_v20, %v3102_v6  ;;  %v12639_v13 = vld [vmem:[#allocation45_spill] sm:$0xff]  ;;  %v7526_v40 = vld [vmem:[#allocation11 + $0x64] sm:$0xf]  ;;  %v7328_v10 = vld [vmem:[#allocation11 + $0x70] sm:$0xf0] }
 0x3a3   : > { %v4335_v43 = vsel %vm12640_vm9, %v4261_v21, %v12639_v13  ;;  %v3772_v35 = vshll.u32 %v3103_v26, 16  ;;  %v12642_v20 = vld [vmem:[#allocation41_spill] sm:$0xff]  ;;  %v7331_v4 = vor.u32 %v7526_v40, %v7328_v10 }
 0x3a4   : > { %v7527_v40 = vld [vmem:[#allocation11 + $0x6c] sm:$0xf] }
 0x3a5   : > { %v3774_v19 = vrot.slane %v3772_v35, 4  ;;  %6046 = vmatpush.bf16.msra.mxu2 %v7331_v4  ;;  %v7310_v4 = vld [vmem:[#allocation11 + $0x40] sm:$0xf] }
 0x3a6   : > { %v11133_v60 = vpop.f32.mrf.mxu3  ;;  %v5391_v56 = vpop.f32.mrf.mxu1 }
 0x3a7   : > { %v11131_v44 = vpop.f32.mrf.mxu2  ;;  %v5332_v29 = vpop.f32.mrf.mxu0  ;;  %v5392_v31 = vadd.f32 %v5391_v56, %v10884_v16  ;;  %v3769_v16 = vshrl.u32 %v3103_v26, 16  ;;  %v12644_v56 = vld [vmem:[#allocation65_spill] sm:$0xff] }
 0x3a8   : > { %v11136_v39 = vadd.f32 %v5332_v29, %v10745_v42  ;;  %v4344_v42 = vsel %vm12641_vm4, %v10960_v49, %v11139_v55  ;;  %v7334_v49 = vld [vmem:[#allocation11 + $0x68] sm:$0xf]  ;;  %v7529_v29 = vld [vmem:[#allocation11 + $0x74] sm:$0xf0] }
 0x3a9   : > { %5430 = vmatmul.bf16.gmra.mxu1 %v4334_v62  ;;  %v3771_v47 = vrot.slane %v3769_v16, 3  ;;  %v7335_v26 = vor.u32 %v7529_v29, %v7334_v49  ;;  %v7336_v49 = vld [vmem:[#allocation11 + $0x78] sm:$0xf0]  ;;  %v7524_v29 = vld [vmem:[#allocation11 + $0x4c] sm:$0xf0] }
 0x3aa   : > { %5647 = vmatmul.bf16.gmra.mxu0 %v3713_v12  ;;  %v12645_v12 = vld [vmem:[#allocation25_spill] sm:$0xff] }
 0x3ab   : > { %5608 = vmatmul.bf16.gmra.mxu3 %v4344_v42  ;;  %vm12646_vm7 = vnez %v12645_v12  ;;  %v7522_v12 = vld [vmem:[#allocation11 + $0x44] sm:$0xf] }
 0x3ac   : > { %5519 = vmatmul.bf16.gmra.mxu2 %v4335_v43  ;;  %v2821_v62 = vsel %vm12646_vm7, 0, %v12644_v56  ;;  %6135 = vmatpush.bf16.msra.mxu3 %v7335_v26  ;;  %v7339_v56 = vor.u32 %v7527_v40, %v7336_v49  ;;  %v7318_v26 = vld [vmem:[#allocation11 + $0x48] sm:$0xf]  ;;  %v12652_v49 = vld [vmem:[#allocation35_spill] sm:$0xff] }
 0x3ad   : > { %v11165_v42 = vrot.slane %v2821_v62, 1  ;;  %v7312_v62 = vld [vmem:[#allocation11 + $0x50] sm:$0xf0]  ;;  %vm12653_vm6 = vnez %v12652_v49 }
 0x3ae   : > { %v5569_v46 = vpop.f32.mrf.mxu3  ;;  %v11149_v34 = vpop.f32.mrf.mxu1  ;;  %6224 = vmatpush.bf16.msra.mxu0 %v7339_v56 }
 0x3af   : > { %v5480_v50 = vpop.f32.mrf.mxu2  ;;  %v5334_v37 = vpop.f32.mrf.mxu0 }
 0x3b0   : > { %v5481_v36 = vadd.f32 %v5480_v50, %v5392_v31  ;;  %v11152_v32 = vadd.f32 %v5334_v37, %v12642_v20  ;;  %v11159_v31 = vor.u32 %v3774_v19, %v3771_v47  ;;  %v12647_v50 = vld [vmem:[#allocation72_spill] sm:$0xff]  ;;  %v3105_v20 = vsel %vm12649_vm10, %v3102_v6, %v11165_v42  ;;  %v7326_v47 = vld [vmem:[#allocation11 + $0x60] sm:$0xf]  ;;  %v7528_v19 = vld [vmem:[#allocation11 + $0x6c] sm:$0xf0] }
 0x3b1   : > { %v7327_v10 = vor.u32 %v7528_v19, %v7326_v47  ;;  %v12650_v19 = vld [vmem:[#allocation48_spill] sm:$0xff] }
 0x3b2   : > { %12643 = vst [vmem:[#allocation36_spill] sm:$0xff] %v11152_v32  ;;  %v11154_v21 = vadd.f32 %v5569_v46, %v5481_v36  ;;  %v3776_v36 = vsel %vm12648_vm11, %v3712_v9, %v11159_v31  ;;  %v7315_v9 = vor.u32 %v7522_v12, %v7312_v62  ;;  %v7294_v12 = vld [vmem:[#allocation11 + $0x20] sm:$0xf]  ;;  %v7520_v62 = vld [vmem:[#allocation11 + $0x2c] sm:$0xf0] }
 0x3b3   : > { %5957 = vmatpush.bf16.msra.mxu1 %v7327_v10 }
 0x3b4   : > { %6047 = vmatpush.bf16.msra.mxu2 %v7315_v9  ;;  %v7296_v9 = vld [vmem:[#allocation11 + $0x30] sm:$0xf0] }
 0x3b6   : > { %v11163_v43 = vpop.f32.mrf.mxu3  ;;  %v5396_v35 = vpop.f32.mrf.mxu1 }
 0x3b7   : > { %v11161_v13 = vpop.f32.mrf.mxu2  ;;  %v5337_v16 = vpop.f32.mrf.mxu0  ;;  %v5397_v37 = vadd.f32 %v5396_v35, %v10930_v38  ;;  %v3835_v38 = vshll.u32 %v3105_v20, 16  ;;  %v7311_v35 = vor.u32 %v7524_v29, %v7310_v4 }
 0x3b8   : > { %v11168_v46 = vadd.f32 %v5337_v16, %v12647_v50  ;;  %v3832_v16 = vshrl.u32 %v3105_v20, 16  ;;  %v7525_v50 = vld [vmem:[#allocation11 + $0x54] sm:$0xf0]  ;;  %v2822_v20 = vsel %vm12653_vm6, 0, %v12543_v52 }
 0x3b9   : > { %v7319_v6 = vor.u32 %v7525_v50, %v7318_v26  ;;  %v3837_v29 = vrot.slane %v3835_v38, 4  ;;  %5958 = vmatpush.bf16.msra.mxu1 %v7311_v35  ;;  %v3106_v56 = vrot.slane %v2822_v20, 1  ;;  %v7295_v50 = vor.u32 %v7520_v62, %v7294_v12  ;;  %v7280_v20 = vld [vmem:[#allocation11 + $0x10] sm:$0xf0] }
 0x3ba   : > { %5652 = vmatmul.bf16.gmra.mxu0 %v3776_v36  ;;  %v3834_v4 = vrot.slane %v3832_v16, 3  ;;  %v7514_v16 = vld [vmem:[#allocation11 + $0x4] sm:$0xf] }
 0x3bb   : > { %6136 = vmatpush.bf16.msra.mxu3 %v7319_v6 }
 0x3bc   : > { %v3838_v26 = vor.u32 %v3837_v29, %v3834_v4  ;;  %v7517_v4 = vld [vmem:[#allocation11 + $0x14] sm:$0xf0]  ;;  %v12655_v29 = vld [vmem:[#allocation51_spill] sm:$0xff] }
 0x3bd   : > { %5959 = vmatpush.bf16.msra.mxu1 %v7295_v50  ;;  %v3107_v50 = vsel %vm12657_vm15, %v11165_v42, %v3106_v56 }
 0x3be   : > { %v5574_v32 = vpop.f32.mrf.mxu3  ;;  %v11175_v47 = vpop.f32.mrf.mxu1 }
 0x3bf   : > { %v5485_v36 = vpop.f32.mrf.mxu2  ;;  %v5339_v24 = vpop.f32.mrf.mxu0 }
 0x3c0   : > { %v5486_v17 = vadd.f32 %v5485_v36, %v5397_v37  ;;  %v11178_v40 = vadd.f32 %v5339_v24, %v12650_v19  ;;  %v7518_v37 = vld [vmem:[#allocation11 + $0x24] sm:$0xf]  ;;  %v7302_v36 = vld [vmem:[#allocation11 + $0x28] sm:$0xf]  ;;  %v7521_v24 = vld [vmem:[#allocation11 + $0x34] sm:$0xf0] }
 0x3c1   : > { %v7299_v52 = vor.u32 %v7518_v37, %v7296_v9  ;;  %v7303_v6 = vor.u32 %v7521_v24, %v7302_v36  ;;  %v3839_v37 = vsel %vm12656_vm5, %v11159_v31, %v3838_v26  ;;  %v7287_v9 = vor.u32 %v7517_v4, %v7286_v25 }
 0x3c2   : > { %12651 = vst [vmem:[#allocation61_spill] sm:$0xff] %v11178_v40  ;;  %v11183_v10 = vadd.f32 %v5574_v32, %v5486_v17  ;;  %v7278_v17 = vld [vmem:[#allocation11] sm:$0xf]  ;;  %v7516_v32 = vld [vmem:[#allocation11 + $0xc] sm:$0xf0]  ;;  %v3895_v36 = vshrl.u32 %v3107_v50, 16 }
 0x3c3   : > { %v7279_v49 = vor.u32 %v7516_v32, %v7278_v17  ;;  %6048 = vmatpush.bf16.msra.mxu2 %v7299_v52  ;;  %6137 = vmatpush.bf16.msra.mxu3 %v7303_v6  ;;  %v3898_v24 = vshll.u32 %v3107_v50, 16  ;;  %v12658_v6 = vld [vmem:[#allocation60_spill] sm:$0xff] }
 0x3c4   : > { %12654 = vst [vmem:[#allocation62_spill] sm:$0xff] %v11183_v10  ;;  %v7283_v10 = vor.u32 %v7514_v16, %v7280_v20  ;;  %v3897_v25 = vrot.slane %v3895_v36, 3  ;;  %v12661_v20 = vld [vmem:[#allocation23_spill] sm:$0xff] }
 0x3c5   : > { %5960 = vmatpush.bf16.msra.mxu1 %v7279_v49 }
 0x3c6   : > { %v11187_v40 = vpop.f32.mrf.mxu3  ;;  %v5401_v35 = vpop.f32.mrf.mxu1 }
 0x3c7   : > { %v11185_v19 = vpop.f32.mrf.mxu2  ;;  %v5342_v38 = vpop.f32.mrf.mxu0  ;;  %v5402_v62 = vadd.f32 %v5401_v35, %v10986_v15  ;;  %6049 = vmatpush.bf16.msra.mxu2 %v7283_v10  ;;  %6138 = vmatpush.bf16.msra.mxu3 %v7287_v9  ;;  %v3900_v35 = vrot.slane %v3898_v24, 4  ;;  %v2823_v10 = vsel %vm12545_vm8, 0, %v12661_v20  ;;  %v7523_v24 = vld [vmem:[#allocation11 + $0x4c] sm:$0xf]  ;;  %vm12670_vm8 = vmmov %vm12641_vm4 }
 0x3c8   : > { %v11190_v12 = vadd.f32 %v5342_v38, %v12655_v29 }
 0x3c9   : > { %v3901_v49 = vor.u32 %v3900_v35, %v3897_v25  ;;  %v12667_v25 = vld [vmem:[#allocation54_spill] sm:$0xff] }
 0x3ca   : > { %5657 = vmatmul.bf16.gmra.mxu0 %v3839_v37  ;;  %v3108_v37 = vrot.slane %v2823_v10, 1 }
 0x3cc   : > { %v3109_v36 = vsel %vm12666_vm12, %v3106_v56, %v3108_v37 }
 0x3ce   : > { %v5579_v32 = vpop.f32.mrf.mxu3  ;;  %v11197_v52 = vpop.f32.mrf.mxu1 }
 0x3cf   : > { %v5490_v17 = vpop.f32.mrf.mxu2  ;;  %v5344_v38 = vpop.f32.mrf.mxu0 }
 0x3d0   : > { %v5491_v15 = vadd.f32 %v5490_v17, %v5402_v62  ;;  %v11200_v16 = vadd.f32 %v5344_v38, %v12658_v6  ;;  %v3902_v17 = vsel %vm12665_vm13, %v3838_v26, %v3901_v49  ;;  %v3961_v6 = vshll.u32 %v3109_v36, 16 }
 0x3d2   : > { %12659 = vst [vmem:[#allocation73_spill] sm:$0xff] %v11200_v16  ;;  %v11202_v31 = vadd.f32 %v5579_v32, %v5491_v15  ;;  %v7320_v32 = vld [vmem:[#allocation11 + $0x58] sm:$0xf0]  ;;  %v3958_v15 = vshrl.u32 %v3109_v36, 16  ;;  %v3963_v56 = vrot.slane %v3961_v6, 4  ;;  %v2824_v36 = vsel %vm10224_vm0, 0, %v12576_v2  ;;  %vm12671_vm0 = vmmov %vm12623_vm1 }
 0x3d3   : > { %v7323_v38 = vor.u32 %v7523_v24, %v7320_v32  ;;  %vm12673_vm1 = vmmov %vm12641_vm4 }
 0x3d4   : > { %12660 = vst [vmem:[#allocation46_spill] sm:$0xff] %v11202_v31  ;;  %vm12675_vm9 = vmmov %vm12673_vm1 }
 0x3d5   : > { %6225 = vmatpush.bf16.msra.mxu0 %v7323_v38  ;;  %vm12679_vm4 = vmmov %vm12671_vm0 }
 0x3d6   : > { %v11209_v29 = vpop.f32.mrf.mxu3  ;;  %v5406_v9 = vpop.f32.mrf.mxu1  ;;  %vm12681_vm7 = vmmov %vm12673_vm1 }
 0x3d7   : > { %v11207_v4 = vpop.f32.mrf.mxu2  ;;  %12664 = vst [vmem:[#allocation63_spill] sm:$0xff] %v11209_v29  ;;  %v5623_v62 = vpop.f32.mrf.mxu0  ;;  %v5407_v50 = vadd.f32 %v5406_v9, %v11031_v27  ;;  %v12668_v27 = vld [vmem:[#allocation32_spill] sm:$0xff]  ;;  %vm12682_vm11 = vmmov %vm12671_vm0 }
 0x3d8   : > { %12663 = vst [vmem:[#allocation82_spill] sm:$0xff] %v11207_v4  ;;  %v5624_v35 = vadd.f32 %v5623_v62, %v12667_v25  ;;  %vm12684_vm10 = vmmov %vm12673_vm1 }
 0x3d9   : > { %vm12686_vm6 = vmmov %vm12673_vm1 }
 0x3da   : > { %5662 = vmatmul.bf16.gmra.mxu0 %v3902_v17  ;;  %v3960_v17 = vrot.slane %v3958_v15, 3  ;;  %v5703_v29 = vmax.f32 %v5624_v35, 0.0 }
 0x3dc   : > { %v3964_v62 = vor.u32 %v3963_v56, %v3960_v17 }
 0x3de   : > { %v5584_v42 = vpop.f32.mrf.mxu3  ;;  %v11215_v31 = vpop.f32.mrf.mxu1  ;;  %v3965_v2 = vsel %vm12670_vm8, %v3901_v49, %v3964_v62 }
 0x3df   : > { %v5495_v20 = vpop.f32.mrf.mxu2  ;;  %v5625_v10 = vpop.f32.mrf.mxu0 }
 0x3e0   : > { %v5496_v16 = vadd.f32 %v5495_v20, %v5407_v50  ;;  %v5626_v9 = vadd.f32 %v5625_v10, %v12668_v27 }
 0x3e2   : > { %v11218_v26 = vadd.f32 %v5584_v42, %v5496_v16  ;;  %v5704_v4 = vmax.f32 %v5626_v9, 0.0  ;;  %v3110_v16 = vrot.slane %v2824_v36, 1 }
 0x3e4   : > { %v11223_v32 = vpack.c.bf16 %v5704_v4, %v5703_v29  ;;  %v3111_v4 = vsel %vm12671_vm0, %v3108_v37, %v3110_v16  ;;  %v2825_v37 = vsel %vm10287_vm2, 0, %v12591_v41  ;;  %vm12674_vm2 = vmmov %vm12671_vm0 }
 0x3e5   : > { %v4021_v29 = vshrl.u32 %v3111_v4, 16  ;;  %v4024_v35 = vshll.u32 %v3111_v4, 16 }
 0x3e6   : > { %5961 = vmatmul.bf16.vlgmr.msra.gmra.mxu1 %v11223_v32  ;;  %6050 = vmatmul.bf16.vlgmr.msra.gmra.mxu2 %v11223_v32  ;;  %v11229_v38 = vpop.f32.mrf.mxu3  ;;  %v5411_v6 = vpop.f32.mrf.mxu1 }
 0x3e7   : > { %v11227_v50 = vpop.f32.mrf.mxu2  ;;  %6139 = vmatmul.bf16.vlgmr.msra.gmra.mxu3 %v11223_v32  ;;  %v5628_v15 = vpop.f32.mrf.mxu0  ;;  %v5412_v25 = vadd.f32 %v5411_v6, %v11077_v48  ;;  %v4023_v48 = vrot.slane %v4021_v29, 3  ;;  %v4026_v36 = vrot.slane %v4024_v35, 4 }
 0x3e8   : > { %v5629_v20 = vadd.f32 %v5628_v15, %v10914_v7 }
 0x3e9   : > { %v4027_v7 = vor.u32 %v4026_v36, %v4023_v48 }
 0x3ea   : > { %5667 = vmatmul.bf16.gmra.mxu0 %v3965_v2  ;;  %v5705_v49 = vmax.f32 %v5629_v20, 0.0  ;;  %v7519_v20 = vld [vmem:[#allocation11 + $0x2c] sm:$0xf] }
 0x3eb   : > { %v4028_v23 = vsel %vm12673_vm1, %v3964_v62, %v4027_v7 }
 0x3ee   : > { %v5589_v10 = vpop.f32.mrf.mxu3  ;;  %v11236_v17 = vpop.f32.mrf.mxu1 }
 0x3ef   : > { %v5500_v42 = vpop.f32.mrf.mxu2  ;;  %v5630_v27 = vpop.f32.mrf.mxu0 }
 0x3f0   : > { %v5501_v9 = vadd.f32 %v5500_v42, %v5412_v25  ;;  %v5631_v56 = vadd.f32 %v5630_v27, %v10938_v63  ;;  %v3112_v25 = vrot.slane %v2825_v37, 1  ;;  %v7304_v42 = vld [vmem:[#allocation11 + $0x38] sm:$0xf0] }
 0x3f2   : > { %v11239_v24 = vadd.f32 %v5589_v10, %v5501_v9  ;;  %v5706_v6 = vmax.f32 %v5631_v56, 0.0  ;;  %v3113_v41 = vsel %vm12674_vm2, %v3110_v16, %v3112_v25  ;;  %v7307_v10 = vor.u32 %v7519_v20, %v7304_v42 }
 0x3f3   : > { %v4084_v27 = vshrl.u32 %v3113_v41, 16  ;;  %v4087_v9 = vshll.u32 %v3113_v41, 16  ;;  %v2826_v41 = vsel %vm10321_vm14, 0, %v12603_v33  ;;  %vm12676_vm14 = vmmov %vm12671_vm0 }
 0x3f4   : > { %12672 = vst [vmem:[#allocation30_spill] sm:$0xff] %v11239_v24  ;;  %v11244_v2 = vpack.c.bf16 %v5706_v6, %v5705_v49  ;;  %6226 = vmatpush.bf16.msra.mxu0 %v7307_v10 }
 0x3f5   : > { %v4089_v16 = vrot.slane %v4087_v9, 4 }
 0x3f6   : > { %5966 = vmatmul.bf16.gmra.mxu1 %v11244_v2  ;;  %6055 = vmatmul.bf16.gmra.mxu2 %v11244_v2  ;;  %v11250_v63 = vpop.f32.mrf.mxu3  ;;  %v5416_v29 = vpop.f32.mrf.mxu1 }
 0x3f7   : > { %v11248_v15 = vpop.f32.mrf.mxu2  ;;  %6144 = vmatmul.bf16.gmra.mxu3 %v11244_v2  ;;  %v5633_v4 = vpop.f32.mrf.mxu0  ;;  %v5417_v35 = vadd.f32 %v5416_v29, %v11109_v1  ;;  %v4086_v29 = vrot.slane %v4084_v27, 3 }
 0x3f8   : > { %v5634_v56 = vadd.f32 %v5633_v4, %v10962_v5 }
 0x3f9   : > { %v4090_v5 = vor.u32 %v4089_v16, %v4086_v29 }
 0x3fa   : > { %5672 = vmatmul.bf16.gmra.mxu0 %v4028_v23  ;;  %v5707_v23 = vmax.f32 %v5634_v56, 0.0 }
 0x3fb   : > { %v4091_v58 = vsel %vm12675_vm9, %v4027_v7, %v4090_v5 }
 0x3fe   : > { %v5594_v36 = vpop.f32.mrf.mxu3  ;;  %v11257_v37 = vpop.f32.mrf.mxu1 }
 0x3ff   : > { %v5505_v48 = vpop.f32.mrf.mxu2  ;;  %v5635_v49 = vpop.f32.mrf.mxu0 }
 0x400   : > { %v5506_v6 = vadd.f32 %v5505_v48, %v5417_v35  ;;  %v5636_v1 = vadd.f32 %v5635_v49, %v10995_v57  ;;  %v3114_v35 = vrot.slane %v2826_v41, 1 }
 0x402   : > { %v11260_v62 = vadd.f32 %v5594_v36, %v5506_v6  ;;  %v5708_v24 = vmax.f32 %v5636_v1, 0.0  ;;  %v3115_v33 = vsel %vm12676_vm14, %v3112_v25, %v3114_v35  ;;  %v2827_v25 = vsel %vm12605_vm3, 0, %v10501_v51  ;;  %vm12678_vm3 = vmmov %vm12673_vm1 }
 0x403   : > { %v4150_v9 = vshll.u32 %v3115_v33, 16 }
 0x404   : > { %v11265_v20 = vpack.c.bf16 %v5708_v24, %v5707_v23  ;;  %v4147_v24 = vshrl.u32 %v3115_v33, 16 }
 0x405   : > { %v4152_v23 = vrot.slane %v4150_v9, 4 }
 0x406   : > { %5971 = vmatmul.bf16.gmra.mxu1 %v11265_v20  ;;  %6060 = vmatmul.bf16.gmra.mxu2 %v11265_v20  ;;  %v11271_v57 = vpop.f32.mrf.mxu3  ;;  %v5421_v10 = vpop.f32.mrf.mxu1 }
 0x407   : > { %v11269_v4 = vpop.f32.mrf.mxu2  ;;  %6149 = vmatmul.bf16.gmra.mxu3 %v11265_v20  ;;  %v5638_v42 = vpop.f32.mrf.mxu0  ;;  %v5422_v27 = vadd.f32 %v5421_v10, %v11136_v39  ;;  %v4149_v39 = vrot.slane %v4147_v24, 3  ;;  %v12677_v24 = vld [vmem:[#allocation55_spill] sm:$0xff] }
 0x408   : > { %v5639_v56 = vadd.f32 %v5638_v42, %v11014_v45  ;;  %v5379_v54 = vadd.f32 %v11054_v14, %v12677_v24 }
 0x409   : > { %v4153_v45 = vor.u32 %v4152_v23, %v4149_v39 }
 0x40a   : > { %5677 = vmatmul.bf16.gmra.mxu0 %v4091_v58  ;;  %v5709_v7 = vmax.f32 %v5639_v56, 0.0  ;;  %v5468_v56 = vadd.f32 %v11072_v61, %v5379_v54 }
 0x40b   : > { %v4154_v9 = vsel %vm12678_vm3, %v4090_v5, %v4153_v45 }
 0x40c   : > { %v5557_v23 = vadd.f32 %v11074_v3, %v5468_v56  ;;  %v12680_v56 = vld [vmem:[#allocation75_spill] sm:$0xff] }
 0x40e   : > { %v5599_v36 = vpop.f32.mrf.mxu3  ;;  %v11278_v1 = vpop.f32.mrf.mxu1 }
 0x40f   : > { %v5510_v48 = vpop.f32.mrf.mxu2  ;;  %v5640_v49 = vpop.f32.mrf.mxu0 }
 0x410   : > { %v5511_v6 = vadd.f32 %v5510_v48, %v5422_v27  ;;  %v5641_v29 = vadd.f32 %v5640_v49, %v11037_v22  ;;  %v3116_v27 = vrot.slane %v2827_v25, 1  ;;  %v7288_v49 = vld [vmem:[#allocation11 + $0x18] sm:$0xf0] }
 0x412   : > { %v11281_v16 = vadd.f32 %v5599_v36, %v5511_v6  ;;  %v5710_v41 = vmax.f32 %v5641_v29, 0.0  ;;  %v3117_v48 = vsel %vm12679_vm4, %v3114_v35, %v3116_v27  ;;  %v7515_v36 = vld [vmem:[#allocation11 + $0xc] sm:$0xf] }
 0x413   : > { %v7291_v6 = vor.u32 %v7515_v36, %v7288_v49  ;;  %v4210_v29 = vshrl.u32 %v3117_v48, 16  ;;  %v4213_v39 = vshll.u32 %v3117_v48, 16  ;;  %v5384_v49 = vadd.f32 %v11094_v53, %v12680_v56 }
 0x414   : > { %v11286_v10 = vpack.c.bf16 %v5710_v41, %v5709_v7 }
 0x415   : > { %6227 = vmatpush.bf16.msra.mxu0 %v7291_v6  ;;  %v4212_v35 = vrot.slane %v4210_v29, 3  ;;  %v4215_v24 = vrot.slane %v4213_v39, 4  ;;  %v5473_v39 = vadd.f32 %v11104_v0, %v5384_v49 }
 0x416   : > { %5976 = vmatmul.bf16.gmra.mxu1 %v11286_v10  ;;  %6065 = vmatmul.bf16.gmra.mxu2 %v11286_v10  ;;  %v11292_v22 = vpop.f32.mrf.mxu3  ;;  %v5426_v33 = vpop.f32.mrf.mxu1 }
 0x417   : > { %v11290_v42 = vpop.f32.mrf.mxu2  ;;  %6154 = vmatmul.bf16.gmra.mxu3 %v11286_v10  ;;  %v5643_v58 = vpop.f32.mrf.mxu0  ;;  %v5427_v51 = vadd.f32 %v5426_v33, %v11168_v46  ;;  %v4216_v48 = vor.u32 %v4215_v24, %v4212_v35 }
 0x418   : > { %v5644_v7 = vadd.f32 %v5643_v58, %v11059_v18 }
 0x419   : > { %v4217_v29 = vsel %vm12681_vm7, %v4153_v45, %v4216_v48 }
 0x41a   : > { %5682 = vmatmul.bf16.gmra.mxu0 %v4154_v9  ;;  %v5711_v54 = vmax.f32 %v5644_v7, 0.0 }
 0x41e   : > { %v5604_v41 = vpop.f32.mrf.mxu3  ;;  %v11303_v5 = vpop.f32.mrf.mxu1 }
 0x41f   : > { %v5515_v14 = vpop.f32.mrf.mxu2  ;;  %v5645_v46 = vpop.f32.mrf.mxu0 }
 0x420   : > { %v5516_v25 = vadd.f32 %v5515_v14, %v5427_v51  ;;  %v5646_v61 = vadd.f32 %v5645_v46, %v5557_v23  ;;  %v3118_v23 = vsel %vm12682_vm11, %v3116_v27, %v12584_v59 }
 0x421   : > { %v4273_v7 = vshrl.u32 %v3118_v23, 16  ;;  %v4276_v14 = vshll.u32 %v3118_v23, 16 }
 0x422   : > { %v11305_v33 = vadd.f32 %v5604_v41, %v5516_v25  ;;  %v5712_v9 = vmax.f32 %v5646_v61, 0.0  ;;  %v5562_v41 = vadd.f32 %v11106_v28, %v5473_v39  ;;  %v12683_v28 = vld [vmem:[#allocation77_spill] sm:$0xff] }
 0x423   : > { %v4275_v45 = vrot.slane %v4273_v7, 3  ;;  %v5389_v27 = vadd.f32 %v11119_v8, %v12683_v28 }
 0x424   : > { %v11307_v36 = vpack.c.bf16 %v5712_v9, %v5711_v54  ;;  %v4278_v54 = vrot.slane %v4276_v14, 4 }
 0x425   : > { %v5478_v56 = vadd.f32 %v11131_v44, %v5389_v27 }
 0x426   : > { %5981 = vmatmul.bf16.gmra.mxu1 %v11307_v36  ;;  %6070 = vmatmul.bf16.gmra.mxu2 %v11307_v36  ;;  %v11313_v3 = vpop.f32.mrf.mxu3  ;;  %v5431_v51 = vpop.f32.mrf.mxu1  ;;  %v4279_v59 = vor.u32 %v4278_v54, %v4275_v45  ;;  %v11361_v45 = vld [vmem:[#allocation13] sm:$0xf] }
 0x427   : > { %v11311_v18 = vpop.f32.mrf.mxu2  ;;  %6159 = vmatmul.bf16.gmra.mxu3 %v11307_v36  ;;  %v5648_v58 = vpop.f32.mrf.mxu0  ;;  %v5432_v6 = vadd.f32 %v5431_v51, %v11190_v12  ;;  %v5567_v49 = vadd.f32 %v11133_v60, %v5478_v56  ;;  %v11366_v28 = vperm.slane %v11361_v45, 0 }
 0x428   : > { %v5649_v46 = vadd.f32 %v5648_v58, %v11099_v11  ;;  %v4280_v58 = vsel %vm12684_vm10, %v4216_v48, %v4279_v59  ;;  %v12685_v48 = vld [vmem:[#allocation56_spill] sm:$0xff]  ;;  %v4353_v60 = vsel %vm12686_vm6, %v4279_v59, %v11139_v55 }
 0x429   : > { %v5394_v44 = vadd.f32 %v11149_v34, %v12685_v48  ;;  %v12687_v34 = vld [vmem:[#allocation44_spill] sm:$0xff] }
 0x42a   : > { %5687 = vmatmul.bf16.gmra.mxu0 %v4217_v29  ;;  %v5713_v0 = vmax.f32 %v5649_v46, 0.0 }
 0x42e   : > { %v5609_v24 = vpop.f32.mrf.mxu3 }
 0x42f   : > { %v5520_v25 = vpop.f32.mrf.mxu2  ;;  %v5650_v61 = vpop.f32.mrf.mxu0 }
 0x430   : > { %v5521_v35 = vadd.f32 %v5520_v25, %v5432_v6  ;;  %v5651_v53 = vadd.f32 %v5650_v61, %v5562_v41 }
 0x432   : > { %v11325_v12 = vadd.f32 %v5609_v24, %v5521_v35  ;;  %v5714_v9 = vmax.f32 %v5651_v53, 0.0 }
 0x434   : > { %v11327_v51 = vpack.c.bf16 %v5714_v9, %v5713_v0  ;;  %v12688_v0 = vld [vmem:[#allocation62_spill] sm:$0xff] }
 0x436   : > { %5986 = vmatmul.bf16.gmra.mxu1 %v11327_v51  ;;  %6075 = vmatmul.bf16.gmra.mxu2 %v11327_v51 }
 0x437   : > { %6164 = vmatmul.bf16.gmra.mxu3 %v11327_v51  ;;  %v5653_v11 = vpop.f32.mrf.mxu0  ;;  %v11368_v27 = vpop.f32.mrf.mxu2 }
 0x438   : > { %v5654_v6 = vadd.f32 %v5653_v11, %v11126_v30  ;;  %v5483_v30 = vadd.f32 %v11161_v13, %v5394_v44  ;;  %v5399_v13 = vadd.f32 %v11175_v47, %v12687_v34  ;;  %v11370_v47 = vpop.f32.mrf.mxu3 }
 0x43a   : > { %5692 = vmatmul.bf16.gmra.mxu0 %v4280_v58  ;;  %v5715_v23 = vmax.f32 %v5654_v6, 0.0  ;;  %v5572_v41 = vadd.f32 %v11163_v43, %v5483_v30  ;;  %v5488_v43 = vadd.f32 %v11185_v19, %v5399_v13  ;;  %v12691_v13 = vld [vmem:[#allocation63_spill] sm:$0xff] }
 0x43c   : > { %v5577_v54 = vadd.f32 %v11187_v40, %v5488_v43  ;;  %v7692_v40 = vld [vmem:[%s8299_s20] sm:$0xff] }
 0x43f   : > { %v5655_v29 = vpop.f32.mrf.mxu0 }
 0x440   : > { %v5656_v39 = vadd.f32 %v5655_v29, %v5567_v49  ;;  %v11379_v29 = vperm.slane %v11361_v45, 1 }
 0x442   : > { %v5716_v7 = vmax.f32 %v5656_v39, 0.0 }
 0x444   : > { %v11338_v14 = vpack.c.bf16 %v5716_v7, %v5715_v23  ;;  %v11383_v23 = vperm.slane %v11361_v45, 2  ;;  %v12689_v7 = vld [vmem:[#allocation59_spill] sm:$0xff] }
 0x446   : > { %5991 = vmatmul.bf16.gmra.mxu1 %v11338_v14  ;;  %6080 = vmatmul.bf16.gmra.mxu2 %v11338_v14 }
 0x447   : > { %6169 = vmatmul.bf16.gmra.mxu3 %v11338_v14  ;;  %v5658_v8 = vpop.f32.mrf.mxu0 }
 0x448   : > { %v5659_v46 = vadd.f32 %v5658_v8, %v11154_v21  ;;  %v11359_v21 = vpop.f32.mrf.mxu1  ;;  %v5404_v8 = vadd.f32 %v11197_v52, %v12689_v7  ;;  %v7693_v52 = vld [vmem:[%s8299_s20 + $0x8] sm:$0xff] }
 0x44a   : > { %5697 = vmatmul.bf16.gmra.mxu0 %v4353_v60  ;;  %v5717_v35 = vmax.f32 %v5659_v46, 0.0  ;;  %v12690_v60 = vld [vmem:[#allocation82_spill] sm:$0xff] }
 0x44b   : > { %v5493_v30 = vadd.f32 %v12690_v60, %v5404_v8  ;;  %v7696_v60 = vld [vmem:[%s8299_s20 + $0x28] sm:$0xff] }
 0x44d   : > { %v5582_v43 = vadd.f32 %v12691_v13, %v5493_v30 }
 0x44f   : > { %v5660_v25 = vpop.f32.mrf.mxu0 }
 0x450   : > { %v5661_v61 = vadd.f32 %v5660_v25, %v5572_v41 }
 0x452   : > { %v5718_v53 = vmax.f32 %v5661_v61, 0.0 }
 0x454   : > { %v11350_v24 = vpack.c.bf16 %v5718_v53, %v5717_v35 }
 0x456   : > { %5996 = vmatmul.bf16.gmra.mxu1 %v11350_v24  ;;  %6085 = vmatmul.bf16.gmra.mxu2 %v11350_v24 }
 0x457   : > { %6174 = vmatmul.bf16.gmra.mxu3 %v11350_v24  ;;  %v5663_v55 = vpop.f32.mrf.mxu0 }
 0x458   : > { %v5664_v9 = vadd.f32 %v5663_v55, %v12688_v0  ;;  %v7694_v55 = vld [vmem:[%s8299_s20 + $0x10] sm:$0xff] }
 0x45a   : > { %6228 = vmatmul.bf16.vlgmr.msra.gmra.mxu0 %v11223_v32  ;;  %v5719_v19 = vmax.f32 %v5664_v9, 0.0 }
 0x45f   : > { %v5665_v59 = vpop.f32.mrf.mxu0 }
 0x460   : > { %v5666_v11 = vadd.f32 %v5665_v59, %v5577_v54  ;;  %v12692_v54 = vld [vmem:[#allocation46_spill] sm:$0xff]  ;;  %v7695_v59 = vld [vmem:[%s8299_s20 + $0x20] sm:$0xff] }
 0x462   : > { %v5720_v58 = vmax.f32 %v5666_v11, 0.0 }
 0x463   : > { %v5962_v32 = vpop.f32.mrf.mxu1 }
 0x464   : > { %v11372_v56 = vpack.c.bf16 %v5720_v58, %v5719_v19  ;;  %v5963_v49 = vadd.f32 %v5962_v32, %v11366_v28 }
 0x466   : > { %v6309_v6 = vadd.f32 %v7692_v40, %v5963_v49  ;;  %6001 = vmatmul.bf16.gmra.mxu1 %v11372_v56  ;;  %6090 = vmatmul.bf16.gmra.mxu2 %v11372_v56 }
 0x467   : > { %6179 = vmatmul.bf16.gmra.mxu3 %v11372_v56  ;;  %v5668_v39 = vpop.f32.mrf.mxu0 }
 0x468   : > { %v6437_v48 = vmax.f32 %v6309_v6, 0.0  ;;  %v5669_v0 = vadd.f32 %v5668_v39, %v12692_v54 }
 0x469   : > { %v6051_v44 = vpop.f32.mrf.mxu2 }
 0x46a   : > { %6565 = vst [vmem:[%s11390_s9] sm:$0xff] %v6437_v48  ;;  %v6052_v41 = vadd.f32 %v6051_v44, %v11379_v29  ;;  %v6140_v46 = vpop.f32.mrf.mxu3  ;;  %6233 = vmatmul.bf16.gmra.mxu0 %v11244_v2  ;;  %v5721_v40 = vmax.f32 %v5669_v0, 0.0 }
 0x46b   : > { %v6141_v25 = vadd.f32 %v6140_v46, %v11383_v23  ;;  %v5964_v61 = vpop.f32.mrf.mxu1  ;;  %v7697_v46 = vld [vmem:[%s8299_s20 + $0x30] sm:$0xff] }
 0x46c   : > { %v6310_v35 = vadd.f32 %v7693_v52, %v6052_v41  ;;  %v5965_v53 = vadd.f32 %v5964_v61, %v11366_v28  ;;  %v7698_v52 = vld [vmem:[%s8299_s20 + $0x40] sm:$0xff] }
 0x46d   : > { %v6311_v34 = vadd.f32 %v7694_v55, %v6141_v25 }
 0x46e   : > { %v6438_v9 = vmax.f32 %v6310_v35, 0.0  ;;  %v6313_v11 = vadd.f32 %v7695_v59, %v5965_v53 }
 0x46f   : > { %v6439_v2 = vmax.f32 %v6311_v34, 0.0  ;;  %v5670_v19 = vpop.f32.mrf.mxu0  ;;  %v12693_v34 = vld [vmem:[#allocation22_spill] sm:$0xff] }
 0x470   : > { %6566 = vst [vmem:[%s11390_s9 + $0x8] sm:$0xff] %v6438_v9  ;;  %v6441_v58 = vmax.f32 %v6313_v11, 0.0  ;;  %v5671_v32 = vadd.f32 %v5670_v19, %v5582_v43  ;;  %v5409_v13 = vadd.f32 %v11215_v31, %v12693_v34  ;;  %v7699_v19 = vld [vmem:[%s8299_s20 + $0x48] sm:$0xff]  ;;  %v7703_v34 = vld [vmem:[%s8299_s20 + $0x70] sm:$0xff] }
 0x471   : > { %6567 = vst [vmem:[%s11390_s9 + $0x10] sm:$0xff] %v6439_v2  ;;  %v6053_v49 = vpop.f32.mrf.mxu2 }
 0x472   : > { %6569 = vst [vmem:[%s11390_s9 + $0x20] sm:$0xff] %v6441_v58  ;;  %v5722_v6 = vmax.f32 %v5671_v32, 0.0  ;;  %v6054_v7 = vadd.f32 %v6053_v49, %v11379_v29  ;;  %v6142_v8 = vpop.f32.mrf.mxu3  ;;  %v5498_v0 = vadd.f32 %v11227_v50, %v5409_v13  ;;  %v7700_v32 = vld [vmem:[%s8299_s20 + $0x50] sm:$0xff] }
 0x473   : > { %v6143_v39 = vadd.f32 %v6142_v8, %v11383_v23  ;;  %v5967_v48 = vpop.f32.mrf.mxu1 }
 0x474   : > { %v11407_v44 = vpack.c.bf16 %v5722_v6, %v5721_v40  ;;  %v6314_v30 = vadd.f32 %v7696_v60, %v6054_v7  ;;  %v5968_v41 = vadd.f32 %v5967_v48, %v11366_v28  ;;  %v5587_v50 = vadd.f32 %v11229_v38, %v5498_v0  ;;  %v7701_v7 = vld [vmem:[%s8299_s20 + $0x60] sm:$0xff] }
 0x475   : > { %v6315_v25 = vadd.f32 %v7697_v46, %v6143_v39 }
 0x476   : > { %v6442_v61 = vmax.f32 %v6314_v30, 0.0  ;;  %v6317_v35 = vadd.f32 %v7698_v52, %v5968_v41  ;;  %6006 = vmatmul.bf16.gmra.mxu1 %v11407_v44  ;;  %6095 = vmatmul.bf16.gmra.mxu2 %v11407_v44 }
 0x477   : > { %v6443_v53 = vmax.f32 %v6315_v25, 0.0  ;;  %6184 = vmatmul.bf16.gmra.mxu3 %v11407_v44  ;;  %v5673_v55 = vpop.f32.mrf.mxu0 }
 0x478   : > { %6570 = vst [vmem:[%s11390_s9 + $0x28] sm:$0xff] %v6442_v61  ;;  %v6445_v43 = vmax.f32 %v6317_v35, 0.0  ;;  %v5674_v40 = vadd.f32 %v5673_v55, %v11218_v26  ;;  %v7702_v35 = vld [vmem:[%s8299_s20 + $0x68] sm:$0xff] }
 0x479   : > { %6571 = vst [vmem:[%s11390_s9 + $0x30] sm:$0xff] %v6443_v53  ;;  %v6056_v54 = vpop.f32.mrf.mxu2 }
 0x47a   : > { %6573 = vst [vmem:[%s11390_s9 + $0x40] sm:$0xff] %v6445_v43  ;;  %v6057_v9 = vadd.f32 %v6056_v54, %v11379_v29  ;;  %v6145_v59 = vpop.f32.mrf.mxu3  ;;  %6238 = vmatmul.bf16.gmra.mxu0 %v11265_v20  ;;  %v5723_v41 = vmax.f32 %v5674_v40, 0.0  ;;  %v7704_v54 = vld [vmem:[%s8299_s20 + $0x80] sm:$0xff] }
 0x47b   : > { %v6146_v11 = vadd.f32 %v6145_v59, %v11383_v23  ;;  %v5969_v2 = vpop.f32.mrf.mxu1 }
 0x47c   : > { %v6318_v31 = vadd.f32 %v7699_v19, %v6057_v9  ;;  %v5970_v58 = vadd.f32 %v5969_v2, %v11366_v28 }
 0x47d   : > { %v6319_v49 = vadd.f32 %v7700_v32, %v6146_v11  ;;  %v12694_v11 = vld [vmem:[#allocation53_spill] sm:$0xff] }
 0x47e   : > { %v6446_v6 = vmax.f32 %v6318_v31, 0.0  ;;  %v6321_v8 = vadd.f32 %v7701_v7, %v5970_v58  ;;  %v5414_v2 = vadd.f32 %v11236_v17, %v12694_v11 }
 0x47f   : > { %v6447_v20 = vmax.f32 %v6319_v49, 0.0  ;;  %v5675_v39 = vpop.f32.mrf.mxu0 }
 0x480   : > { %6574 = vst [vmem:[%s11390_s9 + $0x48] sm:$0xff] %v6446_v6  ;;  %v6449_v48 = vmax.f32 %v6321_v8, 0.0  ;;  %v5676_v60 = vadd.f32 %v5675_v39, %v5587_v50  ;;  %v5503_v58 = vadd.f32 %v11248_v15, %v5414_v2  ;;  %v7705_v6 = vld [vmem:[%s8299_s20 + $0x88] sm:$0xff]  ;;  %v7706_v8 = vld [vmem:[%s8299_s20 + $0x90] sm:$0xff]  ;;  %v12695_v39 = vld [vmem:[#allocation30_spill] sm:$0xff] }
 0x481   : > { %6575 = vst [vmem:[%s11390_s9 + $0x50] sm:$0xff] %v6447_v20  ;;  %v6058_v30 = vpop.f32.mrf.mxu2  ;;  %v7710_v2 = vld [vmem:[%s8299_s20 + $0xc0] sm:$0xff] }
 0x482   : > { %6577 = vst [vmem:[%s11390_s9 + $0x60] sm:$0xff] %v6449_v48  ;;  %v5724_v46 = vmax.f32 %v5676_v60, 0.0  ;;  %v6059_v38 = vadd.f32 %v6058_v30, %v11379_v29  ;;  %v6147_v25 = vpop.f32.mrf.mxu3  ;;  %v5592_v15 = vadd.f32 %v11250_v63, %v5503_v58  ;;  %v7707_v30 = vld [vmem:[%s8299_s20 + $0xa0] sm:$0xff] }
 0x483   : > { %v6148_v26 = vadd.f32 %v6147_v25, %v11383_v23  ;;  %v5972_v61 = vpop.f32.mrf.mxu1 }
 0x484   : > { %v11436_v52 = vpack.c.bf16 %v5724_v46, %v5723_v41  ;;  %v6322_v53 = vadd.f32 %v7702_v35, %v6059_v38  ;;  %v5973_v55 = vadd.f32 %v5972_v61, %v11366_v28 }
 0x485   : > { %v6323_v13 = vadd.f32 %v7703_v34, %v6148_v26 }
 0x486   : > { %v6450_v43 = vmax.f32 %v6322_v53, 0.0  ;;  %v6325_v0 = vadd.f32 %v7704_v54, %v5973_v55  ;;  %6011 = vmatmul.bf16.gmra.mxu1 %v11436_v52  ;;  %6100 = vmatmul.bf16.gmra.mxu2 %v11436_v52 }
 0x487   : > { %v6451_v9 = vmax.f32 %v6323_v13, 0.0  ;;  %6189 = vmatmul.bf16.gmra.mxu3 %v11436_v52  ;;  %v5678_v59 = vpop.f32.mrf.mxu0 }
 0x488   : > { %6578 = vst [vmem:[%s11390_s9 + $0x68] sm:$0xff] %v6450_v43  ;;  %v6453_v19 = vmax.f32 %v6325_v0, 0.0  ;;  %v5679_v48 = vadd.f32 %v5678_v59, %v12695_v39  ;;  %v7708_v43 = vld [vmem:[%s8299_s20 + $0xa8] sm:$0xff] }
 0x489   : > { %6579 = vst [vmem:[%s11390_s9 + $0x70] sm:$0xff] %v6451_v9  ;;  %v6061_v31 = vpop.f32.mrf.mxu2  ;;  %v7709_v9 = vld [vmem:[%s8299_s20 + $0xb0] sm:$0xff] }
 0x48a   : > { %6581 = vst [vmem:[%s11390_s9 + $0x80] sm:$0xff] %v6453_v19  ;;  %v6062_v32 = vadd.f32 %v6061_v31, %v11379_v29  ;;  %v6150_v49 = vpop.f32.mrf.mxu3  ;;  %6243 = vmatmul.bf16.gmra.mxu0 %v11286_v10  ;;  %v5725_v61 = vmax.f32 %v5679_v48, 0.0  ;;  %v7712_v48 = vld [vmem:[%s8299_s20 + $0xd0] sm:$0xff] }
 0x48b   : > { %v6151_v50 = vadd.f32 %v6150_v49, %v11383_v23  ;;  %v5974_v40 = vpop.f32.mrf.mxu1 }
 0x48c   : > { %v6326_v17 = vadd.f32 %v7705_v6, %v6062_v32  ;;  %v5975_v7 = vadd.f32 %v5974_v40, %v11366_v28  ;;  %v12696_v32 = vld [vmem:[#allocation27_spill] sm:$0xff] }
 0x48d   : > { %v6327_v20 = vadd.f32 %v7706_v8, %v6151_v50  ;;  %v5419_v49 = vadd.f32 %v11257_v37, %v12696_v32  ;;  %v12697_v32 = vld [vmem:[#allocation36_spill] sm:$0xff] }
 0x48e   : > { %v6454_v60 = vmax.f32 %v6326_v17, 0.0  ;;  %v6329_v41 = vadd.f32 %v7707_v30, %v5975_v7 }
 0x48f   : > { %v6455_v10 = vmax.f32 %v6327_v20, 0.0  ;;  %v5680_v46 = vpop.f32.mrf.mxu0  ;;  %v5508_v6 = vadd.f32 %v11269_v4, %v5419_v49  ;;  %v5424_v49 = vadd.f32 %v11278_v1, %v12697_v32 }
 0x490   : > { %6582 = vst [vmem:[%s11390_s9 + $0x88] sm:$0xff] %v6454_v60  ;;  %v6457_v38 = vmax.f32 %v6329_v41, 0.0  ;;  %v5681_v25 = vadd.f32 %v5680_v46, %v5592_v15  ;;  %v7711_v15 = vld [vmem:[%s8299_s20 + $0xc8] sm:$0xff] }
 0x491   : > { %6583 = vst [vmem:[%s11390_s9 + $0x90] sm:$0xff] %v6455_v10  ;;  %v6063_v26 = vpop.f32.mrf.mxu2  ;;  %v5597_v4 = vadd.f32 %v11271_v57, %v5508_v6  ;;  %v7713_v10 = vld [vmem:[%s8299_s20 + $0xe0] sm:$0xff]  ;;  %v5513_v6 = vadd.f32 %v11290_v42, %v5424_v49 }
 0x492   : > { %6585 = vst [vmem:[%s11390_s9 + $0xa0] sm:$0xff] %v6457_v38  ;;  %v5726_v35 = vmax.f32 %v5681_v25, 0.0  ;;  %v6064_v63 = vadd.f32 %v6063_v26, %v11379_v29  ;;  %v6152_v53 = vpop.f32.mrf.mxu3 }
 0x493   : > { %v6153_v55 = vadd.f32 %v6152_v53, %v11383_v23  ;;  %v5977_v34 = vpop.f32.mrf.mxu1  ;;  %v5602_v42 = vadd.f32 %v11292_v22, %v5513_v6 }
 0x494   : > { %v11465_v13 = vpack.c.bf16 %v5726_v35, %v5725_v61  ;;  %v6330_v54 = vadd.f32 %v7708_v43, %v6064_v63  ;;  %v5978_v0 = vadd.f32 %v5977_v34, %v11366_v28  ;;  %v7714_v43 = vld [vmem:[%s8299_s20 + $0xe8] sm:$0xff] }
 0x495   : > { %v6331_v59 = vadd.f32 %v7709_v9, %v6153_v55  ;;  %v7715_v9 = vld [vmem:[%s8299_s20 + $0xf0] sm:$0xff] }
 0x496   : > { %v6458_v11 = vmax.f32 %v6330_v54, 0.0  ;;  %v6333_v19 = vadd.f32 %v7710_v2, %v5978_v0  ;;  %6016 = vmatmul.bf16.gmra.mxu1 %v11465_v13  ;;  %6105 = vmatmul.bf16.gmra.mxu2 %v11465_v13  ;;  %v7716_v2 = vld [vmem:[%s8299_s20 + $0x100] sm:$0xff] }
 0x497   : > { %v6459_v31 = vmax.f32 %v6331_v59, 0.0  ;;  %6194 = vmatmul.bf16.gmra.mxu3 %v11465_v13  ;;  %v5683_v58 = vpop.f32.mrf.mxu0 }
 0x498   : > { %6586 = vst [vmem:[%s11390_s9 + $0xa8] sm:$0xff] %v6458_v11  ;;  %v6461_v50 = vmax.f32 %v6333_v19, 0.0  ;;  %v5684_v30 = vadd.f32 %v5683_v58, %v11260_v62 }
 0x499   : > { %6587 = vst [vmem:[%s11390_s9 + $0xb0] sm:$0xff] %v6459_v31  ;;  %v6066_v40 = vpop.f32.mrf.mxu2 }
 0x49a   : > { %6589 = vst [vmem:[%s11390_s9 + $0xc0] sm:$0xff] %v6461_v50  ;;  %v6067_v17 = vadd.f32 %v6066_v40, %v11379_v29  ;;  %v6155_v7 = vpop.f32.mrf.mxu3  ;;  %6248 = vmatmul.bf16.gmra.mxu0 %v11307_v36  ;;  %v5727_v35 = vmax.f32 %v5684_v30, 0.0  ;;  %v7719_v30 = vld [vmem:[%s8299_s20 + $0x120] sm:$0xff] }
 0x49b   : > { %v6156_v8 = vadd.f32 %v6155_v7, %v11383_v23  ;;  %v5979_v20 = vpop.f32.mrf.mxu1 }
 0x49c   : > { %v6334_v37 = vadd.f32 %v7711_v15, %v6067_v17  ;;  %v5980_v39 = vadd.f32 %v5979_v20, %v11366_v28  ;;  %v7717_v15 = vld [vmem:[%s8299_s20 + $0x108] sm:$0xff] }
 0x49d   : > { %v6335_v60 = vadd.f32 %v7712_v48, %v6156_v8 }
 0x49e   : > { %v6462_v41 = vmax.f32 %v6334_v37, 0.0  ;;  %v6337_v46 = vadd.f32 %v7713_v10, %v5980_v39  ;;  %v7718_v39 = vld [vmem:[%s8299_s20 + $0x110] sm:$0xff] }
 0x49f   : > { %v6463_v36 = vmax.f32 %v6335_v60, 0.0  ;;  %v5685_v38 = vpop.f32.mrf.mxu0 }
 0x4a0   : > { %6590 = vst [vmem:[%s11390_s9 + $0xc8] sm:$0xff] %v6462_v41  ;;  %v6465_v25 = vmax.f32 %v6337_v46, 0.0  ;;  %v5686_v26 = vadd.f32 %v5685_v38, %v5597_v4 }
 0x4a1   : > { %6591 = vst [vmem:[%s11390_s9 + $0xd0] sm:$0xff] %v6463_v36  ;;  %v6068_v61 = vpop.f32.mrf.mxu2 }
 0x4a2   : > { %6593 = vst [vmem:[%s11390_s9 + $0xe0] sm:$0xff] %v6465_v25  ;;  %v5728_v63 = vmax.f32 %v5686_v26, 0.0  ;;  %v6069_v57 = vadd.f32 %v6068_v61, %v11379_v29  ;;  %v6157_v53 = vpop.f32.mrf.mxu3 }
 0x4a3   : > { %v6158_v62 = vadd.f32 %v6157_v53, %v11383_v23  ;;  %v5982_v55 = vpop.f32.mrf.mxu1 }
 0x4a4   : > { %v11494_v34 = vpack.c.bf16 %v5728_v63, %v5727_v35  ;;  %v6338_v54 = vadd.f32 %v7714_v43, %v6069_v57  ;;  %v5983_v0 = vadd.f32 %v5982_v55, %v11366_v28  ;;  %v7720_v57 = vld [vmem:[%s8299_s20 + $0x128] sm:$0xff]  ;;  %v7721_v55 = vld [vmem:[%s8299_s20 + $0x130] sm:$0xff] }
 0x4a5   : > { %v6339_v59 = vadd.f32 %v7715_v9, %v6158_v62 }
 0x4a6   : > { %v6466_v11 = vmax.f32 %v6338_v54, 0.0  ;;  %v6341_v19 = vadd.f32 %v7716_v2, %v5983_v0  ;;  %6021 = vmatmul.bf16.gmra.mxu1 %v11494_v34  ;;  %6110 = vmatmul.bf16.gmra.mxu2 %v11494_v34  ;;  %v7722_v0 = vld [vmem:[%s8299_s20 + $0x140] sm:$0xff]  ;;  %v12698_v2 = vld [vmem:[#allocation61_spill] sm:$0xff] }
 0x4a7   : > { %v6467_v31 = vmax.f32 %v6339_v59, 0.0  ;;  %6199 = vmatmul.bf16.gmra.mxu3 %v11494_v34  ;;  %v5688_v58 = vpop.f32.mrf.mxu0 }
 0x4a8   : > { %6594 = vst [vmem:[%s11390_s9 + $0xe8] sm:$0xff] %v6466_v11  ;;  %v6469_v50 = vmax.f32 %v6341_v19, 0.0  ;;  %v5689_v60 = vadd.f32 %v5688_v58, %v11281_v16  ;;  %v5429_v19 = vadd.f32 %v11303_v5, %v12698_v2 }
 0x4a9   : > { %6595 = vst [vmem:[%s11390_s9 + $0xf0] sm:$0xff] %v6467_v31  ;;  %v6071_v40 = vpop.f32.mrf.mxu2 }
 0x4aa   : > { %6597 = vst [vmem:[%s11390_s9 + $0x100] sm:$0xff] %v6469_v50  ;;  %v6072_v17 = vadd.f32 %v6071_v40, %v11379_v29  ;;  %v6160_v7 = vpop.f32.mrf.mxu3  ;;  %6253 = vmatmul.bf16.gmra.mxu0 %v11327_v51  ;;  %v5729_v25 = vmax.f32 %v5689_v60, 0.0  ;;  %v5518_v32 = vadd.f32 %v11311_v18, %v5429_v19  ;;  %v7729_v19 = vld [vmem:[%s8299_s20 + $0x188] sm:$0xff] }
 0x4ab   : > { %v6161_v8 = vadd.f32 %v6160_v7, %v11383_v23  ;;  %v5984_v20 = vpop.f32.mrf.mxu1 }
 0x4ac   : > { %v6342_v1 = vadd.f32 %v7717_v15, %v6072_v17  ;;  %v5985_v37 = vadd.f32 %v5984_v20, %v11366_v28  ;;  %v7723_v17 = vld [vmem:[%s8299_s20 + $0x148] sm:$0xff]  ;;  %v5607_v18 = vadd.f32 %v11313_v3, %v5518_v32 }
 0x4ad   : > { %v6343_v48 = vadd.f32 %v7718_v39, %v6161_v8  ;;  %v7724_v8 = vld [vmem:[%s8299_s20 + $0x150] sm:$0xff] }
 0x4ae   : > { %v6470_v4 = vmax.f32 %v6342_v1, 0.0  ;;  %v6345_v41 = vadd.f32 %v7719_v30, %v5985_v37  ;;  %v7725_v37 = vld [vmem:[%s8299_s20 + $0x160] sm:$0xff] }
 0x4af   : > { %v6471_v51 = vmax.f32 %v6343_v48, 0.0  ;;  %v5690_v10 = vpop.f32.mrf.mxu0 }
 0x4b0   : > { %6598 = vst [vmem:[%s11390_s9 + $0x108] sm:$0xff] %v6470_v4  ;;  %v6473_v46 = vmax.f32 %v6345_v41, 0.0  ;;  %v5691_v36 = vadd.f32 %v5690_v10, %v5602_v42 }
 0x4b1   : > { %6599 = vst [vmem:[%s11390_s9 + $0x110] sm:$0xff] %v6471_v51  ;;  %v6073_v38 = vpop.f32.mrf.mxu2 }
 0x4b2   : > { %6601 = vst [vmem:[%s11390_s9 + $0x120] sm:$0xff] %v6473_v46  ;;  %v5730_v26 = vmax.f32 %v5691_v36, 0.0  ;;  %v6074_v22 = vadd.f32 %v6073_v38, %v11379_v29  ;;  %v6162_v61 = vpop.f32.mrf.mxu3  ;;  %v7726_v36 = vld [vmem:[%s8299_s20 + $0x168] sm:$0xff] }
 0x4b3   : > { %v6163_v16 = vadd.f32 %v6162_v61, %v11383_v23  ;;  %v5987_v35 = vpop.f32.mrf.mxu1 }
 0x4b4   : > { %v11523_v63 = vpack.c.bf16 %v5730_v26, %v5729_v25  ;;  %v6346_v53 = vadd.f32 %v7720_v57, %v6074_v22  ;;  %v5988_v62 = vadd.f32 %v5987_v35, %v11366_v28  ;;  %v7727_v26 = vld [vmem:[%s8299_s20 + $0x170] sm:$0xff] }
 0x4b5   : > { %v6347_v43 = vadd.f32 %v7721_v55, %v6163_v16  ;;  %v7728_v16 = vld [vmem:[%s8299_s20 + $0x180] sm:$0xff] }
 0x4b6   : > { %v6474_v54 = vmax.f32 %v6346_v53, 0.0  ;;  %v6349_v9 = vadd.f32 %v7722_v0, %v5988_v62  ;;  %6026 = vmatmul.bf16.gmra.mxu1 %v11523_v63  ;;  %6115 = vmatmul.bf16.gmra.mxu2 %v11523_v63  ;;  %v12699_v62 = vld [vmem:[#allocation73_spill] sm:$0xff] }
 0x4b7   : > { %v6475_v59 = vmax.f32 %v6347_v43, 0.0  ;;  %6204 = vmatmul.bf16.gmra.mxu3 %v11523_v63  ;;  %v5693_v11 = vpop.f32.mrf.mxu0  ;;  %v5434_v55 = vadd.f32 %v11359_v21, %v12699_v62 }
 0x4b8   : > { %6602 = vst [vmem:[%s11390_s9 + $0x128] sm:$0xff] %v6474_v54  ;;  %v6477_v31 = vmax.f32 %v6349_v9, 0.0  ;;  %v5694_v15 = vadd.f32 %v5693_v11, %v11305_v33 }
 0x4b9   : > { %6603 = vst [vmem:[%s11390_s9 + $0x130] sm:$0xff] %v6475_v59  ;;  %v6076_v58 = vpop.f32.mrf.mxu2  ;;  %v5523_v0 = vadd.f32 %v11368_v27, %v5434_v55  ;;  %v7737_v55 = vld [vmem:[%s8299_s20 + $0x1d0] sm:$0xff] }
 0x4ba   : > { %6605 = vst [vmem:[%s11390_s9 + $0x140] sm:$0xff] %v6477_v31  ;;  %v6077_v49 = vadd.f32 %v6076_v58, %v11379_v29  ;;  %v6165_v50 = vpop.f32.mrf.mxu3  ;;  %6258 = vmatmul.bf16.gmra.mxu0 %v11338_v14  ;;  %v5731_v30 = vmax.f32 %v5694_v15, 0.0  ;;  %v7730_v58 = vld [vmem:[%s8299_s20 + $0x190] sm:$0xff] }
 0x4bb   : > { %v6166_v40 = vadd.f32 %v6165_v50, %v11383_v23  ;;  %v5989_v6 = vpop.f32.mrf.mxu1  ;;  %v5612_v27 = vadd.f32 %v11370_v47, %v5523_v0  ;;  %v7738_v0 = vld [vmem:[%s8299_s20 + $0x1e0] sm:$0xff] }
 0x4bc   : > { %v6350_v5 = vadd.f32 %v7723_v17, %v6077_v49  ;;  %v5990_v7 = vadd.f32 %v5989_v6, %v11366_v28 }
 0x4bd   : > { %v6351_v20 = vadd.f32 %v7724_v8, %v6166_v40  ;;  %v7731_v40 = vld [vmem:[%s8299_s20 + $0x1a0] sm:$0xff] }
 0x4be   : > { %v6478_v1 = vmax.f32 %v6350_v5, 0.0  ;;  %v6353_v39 = vadd.f32 %v7725_v37, %v5990_v7 }
 0x4bf   : > { %v6479_v14 = vmax.f32 %v6351_v20, 0.0  ;;  %v5695_v48 = vpop.f32.mrf.mxu0 }
 0x4c0   : > { %6606 = vst [vmem:[%s11390_s9 + $0x148] sm:$0xff] %v6478_v1  ;;  %v6481_v42 = vmax.f32 %v6353_v39, 0.0  ;;  %v5696_v60 = vadd.f32 %v5695_v48, %v5607_v18  ;;  %v7732_v39 = vld [vmem:[%s8299_s20 + $0x1a8] sm:$0xff] }
 0x4c1   : > { %6607 = vst [vmem:[%s11390_s9 + $0x150] sm:$0xff] %v6479_v14  ;;  %v6078_v4 = vpop.f32.mrf.mxu2 }
 0x4c2   : > { %6609 = vst [vmem:[%s11390_s9 + $0x160] sm:$0xff] %v6481_v42  ;;  %v5732_v41 = vmax.f32 %v5696_v60, 0.0  ;;  %v6079_v3 = vadd.f32 %v6078_v4, %v11379_v29  ;;  %v6167_v51 = vpop.f32.mrf.mxu3  ;;  %v11586_v42 = vperm.slane %v11361_v45, 3  ;;  %v7733_v60 = vld [vmem:[%s8299_s20 + $0x1b0] sm:$0xff] }
 0x4c3   : > { %v6168_v33 = vadd.f32 %v6167_v51, %v11383_v23  ;;  %v5992_v10 = vpop.f32.mrf.mxu1 }
 0x4c4   : > { %v11552_v46 = vpack.c.bf16 %v5732_v41, %v5731_v30  ;;  %v6354_v38 = vadd.f32 %v7726_v36, %v6079_v3  ;;  %v5993_v25 = vadd.f32 %v5992_v10, %v11366_v28  ;;  %v7734_v41 = vld [vmem:[%s8299_s20 + $0x1c0] sm:$0xff] }
 0x4c5   : > { %v6355_v22 = vadd.f32 %v7727_v26, %v6168_v33 }
 0x4c6   : > { %v6482_v61 = vmax.f32 %v6354_v38, 0.0  ;;  %v6357_v35 = vadd.f32 %v7728_v16, %v5993_v25  ;;  %6031 = vmatmul.bf16.gmra.mxu1 %v11552_v46  ;;  %6120 = vmatmul.bf16.gmra.mxu2 %v11552_v46  ;;  %v7735_v38 = vld [vmem:[%s8299_s20 + $0x18] sm:$0xff] }
 0x4c7   : > { %v6483_v57 = vmax.f32 %v6355_v22, 0.0  ;;  %6209 = vmatmul.bf16.gmra.mxu3 %v11552_v46  ;;  %v5698_v53 = vpop.f32.mrf.mxu0 }
 0x4c8   : > { %6610 = vst [vmem:[%s11390_s9 + $0x168] sm:$0xff] %v6482_v61  ;;  %v6485_v43 = vmax.f32 %v6357_v35, 0.0  ;;  %v5699_v49 = vadd.f32 %v5698_v53, %v11325_v12 }
 0x4c9   : > { %6611 = vst [vmem:[%s11390_s9 + $0x170] sm:$0xff] %v6483_v57  ;;  %v6081_v54 = vpop.f32.mrf.mxu2  ;;  %v7736_v57 = vld [vmem:[%s8299_s20 + $0x1c8] sm:$0xff] }
 0x4ca   : > { %6613 = vst [vmem:[%s11390_s9 + $0x180] sm:$0xff] %v6485_v43  ;;  %v6082_v9 = vadd.f32 %v6081_v54, %v11379_v29  ;;  %v6170_v59 = vpop.f32.mrf.mxu3  ;;  %6263 = vmatmul.bf16.gmra.mxu0 %v11350_v24  ;;  %v5733_v20 = vmax.f32 %v5699_v49, 0.0 }
 0x4cb   : > { %v6171_v11 = vadd.f32 %v6170_v59, %v11383_v23  ;;  %v5994_v2 = vpop.f32.mrf.mxu1 }
 0x4cc   : > { %v6358_v21 = vadd.f32 %v7729_v19, %v6082_v9  ;;  %v5995_v31 = vadd.f32 %v5994_v2, %v11366_v28 }
 0x4cd   : > { %v6359_v32 = vadd.f32 %v7730_v58, %v6171_v11 }
 0x4ce   : > { %v6486_v50 = vmax.f32 %v6358_v21, 0.0  ;;  %v6361_v6 = vadd.f32 %v7731_v40, %v5995_v31  ;;  %v7739_v21 = vld [vmem:[%s8299_s20 + $0x38] sm:$0xff]  ;;  %v7740_v40 = vld [vmem:[%s8299_s20 + $0x1e8] sm:$0xff] }
 0x4cf   : > { %v6487_v24 = vmax.f32 %v6359_v32, 0.0  ;;  %v5700_v17 = vpop.f32.mrf.mxu0 }
 0x4d0   : > { %6614 = vst [vmem:[%s11390_s9 + $0x188] sm:$0xff] %v6486_v50  ;;  %v6489_v5 = vmax.f32 %v6361_v6, 0.0  ;;  %v5701_v7 = vadd.f32 %v5700_v17, %v5612_v27  ;;  %v7741_v17 = vld [vmem:[%s8299_s20 + $0x1f0] sm:$0xff] }
 0x4d1   : > { %6615 = vst [vmem:[%s11390_s9 + $0x190] sm:$0xff] %v6487_v24  ;;  %v6083_v8 = vpop.f32.mrf.mxu2 }
 0x4d2   : > { %6617 = vst [vmem:[%s11390_s9 + $0x1a0] sm:$0xff] %v6489_v5  ;;  %v5734_v18 = vmax.f32 %v5701_v7, 0.0  ;;  %v6084_v47 = vadd.f32 %v6083_v8, %v11379_v29  ;;  %v6172_v15 = vpop.f32.mrf.mxu3  ;;  %v7742_v8 = vld [vmem:[%s8299_s20 + $0x200] sm:$0xff] }
 0x4d3   : > { %v6173_v12 = vadd.f32 %v6172_v15, %v11383_v23  ;;  %v5997_v1 = vpop.f32.mrf.mxu1 }
 0x4d4   : > { %v11581_v37 = vpack.c.bf16 %v5734_v18, %v5733_v20  ;;  %v6362_v14 = vadd.f32 %v7732_v39, %v6084_v47  ;;  %v5998_v48 = vadd.f32 %v5997_v1, %v11366_v28  ;;  %v7743_v39 = vld [vmem:[%s8299_s20 + $0x58] sm:$0xff] }
 0x4d5   : > { %v6363_v4 = vadd.f32 %v7733_v60, %v6173_v12 }
 0x4d6   : > { %v6490_v30 = vmax.f32 %v6362_v14, 0.0  ;;  %v6365_v3 = vadd.f32 %v7734_v41, %v5998_v48  ;;  %6036 = vmatmul.bf16.gmra.mxu1 %v11581_v37  ;;  %6125 = vmatmul.bf16.gmra.mxu2 %v11581_v37 }
 0x4d7   : > { %v6491_v51 = vmax.f32 %v6363_v4, 0.0  ;;  %6214 = vmatmul.bf16.gmra.mxu3 %v11581_v37  ;;  %v6229_v33 = vpop.f32.mrf.mxu0 }
 0x4d8   : > { %6618 = vst [vmem:[%s11390_s9 + $0x1a8] sm:$0xff] %v6490_v30  ;;  %v6493_v10 = vmax.f32 %v6365_v3, 0.0  ;;  %v6230_v45 = vadd.f32 %v6229_v33, %v11586_v42  ;;  %v7744_v3 = vld [vmem:[%s8299_s20 + $0x208] sm:$0xff] }
 0x4d9   : > { %6619 = vst [vmem:[%s11390_s9 + $0x1b0] sm:$0xff] %v6491_v51  ;;  %v6086_v36 = vpop.f32.mrf.mxu2 }
 0x4da   : > { %6621 = vst [vmem:[%s11390_s9 + $0x1c0] sm:$0xff] %v6493_v10  ;;  %v6312_v25 = vadd.f32 %v7735_v38, %v6230_v45  ;;  %v6087_v26 = vadd.f32 %v6086_v36, %v11379_v29  ;;  %v6175_v22 = vpop.f32.mrf.mxu3  ;;  %6268 = vmatmul.bf16.gmra.mxu0 %v11372_v56  ;;  %v7745_v10 = vld [vmem:[%s8299_s20 + $0x210] sm:$0xff]  ;;  %v7746_v38 = vld [vmem:[%s8299_s20 + $0x220] sm:$0xff] }
 0x4db   : > { %v6176_v61 = vadd.f32 %v6175_v22, %v11383_v23  ;;  %v5999_v16 = vpop.f32.mrf.mxu1 }
 0x4dc   : > { %v6440_v35 = vmax.f32 %v6312_v25, 0.0  ;;  %v6366_v53 = vadd.f32 %v7736_v57, %v6087_v26  ;;  %v6000_v62 = vadd.f32 %v5999_v16, %v11366_v28 }
 0x4dd   : > { %v6367_v43 = vadd.f32 %v7737_v55, %v6176_v61 }
 0x4de   : > { %6568 = vst [vmem:[%s11390_s9 + $0x18] sm:$0xff] %v6440_v35  ;;  %v6494_v54 = vmax.f32 %v6366_v53, 0.0  ;;  %v6369_v9 = vadd.f32 %v7738_v0, %v6000_v62  ;;  %v7747_v35 = vld [vmem:[%s8299_s20 + $0x78] sm:$0xff]  ;;  %v7748_v0 = vld [vmem:[%s8299_s20 + $0x228] sm:$0xff] }
 0x4df   : > { %v6495_v59 = vmax.f32 %v6367_v43, 0.0  ;;  %v6231_v56 = vpop.f32.mrf.mxu0 }
 0x4e0   : > { %6622 = vst [vmem:[%s11390_s9 + $0x1c8] sm:$0xff] %v6494_v54  ;;  %v6497_v11 = vmax.f32 %v6369_v9, 0.0  ;;  %v6232_v2 = vadd.f32 %v6231_v56, %v11586_v42  ;;  %v7749_v56 = vld [vmem:[%s8299_s20 + $0x230] sm:$0xff] }
 0x4e1   : > { %6623 = vst [vmem:[%s11390_s9 + $0x1d0] sm:$0xff] %v6495_v59  ;;  %v6088_v19 = vpop.f32.mrf.mxu2 }
 0x4e2   : > { %6625 = vst [vmem:[%s11390_s9 + $0x1e0] sm:$0xff] %v6497_v11  ;;  %v6316_v31 = vadd.f32 %v7739_v21, %v6232_v2  ;;  %v6089_v58 = vadd.f32 %v6088_v19, %v11379_v29  ;;  %v6177_v32 = vpop.f32.mrf.mxu3  ;;  %v7750_v19 = vld [vmem:[%s8299_s20 + $0x240] sm:$0xff] }
 0x4e3   : > { %v6178_v27 = vadd.f32 %v6177_v32, %v11383_v23  ;;  %v6002_v49 = vpop.f32.mrf.mxu1 }
 0x4e4   : > { %v6444_v50 = vmax.f32 %v6316_v31, 0.0  ;;  %v6370_v6 = vadd.f32 %v7740_v40, %v6089_v58  ;;  %v6003_v24 = vadd.f32 %v6002_v49, %v11366_v28 }
 0x4e5   : > { %v6371_v5 = vadd.f32 %v7741_v17, %v6178_v27 }
 0x4e6   : > { %6572 = vst [vmem:[%s11390_s9 + $0x38] sm:$0xff] %v6444_v50  ;;  %v6498_v7 = vmax.f32 %v6370_v6, 0.0  ;;  %v6373_v20 = vadd.f32 %v7742_v8, %v6003_v24  ;;  %v7751_v50 = vld [vmem:[%s8299_s20 + $0x98] sm:$0xff]  ;;  %v7752_v8 = vld [vmem:[%s8299_s20 + $0x248] sm:$0xff] }
 0x4e7   : > { %v6499_v18 = vmax.f32 %v6371_v5, 0.0  ;;  %v6234_v47 = vpop.f32.mrf.mxu0 }
 0x4e8   : > { %6626 = vst [vmem:[%s11390_s9 + $0x1e8] sm:$0xff] %v6498_v7  ;;  %v6501_v15 = vmax.f32 %v6373_v20, 0.0  ;;  %v6235_v12 = vadd.f32 %v6234_v47, %v11586_v42  ;;  %v7753_v47 = vld [vmem:[%s8299_s20 + $0x250] sm:$0xff] }
 0x4e9   : > { %6627 = vst [vmem:[%s11390_s9 + $0x1f0] sm:$0xff] %v6499_v18  ;;  %v6091_v1 = vpop.f32.mrf.mxu2 }
 0x4ea   : > { %6629 = vst [vmem:[%s11390_s9 + $0x200] sm:$0xff] %v6501_v15  ;;  %v6320_v14 = vadd.f32 %v7743_v39, %v6235_v12  ;;  %v6092_v48 = vadd.f32 %v6091_v1, %v11379_v29  ;;  %v6180_v60 = vpop.f32.mrf.mxu3  ;;  %6273 = vmatmul.bf16.gmra.mxu0 %v11407_v44  ;;  %v7754_v1 = vld [vmem:[%s8299_s20 + $0x260] sm:$0xff] }
 0x4eb   : > { %v6181_v4 = vadd.f32 %v6180_v60, %v11383_v23  ;;  %v6004_v30 = vpop.f32.mrf.mxu1 }
 0x4ec   : > { %v6448_v41 = vmax.f32 %v6320_v14, 0.0  ;;  %v6374_v51 = vadd.f32 %v7744_v3, %v6092_v48  ;;  %v6005_v33 = vadd.f32 %v6004_v30, %v11366_v28  ;;  %v7755_v30 = vld [vmem:[%s8299_s20 + $0xb8] sm:$0xff] }
 0x4ed   : > { %v6375_v45 = vadd.f32 %v7745_v10, %v6181_v4 }
 0x4ee   : > { %6576 = vst [vmem:[%s11390_s9 + $0x58] sm:$0xff] %v6448_v41  ;;  %v6502_v36 = vmax.f32 %v6374_v51, 0.0  ;;  %v6377_v25 = vadd.f32 %v7746_v38, %v6005_v33 }
 0x4ef   : > { %v6503_v26 = vmax.f32 %v6375_v45, 0.0  ;;  %v6236_v44 = vpop.f32.mrf.mxu0 }
 0x4f0   : > { %6630 = vst [vmem:[%s11390_s9 + $0x208] sm:$0xff] %v6502_v36  ;;  %v6505_v22 = vmax.f32 %v6377_v25, 0.0  ;;  %v6237_v61 = vadd.f32 %v6236_v44, %v11586_v42  ;;  %v7756_v36 = vld [vmem:[%s8299_s20 + $0x268] sm:$0xff] }
 0x4f1   : > { %6631 = vst [vmem:[%s11390_s9 + $0x210] sm:$0xff] %v6503_v26  ;;  %v6093_v16 = vpop.f32.mrf.mxu2  ;;  %v7757_v26 = vld [vmem:[%s8299_s20 + $0x270] sm:$0xff] }
 0x4f2   : > { %6633 = vst [vmem:[%s11390_s9 + $0x220] sm:$0xff] %v6505_v22  ;;  %v6324_v57 = vadd.f32 %v7747_v35, %v6237_v61  ;;  %v6094_v53 = vadd.f32 %v6093_v16, %v11379_v29  ;;  %v6182_v62 = vpop.f32.mrf.mxu3  ;;  %v7758_v61 = vld [vmem:[%s8299_s20 + $0x280] sm:$0xff] }
 0x4f3   : > { %v6183_v55 = vadd.f32 %v6182_v62, %v11383_v23  ;;  %v6007_v43 = vpop.f32.mrf.mxu1 }
 0x4f4   : > { %v6452_v54 = vmax.f32 %v6324_v57, 0.0  ;;  %v6378_v9 = vadd.f32 %v7748_v0, %v6094_v53  ;;  %v6008_v59 = vadd.f32 %v6007_v43, %v11366_v28  ;;  %v7759_v43 = vld [vmem:[%s8299_s20 + $0xd8] sm:$0xff] }
 0x4f5   : > { %v6379_v11 = vadd.f32 %v7749_v56, %v6183_v55 }
 0x4f6   : > { %6580 = vst [vmem:[%s11390_s9 + $0x78] sm:$0xff] %v6452_v54  ;;  %v6506_v2 = vmax.f32 %v6378_v9, 0.0  ;;  %v6381_v21 = vadd.f32 %v7750_v19, %v6008_v59 }
 0x4f7   : > { %v6507_v31 = vmax.f32 %v6379_v11, 0.0  ;;  %v6239_v58 = vpop.f32.mrf.mxu0 }
 0x4f8   : > { %6634 = vst [vmem:[%s11390_s9 + $0x228] sm:$0xff] %v6506_v2  ;;  %v6509_v32 = vmax.f32 %v6381_v21, 0.0  ;;  %v6240_v27 = vadd.f32 %v6239_v58, %v11586_v42  ;;  %v7760_v2 = vld [vmem:[%s8299_s20 + $0x288] sm:$0xff] }
 0x4f9   : > { %6635 = vst [vmem:[%s11390_s9 + $0x230] sm:$0xff] %v6507_v31  ;;  %v6096_v49 = vpop.f32.mrf.mxu2  ;;  %v7761_v31 = vld [vmem:[%s8299_s20 + $0x290] sm:$0xff] }
 0x4fa   : > { %6637 = vst [vmem:[%s11390_s9 + $0x240] sm:$0xff] %v6509_v32  ;;  %v6328_v40 = vadd.f32 %v7751_v50, %v6240_v27  ;;  %v6097_v6 = vadd.f32 %v6096_v49, %v11379_v29  ;;  %v6185_v24 = vpop.f32.mrf.mxu3  ;;  %6278 = vmatmul.bf16.gmra.mxu0 %v11436_v52  ;;  %v7762_v27 = vld [vmem:[%s8299_s20 + $0x2a0] sm:$0xff] }
 0x4fb   : > { %v6186_v17 = vadd.f32 %v6185_v24, %v11383_v23  ;;  %v6009_v5 = vpop.f32.mrf.mxu1 }
 0x4fc   : > { %v6456_v7 = vmax.f32 %v6328_v40, 0.0  ;;  %v6382_v20 = vadd.f32 %v7752_v8, %v6097_v6  ;;  %v6010_v18 = vadd.f32 %v6009_v5, %v11366_v28 }
 0x4fd   : > { %v6383_v15 = vadd.f32 %v7753_v47, %v6186_v17  ;;  %v7763_v17 = vld [vmem:[%s8299_s20 + $0xf8] sm:$0xff] }
 0x4fe   : > { %6584 = vst [vmem:[%s11390_s9 + $0x98] sm:$0xff] %v6456_v7  ;;  %v6510_v12 = vmax.f32 %v6382_v20, 0.0  ;;  %v6385_v39 = vadd.f32 %v7754_v1, %v6010_v18 }
 0x4ff   : > { %v6511_v14 = vmax.f32 %v6383_v15, 0.0  ;;  %v6241_v52 = vpop.f32.mrf.mxu0  ;;  %v7764_v15 = vld [vmem:[%s8299_s20 + $0x2a8] sm:$0xff] }
 0x500   : > { %6638 = vst [vmem:[%s11390_s9 + $0x248] sm:$0xff] %v6510_v12  ;;  %v6513_v48 = vmax.f32 %v6385_v39, 0.0  ;;  %v6242_v60 = vadd.f32 %v6241_v52, %v11586_v42  ;;  %v7765_v39 = vld [vmem:[%s8299_s20 + $0x2b0] sm:$0xff] }
 0x501   : > { %6639 = vst [vmem:[%s11390_s9 + $0x250] sm:$0xff] %v6511_v14  ;;  %v6098_v4 = vpop.f32.mrf.mxu2 }
 0x502   : > { %6641 = vst [vmem:[%s11390_s9 + $0x260] sm:$0xff] %v6513_v48  ;;  %v6332_v41 = vadd.f32 %v7755_v30, %v6242_v60  ;;  %v6099_v3 = vadd.f32 %v6098_v4, %v11379_v29  ;;  %v6187_v51 = vpop.f32.mrf.mxu3  ;;  %v7766_v48 = vld [vmem:[%s8299_s20 + $0x2c0] sm:$0xff] }
 0x503   : > { %v6188_v33 = vadd.f32 %v6187_v51, %v11383_v23  ;;  %v6012_v10 = vpop.f32.mrf.mxu1 }
 0x504   : > { %v6460_v45 = vmax.f32 %v6332_v41, 0.0  ;;  %v6386_v38 = vadd.f32 %v7756_v36, %v6099_v3  ;;  %v6013_v25 = vadd.f32 %v6012_v10, %v11366_v28 }
 0x505   : > { %v6387_v44 = vadd.f32 %v7757_v26, %v6188_v33  ;;  %v7767_v33 = vld [vmem:[%s8299_s20 + $0x118] sm:$0xff] }
 0x506   : > { %6588 = vst [vmem:[%s11390_s9 + $0xb8] sm:$0xff] %v6460_v45  ;;  %v6514_v22 = vmax.f32 %v6386_v38, 0.0  ;;  %v6389_v16 = vadd.f32 %v7758_v61, %v6013_v25 }
 0x507   : > { %v6515_v35 = vmax.f32 %v6387_v44, 0.0  ;;  %v6244_v57 = vpop.f32.mrf.mxu0  ;;  %v7768_v44 = vld [vmem:[%s8299_s20 + $0x2c8] sm:$0xff] }
 0x508   : > { %6642 = vst [vmem:[%s11390_s9 + $0x268] sm:$0xff] %v6514_v22  ;;  %v6517_v53 = vmax.f32 %v6389_v16, 0.0  ;;  %v6245_v62 = vadd.f32 %v6244_v57, %v11586_v42  ;;  %v7769_v16 = vld [vmem:[%s8299_s20 + $0x2d0] sm:$0xff] }
 0x509   : > { %6643 = vst [vmem:[%s11390_s9 + $0x270] sm:$0xff] %v6515_v35  ;;  %v6101_v55 = vpop.f32.mrf.mxu2 }
 0x50a   : > { %6645 = vst [vmem:[%s11390_s9 + $0x280] sm:$0xff] %v6517_v53  ;;  %v6336_v54 = vadd.f32 %v7759_v43, %v6245_v62  ;;  %v6102_v0 = vadd.f32 %v6101_v55, %v11379_v29  ;;  %v6190_v9 = vpop.f32.mrf.mxu3  ;;  %6283 = vmatmul.bf16.gmra.mxu0 %v11465_v13  ;;  %v7770_v53 = vld [vmem:[%s8299_s20 + $0x2e0] sm:$0xff] }
 0x50b   : > { %v6191_v59 = vadd.f32 %v6190_v9, %v11383_v23  ;;  %v6014_v56 = vpop.f32.mrf.mxu1  ;;  %v7771_v9 = vld [vmem:[%s8299_s20 + $0x138] sm:$0xff] }
 0x50c   : > { %v6464_v11 = vmax.f32 %v6336_v54, 0.0  ;;  %v6390_v19 = vadd.f32 %v7760_v2, %v6102_v0  ;;  %v6015_v21 = vadd.f32 %v6014_v56, %v11366_v28 }
 0x50d   : > { %v6391_v58 = vadd.f32 %v7761_v31, %v6191_v59  ;;  %v7772_v31 = vld [vmem:[%s8299_s20 + $0x2e8] sm:$0xff] }
 0x50e   : > { %6592 = vst [vmem:[%s11390_s9 + $0xd8] sm:$0xff] %v6464_v11  ;;  %v6518_v32 = vmax.f32 %v6390_v19, 0.0  ;;  %v6393_v49 = vadd.f32 %v7762_v27, %v6015_v21  ;;  %v7773_v27 = vld [vmem:[%s8299_s20 + $0x2f0] sm:$0xff] }
 0x50f   : > { %v6519_v50 = vmax.f32 %v6391_v58, 0.0  ;;  %v6246_v13 = vpop.f32.mrf.mxu0 }
 0x510   : > { %6646 = vst [vmem:[%s11390_s9 + $0x288] sm:$0xff] %v6518_v32  ;;  %v6521_v40 = vmax.f32 %v6393_v49, 0.0  ;;  %v6247_v6 = vadd.f32 %v6246_v13, %v11586_v42  ;;  %v7774_v13 = vld [vmem:[%s8299_s20 + $0x300] sm:$0xff] }
 0x511   : > { %6647 = vst [vmem:[%s11390_s9 + $0x290] sm:$0xff] %v6519_v50  ;;  %v6103_v24 = vpop.f32.mrf.mxu2 }
 0x512   : > { %6649 = vst [vmem:[%s11390_s9 + $0x2a0] sm:$0xff] %v6521_v40  ;;  %v6340_v5 = vadd.f32 %v7763_v17, %v6247_v6  ;;  %v6104_v7 = vadd.f32 %v6103_v24, %v11379_v29  ;;  %v6192_v8 = vpop.f32.mrf.mxu3 }
 0x513   : > { %v6193_v20 = vadd.f32 %v6192_v8, %v11383_v23  ;;  %v6017_v18 = vpop.f32.mrf.mxu1  ;;  %v7775_v8 = vld [vmem:[%s8299_s20 + $0x158] sm:$0xff] }
 0x514   : > { %v6468_v47 = vmax.f32 %v6340_v5, 0.0  ;;  %v6394_v12 = vadd.f32 %v7764_v15, %v6104_v7  ;;  %v6018_v1 = vadd.f32 %v6017_v18, %v11366_v28 }
 0x515   : > { %v6395_v14 = vadd.f32 %v7765_v39, %v6193_v20  ;;  %v7776_v39 = vld [vmem:[%s8299_s20 + $0x308] sm:$0xff] }
 0x516   : > { %6596 = vst [vmem:[%s11390_s9 + $0xf8] sm:$0xff] %v6468_v47  ;;  %v6522_v52 = vmax.f32 %v6394_v12, 0.0  ;;  %v6397_v60 = vadd.f32 %v7766_v48, %v6018_v1  ;;  %v7777_v48 = vld [vmem:[%s8299_s20 + $0x310] sm:$0xff] }
 0x517   : > { %v6523_v4 = vmax.f32 %v6395_v14, 0.0  ;;  %v6249_v30 = vpop.f32.mrf.mxu0 }
 0x518   : > { %6650 = vst [vmem:[%s11390_s9 + $0x2a8] sm:$0xff] %v6522_v52  ;;  %v6525_v41 = vmax.f32 %v6397_v60, 0.0  ;;  %v6250_v3 = vadd.f32 %v6249_v30, %v11586_v42  ;;  %v7778_v30 = vld [vmem:[%s8299_s20 + $0x320] sm:$0xff] }
 0x519   : > { %6651 = vst [vmem:[%s11390_s9 + $0x2b0] sm:$0xff] %v6523_v4  ;;  %v6106_v51 = vpop.f32.mrf.mxu2 }
 0x51a   : > { %6653 = vst [vmem:[%s11390_s9 + $0x2c0] sm:$0xff] %v6525_v41  ;;  %v6344_v10 = vadd.f32 %v7767_v33, %v6250_v3  ;;  %v6107_v45 = vadd.f32 %v6106_v51, %v11379_v29  ;;  %v6195_v36 = vpop.f32.mrf.mxu3  ;;  %6288 = vmatmul.bf16.gmra.mxu0 %v11494_v34 }
 0x51b   : > { %v6196_v38 = vadd.f32 %v6195_v36, %v11383_v23  ;;  %v6019_v25 = vpop.f32.mrf.mxu1 }
 0x51c   : > { %v6472_v26 = vmax.f32 %v6344_v10, 0.0  ;;  %v6398_v22 = vadd.f32 %v7768_v44, %v6107_v45  ;;  %v6020_v61 = vadd.f32 %v6019_v25, %v11366_v28  ;;  %v7779_v45 = vld [vmem:[%s8299_s20 + $0x178] sm:$0xff] }
 0x51d   : > { %v6399_v35 = vadd.f32 %v7769_v16, %v6196_v38 }
 0x51e   : > { %6600 = vst [vmem:[%s11390_s9 + $0x118] sm:$0xff] %v6472_v26  ;;  %v6526_v57 = vmax.f32 %v6398_v22, 0.0  ;;  %v6401_v62 = vadd.f32 %v7770_v53, %v6020_v61  ;;  %v7780_v61 = vld [vmem:[%s8299_s20 + $0x328] sm:$0xff] }
 0x51f   : > { %v6527_v55 = vmax.f32 %v6399_v35, 0.0  ;;  %v6251_v34 = vpop.f32.mrf.mxu0 }
 0x520   : > { %6654 = vst [vmem:[%s11390_s9 + $0x2c8] sm:$0xff] %v6526_v57  ;;  %v6529_v43 = vmax.f32 %v6401_v62, 0.0  ;;  %v6252_v54 = vadd.f32 %v6251_v34, %v11586_v42  ;;  %v7781_v57 = vld [vmem:[%s8299_s20 + $0x330] sm:$0xff] }
 0x521   : > { %6655 = vst [vmem:[%s11390_s9 + $0x2d0] sm:$0xff] %v6527_v55  ;;  %v6108_v0 = vpop.f32.mrf.mxu2  ;;  %v7782_v55 = vld [vmem:[%s8299_s20 + $0x340] sm:$0xff] }
 0x522   : > { %6657 = vst [vmem:[%s11390_s9 + $0x2e0] sm:$0xff] %v6529_v43  ;;  %v6348_v59 = vadd.f32 %v7771_v9, %v6252_v54  ;;  %v6109_v56 = vadd.f32 %v6108_v0, %v11379_v29  ;;  %v6197_v11 = vpop.f32.mrf.mxu3 }
 0x523   : > { %v6198_v2 = vadd.f32 %v6197_v11, %v11383_v23  ;;  %v6022_v19 = vpop.f32.mrf.mxu1 }
 0x524   : > { %v6476_v21 = vmax.f32 %v6348_v59, 0.0  ;;  %v6402_v58 = vadd.f32 %v7772_v31, %v6109_v56  ;;  %v6023_v32 = vadd.f32 %v6022_v19, %v11366_v28  ;;  %v7783_v56 = vld [vmem:[%s8299_s20 + $0x198] sm:$0xff] }
 0x525   : > { %v6403_v49 = vadd.f32 %v7773_v27, %v6198_v2 }
 0x526   : > { %6604 = vst [vmem:[%s11390_s9 + $0x138] sm:$0xff] %v6476_v21  ;;  %v6530_v50 = vmax.f32 %v6402_v58, 0.0  ;;  %v6405_v40 = vadd.f32 %v7774_v13, %v6023_v32  ;;  %v7784_v32 = vld [vmem:[%s8299_s20 + $0x348] sm:$0xff] }
 0x527   : > { %v6531_v6 = vmax.f32 %v6403_v49, 0.0  ;;  %v6254_v24 = vpop.f32.mrf.mxu0 }
 0x528   : > { %6658 = vst [vmem:[%s11390_s9 + $0x2e8] sm:$0xff] %v6530_v50  ;;  %v6533_v17 = vmax.f32 %v6405_v40, 0.0  ;;  %v6255_v5 = vadd.f32 %v6254_v24, %v11586_v42  ;;  %v7785_v50 = vld [vmem:[%s8299_s20 + $0x350] sm:$0xff] }
 0x529   : > { %6659 = vst [vmem:[%s11390_s9 + $0x2f0] sm:$0xff] %v6531_v6  ;;  %v6111_v7 = vpop.f32.mrf.mxu2  ;;  %v7786_v6 = vld [vmem:[%s8299_s20 + $0x360] sm:$0xff] }
 0x52a   : > { %6661 = vst [vmem:[%s11390_s9 + $0x300] sm:$0xff] %v6533_v17  ;;  %v6352_v20 = vadd.f32 %v7775_v8, %v6255_v5  ;;  %v6112_v18 = vadd.f32 %v6111_v7, %v11379_v29  ;;  %v6200_v47 = vpop.f32.mrf.mxu3  ;;  %6293 = vmatmul.bf16.gmra.mxu0 %v11523_v63 }
 0x52b   : > { %v6201_v15 = vadd.f32 %v6200_v47, %v11383_v23  ;;  %v6024_v12 = vpop.f32.mrf.mxu1 }
 0x52c   : > { %v6480_v1 = vmax.f32 %v6352_v20, 0.0  ;;  %v6406_v14 = vadd.f32 %v7776_v39, %v6112_v18  ;;  %v6025_v52 = vadd.f32 %v6024_v12, %v11366_v28  ;;  %v7787_v20 = vld [vmem:[%s8299_s20 + $0x1b8] sm:$0xff] }
 0x52d   : > { %v6407_v60 = vadd.f32 %v7777_v48, %v6201_v15 }
 0x52e   : > { %6608 = vst [vmem:[%s11390_s9 + $0x158] sm:$0xff] %v6480_v1  ;;  %v6534_v4 = vmax.f32 %v6406_v14, 0.0  ;;  %v6409_v41 = vadd.f32 %v7778_v30, %v6025_v52  ;;  %v7788_v14 = vld [vmem:[%s8299_s20 + $0x368] sm:$0xff] }
 0x52f   : > { %v6535_v3 = vmax.f32 %v6407_v60, 0.0  ;;  %v6256_v63 = vpop.f32.mrf.mxu0  ;;  %v7789_v60 = vld [vmem:[%s8299_s20 + $0x370] sm:$0xff] }
 0x530   : > { %6662 = vst [vmem:[%s11390_s9 + $0x308] sm:$0xff] %v6534_v4  ;;  %v6537_v51 = vmax.f32 %v6409_v41, 0.0  ;;  %v6257_v33 = vadd.f32 %v6256_v63, %v11586_v42  ;;  %v7790_v41 = vld [vmem:[%s8299_s20 + $0x380] sm:$0xff] }
 0x531   : > { %6663 = vst [vmem:[%s11390_s9 + $0x310] sm:$0xff] %v6535_v3  ;;  %v6113_v10 = vpop.f32.mrf.mxu2 }
 0x532   : > { %6665 = vst [vmem:[%s11390_s9 + $0x320] sm:$0xff] %v6537_v51  ;;  %v6356_v36 = vadd.f32 %v7779_v45, %v6257_v33  ;;  %v6114_v38 = vadd.f32 %v6113_v10, %v11379_v29  ;;  %v6202_v25 = vpop.f32.mrf.mxu3 }
 0x533   : > { %v6203_v26 = vadd.f32 %v6202_v25, %v11383_v23  ;;  %v6027_v44 = vpop.f32.mrf.mxu1 }
 0x534   : > { %v6484_v22 = vmax.f32 %v6356_v36, 0.0  ;;  %v6410_v16 = vadd.f32 %v7780_v61, %v6114_v38  ;;  %v6028_v35 = vadd.f32 %v6027_v44, %v11366_v28  ;;  %v7791_v36 = vld [vmem:[%s8299_s20 + $0x1d8] sm:$0xff] }
 0x535   : > { %v6411_v53 = vadd.f32 %v7781_v57, %v6203_v26 }
 0x536   : > { %6612 = vst [vmem:[%s11390_s9 + $0x178] sm:$0xff] %v6484_v22  ;;  %v6538_v62 = vmax.f32 %v6410_v16, 0.0  ;;  %v6413_v34 = vadd.f32 %v7782_v55, %v6028_v35  ;;  %v7792_v16 = vld [vmem:[%s8299_s20 + $0x388] sm:$0xff] }
 0x537   : > { %v6539_v43 = vmax.f32 %v6411_v53, 0.0  ;;  %v6259_v54 = vpop.f32.mrf.mxu0  ;;  %v7793_v53 = vld [vmem:[%s8299_s20 + $0x390] sm:$0xff] }
 0x538   : > { %6666 = vst [vmem:[%s11390_s9 + $0x328] sm:$0xff] %v6538_v62  ;;  %v6541_v0 = vmax.f32 %v6413_v34, 0.0  ;;  %v6260_v9 = vadd.f32 %v6259_v54, %v11586_v42  ;;  %v7794_v34 = vld [vmem:[%s8299_s20 + $0x3a0] sm:$0xff] }
 0x539   : > { %6667 = vst [vmem:[%s11390_s9 + $0x330] sm:$0xff] %v6539_v43  ;;  %v6116_v59 = vpop.f32.mrf.mxu2 }
 0x53a   : > { %6669 = vst [vmem:[%s11390_s9 + $0x340] sm:$0xff] %v6541_v0  ;;  %v6360_v11 = vadd.f32 %v7783_v56, %v6260_v9  ;;  %v6117_v2 = vadd.f32 %v6116_v59, %v11379_v29  ;;  %v6205_v19 = vpop.f32.mrf.mxu3  ;;  %6298 = vmatmul.bf16.gmra.mxu0 %v11552_v46  ;;  %v7795_v56 = vld [vmem:[%s8299_s20 + $0x1f8] sm:$0xff] }
 0x53b   : > { %v6206_v21 = vadd.f32 %v6205_v19, %v11383_v23  ;;  %v6029_v31 = vpop.f32.mrf.mxu1 }
 0x53c   : > { %v6488_v58 = vmax.f32 %v6360_v11, 0.0  ;;  %v6414_v27 = vadd.f32 %v7784_v32, %v6117_v2  ;;  %v6030_v49 = vadd.f32 %v6029_v31, %v11366_v28  ;;  %v7796_v32 = vld [vmem:[%s8299_s20 + $0x3a8] sm:$0xff] }
 0x53d   : > { %v6415_v13 = vadd.f32 %v7785_v50, %v6206_v21  ;;  %v7797_v50 = vld [vmem:[%s8299_s20 + $0x3b0] sm:$0xff] }
 0x53e   : > { %6616 = vst [vmem:[%s11390_s9 + $0x198] sm:$0xff] %v6488_v58  ;;  %v6542_v40 = vmax.f32 %v6414_v27, 0.0  ;;  %v6417_v24 = vadd.f32 %v7786_v6, %v6030_v49  ;;  %v7798_v6 = vld [vmem:[%s8299_s20 + $0x3c0] sm:$0xff] }
 0x53f   : > { %v6543_v17 = vmax.f32 %v6415_v13, 0.0  ;;  %v6261_v46 = vpop.f32.mrf.mxu0 }
 0x540   : > { %6670 = vst [vmem:[%s11390_s9 + $0x348] sm:$0xff] %v6542_v40  ;;  %v6545_v5 = vmax.f32 %v6417_v24, 0.0  ;;  %v6262_v7 = vadd.f32 %v6261_v46, %v11586_v42 }
 0x541   : > { %6671 = vst [vmem:[%s11390_s9 + $0x350] sm:$0xff] %v6543_v17  ;;  %v6118_v8 = vpop.f32.mrf.mxu2 }
 0x542   : > { %6673 = vst [vmem:[%s11390_s9 + $0x360] sm:$0xff] %v6545_v5  ;;  %v6364_v18 = vadd.f32 %v7787_v20, %v6262_v7  ;;  %v6119_v47 = vadd.f32 %v6118_v8, %v11379_v29  ;;  %v6207_v15 = vpop.f32.mrf.mxu3  ;;  %v7799_v20 = vld [vmem:[%s8299_s20 + $0x218] sm:$0xff] }
 0x543   : > { %v6208_v12 = vadd.f32 %v6207_v15, %v11383_v23  ;;  %v6032_v1 = vpop.f32.mrf.mxu1 }
 0x544   : > { %v6492_v39 = vmax.f32 %v6364_v18, 0.0  ;;  %v6418_v52 = vadd.f32 %v7788_v14, %v6119_v47  ;;  %v6033_v48 = vadd.f32 %v6032_v1, %v11366_v28  ;;  %v7800_v14 = vld [vmem:[%s8299_s20 + $0x3c8] sm:$0xff] }
 0x545   : > { %v6419_v4 = vadd.f32 %v7789_v60, %v6208_v12  ;;  %v7801_v60 = vld [vmem:[%s8299_s20 + $0x3d0] sm:$0xff] }
 0x546   : > { %6620 = vst [vmem:[%s11390_s9 + $0x1b8] sm:$0xff] %v6492_v39  ;;  %v6546_v30 = vmax.f32 %v6418_v52, 0.0  ;;  %v6421_v3 = vadd.f32 %v7790_v41, %v6033_v48  ;;  %v7802_v41 = vld [vmem:[%s8299_s20 + $0x3e0] sm:$0xff] }
 0x547   : > { %v6547_v63 = vmax.f32 %v6419_v4, 0.0  ;;  %v6264_v51 = vpop.f32.mrf.mxu0 }
 0x548   : > { %6674 = vst [vmem:[%s11390_s9 + $0x368] sm:$0xff] %v6546_v30  ;;  %v6549_v33 = vmax.f32 %v6421_v3, 0.0  ;;  %v6265_v10 = vadd.f32 %v6264_v51, %v11586_v42 }
 0x549   : > { %6675 = vst [vmem:[%s11390_s9 + $0x370] sm:$0xff] %v6547_v63  ;;  %v6121_v45 = vpop.f32.mrf.mxu2 }
 0x54a   : > { %6677 = vst [vmem:[%s11390_s9 + $0x380] sm:$0xff] %v6549_v33  ;;  %v6368_v38 = vadd.f32 %v7791_v36, %v6265_v10  ;;  %v6122_v25 = vadd.f32 %v6121_v45, %v11379_v29  ;;  %v6210_v26 = vpop.f32.mrf.mxu3  ;;  %6303 = vmatmul.bf16.gmra.mxu0 %v11581_v37 }
 0x54b   : > { %v6211_v44 = vadd.f32 %v6210_v26, %v11383_v23  ;;  %v6034_v22 = vpop.f32.mrf.mxu1 }
 0x54c   : > { %v6496_v61 = vmax.f32 %v6368_v38, 0.0  ;;  %v6422_v35 = vadd.f32 %v7792_v16, %v6122_v25  ;;  %v6035_v57 = vadd.f32 %v6034_v22, %v11366_v28  ;;  %v7804_v22 = vld [vmem:[%s8299_s20 + $0x3e8] sm:$0xff]  ;;  %v7805_v16 = vld [vmem:[%s8299_s20 + $0x3f0] sm:$0xff] }
 0x54d   : > { %v6423_v62 = vadd.f32 %v7793_v53, %v6211_v44 }
 0x54e   : > { %6624 = vst [vmem:[%s11390_s9 + $0x1d8] sm:$0xff] %v6496_v61  ;;  %v6550_v55 = vmax.f32 %v6422_v35, 0.0  ;;  %v6425_v43 = vadd.f32 %v7794_v34, %v6035_v57 }
 0x54f   : > { %v6551_v54 = vmax.f32 %v6423_v62, 0.0  ;;  %v6266_v37 = vpop.f32.mrf.mxu0 }
 0x550   : > { %6678 = vst [vmem:[%s11390_s9 + $0x388] sm:$0xff] %v6550_v55  ;;  %v6553_v0 = vmax.f32 %v6425_v43, 0.0  ;;  %v6267_v9 = vadd.f32 %v6266_v37, %v11586_v42  ;;  %v7807_v37 = vld [vmem:[%s8299_s20 + $0x278] sm:$0xff] }
 0x551   : > { %6679 = vst [vmem:[%s11390_s9 + $0x390] sm:$0xff] %v6551_v54  ;;  %v6123_v59 = vpop.f32.mrf.mxu2 }
 0x552   : > { %6681 = vst [vmem:[%s11390_s9 + $0x3a0] sm:$0xff] %v6553_v0  ;;  %v6372_v11 = vadd.f32 %v7795_v56, %v6267_v9  ;;  %v6124_v2 = vadd.f32 %v6123_v59, %v11379_v29  ;;  %v6212_v19 = vpop.f32.mrf.mxu3 }
 0x553   : > { %v6213_v21 = vadd.f32 %v6212_v19, %v11383_v23  ;;  %v6037_v31 = vpop.f32.mrf.mxu1 }
 0x554   : > { %v6500_v58 = vmax.f32 %v6372_v11, 0.0  ;;  %v6426_v27 = vadd.f32 %v7796_v32, %v6124_v2  ;;  %v6038_v49 = vadd.f32 %v6037_v31, %v11366_v28  ;;  %v7808_v11 = vld [vmem:[%s8299_s20 + $0x298] sm:$0xff] }
 0x555   : > { %v6427_v13 = vadd.f32 %v7797_v50, %v6213_v21 }
 0x556   : > { %6628 = vst [vmem:[%s11390_s9 + $0x1f8] sm:$0xff] %v6500_v58  ;;  %v6554_v40 = vmax.f32 %v6426_v27, 0.0  ;;  %v6429_v24 = vadd.f32 %v7798_v6, %v6038_v49  ;;  %v7809_v58 = vld [vmem:[%s8299_s20 + $0x2b8] sm:$0xff] }
 0x557   : > { %v6555_v17 = vmax.f32 %v6427_v13, 0.0  ;;  %v6269_v46 = vpop.f32.mrf.mxu0  ;;  %v7810_v13 = vld [vmem:[%s8299_s20 + $0x2d8] sm:$0xff] }
 0x558   : > { %6682 = vst [vmem:[%s11390_s9 + $0x3a8] sm:$0xff] %v6554_v40  ;;  %v6557_v5 = vmax.f32 %v6429_v24, 0.0  ;;  %v6270_v7 = vadd.f32 %v6269_v46, %v11586_v42  ;;  %v7811_v46 = vld [vmem:[%s8299_s20 + $0x2f8] sm:$0xff] }
 0x559   : > { %6683 = vst [vmem:[%s11390_s9 + $0x3b0] sm:$0xff] %v6555_v17  ;;  %v6126_v8 = vpop.f32.mrf.mxu2 }
 0x55a   : > { %6685 = vst [vmem:[%s11390_s9 + $0x3c0] sm:$0xff] %v6557_v5  ;;  %v6376_v18 = vadd.f32 %v7799_v20, %v6270_v7  ;;  %v6127_v47 = vadd.f32 %v6126_v8, %v11379_v29  ;;  %v6215_v15 = vpop.f32.mrf.mxu3 }
 0x55b   : > { %v6216_v12 = vadd.f32 %v6215_v15, %v11383_v23  ;;  %v6039_v1 = vpop.f32.mrf.mxu1 }
 0x55c   : > { %v6504_v39 = vmax.f32 %v6376_v18, 0.0  ;;  %v6430_v52 = vadd.f32 %v7800_v14, %v6127_v47  ;;  %v6040_v48 = vadd.f32 %v6039_v1, %v11366_v28  ;;  %v7803_v28 = vld [vmem:[%s8299_s20 + $0x238] sm:$0xff] }
 0x55d   : > { %v6431_v4 = vadd.f32 %v7801_v60, %v6216_v12  ;;  %v7812_v18 = vld [vmem:[%s8299_s20 + $0x318] sm:$0xff] }
 0x55e   : > { %6632 = vst [vmem:[%s11390_s9 + $0x218] sm:$0xff] %v6504_v39  ;;  %v6558_v30 = vmax.f32 %v6430_v52, 0.0  ;;  %v6433_v3 = vadd.f32 %v7802_v41, %v6040_v48  ;;  %v7813_v39 = vld [vmem:[%s8299_s20 + $0x338] sm:$0xff] }
 0x55f   : > { %v6559_v63 = vmax.f32 %v6431_v4, 0.0  ;;  %v6271_v51 = vpop.f32.mrf.mxu0  ;;  %v7814_v4 = vld [vmem:[%s8299_s20 + $0x358] sm:$0xff] }
 0x560   : > { %6686 = vst [vmem:[%s11390_s9 + $0x3c8] sm:$0xff] %v6558_v30  ;;  %v6561_v33 = vmax.f32 %v6433_v3, 0.0  ;;  %v6272_v10 = vadd.f32 %v6271_v51, %v11586_v42  ;;  %v7815_v51 = vld [vmem:[%s8299_s20 + $0x378] sm:$0xff] }
 0x561   : > { %6687 = vst [vmem:[%s11390_s9 + $0x3d0] sm:$0xff] %v6559_v63  ;;  %v6128_v45 = vpop.f32.mrf.mxu2 }
 0x562   : > { %6689 = vst [vmem:[%s11390_s9 + $0x3e0] sm:$0xff] %v6561_v33  ;;  %v6380_v36 = vadd.f32 %v7803_v28, %v6272_v10  ;;  %v6129_v38 = vadd.f32 %v6128_v45, %v11379_v29  ;;  %v6217_v25 = vpop.f32.mrf.mxu3  ;;  %v7806_v29 = vld [vmem:[%s8299_s20 + $0x258] sm:$0xff] }
 0x563   : > { %v6218_v26 = vadd.f32 %v6217_v25, %v11383_v23 }
 0x564   : > { %v6508_v44 = vmax.f32 %v6380_v36, 0.0  ;;  %v6434_v61 = vadd.f32 %v7804_v22, %v6129_v38  ;;  %v7816_v36 = vld [vmem:[%s8299_s20 + $0x398] sm:$0xff] }
 0x565   : > { %v6435_v35 = vadd.f32 %v7805_v16, %v6218_v26  ;;  %v7817_v22 = vld [vmem:[%s8299_s20 + $0x3b8] sm:$0xff] }
 0x566   : > { %6636 = vst [vmem:[%s11390_s9 + $0x238] sm:$0xff] %v6508_v44  ;;  %v6562_v57 = vmax.f32 %v6434_v61, 0.0 }
 0x567   : > { %v6563_v53 = vmax.f32 %v6435_v35, 0.0  ;;  %v6274_v62 = vpop.f32.mrf.mxu0 }
 0x568   : > { %6690 = vst [vmem:[%s11390_s9 + $0x3e8] sm:$0xff] %v6562_v57  ;;  %v6275_v55 = vadd.f32 %v6274_v62, %v11586_v42 }
 0x569   : > { %6691 = vst [vmem:[%s11390_s9 + $0x3f0] sm:$0xff] %v6563_v53  ;;  %v7818_v53 = vld [vmem:[%s8299_s20 + $0x3d8] sm:$0xff] }
 0x56a   : > { %v6384_v23 = vadd.f32 %v7806_v29, %v6275_v55 }
 0x56c   : > { %v6512_v34 = vmax.f32 %v6384_v23, 0.0 }
 0x56e   : > { %6640 = vst [vmem:[%s11390_s9 + $0x258] sm:$0xff] %v6512_v34  ;;  %v7819_v34 = vld [vmem:[%s8299_s20 + $0x3f8] sm:$0xff] }
 0x56f   : > { %v6276_v43 = vpop.f32.mrf.mxu0 }
 0x570   : > { %v6277_v54 = vadd.f32 %v6276_v43, %v11586_v42 }
 0x572   : > { %v6388_v0 = vadd.f32 %v7807_v37, %v6277_v54 }
 0x574   : > { %v6516_v9 = vmax.f32 %v6388_v0, 0.0 }
 0x576   : > { %6644 = vst [vmem:[%s11390_s9 + $0x278] sm:$0xff] %v6516_v9 }
 0x577   : > { %v6279_v59 = vpop.f32.mrf.mxu0 }
 0x578   : > { %v6280_v56 = vadd.f32 %v6279_v59, %v11586_v42 }
 0x57a   : > { %v6392_v2 = vadd.f32 %v7808_v11, %v6280_v56 }
 0x57c   : > { %v6520_v19 = vmax.f32 %v6392_v2, 0.0 }
 0x57e   : > { %6648 = vst [vmem:[%s11390_s9 + $0x298] sm:$0xff] %v6520_v19 }
 0x57f   : > { %v6281_v21 = vpop.f32.mrf.mxu0 }
 0x580   : > { %v6282_v31 = vadd.f32 %v6281_v21, %v11586_v42 }
 0x582   : > { %v6396_v32 = vadd.f32 %v7809_v58, %v6282_v31 }
 0x584   : > { %v6524_v27 = vmax.f32 %v6396_v32, 0.0 }
 0x586   : > { %6652 = vst [vmem:[%s11390_s9 + $0x2b8] sm:$0xff] %v6524_v27 }
 0x587   : > { %v6284_v49 = vpop.f32.mrf.mxu0 }
 0x588   : > { %v6285_v50 = vadd.f32 %v6284_v49, %v11586_v42 }
 0x58a   : > { %v6400_v40 = vadd.f32 %v7810_v13, %v6285_v50 }
 0x58c   : > { %v6528_v6 = vmax.f32 %v6400_v40, 0.0 }
 0x58e   : > { %6656 = vst [vmem:[%s11390_s9 + $0x2d8] sm:$0xff] %v6528_v6 }
 0x58f   : > { %v6286_v24 = vpop.f32.mrf.mxu0 }
 0x590   : > { %v6287_v17 = vadd.f32 %v6286_v24, %v11586_v42 }
 0x592   : > { %v6404_v5 = vadd.f32 %v7811_v46, %v6287_v17 }
 0x594   : > { %v6532_v7 = vmax.f32 %v6404_v5, 0.0 }
 0x596   : > { %6660 = vst [vmem:[%s11390_s9 + $0x2f8] sm:$0xff] %v6532_v7 }
 0x597   : > { %v6289_v8 = vpop.f32.mrf.mxu0 }
 0x598   : > { %v6290_v20 = vadd.f32 %v6289_v8, %v11586_v42 }
 0x59a   : > { %v6408_v47 = vadd.f32 %v7812_v18, %v6290_v20 }
 0x59c   : > { %v6536_v15 = vmax.f32 %v6408_v47, 0.0 }
 0x59e   : > { %6664 = vst [vmem:[%s11390_s9 + $0x318] sm:$0xff] %v6536_v15 }
 0x59f   : > { %v6291_v12 = vpop.f32.mrf.mxu0 }
 0x5a0   : > { %v6292_v1 = vadd.f32 %v6291_v12, %v11586_v42 }
 0x5a2   : > { %v6412_v14 = vadd.f32 %v7813_v39, %v6292_v1 }
 0x5a4   : > { %v6540_v52 = vmax.f32 %v6412_v14, 0.0 }
 0x5a6   : > { %6668 = vst [vmem:[%s11390_s9 + $0x338] sm:$0xff] %v6540_v52 }
 0x5a7   : > { %v6294_v48 = vpop.f32.mrf.mxu0 }
 0x5a8   : > { %v6295_v60 = vadd.f32 %v6294_v48, %v11586_v42 }
 0x5aa   : > { %v6416_v30 = vadd.f32 %v7814_v4, %v6295_v60 }
 0x5ac   : > { %v6544_v41 = vmax.f32 %v6416_v30, 0.0 }
 0x5ae   : > { %6672 = vst [vmem:[%s11390_s9 + $0x358] sm:$0xff] %v6544_v41 }
 0x5af   : > { %v6296_v3 = vpop.f32.mrf.mxu0 }
 0x5b0   : > { %v6297_v63 = vadd.f32 %v6296_v3, %v11586_v42 }
 0x5b2   : > { %v6420_v33 = vadd.f32 %v7815_v51, %v6297_v63 }
 0x5b4   : > { %v6548_v10 = vmax.f32 %v6420_v33, 0.0 }
 0x5b6   : > { %6676 = vst [vmem:[%s11390_s9 + $0x378] sm:$0xff] %v6548_v10 }
 0x5b7   : > { %v6299_v45 = vpop.f32.mrf.mxu0 }
 0x5b8   : > { %v6300_v28 = vadd.f32 %v6299_v45, %v11586_v42 }
 0x5ba   : > { %v6424_v38 = vadd.f32 %v7816_v36, %v6300_v28 }
 0x5bc   : > { %v6552_v25 = vmax.f32 %v6424_v38, 0.0 }
 0x5be   : > { %6680 = vst [vmem:[%s11390_s9 + $0x398] sm:$0xff] %v6552_v25 }
 0x5bf   : > { %v6301_v26 = vpop.f32.mrf.mxu0 }
 0x5c0   : > { %v6302_v44 = vadd.f32 %v6301_v26, %v11586_v42 }
 0x5c2   : > { %v6428_v61 = vadd.f32 %v7817_v22, %v6302_v44 }
 0x5c4   : > { %v6556_v16 = vmax.f32 %v6428_v61, 0.0 }
 0x5c6   : > { %6684 = vst [vmem:[%s11390_s9 + $0x3b8] sm:$0xff] %v6556_v16 }
 0x5c7   : > { %v6304_v35 = vpop.f32.mrf.mxu0 }
 0x5c8   : > { %v6305_v57 = vadd.f32 %v6304_v35, %v11586_v42 }
 0x5ca   : > { %v6432_v62 = vadd.f32 %v7818_v53, %v6305_v57 }
 0x5cc   : > { %v6560_v55 = vmax.f32 %v6432_v62, 0.0 }
 0x5ce   : > { %6688 = vst [vmem:[%s11390_s9 + $0x3d8] sm:$0xff] %v6560_v55 }
 0x5cf   : > { %v6306_v29 = vpop.f32.mrf.mxu0 }
 0x5d0   : > { %v6307_v23 = vadd.f32 %v6306_v29, %v11586_v42 }
 0x5d2   : > { %v6436_v43 = vadd.f32 %v7819_v34, %v6307_v23 }
 0x5d4   : > { %v6564_v54 = vmax.f32 %v6436_v43, 0.0 }
 0x5d6   : > { %6692 = vst [vmem:[%s11390_s9 + $0x3f8] sm:$0xff] %v6564_v54 }
 0x5d7   : > { %8057 = shalt.err (!%p8054_p8)
}
 0x5d8   : > { %s8124_s28 = smov 512   ;;  %s8125_s20 = smov 32  }
 0x5d9   : > { %7597 = dma.vmem_to_hbm [thread:$0]  (%p8262_p2), %s6707_s16, 16384, %s6709_s21, %s6694_s18, %s8124_s28, %s8124_s28, %s8125_s20  }
 0x5da PF: > { %p7639_p9 = scmp.ge.s32.totalorder %s8108_s27, 2  ;;  %s6723_s9 = sand.u32 1, %s8096_s24  }
 0x5db   : > { %s6724_s15 = scalar_lea.sflag [#allocation4], %s6723_s9 }
 0x5dc   : > { %p7623_p10 = pnand %p7639_p9, %p8266_p4 }
 0x5de   : > { %p7624_p12 = pneg %p7623_p10 }
 0x5e0   : > { %8091 = dma.done.wait (%p7624_p12), %s6724_s15, 16384  }
 0x5e1   : > { %8093 = vsyncadd (%p7624_p12), %s6724_s15, 4294950912  ;;  %p23_p13 = scmp.ge.s32.totalorder %s8236_s12, 6   ;;  %s12700_s24 = smov %s8100_s25 }
 0x5e2   : > { %s12701_s25 = smov %s8104_s26  ;;  %s12702_s26 = smov %s8247_s30 }
 0x5e3   : > { %s12703_s27 = smov %s8236_s12  ;;  %25 = sbr.rel (!%p23_p13) target bundleno = 11 (0xb), region = 117 }
 0x5e8   :  { %6730 = vsyncpa [#allocation3], 1 }
 0x5e9   :  { %6732 = vsyncpa [#allocation3 + $0x1], 1 }
 0x5ea   :  { %6733 = vsyncpa [#allocation6], 1 }
 0x5eb   :  { %6734 = vsyncpa [#allocation9], 1 }
 0x5ec   :  { %6735 = vsyncpa [#allocation12], 1 }
 0x5ed   :  { %6736 = vsyncpa [#allocation4], 1 }
 0x5ee   :  { %6738 = vsyncpa [#allocation4 + $0x1], 1 }

</bundles_post_ra>
